<compile_context>
chip_gen: v6e
topology: v6e:2x2x1
jax: 0.10.0
libtpu: 0.0.40
codegen_flags: <defaults>
</compile_context>

<pallas_src>
import functools

import jax
import jax.numpy as jnp
from jax import lax
from jax.experimental import pallas as pl
from jax.experimental.pallas import tpu as pltpu


LANE = 128   # matmul N dims are zero-padded to a multiple of this
C1PAD = 8    # conv1 out channels (6) padded to 8 for the inter-kernel buffer
KSIZE = 5


def _round_up(n, m):
    return (n + m - 1) // m * m


def _const_map(ndim):
    return lambda i: (0,) * ndim


# ----------------------------------------------------------------------------
# Pallas kernels
# ----------------------------------------------------------------------------
def _conv_pool_kernel(p_ref, w_ref, b_ref, o_ref):
    """conv1 (im2col matmul) + 2x2/stride-2 max-pool + bias + ReLU, one row tile.

    p_ref : (4, TM, K) bf16  one im2col patch tile per pool quadrant.
    w_ref : (K, 128)   bf16  conv weights, Cout zero-padded to 128 lanes.
    b_ref : (1, 128)   f32   bias, zero-padded.
    o_ref : (TM, 8)    bf16  pooled activation, only the 8 consumed channels.
    """
    w = w_ref[...]
    m = jnp.dot(p_ref[0], w, preferred_element_type=jnp.float32)
    for q in range(1, p_ref.shape[0]):
        m = jnp.maximum(m, jnp.dot(p_ref[q], w, preferred_element_type=jnp.float32))
    # bias + ReLU once, after the quadrant max (exact: ReLU monotone, bias
    # identical across quadrants).
    act = jnp.maximum(m + b_ref[...], 0.0)
    o_ref[...] = act[:, :o_ref.shape[1]].astype(o_ref.dtype)


def _tail_kernel(p_ref, w2_ref, b2_ref, wl1_ref, bl1_ref, wl2_ref, bl2_ref,
                 wl3_ref, bl3_ref, o_ref):
    """conv2 + pool + ReLU + lin1 + ReLU + lin2 + ReLU + lin3, one batch tile.

    p_ref  : (4, S, TB, K2) bf16  conv2 pool-quadrant patches (s-major, batch
                                  tile TB is a multiple of 16).
    w2_ref : (K2, 128) bf16, b2_ref: (1, 128) f32.
    wl1_ref: (S, 128, 256) bf16  lin1 weights split per pooled spatial position,
                                 channel axis zero-padded 16 -> 128.
    bl1_ref: (1, 256) f32; wl2_ref: (256, 128) bf16; bl2_ref: (1, 128) f32;
    wl3_ref: (128, N3) bf16; bl3_ref: (1, N3) f32 (classes zero-padded).
    o_ref  : (TB, N3) f32 padded logits for this batch tile.
    """
    Q, S, TB, K2 = p_ref.shape

    # conv2: 4 pool-quadrant matmuls, quadrant max, then bias + ReLU once.
    w2 = w2_ref[...]
    m = jnp.dot(p_ref[0].reshape(S * TB, K2), w2, preferred_element_type=jnp.float32)
    for q in range(1, Q):
        m = jnp.maximum(
            m, jnp.dot(p_ref[q].reshape(S * TB, K2), w2,
                       preferred_element_type=jnp.float32))
    p2 = jnp.maximum(m + b2_ref[...], 0.0)                 # (S*TB, 128) f32

    # lin1 as one batched contraction over spatial positions (no unaligned
    # slices, single cast); padded channel lanes are zero on both sides.
    p2b = p2.reshape(S, TB, p2.shape[-1]).astype(jnp.bfloat16)   # (S, TB, 128)
    h1 = jnp.einsum("sbc,sch->sbh", p2b, wl1_ref[...],
                    preferred_element_type=jnp.float32).sum(axis=0)
    h1 = jnp.maximum(h1 + bl1_ref[...], 0.0)               # (TB, 256)

    # lin2 + ReLU
    h2 = jnp.dot(h1.astype(jnp.bfloat16), wl2_ref[...],
                 preferred_element_type=jnp.float32) + bl2_ref[...]
    h2 = jnp.maximum(h2, 0.0)                              # (TB, 128)

    # lin3 (padded logits)
    o_ref[...] = jnp.dot(h2.astype(jnp.bfloat16), wl3_ref[...],
                         preferred_element_type=jnp.float32) + bl3_ref[...]


# ----------------------------------------------------------------------------
# pallas_call wrappers
# ----------------------------------------------------------------------------
def _conv_pool_call(patches, w, b, tm):
    """patches: (4, M_pad, K) bf16 with M_pad % tm == 0.  Returns (M_pad, 8) bf16."""
    Q, M, K = patches.shape
    N = w.shape[1]
    return pl.pallas_call(
        _conv_pool_kernel,
        out_shape=jax.ShapeDtypeStruct((M, C1PAD), jnp.bfloat16),
        grid=(M // tm,),
        in_specs=[
            pl.BlockSpec((Q, tm, K), lambda i: (0, i, 0)),
            pl.BlockSpec((K, N), _const_map(2)),
            pl.BlockSpec((1, N), _const_map(2)),
        ],
        out_specs=pl.BlockSpec((tm, C1PAD), lambda i: (i, 0)),
        compiler_params=pltpu.CompilerParams(dimension_semantics=("parallel",)),
    )(patches, w, b)


def _tail_call(patches, prep, tb):
    """patches: (4, S, B_pad, K2) bf16 with B_pad % tb == 0.  Returns (B_pad, N3) f32."""
    Q, S, Bp, K2 = patches.shape
    N3 = prep["wl3"].shape[1]
    weights = (prep["w2"], prep["b2"], prep["wl1"], prep["bl1"],
               prep["wl2"], prep["bl2"], prep["wl3"], prep["bl3"])
    in_specs = [pl.BlockSpec((Q, S, tb, K2), lambda i: (0, 0, i, 0))]
    in_specs += [pl.BlockSpec(wgt.shape, _const_map(wgt.ndim)) for wgt in weights]
    return pl.pallas_call(
        _tail_kernel,
        out_shape=jax.ShapeDtypeStruct((Bp, N3), jnp.float32),
        grid=(Bp // tb,),
        in_specs=in_specs,
        out_specs=pl.BlockSpec((tb, N3), lambda i: (i, 0)),
        compiler_params=pltpu.CompilerParams(dimension_semantics=("parallel",)),
    )(patches, *weights)


# ----------------------------------------------------------------------------
# XLA glue: im2col fused with the 2x2 pool-window decomposition (tiny, jitted)
# ----------------------------------------------------------------------------
def _pool_quadrant_taps(xh, ksize):
    """xh: (B, H, W, C) NHWC.  Returns ([4 x (B, Hp, Wp, K*K*C)], Hp, Wp)."""
    B, H, W, C = xh.shape
    Hc, Wc = H - ksize + 1, W - ksize + 1       # conv output size
    Hp, Wp = Hc // 2, Wc // 2                   # pooled output size
    quads = []
    for qy in range(2):
        for qx in range(2):
            taps = []
            for dy in range(ksize):
                for dx in range(ksize):
                    ys, xs = qy + dy, qx + dx
                    taps.append(xh[:, ys:ys + 2 * Hp - 1:2, xs:xs + 2 * Wp - 1:2, :])
            quads.append(jnp.concatenate(taps, axis=-1))
    return quads, Hp, Wp


def _conv1_pool_patches(xh, ksize):
    """-> (4, B*Hp*Wp, K*K*C), rows ordered (b, i, j)."""
    quads, Hp, Wp = _pool_quadrant_taps(xh, ksize)
    return jnp.stack([q.reshape(-1, q.shape[-1]) for q in quads], axis=0), Hp, Wp


def _conv2_pool_patches(xh, ksize):
    """-> (4, S, B, K*K*C) with S = Hp*Wp (s-major so kernel 2 tiles over batch)."""
    quads, Hp, Wp = _pool_quadrant_taps(xh, ksize)
    B = xh.shape[0]
    out = [q.transpose(1, 2, 0, 3).reshape(Hp * Wp, B, q.shape[-1]) for q in quads]
    return jnp.stack(out, axis=0), Hp, Wp


# ----------------------------------------------------------------------------
# Parameters: PyTorch layout -> kernel-friendly layout (done once)
# ----------------------------------------------------------------------------
def init_lenet_params(key, num_classes=100):
    ks = jax.random.split(key, 10)
    scale = 0.05
    return {
        "conv1_w": scale * jax.random.normal(ks[0], (6, 3, 5, 5), jnp.float32),
        "conv1_b": scale * jax.random.normal(ks[1], (6,), jnp.float32),
        "conv2_w": scale * jax.random.normal(ks[2], (16, 6, 5, 5), jnp.float32),
        "conv2_b": scale * jax.random.normal(ks[3], (16,), jnp.float32),
        "lin1_w": scale * jax.random.normal(ks[4], (256, 16 * 5 * 5), jnp.float32),
        "lin1_b": scale * jax.random.normal(ks[5], (256,), jnp.float32),
        "lin2_w": scale * jax.random.normal(ks[6], (128, 256), jnp.float32),
        "lin2_b": scale * jax.random.normal(ks[7], (128,), jnp.float32),
        "lin3_w": scale * jax.random.normal(ks[8], (num_classes, 128), jnp.float32),
        "lin3_b": scale * jax.random.normal(ks[9], (num_classes,), jnp.float32),
    }


def prepare_params(params, num_classes=100):
    """One-time conversion: pre-transpose, zero-pad to lane-dense widths, bf16."""
    bf16, f32 = jnp.bfloat16, jnp.float32

    def pad_cols(a, n):
        return jnp.pad(a, ((0, 0), (0, n - a.shape[1])))

    # conv1 (6,3,5,5) -> (dy,dx,ci,co) -> (75, 128)
    w1 = jnp.transpose(params["conv1_w"], (2, 3, 1, 0)).reshape(5 * 5 * 3, 6)
    # conv2 (16,6,5,5) -> (dy,dx,ci,co), pad ci 6->8 -> (200, 128)
    w2 = jnp.transpose(params["conv2_w"], (2, 3, 1, 0))            # (5,5,6,16)
    w2 = jnp.pad(w2, ((0, 0), (0, 0), (0, 2), (0, 0))).reshape(5 * 5 * 8, 16)
    # lin1 (256, 400) with PyTorch (c, py, px) flatten order -> (25, 16, 256),
    # channel axis zero-padded to 128 so the kernel contracts full lanes.
    wl1 = params["lin1_w"].reshape(256, 16, 5, 5).transpose(2, 3, 1, 0)
    wl1 = wl1.reshape(25, 16, 256)
    wl1 = jnp.pad(wl1, ((0, 0), (0, LANE - 16), (0, 0)))
    # lin3: store (in, out), zero-pad classes to a multiple of 128
    n3 = _round_up(num_classes, LANE)
    wl3 = pad_cols(params["lin3_w"].T, n3)
    bl3 = jnp.pad(params["lin3_b"], (0, n3 - num_classes))

    return {
        "w1": pad_cols(w1, LANE).astype(bf16),
        "b1": jnp.pad(params["conv1_b"], (0, LANE - 6)).reshape(1, LANE).astype(f32),
        "w2": pad_cols(w2, LANE).astype(bf16),
        "b2": jnp.pad(params["conv2_b"], (0, LANE - 16)).reshape(1, LANE).astype(f32),
        "wl1": wl1.astype(bf16),
        "bl1": params["lin1_b"].reshape(1, 256).astype(f32),
        "wl2": params["lin2_w"].T.astype(bf16),
        "bl2": params["lin2_b"].reshape(1, 128).astype(f32),
        "wl3": wl3.astype(bf16),
        "bl3": bl3.reshape(1, n3).astype(f32),
    }


# ----------------------------------------------------------------------------
# Forward
# ----------------------------------------------------------------------------
@functools.partial(jax.jit, static_argnames=("num_classes",))
def lenet_logits(prep, x, *, num_classes=100):
    """Fused LeNet forward.  x: NCHW f32.  Returns (B, num_classes) f32 logits."""
    B = x.shape[0]
    xh = jnp.transpose(x, (0, 2, 3, 1)).astype(jnp.bfloat16)       # NCHW -> NHWC

    # ---- kernel 1: conv1 + pool1 + bias + ReLU, tiled over pooled rows ----
    pq1, Hp1, Wp1 = _conv1_pool_patches(xh, KSIZE)                 # (4, B*196, 75)
    M1 = B * Hp1 * Wp1
    tm = min(512, _round_up(M1, 16))                               # rows per tile
    M1p = _round_up(M1, tm)
    if M1p != M1:
        pq1 = jnp.pad(pq1, ((0, 0), (0, M1p - M1), (0, 0)))
    hp1 = _conv_pool_call(pq1, prep["w1"], prep["b1"], tm)         # (M1p, 8) bf16

    # ---- glue: conv2 pool-quadrant patches (6 real + 2 zero channels) ----
    p1 = hp1[:M1].reshape(B, Hp1, Wp1, C1PAD)
    pq2, _, _ = _conv2_pool_patches(p1, KSIZE)                     # (4, 25, B, 200)
    tb = min(64, _round_up(B, 16))                                 # batch tile
    Bp = _round_up(B, tb)
    if Bp != B:
        pq2 = jnp.pad(pq2, ((0, 0), (0, 0), (0, Bp - B), (0, 0)))

    # ---- kernel 2: conv2 + pool2 + lin1 + lin2 + lin3, tiled over batch ----
    logits_pad = _tail_call(pq2, prep, tb)                         # (Bp, N3) f32
    return logits_pad[:B, :num_classes]


def lenet_forward(prep, x, num_classes=100):
    """Mirrors LeNet.forward: returns (logits, shape_dict).

    shape_dict records the semantic NCHW shapes of the intermediates (the fused
    kernels keep activations in padded lane-dense layouts instead of
    materializing each NCHW tensor in HBM)."""
    logits = lenet_logits(prep, x, num_classes=num_classes)
    B, _, H, W = x.shape
    h1, w1 = (H - 4) // 2, (W - 4) // 2
    h2, w2 = (h1 - 4) // 2, (w1 - 4) // 2
    shape_dict = {
        1: [B, 6, h1, w1],
        2: [B, 16, h2, w2],
        3: [B, 16 * h2 * w2],
        4: [B, 256],
        5: [B, 128],
        6: [B, num_classes],
    }
    return logits, shape_dict


# ----------------------------------------------------------------------------
# Pure-JAX f32 reference (same math as the PyTorch module) for validation
# ----------------------------------------------------------------------------
def lenet_reference(params, x):
    def conv(t, w, b):
        y = lax.conv_general_dilated(t, w, (1, 1), "VALID",
                                     dimension_numbers=("NCHW", "OIHW", "NCHW"))
        return jax.nn.relu(y + b.reshape(1, -1, 1, 1))

    def pool(t):
        return lax.reduce_window(t, -jnp.inf, lax.max,
                                 (1, 1, 2, 2), (1, 1, 2, 2), "VALID")

    t = pool(conv(x, params["conv1_w"], params["conv1_b"]))
    t = pool(conv(t, params["conv2_w"], params["conv2_b"]))
    t = t.reshape(t.shape[0], -1)
    t = jax.nn.relu(t @ params["lin1_w"].T + params["lin1_b"])
    t = jax.nn.relu(t @ params["lin2_w"].T + params["lin2_b"])
    return t @ params["lin3_w"].T + params["lin3_b"]


if __name__ == "__main__":
    key = jax.random.PRNGKey(0)
    k_x, k_p = jax.random.split(key)

    # LeNet geometry requires 32x32 spatial input (flattened = 16*5*5); batch=2.
    x = jax.random.normal(k_x, (2, 3, 32, 32), jnp.float32)        # NCHW
    params = init_lenet_params(k_p, num_classes=100)
    prep = prepare_params(params, num_classes=100)

    logits, shape_dict = lenet_forward(prep, x, num_classes=100)
    logits = jax.block_until_ready(logits)

    assert logits.shape == (2, 100), logits.shape
    assert shape_dict == {
        1: [2, 6, 14, 14],
        2: [2, 16, 5, 5],
        3: [2, 400],
        4: [2, 256],
        5: [2, 128],
        6: [2, 100],
    }, shape_dict

    # Numerical check vs. pure-JAX f32 reference (kernels use bf16 MXU inputs).
    ref = jax.block_until_ready(lenet_reference(params, x))
    err = float(jnp.max(jnp.abs(logits - ref)))
    assert err < 3e-2, f"max abs error vs reference: {err}"

    print("KERNEL_OK")
</pallas_src>

<mosaic_0001>
module attributes {stable_mosaic.version = 11 : i64} {
  func.func @_conv_pool_kernel(%arg0: i32, %arg1: memref<4x400x75xbf16, #tpu.memory_space<vmem>>, %arg2: memref<75x128xbf16, #tpu.memory_space<vmem>>, %arg3: memref<1x128xf32, #tpu.memory_space<vmem>>, %arg4: memref<400x8xbf16, #tpu.memory_space<vmem>>) attributes {dimension_semantics = [#tpu.dimension_semantics<parallel>], iteration_bounds = array<i64: 1>, scalar_prefetch = 0 : i64, scratch_operands = 0 : i64, tpu.core_type = #tpu.core_type<tc>, window_params = [{transform_indices = @transform_0, window_bounds = array<i64: 4, 400, 75>}, {pipeline_mode = #tpu.pipeline_mode<synchronous>, transform_indices = @transform_1, window_bounds = array<i64: 75, 128>}, {pipeline_mode = #tpu.pipeline_mode<synchronous>, transform_indices = @transform_2, window_bounds = array<i64: 1, 128>}, {transform_indices = @transform_3, window_bounds = array<i64: 400, 8>}]} {
    %c0 = arith.constant 0 : index
    %c0_0 = arith.constant 0 : index
    %0 = vector.load %arg2[%c0, %c0_0] : memref<75x128xbf16, #tpu.memory_space<vmem>>, vector<75x128xbf16>
    %c0_1 = arith.constant 0 : index
    %c0_2 = arith.constant 0 : index
    %c0_3 = arith.constant 0 : index
    %1 = vector.load %arg1[%c0_1, %c0_2, %c0_3] : memref<4x400x75xbf16, #tpu.memory_space<vmem>>, vector<1x400x75xbf16>
    %2 = vector.shape_cast %1 : vector<1x400x75xbf16> to vector<400x75xbf16>
    %cst = arith.constant dense<0.000000e+00> : vector<400x128xf32>
    %3 = tpu.matmul %2, %0, %cst {dimension_numbers = #tpu.dot_dimension_numbers<[1], [0], [0], [1], [0, 0, 1, 1], [], []>} : vector<400x75xbf16>, vector<75x128xbf16>, vector<400x128xf32> -> vector<400x128xf32>
    %c1 = arith.constant 1 : index
    %c0_4 = arith.constant 0 : index
    %c0_5 = arith.constant 0 : index
    %4 = vector.load %arg1[%c1, %c0_4, %c0_5] : memref<4x400x75xbf16, #tpu.memory_space<vmem>>, vector<1x400x75xbf16>
    %5 = vector.shape_cast %4 : vector<1x400x75xbf16> to vector<400x75xbf16>
    %cst_6 = arith.constant dense<0.000000e+00> : vector<400x128xf32>
    %6 = tpu.matmul %5, %0, %cst_6 {dimension_numbers = #tpu.dot_dimension_numbers<[1], [0], [0], [1], [0, 0, 1, 1], [], []>} : vector<400x75xbf16>, vector<75x128xbf16>, vector<400x128xf32> -> vector<400x128xf32>
    %7 = arith.maximumf %3, %6 : vector<400x128xf32>
    %c2 = arith.constant 2 : index
    %c0_7 = arith.constant 0 : index
    %c0_8 = arith.constant 0 : index
    %8 = vector.load %arg1[%c2, %c0_7, %c0_8] : memref<4x400x75xbf16, #tpu.memory_space<vmem>>, vector<1x400x75xbf16>
    %9 = vector.shape_cast %8 : vector<1x400x75xbf16> to vector<400x75xbf16>
    %cst_9 = arith.constant dense<0.000000e+00> : vector<400x128xf32>
    %10 = tpu.matmul %9, %0, %cst_9 {dimension_numbers = #tpu.dot_dimension_numbers<[1], [0], [0], [1], [0, 0, 1, 1], [], []>} : vector<400x75xbf16>, vector<75x128xbf16>, vector<400x128xf32> -> vector<400x128xf32>
    %11 = arith.maximumf %7, %10 : vector<400x128xf32>
    %c3 = arith.constant 3 : index
    %c0_10 = arith.constant 0 : index
    %c0_11 = arith.constant 0 : index
    %12 = vector.load %arg1[%c3, %c0_10, %c0_11] : memref<4x400x75xbf16, #tpu.memory_space<vmem>>, vector<1x400x75xbf16>
    %13 = vector.shape_cast %12 : vector<1x400x75xbf16> to vector<400x75xbf16>
    %cst_12 = arith.constant dense<0.000000e+00> : vector<400x128xf32>
    %14 = tpu.matmul %13, %0, %cst_12 {dimension_numbers = #tpu.dot_dimension_numbers<[1], [0], [0], [1], [0, 0, 1, 1], [], []>} : vector<400x75xbf16>, vector<75x128xbf16>, vector<400x128xf32> -> vector<400x128xf32>
    %15 = arith.maximumf %11, %14 : vector<400x128xf32>
    %c0_13 = arith.constant 0 : index
    %c0_14 = arith.constant 0 : index
    %16 = vector.load %arg3[%c0_13, %c0_14] : memref<1x128xf32, #tpu.memory_space<vmem>>, vector<1x128xf32>
    %17 = vector.broadcast %16 : vector<1x128xf32> to vector<400x128xf32>
    %18 = arith.addf %15, %17 : vector<400x128xf32>
    %cst_15 = arith.constant 0.000000e+00 : f32
    %19 = vector.broadcast %cst_15 : f32 to vector<400x128xf32>
    %20 = arith.maximumf %18, %19 : vector<400x128xf32>
    %21 = vector.extract_strided_slice %20 {offsets = [0, 0], sizes = [400, 8], strides = [1, 1]} : vector<400x128xf32> to vector<400x8xf32>
    %22 = arith.truncf %21 : vector<400x8xf32> to vector<400x8xbf16>
    %c0_16 = arith.constant 0 : index
    %c0_17 = arith.constant 0 : index
    %23 = vector.load %arg4[%c0_16, %c0_17] : memref<400x8xbf16, #tpu.memory_space<vmem>>, vector<400x8xbf16>
    tpu.vector_store %arg4[%c0_16, %c0_17], %22 {strides = array<i32>} : memref<400x8xbf16, #tpu.memory_space<vmem>>, vector<400x8xbf16>,
    return
  }
  func.func @transform_0(%arg0: i32) -> (i32, i32, i32) {
    %c0_i32 = arith.constant 0 : i32
    %c0_i32_0 = arith.constant 0 : i32
    %c0_i32_1 = arith.constant 0 : i32
    return %c0_i32, %arg0, %c0_i32_0 : i32, i32, i32
  }
  func.func @transform_1(%arg0: i32) -> (i32, i32) {
    %c0_i32 = arith.constant 0 : i32
    %c0_i32_0 = arith.constant 0 : i32
    %c0_i32_1 = arith.constant 0 : i32
    return %c0_i32, %c0_i32_0 : i32, i32
  }
  func.func @transform_2(%arg0: i32) -> (i32, i32) {
    %c0_i32 = arith.constant 0 : i32
    %c0_i32_0 = arith.constant 0 : i32
    %c0_i32_1 = arith.constant 0 : i32
    return %c0_i32, %c0_i32_0 : i32, i32
  }
  func.func @transform_3(%arg0: i32) -> (i32, i32) {
    %c0_i32 = arith.constant 0 : i32
    %c0_i32_0 = arith.constant 0 : i32
    return %arg0, %c0_i32 : i32, i32
  }
}

module attributes {stable_mosaic.version = 11 : i64} {
  func.func @_tail_kernel(%arg0: i32, %arg1: memref<4x25x16x200xbf16, #tpu.memory_space<vmem>>, %arg2: memref<200x128xbf16, #tpu.memory_space<vmem>>, %arg3: memref<1x128xf32, #tpu.memory_space<vmem>>, %arg4: memref<25x128x256xbf16, #tpu.memory_space<vmem>>, %arg5: memref<1x256xf32, #tpu.memory_space<vmem>>, %arg6: memref<256x128xbf16, #tpu.memory_space<vmem>>, %arg7: memref<1x128xf32, #tpu.memory_space<vmem>>, %arg8: memref<128x128xbf16, #tpu.memory_space<vmem>>, %arg9: memref<1x128xf32, #tpu.memory_space<vmem>>, %arg10: memref<16x128xf32, #tpu.memory_space<vmem>>) attributes {dimension_semantics = [#tpu.dimension_semantics<parallel>], iteration_bounds = array<i64: 1>, scalar_prefetch = 0 : i64, scratch_operands = 0 : i64, tpu.core_type = #tpu.core_type<tc>, window_params = [{transform_indices = @transform_0, window_bounds = array<i64: 4, 25, 16, 200>}, {pipeline_mode = #tpu.pipeline_mode<synchronous>, transform_indices = @transform_1, window_bounds = array<i64: 200, 128>}, {pipeline_mode = #tpu.pipeline_mode<synchronous>, transform_indices = @transform_2, window_bounds = array<i64: 1, 128>}, {pipeline_mode = #tpu.pipeline_mode<synchronous>, transform_indices = @transform_3, window_bounds = array<i64: 25, 128, 256>}, {pipeline_mode = #tpu.pipeline_mode<synchronous>, transform_indices = @transform_4, window_bounds = array<i64: 1, 256>}, {pipeline_mode = #tpu.pipeline_mode<synchronous>, transform_indices = @transform_5, window_bounds = array<i64: 256, 128>}, {pipeline_mode = #tpu.pipeline_mode<synchronous>, transform_indices = @transform_6, window_bounds = array<i64: 1, 128>}, {pipeline_mode = #tpu.pipeline_mode<synchronous>, transform_indices = @transform_7, window_bounds = array<i64: 128, 128>}, {pipeline_mode = #tpu.pipeline_mode<synchronous>, transform_indices = @transform_8, window_bounds = array<i64: 1, 128>}, {transform_indices = @transform_9, window_bounds = array<i64: 16, 128>}]} {
    %c0 = arith.constant 0 : index
    %c0_0 = arith.constant 0 : index
    %0 = vector.load %arg2[%c0, %c0_0] : memref<200x128xbf16, #tpu.memory_space<vmem>>, vector<200x128xbf16>
    %c0_1 = arith.constant 0 : index
    %c0_2 = arith.constant 0 : index
    %c0_3 = arith.constant 0 : index
    %c0_4 = arith.constant 0 : index
    %1 = vector.load %arg1[%c0_1, %c0_2, %c0_3, %c0_4] : memref<4x25x16x200xbf16, #tpu.memory_space<vmem>>, vector<1x25x16x200xbf16>
    %2 = vector.shape_cast %1 : vector<1x25x16x200xbf16> to vector<25x16x200xbf16>
    %3 = vector.shape_cast %2 : vector<25x16x200xbf16> to vector<400x200xbf16>
    %cst = arith.constant dense<0.000000e+00> : vector<400x128xf32>
    %4 = tpu.matmul %3, %0, %cst {dimension_numbers = #tpu.dot_dimension_numbers<[1], [0], [0], [1], [0, 0, 1, 1], [], []>} : vector<400x200xbf16>, vector<200x128xbf16>, vector<400x128xf32> -> vector<400x128xf32>
    %c1 = arith.constant 1 : index
    %c0_5 = arith.constant 0 : index
    %c0_6 = arith.constant 0 : index
    %c0_7 = arith.constant 0 : index
    %5 = vector.load %arg1[%c1, %c0_5, %c0_6, %c0_7] : memref<4x25x16x200xbf16, #tpu.memory_space<vmem>>, vector<1x25x16x200xbf16>
    %6 = vector.shape_cast %5 : vector<1x25x16x200xbf16> to vector<25x16x200xbf16>
    %7 = vector.shape_cast %6 : vector<25x16x200xbf16> to vector<400x200xbf16>
    %cst_8 = arith.constant dense<0.000000e+00> : vector<400x128xf32>
    %8 = tpu.matmul %7, %0, %cst_8 {dimension_numbers = #tpu.dot_dimension_numbers<[1], [0], [0], [1], [0, 0, 1, 1], [], []>} : vector<400x200xbf16>, vector<200x128xbf16>, vector<400x128xf32> -> vector<400x128xf32>
    %9 = arith.maximumf %4, %8 : vector<400x128xf32>
    %c2 = arith.constant 2 : index
    %c0_9 = arith.constant 0 : index
    %c0_10 = arith.constant 0 : index
    %c0_11 = arith.constant 0 : index
    %10 = vector.load %arg1[%c2, %c0_9, %c0_10, %c0_11] : memref<4x25x16x200xbf16, #tpu.memory_space<vmem>>, vector<1x25x16x200xbf16>
    %11 = vector.shape_cast %10 : vector<1x25x16x200xbf16> to vector<25x16x200xbf16>
    %12 = vector.shape_cast %11 : vector<25x16x200xbf16> to vector<400x200xbf16>
    %cst_12 = arith.constant dense<0.000000e+00> : vector<400x128xf32>
    %13 = tpu.matmul %12, %0, %cst_12 {dimension_numbers = #tpu.dot_dimension_numbers<[1], [0], [0], [1], [0, 0, 1, 1], [], []>} : vector<400x200xbf16>, vector<200x128xbf16>, vector<400x128xf32> -> vector<400x128xf32>
    %14 = arith.maximumf %9, %13 : vector<400x128xf32>
    %c3 = arith.constant 3 : index
    %c0_13 = arith.constant 0 : index
    %c0_14 = arith.constant 0 : index
    %c0_15 = arith.constant 0 : index
    %15 = vector.load %arg1[%c3, %c0_13, %c0_14, %c0_15] : memref<4x25x16x200xbf16, #tpu.memory_space<vmem>>, vector<1x25x16x200xbf16>
    %16 = vector.shape_cast %15 : vector<1x25x16x200xbf16> to vector<25x16x200xbf16>
    %17 = vector.shape_cast %16 : vector<25x16x200xbf16> to vector<400x200xbf16>
    %cst_16 = arith.constant dense<0.000000e+00> : vector<400x128xf32>
    %18 = tpu.matmul %17, %0, %cst_16 {dimension_numbers = #tpu.dot_dimension_numbers<[1], [0], [0], [1], [0, 0, 1, 1], [], []>} : vector<400x200xbf16>, vector<200x128xbf16>, vector<400x128xf32> -> vector<400x128xf32>
    %19 = arith.maximumf %14, %18 : vector<400x128xf32>
    %c0_17 = arith.constant 0 : index
    %c0_18 = arith.constant 0 : index
    %20 = vector.load %arg3[%c0_17, %c0_18] : memref<1x128xf32, #tpu.memory_space<vmem>>, vector<1x128xf32>
    %21 = vector.broadcast %20 : vector<1x128xf32> to vector<400x128xf32>
    %22 = arith.addf %19, %21 : vector<400x128xf32>
    %cst_19 = arith.constant 0.000000e+00 : f32
    %23 = vector.broadcast %cst_19 : f32 to vector<400x128xf32>
    %24 = arith.maximumf %22, %23 : vector<400x128xf32>
    %25 = vector.shape_cast %24 : vector<400x128xf32> to vector<25x16x128xf32>
    %26 = arith.truncf %25 : vector<25x16x128xf32> to vector<25x16x128xbf16>
    %c0_20 = arith.constant 0 : index
    %c0_21 = arith.constant 0 : index
    %c0_22 = arith.constant 0 : index
    %27 = vector.load %arg4[%c0_20, %c0_21, %c0_22] : memref<25x128x256xbf16, #tpu.memory_space<vmem>>, vector<25x128x256xbf16>
    "tpu.trace_start"() <{level = 10 : i32, message = "sbc,sch->sbh"}> : () -> ()
    %cst_23 = arith.constant dense<0.000000e+00> : vector<25x16x256xf32>
    %28 = tpu.matmul %26, %27, %cst_23 {dimension_numbers = #tpu.dot_dimension_numbers<[2], [1], [1], [2], [0, 0, 0, 1, 1, 2], [0], [0]>} : vector<25x16x128xbf16>, vector<25x128x256xbf16>, vector<25x16x256xf32> -> vector<25x16x256xf32>
    "tpu.trace_stop"() : () -> ()
    %cst_24 = arith.constant dense<0.000000e+00> : vector<16x256xf32>
    %29 = vector.multi_reduction <add>, %28, %cst_24 [0] : vector<25x16x256xf32> to vector<16x256xf32>
    %c0_25 = arith.constant 0 : index
    %c0_26 = arith.constant 0 : index
    %30 = vector.load %arg5[%c0_25, %c0_26] : memref<1x256xf32, #tpu.memory_space<vmem>>, vector<1x256xf32>
    %31 = vector.broadcast %30 : vector<1x256xf32> to vector<16x256xf32>
    %32 = arith.addf %29, %31 : vector<16x256xf32>
    %cst_27 = arith.constant 0.000000e+00 : f32
    %33 = vector.broadcast %cst_27 : f32 to vector<16x256xf32>
    %34 = arith.maximumf %32, %33 : vector<16x256xf32>
    %35 = arith.truncf %34 : vector<16x256xf32> to vector<16x256xbf16>
    %c0_28 = arith.constant 0 : index
    %c0_29 = arith.constant 0 : index
    %36 = vector.load %arg6[%c0_28, %c0_29] : memref<256x128xbf16, #tpu.memory_space<vmem>>, vector<256x128xbf16>
    %cst_30 = arith.constant dense<0.000000e+00> : vector<16x128xf32>
    %37 = tpu.matmul %35, %36, %cst_30 {dimension_numbers = #tpu.dot_dimension_numbers<[1], [0], [0], [1], [0, 0, 1, 1], [], []>} : vector<16x256xbf16>, vector<256x128xbf16>, vector<16x128xf32> -> vector<16x128xf32>
    %c0_31 = arith.constant 0 : index
    %c0_32 = arith.constant 0 : index
    %38 = vector.load %arg7[%c0_31, %c0_32] : memref<1x128xf32, #tpu.memory_space<vmem>>, vector<1x128xf32>
    %39 = vector.broadcast %38 : vector<1x128xf32> to vector<16x128xf32>
    %40 = arith.addf %37, %39 : vector<16x128xf32>
    %cst_33 = arith.constant 0.000000e+00 : f32
    %41 = vector.broadcast %cst_33 : f32 to vector<16x128xf32>
    %42 = arith.maximumf %40, %41 : vector<16x128xf32>
    %43 = arith.truncf %42 : vector<16x128xf32> to vector<16x128xbf16>
    %c0_34 = arith.constant 0 : index
    %c0_35 = arith.constant 0 : index
    %44 = vector.load %arg8[%c0_34, %c0_35] : memref<128x128xbf16, #tpu.memory_space<vmem>>, vector<128x128xbf16>
    %cst_36 = arith.constant dense<0.000000e+00> : vector<16x128xf32>
    %45 = tpu.matmul %43, %44, %cst_36 {dimension_numbers = #tpu.dot_dimension_numbers<[1], [0], [0], [1], [0, 0, 1, 1], [], []>} : vector<16x128xbf16>, vector<128x128xbf16>, vector<16x128xf32> -> vector<16x128xf32>
    %c0_37 = arith.constant 0 : index
    %c0_38 = arith.constant 0 : index
    %46 = vector.load %arg9[%c0_37, %c0_38] : memref<1x128xf32, #tpu.memory_space<vmem>>, vector<1x128xf32>
    %47 = vector.broadcast %46 : vector<1x128xf32> to vector<16x128xf32>
    %48 = arith.addf %45, %47 : vector<16x128xf32>
    %c0_39 = arith.constant 0 : index
    %c0_40 = arith.constant 0 : index
    %49 = vector.load %arg10[%c0_39, %c0_40] : memref<16x128xf32, #tpu.memory_space<vmem>>, vector<16x128xf32>
    tpu.vector_store %arg10[%c0_39, %c0_40], %48 {strides = array<i32>} : memref<16x128xf32, #tpu.memory_space<vmem>>, vector<16x128xf32>,
    return
  }
  func.func @transform_0(%arg0: i32) -> (i32, i32, i32, i32) {
    %c0_i32 = arith.constant 0 : i32
    %c0_i32_0 = arith.constant 0 : i32
    %c0_i32_1 = arith.constant 0 : i32
    %c0_i32_2 = arith.constant 0 : i32
    return %c0_i32, %c0_i32_0, %arg0, %c0_i32_1 : i32, i32, i32, i32
  }
  func.func @transform_1(%arg0: i32) -> (i32, i32) {
    %c0_i32 = arith.constant 0 : i32
    %c0_i32_0 = arith.constant 0 : i32
    %c0_i32_1 = arith.constant 0 : i32
    return %c0_i32, %c0_i32_0 : i32, i32
  }
  func.func @transform_2(%arg0: i32) -> (i32, i32) {
    %c0_i32 = arith.constant 0 : i32
    %c0_i32_0 = arith.constant 0 : i32
    %c0_i32_1 = arith.constant 0 : i32
    return %c0_i32, %c0_i32_0 : i32, i32
  }
  func.func @transform_3(%arg0: i32) -> (i32, i32, i32) {
    %c0_i32 = arith.constant 0 : i32
    %c0_i32_0 = arith.constant 0 : i32
    %c0_i32_1 = arith.constant 0 : i32
    %c0_i32_2 = arith.constant 0 : i32
    return %c0_i32, %c0_i32_0, %c0_i32_1 : i32, i32, i32
  }
  func.func @transform_4(%arg0: i32) -> (i32, i32) {
    %c0_i32 = arith.constant 0 : i32
    %c0_i32_0 = arith.constant 0 : i32
    %c0_i32_1 = arith.constant 0 : i32
    return %c0_i32, %c0_i32_0 : i32, i32
  }
  func.func @transform_5(%arg0: i32) -> (i32, i32) {
    %c0_i32 = arith.constant 0 : i32
    %c0_i32_0 = arith.constant 0 : i32
    %c0_i32_1 = arith.constant 0 : i32
    return %c0_i32, %c0_i32_0 : i32, i32
  }
  func.func @transform_6(%arg0: i32) -> (i32, i32) {
    %c0_i32 = arith.constant 0 : i32
    %c0_i32_0 = arith.constant 0 : i32
    %c0_i32_1 = arith.constant 0 : i32
    return %c0_i32, %c0_i32_0 : i32, i32
  }
  func.func @transform_7(%arg0: i32) -> (i32, i32) {
    %c0_i32 = arith.constant 0 : i32
    %c0_i32_0 = arith.constant 0 : i32
    %c0_i32_1 = arith.constant 0 : i32
    return %c0_i32, %c0_i32_0 : i32, i32
  }
  func.func @transform_8(%arg0: i32) -> (i32, i32) {
    %c0_i32 = arith.constant 0 : i32
    %c0_i32_0 = arith.constant 0 : i32
    %c0_i32_1 = arith.constant 0 : i32
    return %c0_i32, %c0_i32_0 : i32, i32
  }
  func.func @transform_9(%arg0: i32) -> (i32, i32) {
    %c0_i32 = arith.constant 0 : i32
    %c0_i32_0 = arith.constant 0 : i32
    return %arg0, %c0_i32 : i32, i32
  }
}

</mosaic_0001>

<bundles_post_ra>
// kernel: lenet_logits.2
= control target key start
LH: loop header
LB: loop body
LE: loop exit
PB: predicated region body
PF: predicated region fallthrough
CT: control target
= control target key end

     0   :  { %vm305_vm0 = vcmask 1044480   ;;  %vm306_vm1 = vcmask 1045504   ;;  %v5000_v0 = vmov 0.0   ;;  %v3634_v2 = vmov 65535   ;;  %s4996_s1 = inlined_call_operand.vmem [shape: bf16[75,128], index: 1, kind: input, shape index: {}]   ;;  %s4997_s0 = inlined_call_operand.vmem [shape: bf16[4,400,75], index: 0, kind: input, shape index: {}]   ;;  %s4998_s2 = inlined_call_operand.vmem [shape: f32[1,128], index: 2, kind: input, shape index: {}]   ;;  %s4999_s3 = inlined_call_operand.vmem [shape: bf16[400,8], index: 3, kind: output, shape index: {}]  }
   0x1   :  { %3085 = vmatprep.subr.bf16.mxu0 %v5000_v0  ;;  %3195 = vmatprep.subr.bf16.mxu1 %v5000_v0  ;;  %v3528_v1 = vld [vmem:[%s4996_s1 + $0x20] sm:$0x3f]   ;;  %v307_v3 = vsel %vm305_vm0, 4294967295, %v3634_v2  ;;  %vm3635_vm2 = vmmov 0   ;;  %v3529_v6 = vld [vmem:[%s4996_s1 + $0x18] sm:$0xff]   ;;  %v3530_v7 = vld [vmem:[%s4996_s1 + $0x10] sm:$0xff]  }
   0x2   :  { %v308_v4 = vsel %vm306_vm1, %v307_v3, 0  ;;  %3095 = vmatprep.mubr.msk.bf16.mxu0 %vm3635_vm2, %v5000_v0  ;;  %3205 = vmatprep.mubr.msk.bf16.mxu1 %vm3635_vm2, %v5000_v0  ;;  %v3531_v8 = vld [vmem:[%s4996_s1 + $0x8] sm:$0xff]   ;;  %v3532_v9 = vld [vmem:[%s4996_s1] sm:$0xff]   ;;  %vm229_vm3 = vcmask 613376   ;;  %v3536_v13 = vld [vmem:[%s4997_s0 + $0xd0] sm:$0xff]   ;;  %vm2454_vm4 = vcmask 60416  }
   0x3   :  { %v310_v5 = vand.u32 %v3528_v1, %v308_v4  ;;  %v3533_v10 = vld [vmem:[%s4997_s0] sm:$0xff]   ;;  %v3534_v11 = vld [vmem:[%s4997_s0 + $0xc8] sm:$0xff]   ;;  %v3537_v14 = vld [vmem:[%s4997_s0 + $0x10] sm:$0xff]  }
   0x4   :  { %v3535_v12 = vld [vmem:[%s4997_s0 + $0x8] sm:$0xff]   ;;  %v3538_v15 = vld [vmem:[%s4997_s0 + $0xd8] sm:$0xff]   ;;  %v3540_v17 = vld [vmem:[%s4997_s0 + $0xe0] sm:$0xff]  }
   0x5   :  { %3086 = vmatpush3.bf16.msra.mxu0 %v310_v5  ;;  %3196 = vmatpush3.bf16.msra.mxu1 %v310_v5  ;;  %v3539_v16 = vld [vmem:[%s4997_s0 + $0x18] sm:$0xff]   ;;  %v3541_v18 = vld [vmem:[%s4997_s0 + $0x20] sm:$0xff]   ;;  %v3542_v19 = vld [vmem:[%s4997_s0 + $0xe8] sm:$0xff]  }
   0x6   :  { %3087 = vmatprep.subr.bf16.mxu0 %v5000_v0  ;;  %3197 = vmatprep.subr.bf16.mxu1 %v5000_v0  ;;  %v3543_v20 = vld [vmem:[%s4997_s0 + $0x28] sm:$0xff]   ;;  %v3544_v21 = vld [vmem:[%s4997_s0 + $0xf0] sm:$0xff]   ;;  %v3546_v23 = vld [vmem:[%s4997_s0 + $0xf8] sm:$0xff]  }
   0x7   :  { %v3545_v22 = vld [vmem:[%s4997_s0 + $0x30] sm:$0xff]   ;;  %v3547_v24 = vld [vmem:[%s4997_s0 + $0x38] sm:$0xff]   ;;  %v3548_v25 = vld [vmem:[%s4997_s0 + $0x100] sm:$0xff]  }
   0x8   :  { %v3549_v26 = vld [vmem:[%s4997_s0 + $0x40] sm:$0xff]   ;;  %v3550_v27 = vld [vmem:[%s4997_s0 + $0x108] sm:$0xff]   ;;  %v3552_v29 = vld [vmem:[%s4997_s0 + $0x110] sm:$0xff]  }
   0x9   :  { %3088 = vmatpush3.bf16.msra.mxu0 %v3529_v6  ;;  %3198 = vmatpush3.bf16.msra.mxu1 %v3529_v6  ;;  %v3551_v28 = vld [vmem:[%s4997_s0 + $0x48] sm:$0xff]   ;;  %v3553_v30 = vld [vmem:[%s4997_s0 + $0x50] sm:$0xff]   ;;  %v3554_v31 = vld [vmem:[%s4997_s0 + $0x118] sm:$0xff]  }
   0xa   :  { %3089 = vmatprep.subr.bf16.mxu0 %v5000_v0  ;;  %3199 = vmatprep.subr.bf16.mxu1 %v5000_v0  ;;  %v3555_v32 = vld [vmem:[%s4997_s0 + $0x58] sm:$0xff]   ;;  %v3556_v33 = vld [vmem:[%s4997_s0 + $0x120] sm:$0xff]   ;;  %v3558_v35 = vld [vmem:[%s4997_s0 + $0x128] sm:$0xff]  }
   0xb   :  { %v3557_v34 = vld [vmem:[%s4997_s0 + $0x60] sm:$0xff]   ;;  %v3559_v36 = vld [vmem:[%s4997_s0 + $0x68] sm:$0xff]   ;;  %v3560_v37 = vld [vmem:[%s4997_s0 + $0x130] sm:$0xff]  }
   0xc   :  { %v3561_v38 = vld [vmem:[%s4997_s0 + $0x70] sm:$0xff]   ;;  %v3562_v39 = vld [vmem:[%s4997_s0 + $0x138] sm:$0xff]   ;;  %v3564_v41 = vld [vmem:[%s4997_s0 + $0x140] sm:$0xff]  }
   0xd   :  { %3090 = vmatpush3.bf16.msra.mxu0 %v3530_v7  ;;  %3200 = vmatpush3.bf16.msra.mxu1 %v3530_v7  ;;  %v3563_v40 = vld [vmem:[%s4997_s0 + $0x78] sm:$0xff]   ;;  %v3565_v42 = vld [vmem:[%s4997_s0 + $0x80] sm:$0xff]   ;;  %v3566_v43 = vld [vmem:[%s4997_s0 + $0x148] sm:$0xff]  }
   0xe   :  { %3091 = vmatprep.subr.bf16.mxu0 %v5000_v0  ;;  %3201 = vmatprep.subr.bf16.mxu1 %v5000_v0  ;;  %v3567_v44 = vld [vmem:[%s4997_s0 + $0x88] sm:$0xff]   ;;  %v3568_v45 = vld [vmem:[%s4997_s0 + $0x150] sm:$0xff]   ;;  %v3570_v47 = vld [vmem:[%s4997_s0 + $0x158] sm:$0xff]  }
   0xf   :  { %v3569_v46 = vld [vmem:[%s4997_s0 + $0x90] sm:$0xff]   ;;  %v3571_v48 = vld [vmem:[%s4997_s0 + $0x98] sm:$0xff]   ;;  %v3572_v49 = vld [vmem:[%s4997_s0 + $0x160] sm:$0xff]  }
  0x10   :  { %v3573_v50 = vld [vmem:[%s4997_s0 + $0xa0] sm:$0xff]   ;;  %v3574_v51 = vld [vmem:[%s4997_s0 + $0x168] sm:$0xff]   ;;  %v3576_v53 = vld [vmem:[%s4997_s0 + $0x170] sm:$0xff]  }
  0x11   :  { %3092 = vmatpush3.bf16.msra.mxu0 %v3531_v8  ;;  %3202 = vmatpush3.bf16.msra.mxu1 %v3531_v8  ;;  %v3575_v52 = vld [vmem:[%s4997_s0 + $0xa8] sm:$0xff]   ;;  %v3577_v54 = vld [vmem:[%s4997_s0 + $0xb0] sm:$0xff]   ;;  %v3578_v55 = vld [vmem:[%s4997_s0 + $0x178] sm:$0xff]  }
  0x12   :  { %3093 = vmatprep.subr.bf16.mxu0 %v5000_v0  ;;  %3203 = vmatprep.subr.bf16.mxu1 %v5000_v0  ;;  %v3579_v56 = vld [vmem:[%s4997_s0 + $0xb8] sm:$0xff]   ;;  %v3580_v57 = vld [vmem:[%s4997_s0 + $0x180] sm:$0xff]   ;;  %v3582_v59 = vld [vmem:[%s4997_s0 + $0x188] sm:$0xff]  }
  0x13   :  { %v3581_v58 = vld [vmem:[%s4997_s0 + $0xc0] sm:$0xff]   ;;  %v3583_v4 = vld [vmem:[%s4997_s0 + $0x190] sm:$0xff]  }
  0x15   :  { %3094 = vmatpush3.bf16.msra.mxu0 %v3532_v9  ;;  %3204 = vmatpush3.bf16.msra.mxu1 %v3532_v9 }
  0x16   :  { %3305 = vmatprep.subr.bf16.mxu0 %v5000_v0  ;;  %3415 = vmatprep.subr.bf16.mxu1 %v5000_v0 }
  0x18   :  { %3096 = vmatmul.mubr.msk.bf16.vlgmr.msra.gmra.mxu0 %vm229_vm3, %v3533_v10  ;;  %3206 = vmatmul.mubr.msk.bf16.vlgmr.msra.gmra.mxu1 %vm229_vm3, %v3534_v11 }
  0x19   :  { %3306 = vmatpush3.bf16.msra.mxu0 %v310_v5  ;;  %3416 = vmatpush3.bf16.msra.mxu1 %v310_v5  ;;  %v3584_v5 = vld [vmem:[%s4997_s0 + $0x258] sm:$0xff]  }
  0x1a   :  { %3099 = vmatprep.mubr.msk.bf16.mxu0 %vm3635_vm2, %v5000_v0  ;;  %3209 = vmatprep.mubr.msk.bf16.mxu1 %vm3635_vm2, %v5000_v0 }
  0x1b   :  { %3307 = vmatprep.subr.bf16.mxu0 %v5000_v0  ;;  %3417 = vmatprep.subr.bf16.mxu1 %v5000_v0 }
  0x1d   :  { %3308 = vmatpush3.bf16.msra.mxu0 %v3529_v6  ;;  %3418 = vmatpush3.bf16.msra.mxu1 %v3529_v6 }
  0x1e   :  { %3309 = vmatprep.subr.bf16.mxu0 %v5000_v0  ;;  %3419 = vmatprep.subr.bf16.mxu1 %v5000_v0 }
  0x20   :  { %3100 = vmatmul.mubr.msk.bf16.gmra.mxu0 %vm229_vm3, %v3535_v12  ;;  %3210 = vmatmul.mubr.msk.bf16.gmra.mxu1 %vm229_vm3, %v3536_v13 }
  0x21   :  { %3103 = vmatprep.mubr.msk.bf16.mxu0 %vm3635_vm2, %v5000_v0  ;;  %3213 = vmatprep.mubr.msk.bf16.mxu1 %vm3635_vm2, %v5000_v0 }
  0x22   :  { %3310 = vmatpush3.bf16.msra.mxu0 %v3530_v7  ;;  %3420 = vmatpush3.bf16.msra.mxu1 %v3530_v7 }
  0x23   :  { %3311 = vmatprep.subr.bf16.mxu0 %v5000_v0  ;;  %3421 = vmatprep.subr.bf16.mxu1 %v5000_v0 }
  0x26   :  { %3312 = vmatpush3.bf16.msra.mxu0 %v3531_v8  ;;  %3422 = vmatpush3.bf16.msra.mxu1 %v3531_v8 }
  0x27   :  { %3313 = vmatprep.subr.bf16.mxu0 %v5000_v0  ;;  %3423 = vmatprep.subr.bf16.mxu1 %v5000_v0 }
  0x28   :  { %3104 = vmatmul.mubr.msk.bf16.gmra.mxu0 %vm229_vm3, %v3537_v14  ;;  %3214 = vmatmul.mubr.msk.bf16.gmra.mxu1 %vm229_vm3, %v3538_v15 }
  0x29   :  { %3107 = vmatprep.mubr.msk.bf16.mxu0 %vm3635_vm2, %v5000_v0  ;;  %3217 = vmatprep.mubr.msk.bf16.mxu1 %vm3635_vm2, %v5000_v0 }
  0x2a   :  { %3314 = vmatpush3.bf16.msra.mxu0 %v3532_v9  ;;  %3424 = vmatpush3.bf16.msra.mxu1 %v3532_v9 }
  0x30   :  { %3108 = vmatmul.mubr.msk.bf16.gmra.mxu0 %vm229_vm3, %v3539_v16  ;;  %3218 = vmatmul.mubr.msk.bf16.gmra.mxu1 %vm229_vm3, %v3540_v17  ;;  %v3585_v16 = vld [vmem:[%s4997_s0 + $0x198] sm:$0xff]   ;;  %v3586_v17 = vld [vmem:[%s4997_s0 + $0x260] sm:$0xff]  }
  0x31   :  { %3111 = vmatprep.mubr.msk.bf16.mxu0 %vm3635_vm2, %v5000_v0  ;;  %3221 = vmatprep.mubr.msk.bf16.mxu1 %vm3635_vm2, %v5000_v0 }
  0x38   :  { %3112 = vmatmul.mubr.msk.bf16.gmra.mxu0 %vm229_vm3, %v3541_v18  ;;  %3222 = vmatmul.mubr.msk.bf16.gmra.mxu1 %vm229_vm3, %v3542_v19 }
  0x39   :  { %3115 = vmatprep.mubr.msk.bf16.mxu0 %vm3635_vm2, %v5000_v0  ;;  %3225 = vmatprep.mubr.msk.bf16.mxu1 %vm3635_vm2, %v5000_v0 }
  0x40   :  { %3116 = vmatmul.mubr.msk.bf16.gmra.mxu0 %vm229_vm3, %v3543_v20  ;;  %3226 = vmatmul.mubr.msk.bf16.gmra.mxu1 %vm229_vm3, %v3544_v21 }
  0x41   :  { %3119 = vmatprep.mubr.msk.bf16.mxu0 %vm3635_vm2, %v5000_v0  ;;  %3229 = vmatprep.mubr.msk.bf16.mxu1 %vm3635_vm2, %v5000_v0 }
  0x48   :  { %3120 = vmatmul.mubr.msk.bf16.gmra.mxu0 %vm229_vm3, %v3545_v22  ;;  %3230 = vmatmul.mubr.msk.bf16.gmra.mxu1 %vm229_vm3, %v3546_v23 }
  0x49   :  { %3123 = vmatprep.mubr.msk.bf16.mxu0 %vm3635_vm2, %v5000_v0  ;;  %3233 = vmatprep.mubr.msk.bf16.mxu1 %vm3635_vm2, %v5000_v0 }
  0x50   :  { %3124 = vmatmul.mubr.msk.bf16.gmra.mxu0 %vm229_vm3, %v3547_v24  ;;  %3234 = vmatmul.mubr.msk.bf16.gmra.mxu1 %vm229_vm3, %v3548_v25 }
  0x51   :  { %3127 = vmatprep.mubr.msk.bf16.mxu0 %vm3635_vm2, %v5000_v0  ;;  %3237 = vmatprep.mubr.msk.bf16.mxu1 %vm3635_vm2, %v5000_v0 }
  0x58   :  { %3128 = vmatmul.mubr.msk.bf16.gmra.mxu0 %vm229_vm3, %v3549_v26  ;;  %3238 = vmatmul.mubr.msk.bf16.gmra.mxu1 %vm229_vm3, %v3550_v27 }
  0x59   :  { %3131 = vmatprep.mubr.msk.bf16.mxu0 %vm3635_vm2, %v5000_v0  ;;  %3241 = vmatprep.mubr.msk.bf16.mxu1 %vm3635_vm2, %v5000_v0 }
  0x60   :  { %3132 = vmatmul.mubr.msk.bf16.gmra.mxu0 %vm229_vm3, %v3551_v28  ;;  %3242 = vmatmul.mubr.msk.bf16.gmra.mxu1 %vm229_vm3, %v3552_v29  ;;  %v3587_v28 = vld [vmem:[%s4997_s0 + $0x1a0] sm:$0xff]   ;;  %v3588_v29 = vld [vmem:[%s4997_s0 + $0x268] sm:$0xff]  }
  0x61   :  { %3135 = vmatprep.mubr.msk.bf16.mxu0 %vm3635_vm2, %v5000_v0  ;;  %3245 = vmatprep.mubr.msk.bf16.mxu1 %vm3635_vm2, %v5000_v0 }
  0x68   :  { %3136 = vmatmul.mubr.msk.bf16.gmra.mxu0 %vm229_vm3, %v3553_v30  ;;  %3246 = vmatmul.mubr.msk.bf16.gmra.mxu1 %vm229_vm3, %v3554_v31 }
  0x69   :  { %3139 = vmatprep.mubr.msk.bf16.mxu0 %vm3635_vm2, %v5000_v0  ;;  %3249 = vmatprep.mubr.msk.bf16.mxu1 %vm3635_vm2, %v5000_v0 }
  0x70   :  { %3140 = vmatmul.mubr.msk.bf16.gmra.mxu0 %vm229_vm3, %v3555_v32  ;;  %3250 = vmatmul.mubr.msk.bf16.gmra.mxu1 %vm229_vm3, %v3556_v33 }
  0x71   :  { %3143 = vmatprep.mubr.msk.bf16.mxu0 %vm3635_vm2, %v5000_v0  ;;  %3253 = vmatprep.mubr.msk.bf16.mxu1 %vm3635_vm2, %v5000_v0 }
  0x78   :  { %3144 = vmatmul.mubr.msk.bf16.gmra.mxu0 %vm229_vm3, %v3557_v34  ;;  %3254 = vmatmul.mubr.msk.bf16.gmra.mxu1 %vm229_vm3, %v3558_v35 }
  0x79   :  { %3147 = vmatprep.mubr.msk.bf16.mxu0 %vm3635_vm2, %v5000_v0  ;;  %3257 = vmatprep.mubr.msk.bf16.mxu1 %vm3635_vm2, %v5000_v0 }
  0x80   :  { %3148 = vmatmul.mubr.msk.bf16.gmra.mxu0 %vm229_vm3, %v3559_v36  ;;  %3258 = vmatmul.mubr.msk.bf16.gmra.mxu1 %vm229_vm3, %v3560_v37 }
  0x81   :  { %3151 = vmatprep.mubr.msk.bf16.mxu0 %vm3635_vm2, %v5000_v0  ;;  %3261 = vmatprep.mubr.msk.bf16.mxu1 %vm3635_vm2, %v5000_v0 }
  0x88   :  { %3152 = vmatmul.mubr.msk.bf16.gmra.mxu0 %vm229_vm3, %v3561_v38  ;;  %3262 = vmatmul.mubr.msk.bf16.gmra.mxu1 %vm229_vm3, %v3562_v39 }
  0x89   :  { %3155 = vmatprep.mubr.msk.bf16.mxu0 %vm3635_vm2, %v5000_v0  ;;  %3265 = vmatprep.mubr.msk.bf16.mxu1 %vm3635_vm2, %v5000_v0 }
  0x90   :  { %3156 = vmatmul.mubr.msk.bf16.gmra.mxu0 %vm229_vm3, %v3563_v40  ;;  %3266 = vmatmul.mubr.msk.bf16.gmra.mxu1 %vm229_vm3, %v3564_v41  ;;  %v3589_v40 = vld [vmem:[%s4997_s0 + $0x1a8] sm:$0xff]   ;;  %v3590_v41 = vld [vmem:[%s4997_s0 + $0x270] sm:$0xff]  }
  0x91   :  { %3159 = vmatprep.mubr.msk.bf16.mxu0 %vm3635_vm2, %v5000_v0  ;;  %3269 = vmatprep.mubr.msk.bf16.mxu1 %vm3635_vm2, %v5000_v0 }
  0x98   :  { %3160 = vmatmul.mubr.msk.bf16.gmra.mxu0 %vm229_vm3, %v3565_v42  ;;  %3270 = vmatmul.mubr.msk.bf16.gmra.mxu1 %vm229_vm3, %v3566_v43 }
  0x99   :  { %3163 = vmatprep.mubr.msk.bf16.mxu0 %vm3635_vm2, %v5000_v0  ;;  %3273 = vmatprep.mubr.msk.bf16.mxu1 %vm3635_vm2, %v5000_v0 }
  0xa0   :  { %3164 = vmatmul.mubr.msk.bf16.gmra.mxu0 %vm229_vm3, %v3567_v44  ;;  %3274 = vmatmul.mubr.msk.bf16.gmra.mxu1 %vm229_vm3, %v3568_v45 }
  0xa1   :  { %3167 = vmatprep.mubr.msk.bf16.mxu0 %vm3635_vm2, %v5000_v0  ;;  %3277 = vmatprep.mubr.msk.bf16.mxu1 %vm3635_vm2, %v5000_v0 }
  0xa8   :  { %3168 = vmatmul.mubr.msk.bf16.gmra.mxu0 %vm229_vm3, %v3569_v46  ;;  %3278 = vmatmul.mubr.msk.bf16.gmra.mxu1 %vm229_vm3, %v3570_v47 }
  0xa9   :  { %3171 = vmatprep.mubr.msk.bf16.mxu0 %vm3635_vm2, %v5000_v0  ;;  %3281 = vmatprep.mubr.msk.bf16.mxu1 %vm3635_vm2, %v5000_v0 }
  0xb0   :  { %3172 = vmatmul.mubr.msk.bf16.gmra.mxu0 %vm229_vm3, %v3571_v48  ;;  %3282 = vmatmul.mubr.msk.bf16.gmra.mxu1 %vm229_vm3, %v3572_v49 }
  0xb1   :  { %3175 = vmatprep.mubr.msk.bf16.mxu0 %vm3635_vm2, %v5000_v0  ;;  %3285 = vmatprep.mubr.msk.bf16.mxu1 %vm3635_vm2, %v5000_v0 }
  0xb8   :  { %3176 = vmatmul.mubr.msk.bf16.gmra.mxu0 %vm229_vm3, %v3573_v50  ;;  %3286 = vmatmul.mubr.msk.bf16.gmra.mxu1 %vm229_vm3, %v3574_v51 }
  0xb9   :  { %3179 = vmatprep.mubr.msk.bf16.mxu0 %vm3635_vm2, %v5000_v0  ;;  %3289 = vmatprep.mubr.msk.bf16.mxu1 %vm3635_vm2, %v5000_v0 }
  0xc0   :  { %3180 = vmatmul.mubr.msk.bf16.gmra.mxu0 %vm229_vm3, %v3575_v52  ;;  %3290 = vmatmul.mubr.msk.bf16.gmra.mxu1 %vm229_vm3, %v3576_v53  ;;  %v3591_v52 = vld [vmem:[%s4997_s0 + $0x1b0] sm:$0xff]   ;;  %v3592_v53 = vld [vmem:[%s4997_s0 + $0x278] sm:$0xff]  }
  0xc1   :  { %3183 = vmatprep.mubr.msk.bf16.mxu0 %vm3635_vm2, %v5000_v0  ;;  %3293 = vmatprep.mubr.msk.bf16.mxu1 %vm3635_vm2, %v5000_v0 }
  0xc8   :  { %3184 = vmatmul.mubr.msk.bf16.gmra.mxu0 %vm229_vm3, %v3577_v54  ;;  %3294 = vmatmul.mubr.msk.bf16.gmra.mxu1 %vm229_vm3, %v3578_v55 }
  0xc9   :  { %3187 = vmatprep.mubr.msk.bf16.mxu0 %vm3635_vm2, %v5000_v0  ;;  %3297 = vmatprep.mubr.msk.bf16.mxu1 %vm3635_vm2, %v5000_v0 }
  0xd0   :  { %3188 = vmatmul.mubr.msk.bf16.gmra.mxu0 %vm229_vm3, %v3579_v56  ;;  %3298 = vmatmul.mubr.msk.bf16.gmra.mxu1 %vm229_vm3, %v3580_v57 }
  0xd1   :  { %3191 = vmatprep.mubr.msk.bf16.mxu0 %vm3635_vm2, %v5000_v0  ;;  %3301 = vmatprep.mubr.msk.bf16.mxu1 %vm3635_vm2, %v5000_v0 }
  0xd8   :  { %v3989_v60 = vpop.f32.mrf.mxu0  ;;  %3192 = vmatmul.mubr.msk.bf16.gmra.mxu0 %vm229_vm3, %v3581_v58  ;;  %v3992_v61 = vpop.f32.mrf.mxu1  ;;  %3302 = vmatmul.mubr.msk.bf16.gmra.mxu1 %vm229_vm3, %v3582_v59 }
  0xd9   :  { %3315 = vmatprep.mubr.msk.bf16.mxu0 %vm3635_vm2, %v5000_v0  ;;  %3425 = vmatprep.mubr.msk.bf16.mxu1 %vm3635_vm2, %v5000_v0 }
  0xda   :  { %v3097_v63 = vpop.f32.mrf.mxu0  ;;  %v3207_v1 = vpop.f32.mrf.mxu1 }
  0xdc   :  { %v4001_v2 = vpop.f32.mrf.mxu0  ;;  %v4003_v3 = vpop.f32.mrf.mxu1 }
  0xde   :  { %v3098_v7 = vpop.f32.mrf.mxu0  ;;  %v3208_v8 = vpop.f32.mrf.mxu1 }
  0xdf   :  { %v3593_v7 = vld [vmem:[%s4997_s0 + $0x1b8] sm:$0xff]   ;;  %v3594_v8 = vld [vmem:[%s4997_s0 + $0x280] sm:$0xff]  }
  0xe0   :  { %v4013_v9 = vpop.f32.mrf.mxu0  ;;  %v4015_v10 = vpop.f32.mrf.mxu1  ;;  %3316 = vmatmul.mubr.msk.bf16.vlgmr.msra.gmra.mxu0 %vm229_vm3, %v3583_v4  ;;  %3426 = vmatmul.mubr.msk.bf16.vlgmr.msra.gmra.mxu1 %vm229_vm3, %v3584_v5 }
  0xe1   :  { %3319 = vmatprep.mubr.msk.bf16.mxu0 %vm3635_vm2, %v5000_v0  ;;  %3429 = vmatprep.mubr.msk.bf16.mxu1 %vm3635_vm2, %v5000_v0 }
  0xe2   :  { %v3101_v12 = vpop.f32.mrf.mxu0  ;;  %v3211_v13 = vpop.f32.mrf.mxu1 }
  0xe4   :  { %v4025_v14 = vpop.f32.mrf.mxu0  ;;  %v4027_v15 = vpop.f32.mrf.mxu1 }
  0xe6   :  { %v3102_v19 = vpop.f32.mrf.mxu0  ;;  %v3212_v20 = vpop.f32.mrf.mxu1 }
  0xe8   :  { %v4037_v21 = vpop.f32.mrf.mxu0  ;;  %v4039_v22 = vpop.f32.mrf.mxu1  ;;  %3320 = vmatmul.mubr.msk.bf16.gmra.mxu0 %vm229_vm3, %v3585_v16  ;;  %3430 = vmatmul.mubr.msk.bf16.gmra.mxu1 %vm229_vm3, %v3586_v17 }
  0xe9   :  { %3323 = vmatprep.mubr.msk.bf16.mxu0 %vm3635_vm2, %v5000_v0  ;;  %3433 = vmatprep.mubr.msk.bf16.mxu1 %vm3635_vm2, %v5000_v0 }
  0xea   :  { %v3105_v24 = vpop.f32.mrf.mxu0  ;;  %v3215_v25 = vpop.f32.mrf.mxu1 }
  0xec   :  { %v4049_v26 = vpop.f32.mrf.mxu0  ;;  %v4051_v27 = vpop.f32.mrf.mxu1 }
  0xee   :  { %v3106_v31 = vpop.f32.mrf.mxu0  ;;  %v3216_v32 = vpop.f32.mrf.mxu1 }
  0xef   :  { %v3595_v31 = vld [vmem:[%s4997_s0 + $0x1c0] sm:$0xff]   ;;  %v3596_v32 = vld [vmem:[%s4997_s0 + $0x288] sm:$0xff]  }
  0xf0   :  { %v4061_v33 = vpop.f32.mrf.mxu0  ;;  %v4063_v34 = vpop.f32.mrf.mxu1  ;;  %3324 = vmatmul.mubr.msk.bf16.gmra.mxu0 %vm229_vm3, %v3587_v28  ;;  %3434 = vmatmul.mubr.msk.bf16.gmra.mxu1 %vm229_vm3, %v3588_v29 }
  0xf1   :  { %3327 = vmatprep.mubr.msk.bf16.mxu0 %vm3635_vm2, %v5000_v0  ;;  %3437 = vmatprep.mubr.msk.bf16.mxu1 %vm3635_vm2, %v5000_v0 }
  0xf2   :  { %v3109_v36 = vpop.f32.mrf.mxu0  ;;  %v3219_v37 = vpop.f32.mrf.mxu1 }
  0xf4   :  { %v4073_v38 = vpop.f32.mrf.mxu0  ;;  %v4075_v39 = vpop.f32.mrf.mxu1 }
  0xf6   :  { %v3110_v43 = vpop.f32.mrf.mxu0  ;;  %v3220_v44 = vpop.f32.mrf.mxu1 }
  0xf8   :  { %v4085_v45 = vpop.f32.mrf.mxu0  ;;  %v4087_v46 = vpop.f32.mrf.mxu1  ;;  %3328 = vmatmul.mubr.msk.bf16.gmra.mxu0 %vm229_vm3, %v3589_v40  ;;  %3438 = vmatmul.mubr.msk.bf16.gmra.mxu1 %vm229_vm3, %v3590_v41 }
  0xf9   :  { %3331 = vmatprep.mubr.msk.bf16.mxu0 %vm3635_vm2, %v5000_v0  ;;  %3441 = vmatprep.mubr.msk.bf16.mxu1 %vm3635_vm2, %v5000_v0 }
  0xfa   :  { %v3113_v48 = vpop.f32.mrf.mxu0  ;;  %v3223_v49 = vpop.f32.mrf.mxu1 }
  0xfc   :  { %v4097_v50 = vpop.f32.mrf.mxu0  ;;  %v4099_v51 = vpop.f32.mrf.mxu1 }
  0xfe   :  { %v3114_v55 = vpop.f32.mrf.mxu0  ;;  %v3224_v56 = vpop.f32.mrf.mxu1 }
  0xff   :  { %v3597_v55 = vld [vmem:[%s4997_s0 + $0x1c8] sm:$0xff]   ;;  %v3598_v56 = vld [vmem:[%s4997_s0 + $0x290] sm:$0xff]  }
 0x100   :  { %v4109_v57 = vpop.f32.mrf.mxu0  ;;  %v4111_v58 = vpop.f32.mrf.mxu1  ;;  %3332 = vmatmul.mubr.msk.bf16.gmra.mxu0 %vm229_vm3, %v3591_v52  ;;  %3442 = vmatmul.mubr.msk.bf16.gmra.mxu1 %vm229_vm3, %v3592_v53 }
 0x101   :  { %3335 = vmatprep.mubr.msk.bf16.mxu0 %vm3635_vm2, %v5000_v0  ;;  %3445 = vmatprep.mubr.msk.bf16.mxu1 %vm3635_vm2, %v5000_v0 }
 0x102   :  { %v3117_v63 = vpop.f32.mrf.mxu0  ;;  %v3227_v1 = vpop.f32.mrf.mxu1 }
 0x104   :  { %v4121_v4 = vpop.f32.mrf.mxu0  ;;  %v4123_v5 = vpop.f32.mrf.mxu1 }
 0x106   :  { %v3118_v13 = vpop.f32.mrf.mxu0  ;;  %v3228_v16 = vpop.f32.mrf.mxu1 }
 0x108   :  { %v4133_v17 = vpop.f32.mrf.mxu0  ;;  %v4135_v19 = vpop.f32.mrf.mxu1  ;;  %3336 = vmatmul.mubr.msk.bf16.gmra.mxu0 %vm229_vm3, %v3593_v7  ;;  %3446 = vmatmul.mubr.msk.bf16.gmra.mxu1 %vm229_vm3, %v3594_v8 }
 0x109   :  { %3339 = vmatprep.mubr.msk.bf16.mxu0 %vm3635_vm2, %v5000_v0  ;;  %3449 = vmatprep.mubr.msk.bf16.mxu1 %vm3635_vm2, %v5000_v0 }
 0x10a   :  { %v3121_v24 = vpop.f32.mrf.mxu0  ;;  %v3231_v25 = vpop.f32.mrf.mxu1 }
 0x10c   :  { %v4145_v28 = vpop.f32.mrf.mxu0  ;;  %v4147_v29 = vpop.f32.mrf.mxu1 }
 0x10e   :  { %v3122_v37 = vpop.f32.mrf.mxu0  ;;  %v3232_v40 = vpop.f32.mrf.mxu1 }
 0x10f   :  { %v3599_v37 = vld [vmem:[%s4997_s0 + $0x1d0] sm:$0xff]   ;;  %v3600_v40 = vld [vmem:[%s4997_s0 + $0x298] sm:$0xff]  }
 0x110   :  { %v4157_v41 = vpop.f32.mrf.mxu0  ;;  %v4159_v43 = vpop.f32.mrf.mxu1  ;;  %3340 = vmatmul.mubr.msk.bf16.gmra.mxu0 %vm229_vm3, %v3595_v31  ;;  %3450 = vmatmul.mubr.msk.bf16.gmra.mxu1 %vm229_vm3, %v3596_v32 }
 0x111   :  { %3343 = vmatprep.mubr.msk.bf16.mxu0 %vm3635_vm2, %v5000_v0  ;;  %3453 = vmatprep.mubr.msk.bf16.mxu1 %vm3635_vm2, %v5000_v0 }
 0x112   :  { %v3125_v48 = vpop.f32.mrf.mxu0  ;;  %v3235_v49 = vpop.f32.mrf.mxu1 }
 0x114   :  { %v4169_v52 = vpop.f32.mrf.mxu0  ;;  %v4171_v53 = vpop.f32.mrf.mxu1 }
 0x116   :  { %v3126_v1 = vpop.f32.mrf.mxu0  ;;  %v3236_v7 = vpop.f32.mrf.mxu1 }
 0x118   :  { %v4181_v8 = vpop.f32.mrf.mxu0  ;;  %v4183_v13 = vpop.f32.mrf.mxu1  ;;  %3344 = vmatmul.mubr.msk.bf16.gmra.mxu0 %vm229_vm3, %v3597_v55  ;;  %3454 = vmatmul.mubr.msk.bf16.gmra.mxu1 %vm229_vm3, %v3598_v56 }
 0x119   :  { %3347 = vmatprep.mubr.msk.bf16.mxu0 %vm3635_vm2, %v5000_v0  ;;  %3457 = vmatprep.mubr.msk.bf16.mxu1 %vm3635_vm2, %v5000_v0 }
 0x11a   :  { %v3129_v24 = vpop.f32.mrf.mxu0  ;;  %v3239_v25 = vpop.f32.mrf.mxu1 }
 0x11c   :  { %v4193_v31 = vpop.f32.mrf.mxu0  ;;  %v4195_v32 = vpop.f32.mrf.mxu1 }
 0x11e   :  { %v3130_v49 = vpop.f32.mrf.mxu0  ;;  %v3240_v55 = vpop.f32.mrf.mxu1 }
 0x120   :  { %v4205_v56 = vpop.f32.mrf.mxu0  ;;  %v4207_v1 = vpop.f32.mrf.mxu1  ;;  %3348 = vmatmul.mubr.msk.bf16.gmra.mxu0 %vm229_vm3, %v3599_v37  ;;  %3458 = vmatmul.mubr.msk.bf16.gmra.mxu1 %vm229_vm3, %v3600_v40  ;;  %v3601_v37 = vld [vmem:[%s4997_s0 + $0x1d8] sm:$0xff]   ;;  %v3602_v40 = vld [vmem:[%s4997_s0 + $0x2a0] sm:$0xff]  }
 0x121   :  { %3351 = vmatprep.mubr.msk.bf16.mxu0 %vm3635_vm2, %v5000_v0  ;;  %3461 = vmatprep.mubr.msk.bf16.mxu1 %vm3635_vm2, %v5000_v0 }
 0x122   :  { %v3133_v24 = vpop.f32.mrf.mxu0  ;;  %v3243_v25 = vpop.f32.mrf.mxu1 }
 0x124   :  { %v4217_v49 = vpop.f32.mrf.mxu0  ;;  %v4219_v55 = vpop.f32.mrf.mxu1 }
 0x126   :  { %v3134_v48 = vpop.f32.mrf.mxu0  ;;  %v3244_v16 = vpop.f32.mrf.mxu1 }
 0x128   :  { %v4229_v63 = vpop.f32.mrf.mxu0  ;;  %v4231_v24 = vpop.f32.mrf.mxu1  ;;  %3352 = vmatmul.mubr.msk.bf16.gmra.mxu0 %vm229_vm3, %v3601_v37  ;;  %3462 = vmatmul.mubr.msk.bf16.gmra.mxu1 %vm229_vm3, %v3602_v40  ;;  %v3603_v37 = vld [vmem:[%s4997_s0 + $0x1e0] sm:$0xff]   ;;  %v3604_v40 = vld [vmem:[%s4997_s0 + $0x2a8] sm:$0xff]  }
 0x129   :  { %3355 = vmatprep.mubr.msk.bf16.mxu0 %vm3635_vm2, %v5000_v0  ;;  %3465 = vmatprep.mubr.msk.bf16.mxu1 %vm3635_vm2, %v5000_v0 }
 0x12a   :  { %v3137_v7 = vpop.f32.mrf.mxu0  ;;  %v3247_v48 = vpop.f32.mrf.mxu1 }
 0x12c   :  { %v4241_v16 = vpop.f32.mrf.mxu0  ;;  %v4243_v44 = vpop.f32.mrf.mxu1 }
 0x12e   :  { %v3138_v36 = vpop.f32.mrf.mxu0  ;;  %v3248_v20 = vpop.f32.mrf.mxu1 }
 0x130   :  { %v4253_v12 = vpop.f32.mrf.mxu0  ;;  %v4255_v7 = vpop.f32.mrf.mxu1  ;;  %3356 = vmatmul.mubr.msk.bf16.gmra.mxu0 %vm229_vm3, %v3603_v37  ;;  %3466 = vmatmul.mubr.msk.bf16.gmra.mxu1 %vm229_vm3, %v3604_v40  ;;  %v3605_v37 = vld [vmem:[%s4997_s0 + $0x1e8] sm:$0xff]   ;;  %v3606_v40 = vld [vmem:[%s4997_s0 + $0x2b0] sm:$0xff]  }
 0x131   :  { %3359 = vmatprep.mubr.msk.bf16.mxu0 %vm3635_vm2, %v5000_v0  ;;  %3469 = vmatprep.mubr.msk.bf16.mxu1 %vm3635_vm2, %v5000_v0 }
 0x132   :  { %v3141_v25 = vpop.f32.mrf.mxu0  ;;  %v3251_v36 = vpop.f32.mrf.mxu1 }
 0x134   :  { %v4265_v20 = vpop.f32.mrf.mxu0  ;;  %v4267_v59 = vpop.f32.mrf.mxu1 }
 0x136   :  { %v3142_v54 = vpop.f32.mrf.mxu0  ;;  %v3252_v47 = vpop.f32.mrf.mxu1 }
 0x138   :  { %v4277_v42 = vpop.f32.mrf.mxu0  ;;  %v4279_v25 = vpop.f32.mrf.mxu1  ;;  %3360 = vmatmul.mubr.msk.bf16.gmra.mxu0 %vm229_vm3, %v3605_v37  ;;  %3470 = vmatmul.mubr.msk.bf16.gmra.mxu1 %vm229_vm3, %v3606_v40  ;;  %v3607_v37 = vld [vmem:[%s4997_s0 + $0x1f0] sm:$0xff]   ;;  %v3608_v40 = vld [vmem:[%s4997_s0 + $0x2b8] sm:$0xff]  }
 0x139   :  { %5054 = vst [vmem:[#allocation2_spill] sm:$0xff] %v4277_v42  ;;  %5055 = vst [vmem:[#allocation3_spill] sm:$0xff] %v4279_v25  ;;  %3363 = vmatprep.mubr.msk.bf16.mxu0 %vm3635_vm2, %v5000_v0  ;;  %3473 = vmatprep.mubr.msk.bf16.mxu1 %vm3635_vm2, %v5000_v0 }
 0x13a   :  { %v3145_v48 = vpop.f32.mrf.mxu0  ;;  %v3255_v54 = vpop.f32.mrf.mxu1 }
 0x13c   :  { %v4289_v47 = vpop.f32.mrf.mxu0  ;;  %v4291_v35 = vpop.f32.mrf.mxu1 }
 0x13d   :  { %5056 = vst [vmem:[#allocation4_spill] sm:$0xff] %v4289_v47  ;;  %5057 = vst [vmem:[#allocation5_spill] sm:$0xff] %v4291_v35 }
 0x13e   :  { %v3146_v30 = vpop.f32.mrf.mxu0  ;;  %v3256_v23 = vpop.f32.mrf.mxu1 }
 0x140   :  { %v4301_v18 = vpop.f32.mrf.mxu0  ;;  %v4303_v48 = vpop.f32.mrf.mxu1  ;;  %3364 = vmatmul.mubr.msk.bf16.gmra.mxu0 %vm229_vm3, %v3607_v37  ;;  %3474 = vmatmul.mubr.msk.bf16.gmra.mxu1 %vm229_vm3, %v3608_v40  ;;  %v3609_v37 = vld [vmem:[%s4997_s0 + $0x1f8] sm:$0xff]   ;;  %v3610_v40 = vld [vmem:[%s4997_s0 + $0x2c0] sm:$0xff]  }
 0x141   :  { %5058 = vst [vmem:[#allocation6_spill] sm:$0xff] %v4301_v18  ;;  %5059 = vst [vmem:[#allocation7_spill] sm:$0xff] %v4303_v48  ;;  %3367 = vmatprep.mubr.msk.bf16.mxu0 %vm3635_vm2, %v5000_v0  ;;  %3477 = vmatprep.mubr.msk.bf16.mxu1 %vm3635_vm2, %v5000_v0  ;;  %v5064_v48 = vmov 0.0   ;;  %v4597_v18 = vld [vmem:[%s4998_s2] ss:$0 sm:$0xff] }
 0x142   :  { %v3149_v36 = vpop.f32.mrf.mxu0  ;;  %v3259_v30 = vpop.f32.mrf.mxu1 }
 0x144   :  { %v4313_v23 = vpop.f32.mrf.mxu0  ;;  %v4315_v11 = vpop.f32.mrf.mxu1 }
 0x145   :  { %5060 = vst [vmem:[#allocation8_spill] sm:$0xff] %v4313_v23  ;;  %5061 = vst [vmem:[#allocation9_spill] sm:$0xff] %v4315_v11 }
 0x146   :  { %v3150_v6 = vpop.f32.mrf.mxu0  ;;  %v3260_v62 = vpop.f32.mrf.mxu1 }
 0x148   :  { %v4325_v0 = vpop.f32.mrf.mxu0  ;;  %v4327_v36 = vpop.f32.mrf.mxu1  ;;  %3368 = vmatmul.mubr.msk.bf16.gmra.mxu0 %vm229_vm3, %v3609_v37  ;;  %3478 = vmatmul.mubr.msk.bf16.gmra.mxu1 %vm229_vm3, %v3610_v40  ;;  %v3611_v37 = vld [vmem:[%s4997_s0 + $0x200] sm:$0xff]   ;;  %v3612_v40 = vld [vmem:[%s4997_s0 + $0x2c8] sm:$0xff]  }
 0x149   :  { %5062 = vst [vmem:[#allocation10_spill] sm:$0xff] %v4325_v0  ;;  %5063 = vst [vmem:[#allocation11_spill] sm:$0xff] %v4327_v36  ;;  %3371 = vmatprep.mubr.msk.bf16.mxu0 %vm3635_vm2, %v5064_v48  ;;  %3481 = vmatprep.mubr.msk.bf16.mxu1 %vm3635_vm2, %v5064_v48 }
 0x14a   :  { %v3153_v54 = vpop.f32.mrf.mxu0  ;;  %v3263_v6 = vpop.f32.mrf.mxu1 }
 0x14c   :  { %v4337_v62 = vpop.f32.mrf.mxu0  ;;  %v4339_v11 = vpop.f32.mrf.mxu1 }
 0x14d   :  { %5065 = vst [vmem:[#allocation12_spill] sm:$0xff] %v4337_v62  ;;  %5066 = vst [vmem:[#allocation13_spill] sm:$0xff] %v4339_v11 }
 0x14e   :  { %v3154_v36 = vpop.f32.mrf.mxu0  ;;  %v3264_v0 = vpop.f32.mrf.mxu1 }
 0x150   :  { %v4349_v23 = vpop.f32.mrf.mxu0  ;;  %v4351_v54 = vpop.f32.mrf.mxu1  ;;  %3372 = vmatmul.mubr.msk.bf16.gmra.mxu0 %vm229_vm3, %v3611_v37  ;;  %3482 = vmatmul.mubr.msk.bf16.gmra.mxu1 %vm229_vm3, %v3612_v40  ;;  %v3613_v37 = vld [vmem:[%s4997_s0 + $0x208] sm:$0xff]   ;;  %v3614_v40 = vld [vmem:[%s4997_s0 + $0x2d0] sm:$0xff]  }
 0x151   :  { %5067 = vst [vmem:[#allocation14_spill] sm:$0xff] %v4349_v23  ;;  %5068 = vst [vmem:[#allocation15_spill] sm:$0xff] %v4351_v54  ;;  %3375 = vmatprep.mubr.msk.bf16.mxu0 %vm3635_vm2, %v5064_v48  ;;  %3485 = vmatprep.mubr.msk.bf16.mxu1 %vm3635_vm2, %v5064_v48 }
 0x152   :  { %v3157_v30 = vpop.f32.mrf.mxu0  ;;  %v3267_v36 = vpop.f32.mrf.mxu1 }
 0x154   :  { %v4361_v0 = vpop.f32.mrf.mxu0  ;;  %v4363_v11 = vpop.f32.mrf.mxu1 }
 0x155   :  { %5069 = vst [vmem:[#allocation16_spill] sm:$0xff] %v4361_v0  ;;  %5070 = vst [vmem:[#allocation17_spill] sm:$0xff] %v4363_v11 }
 0x156   :  { %v3158_v54 = vpop.f32.mrf.mxu0  ;;  %v3268_v23 = vpop.f32.mrf.mxu1 }
 0x158   :  { %v4373_v62 = vpop.f32.mrf.mxu0  ;;  %v4375_v30 = vpop.f32.mrf.mxu1  ;;  %3376 = vmatmul.mubr.msk.bf16.gmra.mxu0 %vm229_vm3, %v3613_v37  ;;  %3486 = vmatmul.mubr.msk.bf16.gmra.mxu1 %vm229_vm3, %v3614_v40  ;;  %v3615_v37 = vld [vmem:[%s4997_s0 + $0x210] sm:$0xff]   ;;  %v3616_v40 = vld [vmem:[%s4997_s0 + $0x2d8] sm:$0xff]  }
 0x159   :  { %5071 = vst [vmem:[#allocation18_spill] sm:$0xff] %v4373_v62  ;;  %5072 = vst [vmem:[#allocation19_spill] sm:$0xff] %v4375_v30  ;;  %3379 = vmatprep.mubr.msk.bf16.mxu0 %vm3635_vm2, %v5064_v48  ;;  %3489 = vmatprep.mubr.msk.bf16.mxu1 %vm3635_vm2, %v5064_v48 }
 0x15a   :  { %v3161_v6 = vpop.f32.mrf.mxu0  ;;  %v3271_v54 = vpop.f32.mrf.mxu1 }
 0x15c   :  { %v4385_v23 = vpop.f32.mrf.mxu0  ;;  %v4387_v11 = vpop.f32.mrf.mxu1 }
 0x15d   :  { %5073 = vst [vmem:[#allocation20_spill] sm:$0xff] %v4385_v23  ;;  %5074 = vst [vmem:[#allocation21_spill] sm:$0xff] %v4387_v11 }
 0x15e   :  { %v3162_v30 = vpop.f32.mrf.mxu0  ;;  %v3272_v62 = vpop.f32.mrf.mxu1 }
 0x160   :  { %v4397_v0 = vpop.f32.mrf.mxu0  ;;  %v4399_v6 = vpop.f32.mrf.mxu1  ;;  %3380 = vmatmul.mubr.msk.bf16.gmra.mxu0 %vm229_vm3, %v3615_v37  ;;  %3490 = vmatmul.mubr.msk.bf16.gmra.mxu1 %vm229_vm3, %v3616_v40  ;;  %v3617_v37 = vld [vmem:[%s4997_s0 + $0x218] sm:$0xff]   ;;  %v3618_v40 = vld [vmem:[%s4997_s0 + $0x2e0] sm:$0xff]  }
 0x161   :  { %5075 = vst [vmem:[#allocation22_spill] sm:$0xff] %v4397_v0  ;;  %5076 = vst [vmem:[#allocation23_spill] sm:$0xff] %v4399_v6  ;;  %3383 = vmatprep.mubr.msk.bf16.mxu0 %vm3635_vm2, %v5064_v48  ;;  %3493 = vmatprep.mubr.msk.bf16.mxu1 %vm3635_vm2, %v5064_v48 }
 0x162   :  { %v3165_v36 = vpop.f32.mrf.mxu0  ;;  %v3275_v30 = vpop.f32.mrf.mxu1 }
 0x164   :  { %v4409_v62 = vpop.f32.mrf.mxu0  ;;  %v4411_v11 = vpop.f32.mrf.mxu1 }
 0x165   :  { %5077 = vst [vmem:[#allocation24_spill] sm:$0xff] %v4409_v62  ;;  %5078 = vst [vmem:[#allocation25_spill] sm:$0xff] %v4411_v11 }
 0x166   :  { %v3166_v6 = vpop.f32.mrf.mxu0  ;;  %v3276_v0 = vpop.f32.mrf.mxu1 }
 0x168   :  { %v4421_v23 = vpop.f32.mrf.mxu0  ;;  %v4423_v36 = vpop.f32.mrf.mxu1  ;;  %3384 = vmatmul.mubr.msk.bf16.gmra.mxu0 %vm229_vm3, %v3617_v37  ;;  %3494 = vmatmul.mubr.msk.bf16.gmra.mxu1 %vm229_vm3, %v3618_v40  ;;  %v3619_v37 = vld [vmem:[%s4997_s0 + $0x220] sm:$0xff]   ;;  %v3620_v40 = vld [vmem:[%s4997_s0 + $0x2e8] sm:$0xff]  }
 0x169   :  { %5079 = vst [vmem:[#allocation26_spill] sm:$0xff] %v4421_v23  ;;  %5080 = vst [vmem:[#allocation27_spill] sm:$0xff] %v4423_v36  ;;  %3387 = vmatprep.mubr.msk.bf16.mxu0 %vm3635_vm2, %v5064_v48  ;;  %3497 = vmatprep.mubr.msk.bf16.mxu1 %vm3635_vm2, %v5064_v48 }
 0x16a   :  { %v3169_v54 = vpop.f32.mrf.mxu0  ;;  %v3279_v6 = vpop.f32.mrf.mxu1 }
 0x16c   :  { %v4433_v0 = vpop.f32.mrf.mxu0  ;;  %v4435_v11 = vpop.f32.mrf.mxu1 }
 0x16d   :  { %5081 = vst [vmem:[#allocation28_spill] sm:$0xff] %v4433_v0  ;;  %5082 = vst [vmem:[#allocation29_spill] sm:$0xff] %v4435_v11 }
 0x16e   :  { %v3170_v36 = vpop.f32.mrf.mxu0  ;;  %v3280_v23 = vpop.f32.mrf.mxu1 }
 0x170   :  { %v4445_v62 = vpop.f32.mrf.mxu0  ;;  %v4447_v54 = vpop.f32.mrf.mxu1  ;;  %3388 = vmatmul.mubr.msk.bf16.gmra.mxu0 %vm229_vm3, %v3619_v37  ;;  %3498 = vmatmul.mubr.msk.bf16.gmra.mxu1 %vm229_vm3, %v3620_v40  ;;  %v3621_v37 = vld [vmem:[%s4997_s0 + $0x228] sm:$0xff]   ;;  %v3622_v40 = vld [vmem:[%s4997_s0 + $0x2f0] sm:$0xff]  }
 0x171   :  { %5083 = vst [vmem:[#allocation30_spill] sm:$0xff] %v4445_v62  ;;  %5084 = vst [vmem:[#allocation31_spill] sm:$0xff] %v4447_v54  ;;  %3391 = vmatprep.mubr.msk.bf16.mxu0 %vm3635_vm2, %v5064_v48  ;;  %3501 = vmatprep.mubr.msk.bf16.mxu1 %vm3635_vm2, %v5064_v48 }
 0x172   :  { %v3173_v30 = vpop.f32.mrf.mxu0  ;;  %v3283_v36 = vpop.f32.mrf.mxu1 }
 0x174   :  { %v4457_v23 = vpop.f32.mrf.mxu0  ;;  %v4459_v11 = vpop.f32.mrf.mxu1 }
 0x175   :  { %5085 = vst [vmem:[#allocation32_spill] sm:$0xff] %v4457_v23  ;;  %5086 = vst [vmem:[#allocation33_spill] sm:$0xff] %v4459_v11 }
 0x176   :  { %v3174_v54 = vpop.f32.mrf.mxu0  ;;  %v3284_v62 = vpop.f32.mrf.mxu1 }
 0x178   :  { %v4469_v0 = vpop.f32.mrf.mxu0  ;;  %v4471_v30 = vpop.f32.mrf.mxu1  ;;  %3392 = vmatmul.mubr.msk.bf16.gmra.mxu0 %vm229_vm3, %v3621_v37  ;;  %3502 = vmatmul.mubr.msk.bf16.gmra.mxu1 %vm229_vm3, %v3622_v40  ;;  %v3623_v37 = vld [vmem:[%s4997_s0 + $0x230] sm:$0xff]   ;;  %v3624_v40 = vld [vmem:[%s4997_s0 + $0x2f8] sm:$0xff]  }
 0x179   :  { %5087 = vst [vmem:[#allocation34_spill] sm:$0xff] %v4469_v0  ;;  %5088 = vst [vmem:[#allocation35_spill] sm:$0xff] %v4471_v30  ;;  %3395 = vmatprep.mubr.msk.bf16.mxu0 %vm3635_vm2, %v5064_v48  ;;  %3505 = vmatprep.mubr.msk.bf16.mxu1 %vm3635_vm2, %v5064_v48 }
 0x17a   :  { %v3177_v6 = vpop.f32.mrf.mxu0  ;;  %v3287_v54 = vpop.f32.mrf.mxu1 }
 0x17c   :  { %v4481_v62 = vpop.f32.mrf.mxu0  ;;  %v4483_v11 = vpop.f32.mrf.mxu1 }
 0x17d   :  { %5089 = vst [vmem:[#allocation36_spill] sm:$0xff] %v4481_v62  ;;  %5090 = vst [vmem:[#allocation37_spill] sm:$0xff] %v4483_v11 }
 0x17e   :  { %v3178_v30 = vpop.f32.mrf.mxu0  ;;  %v3288_v0 = vpop.f32.mrf.mxu1 }
 0x180   :  { %v4493_v23 = vpop.f32.mrf.mxu0  ;;  %v4495_v6 = vpop.f32.mrf.mxu1  ;;  %3396 = vmatmul.mubr.msk.bf16.gmra.mxu0 %vm229_vm3, %v3623_v37  ;;  %3506 = vmatmul.mubr.msk.bf16.gmra.mxu1 %vm229_vm3, %v3624_v40  ;;  %v3625_v37 = vld [vmem:[%s4997_s0 + $0x238] sm:$0xff]   ;;  %v3626_v40 = vld [vmem:[%s4997_s0 + $0x300] sm:$0xff]  }
 0x181   :  { %5091 = vst [vmem:[#allocation38_spill] sm:$0xff] %v4493_v23  ;;  %5092 = vst [vmem:[#allocation39_spill] sm:$0xff] %v4495_v6  ;;  %3399 = vmatprep.mubr.msk.bf16.mxu0 %vm3635_vm2, %v5064_v48  ;;  %3509 = vmatprep.mubr.msk.bf16.mxu1 %vm3635_vm2, %v5064_v48 }
 0x182   :  { %v3181_v36 = vpop.f32.mrf.mxu0  ;;  %v3291_v30 = vpop.f32.mrf.mxu1 }
 0x184   :  { %v4505_v0 = vpop.f32.mrf.mxu0  ;;  %v4507_v11 = vpop.f32.mrf.mxu1 }
 0x185   :  { %5093 = vst [vmem:[#allocation40_spill] sm:$0xff] %v4505_v0  ;;  %5094 = vst [vmem:[#allocation41_spill] sm:$0xff] %v4507_v11 }
 0x186   :  { %v3182_v6 = vpop.f32.mrf.mxu0  ;;  %v3292_v23 = vpop.f32.mrf.mxu1 }
 0x188   :  { %v4517_v62 = vpop.f32.mrf.mxu0  ;;  %v4519_v36 = vpop.f32.mrf.mxu1  ;;  %3400 = vmatmul.mubr.msk.bf16.gmra.mxu0 %vm229_vm3, %v3625_v37  ;;  %3510 = vmatmul.mubr.msk.bf16.gmra.mxu1 %vm229_vm3, %v3626_v40  ;;  %v3627_v37 = vld [vmem:[%s4997_s0 + $0x240] sm:$0xff]   ;;  %v3628_v40 = vld [vmem:[%s4997_s0 + $0x308] sm:$0xff]  }
 0x189   :  { %5095 = vst [vmem:[#allocation42_spill] sm:$0xff] %v4517_v62  ;;  %5096 = vst [vmem:[#allocation43_spill] sm:$0xff] %v4519_v36  ;;  %3403 = vmatprep.mubr.msk.bf16.mxu0 %vm3635_vm2, %v5064_v48  ;;  %3513 = vmatprep.mubr.msk.bf16.mxu1 %vm3635_vm2, %v5064_v48 }
 0x18a   :  { %v3185_v54 = vpop.f32.mrf.mxu0  ;;  %v3295_v6 = vpop.f32.mrf.mxu1 }
 0x18c   :  { %v4529_v23 = vpop.f32.mrf.mxu0  ;;  %v4531_v11 = vpop.f32.mrf.mxu1 }
 0x18d   :  { %5097 = vst [vmem:[#allocation44_spill] sm:$0xff] %v4529_v23  ;;  %5098 = vst [vmem:[#allocation45_spill] sm:$0xff] %v4531_v11 }
 0x18e   :  { %v3186_v36 = vpop.f32.mrf.mxu0  ;;  %v3296_v62 = vpop.f32.mrf.mxu1 }
 0x190   :  { %v4541_v0 = vpop.f32.mrf.mxu0  ;;  %v4543_v54 = vpop.f32.mrf.mxu1  ;;  %3404 = vmatmul.mubr.msk.bf16.gmra.mxu0 %vm229_vm3, %v3627_v37  ;;  %3514 = vmatmul.mubr.msk.bf16.gmra.mxu1 %vm229_vm3, %v3628_v40  ;;  %v3629_v37 = vld [vmem:[%s4997_s0 + $0x248] sm:$0xff]   ;;  %v3630_v40 = vld [vmem:[%s4997_s0 + $0x310] sm:$0xff]  }
 0x191   :  { %5099 = vst [vmem:[#allocation46_spill] sm:$0xff] %v4541_v0  ;;  %5100 = vst [vmem:[#allocation47_spill] sm:$0xff] %v4543_v54  ;;  %3407 = vmatprep.mubr.msk.bf16.mxu0 %vm3635_vm2, %v5064_v48  ;;  %3517 = vmatprep.mubr.msk.bf16.mxu1 %vm3635_vm2, %v5064_v48 }
 0x192   :  { %v3189_v30 = vpop.f32.mrf.mxu0  ;;  %v3299_v36 = vpop.f32.mrf.mxu1 }
 0x194   :  { %v4553_v62 = vpop.f32.mrf.mxu0  ;;  %v4555_v11 = vpop.f32.mrf.mxu1 }
 0x195   :  { %5101 = vst [vmem:[#allocation48_spill] sm:$0xff] %v4553_v62  ;;  %5102 = vst [vmem:[#allocation49_spill] sm:$0xff] %v4555_v11 }
 0x196   :  { %v3190_v54 = vpop.f32.mrf.mxu0  ;;  %v3300_v0 = vpop.f32.mrf.mxu1 }
 0x198   :  { %v4565_v23 = vpop.f32.mrf.mxu0  ;;  %v4567_v30 = vpop.f32.mrf.mxu1  ;;  %3408 = vmatmul.mubr.msk.bf16.gmra.mxu0 %vm229_vm3, %v3629_v37  ;;  %3518 = vmatmul.mubr.msk.bf16.gmra.mxu1 %vm229_vm3, %v3630_v40  ;;  %v3631_v37 = vld [vmem:[%s4997_s0 + $0x250] sm:$0xff]   ;;  %v3632_v40 = vld [vmem:[%s4997_s0 + $0x318] sm:$0xff]  }
 0x199   :  { %5103 = vst [vmem:[#allocation50_spill] sm:$0xff] %v4565_v23  ;;  %5104 = vst [vmem:[#allocation51_spill] sm:$0xff] %v4567_v30  ;;  %3411 = vmatprep.mubr.msk.bf16.mxu0 %vm3635_vm2, %v5064_v48  ;;  %3521 = vmatprep.mubr.msk.bf16.mxu1 %vm3635_vm2, %v5064_v48 }
 0x19a   :  { %v3193_v6 = vpop.f32.mrf.mxu0  ;;  %v3303_v54 = vpop.f32.mrf.mxu1 }
 0x19b   :  { %v5107_v54 = vmax.f32 %v3989_v60, %v3992_v61 }
 0x19c   :  { %v4577_v0 = vpop.f32.mrf.mxu0  ;;  %v4579_v11 = vpop.f32.mrf.mxu1 }
 0x19d   :  { %5105 = vst [vmem:[#allocation52_spill] sm:$0xff] %v4577_v0  ;;  %5106 = vst [vmem:[#allocation53_spill] sm:$0xff] %v4579_v11 }
 0x19e   :  { %v3194_v30 = vpop.f32.mrf.mxu0  ;;  %v3304_v23 = vpop.f32.mrf.mxu1 }
 0x1a0   :  { %v1364_v48 = vpop.f32.mrf.mxu0  ;;  %3412 = vmatmul.mubr.msk.bf16.gmra.mxu0 %vm229_vm3, %v3631_v37  ;;  %v1898_v6 = vpop.f32.mrf.mxu1  ;;  %3522 = vmatmul.mubr.msk.bf16.gmra.mxu1 %vm229_vm3, %v3632_v40  ;;  %v5108_v37 = vmax.f32 %v4001_v2, %v4003_v3 }
 0x1a1   :  { %v1563_v62 = vmax.f32 %v5107_v54, %v1364_v48 }
 0x1a2   :  { %v3317_v35 = vpop.f32.mrf.mxu0  ;;  %v3427_v47 = vpop.f32.mrf.mxu1 }
 0x1a3   :  { %v2097_v36 = vmax.f32 %v1563_v62, %v1898_v6  ;;  %v5109_v47 = vmax.f32 %v4013_v9, %v4015_v10 }
 0x1a4   :  { %v1367_v30 = vpop.f32.mrf.mxu0  ;;  %v1901_v23 = vpop.f32.mrf.mxu1 }
 0x1a5   :  { %v2154_v11 = vadd.f32 %v4597_v18, %v2097_v36  ;;  %v1564_v40 = vmax.f32 %v5108_v37, %v1367_v30 }
 0x1a6   :  { %v3318_v0 = vpop.f32.mrf.mxu0  ;;  %v3428_v25 = vpop.f32.mrf.mxu1 }
 0x1a7   :  { %v2204_v60 = vmax.f32 %v2154_v11, 0.0  ;;  %v2098_v61 = vmax.f32 %v1564_v40, %v1901_v23  ;;  %v5110_v23 = vmax.f32 %v4025_v14, %v4027_v15 }
 0x1a8   :  { %v1372_v48 = vpop.f32.mrf.mxu0  ;;  %v1906_v54 = vpop.f32.mrf.mxu1 }
 0x1a9   :  { %v2915_v42 = vpack.c.bf16 %v2204_v60, %v2204_v60  ;;  %v2155_v35 = vadd.f32 %v4597_v18, %v2098_v61  ;;  %v1565_v62 = vmax.f32 %v5109_v47, %v1372_v48 }
 0x1aa   :  { %v3321_v6 = vpop.f32.mrf.mxu0  ;;  %v3431_v36 = vpop.f32.mrf.mxu1 }
 0x1ab   :  { %2455 = vst.msk [vmem:[%s4999_s3] sm:$0xf] %vm2454_vm4, %v2915_v42  ;;  %v2205_v2 = vmax.f32 %v2155_v35, 0.0  ;;  %v2099_v3 = vmax.f32 %v1565_v62, %v1906_v54  ;;  %v5111_v35 = vmax.f32 %v4037_v21, %v4039_v22 }
 0x1ac   :  { %v1375_v11 = vpop.f32.mrf.mxu0  ;;  %v1909_v25 = vpop.f32.mrf.mxu1 }
 0x1ad   :  { %v2916_v0 = vpack.c.bf16 %v2205_v2, %v2205_v2  ;;  %v2156_v30 = vadd.f32 %v4597_v18, %v2099_v3  ;;  %v1566_v37 = vmax.f32 %v5110_v23, %v1375_v11 }
 0x1ae   :  { %v3322_v9 = vpop.f32.mrf.mxu0  ;;  %v3432_v10 = vpop.f32.mrf.mxu1 }
 0x1af   :  { %2456 = vst.msk [vmem:[%s4999_s3 + $0x4] sm:$0xf] %vm2454_vm4, %v2916_v0  ;;  %v2206_v40 = vmax.f32 %v2156_v30, 0.0  ;;  %v2100_v42 = vmax.f32 %v1566_v37, %v1909_v25  ;;  %v5112_v25 = vmax.f32 %v4049_v26, %v4051_v27 }
 0x1b0   :  { %v1380_v60 = vpop.f32.mrf.mxu0  ;;  %v1914_v61 = vpop.f32.mrf.mxu1 }
 0x1b1   :  { %v2917_v48 = vpack.c.bf16 %v2206_v40, %v2206_v40  ;;  %v2157_v54 = vadd.f32 %v4597_v18, %v2100_v42  ;;  %v1567_v47 = vmax.f32 %v5111_v35, %v1380_v60  ;;  %v5113_v42 = vmax.f32 %v4061_v33, %v4063_v34 }
 0x1b2   :  { %v3325_v14 = vpop.f32.mrf.mxu0  ;;  %v3435_v15 = vpop.f32.mrf.mxu1 }
 0x1b3   :  { %2457 = vst.msk [vmem:[%s4999_s3 + $0x8] sm:$0xf] %vm2454_vm4, %v2917_v48  ;;  %v2207_v62 = vmax.f32 %v2157_v54, 0.0  ;;  %v2101_v6 = vmax.f32 %v1567_v47, %v1914_v61  ;;  %v5114_v15 = vmax.f32 %v4073_v38, %v4075_v39 }
 0x1b4   :  { %v1383_v36 = vpop.f32.mrf.mxu0  ;;  %v1917_v2 = vpop.f32.mrf.mxu1 }
 0x1b5   :  { %v2918_v3 = vpack.c.bf16 %v2207_v62, %v2207_v62  ;;  %v2158_v11 = vadd.f32 %v4597_v18, %v2101_v6  ;;  %v1568_v0 = vmax.f32 %v5112_v25, %v1383_v36 }
 0x1b6   :  { %v3326_v21 = vpop.f32.mrf.mxu0  ;;  %v3436_v22 = vpop.f32.mrf.mxu1 }
 0x1b7   :  { %2458 = vst.msk [vmem:[%s4999_s3 + $0xc] sm:$0xf] %vm2454_vm4, %v2918_v3  ;;  %v2208_v30 = vmax.f32 %v2158_v11, 0.0  ;;  %v2102_v23 = vmax.f32 %v1568_v0, %v1917_v2  ;;  %v5115_v0 = vmax.f32 %v4085_v45, %v4087_v46 }
 0x1b8   :  { %v1388_v37 = vpop.f32.mrf.mxu0  ;;  %v1922_v9 = vpop.f32.mrf.mxu1 }
 0x1b9   :  { %v2919_v10 = vpack.c.bf16 %v2208_v30, %v2208_v30  ;;  %v2159_v40 = vadd.f32 %v4597_v18, %v2102_v23  ;;  %v1569_v60 = vmax.f32 %v5113_v42, %v1388_v37 }
 0x1ba   :  { %v3329_v26 = vpop.f32.mrf.mxu0  ;;  %v3439_v27 = vpop.f32.mrf.mxu1 }
 0x1bb   :  { %2459 = vst.msk [vmem:[%s4999_s3 + $0x10] sm:$0xf] %vm2454_vm4, %v2919_v10  ;;  %v2209_v61 = vmax.f32 %v2159_v40, 0.0  ;;  %v2103_v48 = vmax.f32 %v1569_v60, %v1922_v9  ;;  %v5116_v40 = vmax.f32 %v4097_v50, %v4099_v51 }
 0x1bc   :  { %v1391_v54 = vpop.f32.mrf.mxu0  ;;  %v1925_v35 = vpop.f32.mrf.mxu1 }
 0x1bd   :  { %v2920_v47 = vpack.c.bf16 %v2209_v61, %v2209_v61  ;;  %v2160_v14 = vadd.f32 %v4597_v18, %v2103_v48  ;;  %v1570_v62 = vmax.f32 %v5114_v15, %v1391_v54 }
 0x1be   :  { %v3330_v33 = vpop.f32.mrf.mxu0  ;;  %v3440_v34 = vpop.f32.mrf.mxu1 }
 0x1bf   :  { %2460 = vst.msk [vmem:[%s4999_s3 + $0x14] sm:$0xf] %vm2454_vm4, %v2920_v47  ;;  %v2210_v6 = vmax.f32 %v2160_v14, 0.0  ;;  %v2104_v36 = vmax.f32 %v1570_v62, %v1925_v35  ;;  %v5117_v35 = vmax.f32 %v4109_v57, %v4111_v58 }
 0x1c0   :  { %v1396_v2 = vpop.f32.mrf.mxu0  ;;  %v1930_v3 = vpop.f32.mrf.mxu1 }
 0x1c1   :  { %v2921_v11 = vpack.c.bf16 %v2210_v6, %v2210_v6  ;;  %v2161_v25 = vadd.f32 %v4597_v18, %v2104_v36  ;;  %v1571_v21 = vmax.f32 %v5115_v0, %v1396_v2  ;;  %v5118_v36 = vmax.f32 %v4121_v4, %v4123_v5 }
 0x1c2   :  { %v3333_v38 = vpop.f32.mrf.mxu0  ;;  %v3443_v39 = vpop.f32.mrf.mxu1 }
 0x1c3   :  { %2461 = vst.msk [vmem:[%s4999_s3 + $0x18] sm:$0xf] %vm2454_vm4, %v2921_v11  ;;  %v2211_v22 = vmax.f32 %v2161_v25, 0.0  ;;  %v2105_v30 = vmax.f32 %v1571_v21, %v1930_v3  ;;  %v5119_v39 = vmax.f32 %v4133_v17, %v4135_v19 }
 0x1c4   :  { %v1399_v23 = vpop.f32.mrf.mxu0  ;;  %v1933_v37 = vpop.f32.mrf.mxu1 }
 0x1c5   :  { %v2922_v9 = vpack.c.bf16 %v2211_v22, %v2211_v22  ;;  %v2162_v10 = vadd.f32 %v4597_v18, %v2105_v30  ;;  %v1572_v42 = vmax.f32 %v5116_v40, %v1399_v23 }
 0x1c6   :  { %v3334_v45 = vpop.f32.mrf.mxu0  ;;  %v3444_v46 = vpop.f32.mrf.mxu1 }
 0x1c7   :  { %2462 = vst.msk [vmem:[%s4999_s3 + $0x1c] sm:$0xf] %vm2454_vm4, %v2922_v9  ;;  %v2212_v60 = vmax.f32 %v2162_v10, 0.0  ;;  %v2106_v26 = vmax.f32 %v1572_v42, %v1933_v37  ;;  %v5120_v42 = vmax.f32 %v4145_v28, %v4147_v29 }
 0x1c8   :  { %v1404_v27 = vpop.f32.mrf.mxu0  ;;  %v1938_v61 = vpop.f32.mrf.mxu1 }
 0x1c9   :  { %v2923_v48 = vpack.c.bf16 %v2212_v60, %v2212_v60  ;;  %v2163_v54 = vadd.f32 %v4597_v18, %v2106_v26  ;;  %v1573_v47 = vmax.f32 %v5117_v35, %v1404_v27 }
 0x1ca   :  { %v3337_v50 = vpop.f32.mrf.mxu0  ;;  %v3447_v51 = vpop.f32.mrf.mxu1 }
 0x1cb   :  { %2463 = vst.msk [vmem:[%s4999_s3 + $0x20] sm:$0xf] %vm2454_vm4, %v2923_v48  ;;  %v2213_v14 = vmax.f32 %v2163_v54, 0.0  ;;  %v2107_v15 = vmax.f32 %v1573_v47, %v1938_v61  ;;  %v5121_v54 = vmax.f32 %v4157_v41, %v4159_v43 }
 0x1cc   :  { %v1407_v62 = vpop.f32.mrf.mxu0  ;;  %v1941_v33 = vpop.f32.mrf.mxu1 }
 0x1cd   :  { %v2924_v34 = vpack.c.bf16 %v2213_v14, %v2213_v14  ;;  %v2164_v6 = vadd.f32 %v4597_v18, %v2107_v15  ;;  %v1574_v2 = vmax.f32 %v5118_v36, %v1407_v62 }
 0x1ce   :  { %v3338_v57 = vpop.f32.mrf.mxu0  ;;  %v3448_v58 = vpop.f32.mrf.mxu1 }
 0x1cf   :  { %2464 = vst.msk [vmem:[%s4999_s3 + $0x24] sm:$0xf] %vm2454_vm4, %v2924_v34  ;;  %v2214_v3 = vmax.f32 %v2164_v6, 0.0  ;;  %v2108_v11 = vmax.f32 %v1574_v2, %v1941_v33  ;;  %v5122_v33 = vmax.f32 %v4169_v52, %v4171_v53 }
 0x1d0   :  { %v1412_v25 = vpop.f32.mrf.mxu0  ;;  %v1946_v0 = vpop.f32.mrf.mxu1 }
 0x1d1   :  { %v2925_v21 = vpack.c.bf16 %v2214_v3, %v2214_v3  ;;  %v2165_v38 = vadd.f32 %v4597_v18, %v2108_v11  ;;  %v1575_v22 = vmax.f32 %v5119_v39, %v1412_v25  ;;  %v5123_v11 = vmax.f32 %v4181_v8, %v4183_v13 }
 0x1d2   :  { %v3341_v4 = vpop.f32.mrf.mxu0  ;;  %v3451_v5 = vpop.f32.mrf.mxu1 }
 0x1d3   :  { %2465 = vst.msk [vmem:[%s4999_s3 + $0x28] sm:$0xf] %vm2454_vm4, %v2925_v21  ;;  %v2215_v30 = vmax.f32 %v2165_v38, 0.0  ;;  %v2109_v23 = vmax.f32 %v1575_v22, %v1946_v0  ;;  %v5124_v5 = vmax.f32 %v4193_v31, %v4195_v32 }
 0x1d4   :  { %v1415_v37 = vpop.f32.mrf.mxu0  ;;  %v1949_v9 = vpop.f32.mrf.mxu1 }
 0x1d5   :  { %v2926_v10 = vpack.c.bf16 %v2215_v30, %v2215_v30  ;;  %v2166_v40 = vadd.f32 %v4597_v18, %v2109_v23  ;;  %v1576_v45 = vmax.f32 %v5120_v42, %v1415_v37 }
 0x1d6   :  { %v3342_v17 = vpop.f32.mrf.mxu0  ;;  %v3452_v19 = vpop.f32.mrf.mxu1 }
 0x1d7   :  { %2466 = vst.msk [vmem:[%s4999_s3 + $0x2c] sm:$0xf] %vm2454_vm4, %v2926_v10  ;;  %v2216_v46 = vmax.f32 %v2166_v40, 0.0  ;;  %v2110_v60 = vmax.f32 %v1576_v45, %v1949_v9  ;;  %v5125_v45 = vmax.f32 %v4205_v56, %v4207_v1 }
 0x1d8   :  { %v1420_v26 = vpop.f32.mrf.mxu0  ;;  %v1954_v27 = vpop.f32.mrf.mxu1 }
 0x1d9   :  { %v2927_v61 = vpack.c.bf16 %v2216_v46, %v2216_v46  ;;  %v2167_v48 = vadd.f32 %v4597_v18, %v2110_v60  ;;  %v1577_v35 = vmax.f32 %v5121_v54, %v1420_v26 }
 0x1da   :  { %v3345_v28 = vpop.f32.mrf.mxu0  ;;  %v3455_v29 = vpop.f32.mrf.mxu1 }
 0x1db   :  { %2467 = vst.msk [vmem:[%s4999_s3 + $0x30] sm:$0xf] %vm2454_vm4, %v2927_v61  ;;  %v2217_v47 = vmax.f32 %v2167_v48, 0.0  ;;  %v2111_v50 = vmax.f32 %v1577_v35, %v1954_v27  ;;  %v5126_v48 = vmax.f32 %v4217_v49, %v4219_v55 }
 0x1dc   :  { %v1423_v51 = vpop.f32.mrf.mxu0  ;;  %v1957_v14 = vpop.f32.mrf.mxu1 }
 0x1dd   :  { %v2928_v15 = vpack.c.bf16 %v2217_v47, %v2217_v47  ;;  %v2168_v62 = vadd.f32 %v4597_v18, %v2111_v50  ;;  %v1578_v34 = vmax.f32 %v5122_v33, %v1423_v51 }
 0x1de   :  { %v3346_v41 = vpop.f32.mrf.mxu0  ;;  %v3456_v43 = vpop.f32.mrf.mxu1 }
 0x1df   :  { %2468 = vst.msk [vmem:[%s4999_s3 + $0x34] sm:$0xf] %vm2454_vm4, %v2928_v15  ;;  %v2218_v6 = vmax.f32 %v2168_v62, 0.0  ;;  %v2112_v36 = vmax.f32 %v1578_v34, %v1957_v14  ;;  %v5127_v14 = vmax.f32 %v4229_v63, %v4231_v24 }
 0x1e0   :  { %v1428_v2 = vpop.f32.mrf.mxu0  ;;  %v1962_v57 = vpop.f32.mrf.mxu1 }
 0x1e1   :  { %v2929_v58 = vpack.c.bf16 %v2218_v6, %v2218_v6  ;;  %v2169_v3 = vadd.f32 %v4597_v18, %v2112_v36  ;;  %v1579_v25 = vmax.f32 %v5123_v11, %v1428_v2  ;;  %v5128_v36 = vmax.f32 %v4241_v16, %v4243_v44 }
 0x1e2   :  { %v3349_v52 = vpop.f32.mrf.mxu0  ;;  %v3459_v53 = vpop.f32.mrf.mxu1 }
 0x1e3   :  { %2469 = vst.msk [vmem:[%s4999_s3 + $0x38] sm:$0xf] %vm2454_vm4, %v2929_v58  ;;  %v2219_v0 = vmax.f32 %v2169_v3, 0.0  ;;  %v2113_v21 = vmax.f32 %v1579_v25, %v1962_v57  ;;  %v5129_v53 = vmax.f32 %v4253_v12, %v4255_v7 }
 0x1e4   :  { %v1431_v38 = vpop.f32.mrf.mxu0  ;;  %v1965_v39 = vpop.f32.mrf.mxu1 }
 0x1e5   :  { %v2930_v22 = vpack.c.bf16 %v2219_v0, %v2219_v0  ;;  %v2170_v4 = vadd.f32 %v4597_v18, %v2113_v21  ;;  %v1580_v30 = vmax.f32 %v5124_v5, %v1431_v38 }
 0x1e6   :  { %v3350_v8 = vpop.f32.mrf.mxu0  ;;  %v3460_v13 = vpop.f32.mrf.mxu1 }
 0x1e7   :  { %2470 = vst.msk [vmem:[%s4999_s3 + $0x3c] sm:$0xf] %vm2454_vm4, %v2930_v22  ;;  %v2220_v23 = vmax.f32 %v2170_v4, 0.0  ;;  %v2114_v37 = vmax.f32 %v1580_v30, %v1965_v39  ;;  %v5130_v30 = vmax.f32 %v4265_v20, %v4267_v59 }
 0x1e8   :  { %v1436_v9 = vpop.f32.mrf.mxu0  ;;  %v1970_v10 = vpop.f32.mrf.mxu1 }
 0x1e9   :  { %v2931_v40 = vpack.c.bf16 %v2220_v23, %v2220_v23  ;;  %v2171_v42 = vadd.f32 %v4597_v18, %v2114_v37  ;;  %v1581_v17 = vmax.f32 %v5125_v45, %v1436_v9  ;;  %v5132_v45 = vld [vmem:[#allocation3_spill] sm:$0xff] }
 0x1ea   :  { %v3353_v31 = vpop.f32.mrf.mxu0  ;;  %v3463_v32 = vpop.f32.mrf.mxu1 }
 0x1eb   :  { %2471 = vst.msk [vmem:[%s4999_s3 + $0x40] sm:$0xf] %vm2454_vm4, %v2931_v40  ;;  %v2221_v19 = vmax.f32 %v2171_v42, 0.0  ;;  %v2115_v46 = vmax.f32 %v1581_v17, %v1970_v10  ;;  %v5131_v42 = vld [vmem:[#allocation2_spill] sm:$0xff] }
 0x1ec   :  { %v1439_v60 = vpop.f32.mrf.mxu0  ;;  %v1973_v26 = vpop.f32.mrf.mxu1  ;;  %v5133_v17 = vmax.f32 %v5131_v42, %v5132_v45 }
 0x1ed   :  { %v2932_v27 = vpack.c.bf16 %v2221_v19, %v2221_v19  ;;  %v2172_v61 = vadd.f32 %v4597_v18, %v2115_v46  ;;  %v1582_v54 = vmax.f32 %v5126_v48, %v1439_v60  ;;  %v5135_v48 = vld [vmem:[#allocation5_spill] sm:$0xff] }
 0x1ee   :  { %v3354_v56 = vpop.f32.mrf.mxu0  ;;  %v3464_v1 = vpop.f32.mrf.mxu1 }
 0x1ef   :  { %2472 = vst.msk [vmem:[%s4999_s3 + $0x44] sm:$0xf] %vm2454_vm4, %v2932_v27  ;;  %v2222_v35 = vmax.f32 %v2172_v61, 0.0  ;;  %v2116_v28 = vmax.f32 %v1582_v54, %v1973_v26  ;;  %v5134_v61 = vld [vmem:[#allocation4_spill] sm:$0xff] }
 0x1f0   :  { %v1444_v29 = vpop.f32.mrf.mxu0  ;;  %v1978_v47 = vpop.f32.mrf.mxu1  ;;  %v5136_v54 = vmax.f32 %v5134_v61, %v5135_v48 }
 0x1f1   :  { %v2933_v50 = vpack.c.bf16 %v2222_v35, %v2222_v35  ;;  %v2173_v51 = vadd.f32 %v4597_v18, %v2116_v28  ;;  %v1583_v15 = vmax.f32 %v5127_v14, %v1444_v29 }
 0x1f2   :  { %v3357_v49 = vpop.f32.mrf.mxu0  ;;  %v3467_v55 = vpop.f32.mrf.mxu1 }
 0x1f3   :  { %2473 = vst.msk [vmem:[%s4999_s3 + $0x48] sm:$0xf] %vm2454_vm4, %v2933_v50  ;;  %v2223_v62 = vmax.f32 %v2173_v51, 0.0  ;;  %v2117_v33 = vmax.f32 %v1583_v15, %v1978_v47  ;;  %v5137_v15 = vld [vmem:[#allocation6_spill] sm:$0xff]  ;;  %v5138_v49 = vld [vmem:[#allocation7_spill] sm:$0xff] }
 0x1f4   :  { %v1447_v34 = vpop.f32.mrf.mxu0  ;;  %v1981_v41 = vpop.f32.mrf.mxu1  ;;  %v5139_v55 = vmax.f32 %v5137_v15, %v5138_v49 }
 0x1f5   :  { %v2934_v43 = vpack.c.bf16 %v2223_v62, %v2223_v62  ;;  %v2174_v6 = vadd.f32 %v4597_v18, %v2117_v33  ;;  %v1584_v2 = vmax.f32 %v5128_v36, %v1447_v34 }
 0x1f6   :  { %v3358_v63 = vpop.f32.mrf.mxu0  ;;  %v3468_v24 = vpop.f32.mrf.mxu1 }
 0x1f7   :  { %2474 = vst.msk [vmem:[%s4999_s3 + $0x4c] sm:$0xf] %vm2454_vm4, %v2934_v43  ;;  %v2224_v57 = vmax.f32 %v2174_v6, 0.0  ;;  %v2118_v58 = vmax.f32 %v1584_v2, %v1981_v41  ;;  %v5140_v24 = vld [vmem:[#allocation8_spill] sm:$0xff] }
 0x1f8   :  { %v1452_v3 = vpop.f32.mrf.mxu0  ;;  %v1986_v11 = vpop.f32.mrf.mxu1 }
 0x1f9   :  { %v2935_v25 = vpack.c.bf16 %v2224_v57, %v2224_v57  ;;  %v2175_v52 = vadd.f32 %v4597_v18, %v2118_v58  ;;  %v1585_v0 = vmax.f32 %v5129_v53, %v1452_v3  ;;  %v5141_v57 = vld [vmem:[#allocation9_spill] sm:$0xff] }
 0x1fa   :  { %v3361_v44 = vpop.f32.mrf.mxu0  ;;  %v3471_v16 = vpop.f32.mrf.mxu1  ;;  %v5142_v58 = vmax.f32 %v5140_v24, %v5141_v57 }
 0x1fb   :  { %2475 = vst.msk [vmem:[%s4999_s3 + $0x50] sm:$0xf] %vm2454_vm4, %v2935_v25  ;;  %v2225_v21 = vmax.f32 %v2175_v52, 0.0  ;;  %v2119_v38 = vmax.f32 %v1585_v0, %v1986_v11 }
 0x1fc   :  { %v1455_v39 = vpop.f32.mrf.mxu0  ;;  %v1989_v22 = vpop.f32.mrf.mxu1 }
 0x1fd   :  { %v2936_v4 = vpack.c.bf16 %v2225_v21, %v2225_v21  ;;  %v2176_v5 = vadd.f32 %v4597_v18, %v2119_v38  ;;  %v1586_v8 = vmax.f32 %v5130_v30, %v1455_v39  ;;  %v5143_v38 = vld [vmem:[#allocation10_spill] sm:$0xff]  ;;  %v5144_v39 = vld [vmem:[#allocation11_spill] sm:$0xff] }
 0x1fe   :  { %v3362_v12 = vpop.f32.mrf.mxu0  ;;  %v3472_v7 = vpop.f32.mrf.mxu1 }
 0x1ff   :  { %2476 = vst.msk [vmem:[%s4999_s3 + $0x54] sm:$0xf] %vm2454_vm4, %v2936_v4  ;;  %v2226_v13 = vmax.f32 %v2176_v5, 0.0  ;;  %v2120_v23 = vmax.f32 %v1586_v8, %v1989_v22  ;;  %v5145_v22 = vmax.f32 %v5143_v38, %v5144_v39 }
 0x200   :  { %v1460_v37 = vpop.f32.mrf.mxu0  ;;  %v1994_v9 = vpop.f32.mrf.mxu1 }
 0x201   :  { %v2937_v10 = vpack.c.bf16 %v2226_v13, %v2226_v13  ;;  %v2177_v40 = vadd.f32 %v4597_v18, %v2120_v23  ;;  %v1587_v31 = vmax.f32 %v5133_v17, %v1460_v37 }
 0x202   :  { %v3365_v59 = vpop.f32.mrf.mxu0  ;;  %v3475_v20 = vpop.f32.mrf.mxu1 }
 0x203   :  { %2477 = vst.msk [vmem:[%s4999_s3 + $0x58] sm:$0xf] %vm2454_vm4, %v2937_v10  ;;  %v2227_v32 = vmax.f32 %v2177_v40, 0.0  ;;  %v2121_v19 = vmax.f32 %v1587_v31, %v1994_v9  ;;  %v5146_v9 = vld [vmem:[#allocation12_spill] sm:$0xff]  ;;  %v5147_v10 = vld [vmem:[#allocation13_spill] sm:$0xff] }
 0x204   :  { %v1463_v46 = vpop.f32.mrf.mxu0  ;;  %v1997_v60 = vpop.f32.mrf.mxu1  ;;  %v5148_v40 = vmax.f32 %v5146_v9, %v5147_v10 }
 0x205   :  { %v2938_v26 = vpack.c.bf16 %v2227_v32, %v2227_v32  ;;  %v2178_v27 = vadd.f32 %v4597_v18, %v2121_v19  ;;  %v1588_v56 = vmax.f32 %v5136_v54, %v1463_v46 }
 0x206   :  { %v3366_v1 = vpop.f32.mrf.mxu0  ;;  %v3476_v35 = vpop.f32.mrf.mxu1 }
 0x207   :  { %2478 = vst.msk [vmem:[%s4999_s3 + $0x5c] sm:$0xf] %vm2454_vm4, %v2938_v26  ;;  %v2228_v28 = vmax.f32 %v2178_v27, 0.0  ;;  %v2122_v29 = vmax.f32 %v1588_v56, %v1997_v60  ;;  %v5149_v60 = vld [vmem:[#allocation14_spill] sm:$0xff]  ;;  %v5150_v26 = vld [vmem:[#allocation15_spill] sm:$0xff] }
 0x208   :  { %v1468_v47 = vpop.f32.mrf.mxu0  ;;  %v2002_v50 = vpop.f32.mrf.mxu1  ;;  %v5151_v27 = vmax.f32 %v5149_v60, %v5150_v26 }
 0x209   :  { %v2939_v51 = vpack.c.bf16 %v2228_v28, %v2228_v28  ;;  %v2179_v14 = vadd.f32 %v4597_v18, %v2122_v29  ;;  %v1589_v62 = vmax.f32 %v5139_v55, %v1468_v47 }
 0x20a   :  { %v3369_v33 = vpop.f32.mrf.mxu0  ;;  %v3479_v34 = vpop.f32.mrf.mxu1 }
 0x20b   :  { %2479 = vst.msk [vmem:[%s4999_s3 + $0x60] sm:$0xf] %vm2454_vm4, %v2939_v51  ;;  %v2229_v41 = vmax.f32 %v2179_v14, 0.0  ;;  %v2123_v43 = vmax.f32 %v1589_v62, %v2002_v50  ;;  %v5152_v50 = vld [vmem:[#allocation16_spill] sm:$0xff]  ;;  %v5153_v51 = vld [vmem:[#allocation17_spill] sm:$0xff] }
 0x20c   :  { %v1471_v6 = vpop.f32.mrf.mxu0  ;;  %v2005_v36 = vpop.f32.mrf.mxu1  ;;  %v5154_v14 = vmax.f32 %v5152_v50, %v5153_v51 }
 0x20d   :  { %v2940_v2 = vpack.c.bf16 %v2229_v41, %v2229_v41  ;;  %v2180_v63 = vadd.f32 %v4597_v18, %v2123_v43  ;;  %v1590_v3 = vmax.f32 %v5142_v58, %v1471_v6 }
 0x20e   :  { %v3370_v11 = vpop.f32.mrf.mxu0  ;;  %v3480_v25 = vpop.f32.mrf.mxu1 }
 0x20f   :  { %2480 = vst.msk [vmem:[%s4999_s3 + $0x64] sm:$0xf] %vm2454_vm4, %v2940_v2  ;;  %v2230_v52 = vmax.f32 %v2180_v63, 0.0  ;;  %v2124_v53 = vmax.f32 %v1590_v3, %v2005_v36  ;;  %v5155_v36 = vld [vmem:[#allocation18_spill] sm:$0xff]  ;;  %v5156_v2 = vld [vmem:[#allocation19_spill] sm:$0xff] }
 0x210   :  { %v1476_v0 = vpop.f32.mrf.mxu0  ;;  %v2010_v44 = vpop.f32.mrf.mxu1  ;;  %v5157_v63 = vmax.f32 %v5155_v36, %v5156_v2 }
 0x211   :  { %v2941_v16 = vpack.c.bf16 %v2230_v52, %v2230_v52  ;;  %v2181_v21 = vadd.f32 %v4597_v18, %v2124_v53  ;;  %v1591_v4 = vmax.f32 %v5145_v22, %v1476_v0 }
 0x212   :  { %v3373_v5 = vpop.f32.mrf.mxu0  ;;  %v3483_v30 = vpop.f32.mrf.mxu1 }
 0x213   :  { %2481 = vst.msk [vmem:[%s4999_s3 + $0x68] sm:$0xf] %vm2454_vm4, %v2941_v16  ;;  %v2231_v8 = vmax.f32 %v2181_v21, 0.0  ;;  %v2125_v12 = vmax.f32 %v1591_v4, %v2010_v44  ;;  %v5158_v44 = vld [vmem:[#allocation20_spill] sm:$0xff]  ;;  %v5159_v16 = vld [vmem:[#allocation21_spill] sm:$0xff] }
 0x214   :  { %v1479_v7 = vpop.f32.mrf.mxu0  ;;  %v2013_v13 = vpop.f32.mrf.mxu1  ;;  %v5160_v21 = vmax.f32 %v5158_v44, %v5159_v16 }
 0x215   :  { %v2942_v23 = vpack.c.bf16 %v2231_v8, %v2231_v8  ;;  %v2182_v37 = vadd.f32 %v4597_v18, %v2125_v12  ;;  %v1592_v42 = vmax.f32 %v5148_v40, %v1479_v7 }
 0x216   :  { %v3374_v45 = vpop.f32.mrf.mxu0  ;;  %v3484_v17 = vpop.f32.mrf.mxu1 }
 0x217   :  { %2482 = vst.msk [vmem:[%s4999_s3 + $0x6c] sm:$0xf] %vm2454_vm4, %v2942_v23  ;;  %v2232_v31 = vmax.f32 %v2182_v37, 0.0  ;;  %v2126_v59 = vmax.f32 %v1592_v42, %v2013_v13  ;;  %v5161_v13 = vld [vmem:[#allocation22_spill] sm:$0xff]  ;;  %v5162_v23 = vld [vmem:[#allocation23_spill] sm:$0xff] }
 0x218   :  { %v1484_v20 = vpop.f32.mrf.mxu0  ;;  %v2018_v32 = vpop.f32.mrf.mxu1  ;;  %v5163_v37 = vmax.f32 %v5161_v13, %v5162_v23 }
 0x219   :  { %v2943_v19 = vpack.c.bf16 %v2232_v31, %v2232_v31  ;;  %v2183_v46 = vadd.f32 %v4597_v18, %v2126_v59  ;;  %v1593_v61 = vmax.f32 %v5151_v27, %v1484_v20 }
 0x21a   :  { %v3377_v48 = vpop.f32.mrf.mxu0  ;;  %v3487_v54 = vpop.f32.mrf.mxu1 }
 0x21b   :  { %2483 = vst.msk [vmem:[%s4999_s3 + $0x70] sm:$0xf] %vm2454_vm4, %v2943_v19  ;;  %v2233_v56 = vmax.f32 %v2183_v46, 0.0  ;;  %v2127_v1 = vmax.f32 %v1593_v61, %v2018_v32  ;;  %v5164_v32 = vld [vmem:[#allocation24_spill] sm:$0xff]  ;;  %v5165_v19 = vld [vmem:[#allocation25_spill] sm:$0xff] }
 0x21c   :  { %v1487_v35 = vpop.f32.mrf.mxu0  ;;  %v2021_v28 = vpop.f32.mrf.mxu1  ;;  %v5166_v46 = vmax.f32 %v5164_v32, %v5165_v19 }
 0x21d   :  { %v2944_v29 = vpack.c.bf16 %v2233_v56, %v2233_v56  ;;  %v2184_v47 = vadd.f32 %v4597_v18, %v2127_v1  ;;  %v1594_v15 = vmax.f32 %v5154_v14, %v1487_v35 }
 0x21e   :  { %v3378_v49 = vpop.f32.mrf.mxu0  ;;  %v3488_v55 = vpop.f32.mrf.mxu1 }
 0x21f   :  { %2484 = vst.msk [vmem:[%s4999_s3 + $0x74] sm:$0xf] %vm2454_vm4, %v2944_v29  ;;  %v2234_v62 = vmax.f32 %v2184_v47, 0.0  ;;  %v2128_v33 = vmax.f32 %v1594_v15, %v2021_v28  ;;  %v5167_v28 = vld [vmem:[#allocation26_spill] sm:$0xff]  ;;  %v5168_v29 = vld [vmem:[#allocation27_spill] sm:$0xff] }
 0x220   :  { %v1492_v34 = vpop.f32.mrf.mxu0  ;;  %v2026_v41 = vpop.f32.mrf.mxu1  ;;  %v5169_v47 = vmax.f32 %v5167_v28, %v5168_v29 }
 0x221   :  { %v2945_v43 = vpack.c.bf16 %v2234_v62, %v2234_v62  ;;  %v2185_v6 = vadd.f32 %v4597_v18, %v2128_v33  ;;  %v1595_v24 = vmax.f32 %v5157_v63, %v1492_v34 }
 0x222   :  { %v3381_v57 = vpop.f32.mrf.mxu0  ;;  %v3491_v58 = vpop.f32.mrf.mxu1 }
 0x223   :  { %2485 = vst.msk [vmem:[%s4999_s3 + $0x78] sm:$0xf] %vm2454_vm4, %v2945_v43  ;;  %v2235_v3 = vmax.f32 %v2185_v6, 0.0  ;;  %v2129_v11 = vmax.f32 %v1595_v24, %v2026_v41  ;;  %v5170_v41 = vld [vmem:[#allocation28_spill] sm:$0xff]  ;;  %v5171_v43 = vld [vmem:[#allocation29_spill] sm:$0xff] }
 0x224   :  { %v1495_v25 = vpop.f32.mrf.mxu0  ;;  %v2029_v52 = vpop.f32.mrf.mxu1  ;;  %v5172_v6 = vmax.f32 %v5170_v41, %v5171_v43 }
 0x225   :  { %v2946_v53 = vpack.c.bf16 %v2235_v3, %v2235_v3  ;;  %v2186_v0 = vadd.f32 %v4597_v18, %v2129_v11  ;;  %v1596_v38 = vmax.f32 %v5160_v21, %v1495_v25 }
 0x226   :  { %v3382_v39 = vpop.f32.mrf.mxu0  ;;  %v3492_v22 = vpop.f32.mrf.mxu1 }
 0x227   :  { %2486 = vst.msk [vmem:[%s4999_s3 + $0x7c] sm:$0xf] %vm2454_vm4, %v2946_v53  ;;  %v2236_v4 = vmax.f32 %v2186_v0, 0.0  ;;  %v2130_v5 = vmax.f32 %v1596_v38, %v2029_v52  ;;  %v5173_v52 = vld [vmem:[#allocation30_spill] sm:$0xff]  ;;  %v5174_v53 = vld [vmem:[#allocation31_spill] sm:$0xff] }
 0x228   :  { %v1500_v30 = vpop.f32.mrf.mxu0  ;;  %v2034_v8 = vpop.f32.mrf.mxu1  ;;  %v5175_v0 = vmax.f32 %v5173_v52, %v5174_v53 }
 0x229   :  { %v2947_v12 = vpack.c.bf16 %v2236_v4, %v2236_v4  ;;  %v2187_v7 = vadd.f32 %v4597_v18, %v2130_v5  ;;  %v1597_v9 = vmax.f32 %v5163_v37, %v1500_v30 }
 0x22a   :  { %v3385_v10 = vpop.f32.mrf.mxu0  ;;  %v3495_v40 = vpop.f32.mrf.mxu1 }
 0x22b   :  { %2487 = vst.msk [vmem:[%s4999_s3 + $0x80] sm:$0xf] %vm2454_vm4, %v2947_v12  ;;  %v2237_v42 = vmax.f32 %v2187_v7, 0.0  ;;  %v2131_v45 = vmax.f32 %v1597_v9, %v2034_v8  ;;  %v5176_v8 = vld [vmem:[#allocation32_spill] sm:$0xff]  ;;  %v5177_v12 = vld [vmem:[#allocation33_spill] sm:$0xff] }
 0x22c   :  { %v1503_v17 = vpop.f32.mrf.mxu0  ;;  %v2037_v31 = vpop.f32.mrf.mxu1  ;;  %v5178_v7 = vmax.f32 %v5176_v8, %v5177_v12 }
 0x22d   :  { %v2948_v59 = vpack.c.bf16 %v2237_v42, %v2237_v42  ;;  %v2188_v20 = vadd.f32 %v4597_v18, %v2131_v45  ;;  %v1598_v60 = vmax.f32 %v5166_v46, %v1503_v17 }
 0x22e   :  { %v3386_v26 = vpop.f32.mrf.mxu0  ;;  %v3496_v27 = vpop.f32.mrf.mxu1 }
 0x22f   :  { %2488 = vst.msk [vmem:[%s4999_s3 + $0x84] sm:$0xf] %vm2454_vm4, %v2948_v59  ;;  %v2238_v61 = vmax.f32 %v2188_v20, 0.0  ;;  %v2132_v48 = vmax.f32 %v1598_v60, %v2037_v31  ;;  %v5179_v31 = vld [vmem:[#allocation34_spill] sm:$0xff]  ;;  %v5180_v59 = vld [vmem:[#allocation35_spill] sm:$0xff] }
 0x230   :  { %v1508_v54 = vpop.f32.mrf.mxu0  ;;  %v2042_v56 = vpop.f32.mrf.mxu1  ;;  %v5181_v20 = vmax.f32 %v5179_v31, %v5180_v59 }
 0x231   :  { %v2949_v1 = vpack.c.bf16 %v2238_v61, %v2238_v61  ;;  %v2189_v35 = vadd.f32 %v4597_v18, %v2132_v48  ;;  %v1599_v50 = vmax.f32 %v5169_v47, %v1508_v54 }
 0x232   :  { %v3389_v51 = vpop.f32.mrf.mxu0  ;;  %v3499_v14 = vpop.f32.mrf.mxu1 }
 0x233   :  { %2489 = vst.msk [vmem:[%s4999_s3 + $0x88] sm:$0xf] %vm2454_vm4, %v2949_v1  ;;  %v2239_v15 = vmax.f32 %v2189_v35, 0.0  ;;  %v2133_v49 = vmax.f32 %v1599_v50, %v2042_v56  ;;  %v5182_v56 = vld [vmem:[#allocation36_spill] sm:$0xff]  ;;  %v5183_v1 = vld [vmem:[#allocation37_spill] sm:$0xff] }
 0x234   :  { %v1511_v55 = vpop.f32.mrf.mxu0  ;;  %v2045_v62 = vpop.f32.mrf.mxu1  ;;  %v5184_v35 = vmax.f32 %v5182_v56, %v5183_v1 }
 0x235   :  { %v2950_v33 = vpack.c.bf16 %v2239_v15, %v2239_v15  ;;  %v2190_v34 = vadd.f32 %v4597_v18, %v2133_v49  ;;  %v1600_v36 = vmax.f32 %v5172_v6, %v1511_v55 }
 0x236   :  { %v3390_v2 = vpop.f32.mrf.mxu0  ;;  %v3500_v63 = vpop.f32.mrf.mxu1 }
 0x237   :  { %2490 = vst.msk [vmem:[%s4999_s3 + $0x8c] sm:$0xf] %vm2454_vm4, %v2950_v33  ;;  %v2240_v24 = vmax.f32 %v2190_v34, 0.0  ;;  %v2134_v57 = vmax.f32 %v1600_v36, %v2045_v62  ;;  %v5185_v62 = vld [vmem:[#allocation38_spill] sm:$0xff]  ;;  %v5186_v33 = vld [vmem:[#allocation39_spill] sm:$0xff] }
 0x238   :  { %v1516_v58 = vpop.f32.mrf.mxu0  ;;  %v2050_v3 = vpop.f32.mrf.mxu1  ;;  %v5187_v34 = vmax.f32 %v5185_v62, %v5186_v33 }
 0x239   :  { %v2951_v11 = vpack.c.bf16 %v2240_v24, %v2240_v24  ;;  %v2191_v25 = vadd.f32 %v4597_v18, %v2134_v57  ;;  %v1601_v44 = vmax.f32 %v5175_v0, %v1516_v58 }
 0x23a   :  { %v3393_v16 = vpop.f32.mrf.mxu0  ;;  %v3503_v21 = vpop.f32.mrf.mxu1 }
 0x23b   :  { %2491 = vst.msk [vmem:[%s4999_s3 + $0x90] sm:$0xf] %vm2454_vm4, %v2951_v11  ;;  %v2241_v38 = vmax.f32 %v2191_v25, 0.0  ;;  %v2135_v39 = vmax.f32 %v1601_v44, %v2050_v3  ;;  %v5188_v3 = vld [vmem:[#allocation40_spill] sm:$0xff]  ;;  %v5189_v11 = vld [vmem:[#allocation41_spill] sm:$0xff] }
 0x23c   :  { %v1519_v22 = vpop.f32.mrf.mxu0  ;;  %v2053_v4 = vpop.f32.mrf.mxu1  ;;  %v5190_v25 = vmax.f32 %v5188_v3, %v5189_v11 }
 0x23d   :  { %v2952_v5 = vpack.c.bf16 %v2241_v38, %v2241_v38  ;;  %v2192_v30 = vadd.f32 %v4597_v18, %v2135_v39  ;;  %v1602_v13 = vmax.f32 %v5178_v7, %v1519_v22 }
 0x23e   :  { %v3394_v23 = vpop.f32.mrf.mxu0  ;;  %v3504_v37 = vpop.f32.mrf.mxu1 }
 0x23f   :  { %2492 = vst.msk [vmem:[%s4999_s3 + $0x94] sm:$0xf] %vm2454_vm4, %v2952_v5  ;;  %v2242_v9 = vmax.f32 %v2192_v30, 0.0  ;;  %v2136_v10 = vmax.f32 %v1602_v13, %v2053_v4  ;;  %v5191_v4 = vld [vmem:[#allocation42_spill] sm:$0xff]  ;;  %v5192_v5 = vld [vmem:[#allocation43_spill] sm:$0xff] }
 0x240   :  { %v1524_v40 = vpop.f32.mrf.mxu0  ;;  %v2058_v42 = vpop.f32.mrf.mxu1  ;;  %v5193_v30 = vmax.f32 %v5191_v4, %v5192_v5 }
 0x241   :  { %v2953_v45 = vpack.c.bf16 %v2242_v9, %v2242_v9  ;;  %v2193_v17 = vadd.f32 %v4597_v18, %v2136_v10  ;;  %v1603_v32 = vmax.f32 %v5181_v20, %v1524_v40 }
 0x242   :  { %v3397_v19 = vpop.f32.mrf.mxu0  ;;  %v3507_v46 = vpop.f32.mrf.mxu1 }
 0x243   :  { %2493 = vst.msk [vmem:[%s4999_s3 + $0x98] sm:$0xf] %vm2454_vm4, %v2953_v45  ;;  %v2243_v60 = vmax.f32 %v2193_v17, 0.0  ;;  %v2137_v26 = vmax.f32 %v1603_v32, %v2058_v42  ;;  %v5194_v42 = vld [vmem:[#allocation44_spill] sm:$0xff]  ;;  %v5195_v45 = vld [vmem:[#allocation45_spill] sm:$0xff] }
 0x244   :  { %v1527_v27 = vpop.f32.mrf.mxu0  ;;  %v2061_v61 = vpop.f32.mrf.mxu1  ;;  %v5196_v17 = vmax.f32 %v5194_v42, %v5195_v45 }
 0x245   :  { %v2954_v48 = vpack.c.bf16 %v2243_v60, %v2243_v60  ;;  %v2194_v54 = vadd.f32 %v4597_v18, %v2137_v26  ;;  %v1604_v28 = vmax.f32 %v5184_v35, %v1527_v27 }
 0x246   :  { %v3398_v29 = vpop.f32.mrf.mxu0  ;;  %v3508_v47 = vpop.f32.mrf.mxu1 }
 0x247   :  { %2494 = vst.msk [vmem:[%s4999_s3 + $0x9c] sm:$0xf] %vm2454_vm4, %v2954_v48  ;;  %v2244_v50 = vmax.f32 %v2194_v54, 0.0  ;;  %v2138_v51 = vmax.f32 %v1604_v28, %v2061_v61  ;;  %v5197_v61 = vld [vmem:[#allocation46_spill] sm:$0xff]  ;;  %v5198_v48 = vld [vmem:[#allocation47_spill] sm:$0xff] }
 0x248   :  { %v1532_v14 = vpop.f32.mrf.mxu0  ;;  %v2066_v15 = vpop.f32.mrf.mxu1  ;;  %v5199_v54 = vmax.f32 %v5197_v61, %v5198_v48 }
 0x249   :  { %v2955_v49 = vpack.c.bf16 %v2244_v50, %v2244_v50  ;;  %v2195_v55 = vadd.f32 %v4597_v18, %v2138_v51  ;;  %v1605_v41 = vmax.f32 %v5187_v34, %v1532_v14 }
 0x24a   :  { %v3401_v43 = vpop.f32.mrf.mxu0  ;;  %v3511_v6 = vpop.f32.mrf.mxu1 }
 0x24b   :  { %2495 = vst.msk [vmem:[%s4999_s3 + $0xa0] sm:$0xf] %vm2454_vm4, %v2955_v49  ;;  %v2245_v36 = vmax.f32 %v2195_v55, 0.0  ;;  %v2139_v2 = vmax.f32 %v1605_v41, %v2066_v15  ;;  %v5200_v15 = vld [vmem:[#allocation48_spill] sm:$0xff]  ;;  %v5201_v49 = vld [vmem:[#allocation49_spill] sm:$0xff] }
 0x24c   :  { %v1535_v63 = vpop.f32.mrf.mxu0  ;;  %v2069_v24 = vpop.f32.mrf.mxu1  ;;  %v5202_v55 = vmax.f32 %v5200_v15, %v5201_v49 }
 0x24d   :  { %v2956_v57 = vpack.c.bf16 %v2245_v36, %v2245_v36  ;;  %v2196_v58 = vadd.f32 %v4597_v18, %v2139_v2  ;;  %v1606_v52 = vmax.f32 %v5190_v25, %v1535_v63 }
 0x24e   :  { %v3402_v53 = vpop.f32.mrf.mxu0  ;;  %v3512_v0 = vpop.f32.mrf.mxu1 }
 0x24f   :  { %2496 = vst.msk [vmem:[%s4999_s3 + $0xa4] sm:$0xf] %vm2454_vm4, %v2956_v57  ;;  %v2246_v44 = vmax.f32 %v2196_v58, 0.0  ;;  %v2140_v16 = vmax.f32 %v1606_v52, %v2069_v24  ;;  %v5203_v24 = vld [vmem:[#allocation50_spill] sm:$0xff]  ;;  %v5204_v57 = vld [vmem:[#allocation51_spill] sm:$0xff] }
 0x250   :  { %v1540_v21 = vpop.f32.mrf.mxu0  ;;  %v2074_v38 = vpop.f32.mrf.mxu1  ;;  %v5205_v58 = vmax.f32 %v5203_v24, %v5204_v57 }
 0x251   :  { %v2957_v39 = vpack.c.bf16 %v2246_v44, %v2246_v44  ;;  %v2197_v22 = vadd.f32 %v4597_v18, %v2140_v16  ;;  %v1607_v8 = vmax.f32 %v5193_v30, %v1540_v21 }
 0x252   :  { %v3405_v12 = vpop.f32.mrf.mxu0  ;;  %v3515_v7 = vpop.f32.mrf.mxu1 }
 0x253   :  { %2497 = vst.msk [vmem:[%s4999_s3 + $0xa8] sm:$0xf] %vm2454_vm4, %v2957_v39  ;;  %v2247_v13 = vmax.f32 %v2197_v22, 0.0  ;;  %v2141_v23 = vmax.f32 %v1607_v8, %v2074_v38  ;;  %v5206_v38 = vld [vmem:[#allocation52_spill] sm:$0xff]  ;;  %v5207_v39 = vld [vmem:[#allocation53_spill] sm:$0xff] }
 0x254   :  { %v1543_v37 = vpop.f32.mrf.mxu0  ;;  %v2077_v9 = vpop.f32.mrf.mxu1  ;;  %v5208_v22 = vmax.f32 %v5206_v38, %v5207_v39 }
 0x255   :  { %v2958_v10 = vpack.c.bf16 %v2247_v13, %v2247_v13  ;;  %v2198_v40 = vadd.f32 %v4597_v18, %v2141_v23  ;;  %v1608_v31 = vmax.f32 %v5196_v17, %v1543_v37 }
 0x256   :  { %v3406_v59 = vpop.f32.mrf.mxu0  ;;  %v3516_v20 = vpop.f32.mrf.mxu1 }
 0x257   :  { %2498 = vst.msk [vmem:[%s4999_s3 + $0xac] sm:$0xf] %vm2454_vm4, %v2958_v10  ;;  %v2248_v32 = vmax.f32 %v2198_v40, 0.0  ;;  %v2142_v19 = vmax.f32 %v1608_v31, %v2077_v9 }
 0x258   :  { %v1548_v46 = vpop.f32.mrf.mxu0  ;;  %v2082_v60 = vpop.f32.mrf.mxu1 }
 0x259   :  { %v2959_v26 = vpack.c.bf16 %v2248_v32, %v2248_v32  ;;  %v2199_v27 = vadd.f32 %v4597_v18, %v2142_v19  ;;  %v1609_v56 = vmax.f32 %v5199_v54, %v1548_v46 }
 0x25a   :  { %v3409_v1 = vpop.f32.mrf.mxu0  ;;  %v3519_v35 = vpop.f32.mrf.mxu1 }
 0x25b   :  { %2499 = vst.msk [vmem:[%s4999_s3 + $0xb0] sm:$0xf] %vm2454_vm4, %v2959_v26  ;;  %v2249_v28 = vmax.f32 %v2199_v27, 0.0  ;;  %v2143_v29 = vmax.f32 %v1609_v56, %v2082_v60 }
 0x25c   :  { %v1551_v47 = vpop.f32.mrf.mxu0  ;;  %v2085_v50 = vpop.f32.mrf.mxu1 }
 0x25d   :  { %v2960_v51 = vpack.c.bf16 %v2249_v28, %v2249_v28  ;;  %v2200_v14 = vadd.f32 %v4597_v18, %v2143_v29  ;;  %v1610_v62 = vmax.f32 %v5202_v55, %v1551_v47 }
 0x25e   :  { %v3410_v33 = vpop.f32.mrf.mxu0  ;;  %v3520_v34 = vpop.f32.mrf.mxu1 }
 0x25f   :  { %2500 = vst.msk [vmem:[%s4999_s3 + $0xb4] sm:$0xf] %vm2454_vm4, %v2960_v51  ;;  %v2250_v41 = vmax.f32 %v2200_v14, 0.0  ;;  %v2144_v43 = vmax.f32 %v1610_v62, %v2085_v50 }
 0x260   :  { %v1556_v6 = vpop.f32.mrf.mxu0  ;;  %v2090_v36 = vpop.f32.mrf.mxu1 }
 0x261   :  { %v2961_v2 = vpack.c.bf16 %v2250_v41, %v2250_v41  ;;  %v2201_v63 = vadd.f32 %v4597_v18, %v2144_v43  ;;  %v1611_v3 = vmax.f32 %v5205_v58, %v1556_v6 }
 0x262   :  { %v3413_v11 = vpop.f32.mrf.mxu0  ;;  %v3523_v25 = vpop.f32.mrf.mxu1 }
 0x263   :  { %2501 = vst.msk [vmem:[%s4999_s3 + $0xb8] sm:$0xf] %vm2454_vm4, %v2961_v2  ;;  %v2251_v52 = vmax.f32 %v2201_v63, 0.0  ;;  %v2145_v53 = vmax.f32 %v1611_v3, %v2090_v36 }
 0x264   :  { %v1559_v0 = vpop.f32.mrf.mxu0  ;;  %v2093_v44 = vpop.f32.mrf.mxu1 }
 0x265   :  { %v2962_v16 = vpack.c.bf16 %v2251_v52, %v2251_v52  ;;  %v2202_v21 = vadd.f32 %v4597_v18, %v2145_v53  ;;  %v1612_v4 = vmax.f32 %v5208_v22, %v1559_v0 }
 0x266   :  { %v3414_v5 = vpop.f32.mrf.mxu0  ;;  %v3524_v30 = vpop.f32.mrf.mxu1 }
 0x267   :  { %2502 = vst.msk [vmem:[%s4999_s3 + $0xbc] sm:$0xf] %vm2454_vm4, %v2962_v16  ;;  %v2252_v8 = vmax.f32 %v2202_v21, 0.0  ;;  %v2146_v12 = vmax.f32 %v1612_v4, %v2093_v44 }
 0x269   :  { %v2963_v7 = vpack.c.bf16 %v2252_v8, %v2252_v8  ;;  %v2203_v13 = vadd.f32 %v4597_v18, %v2146_v12 }
 0x26b   :  { %2503 = vst.msk [vmem:[%s4999_s3 + $0xc0] sm:$0xf] %vm2454_vm4, %v2963_v7  ;;  %v2253_v23 = vmax.f32 %v2203_v13, 0.0 }
 0x26d   :  { %v2964_v37 = vpack.c.bf16 %v2253_v23, %v2253_v23 }
 0x26f   :  { %2504 = vst.msk [vmem:[%s4999_s3 + $0xc4] sm:$0xf] %vm2454_vm4, %v2964_v37 }

// kernel: lenet_logits.3
= control target key start
LH: loop header
LB: loop body
LE: loop exit
PB: predicated region body
PF: predicated region fallthrough
CT: control target
= control target key end

     0   :  { %v11596_v0 = vmov 0   ;;  %vm408_vm0 = vcmask 588800   ;;  %vm484_vm1 = vcmask 1043456   ;;  %vm8529_vm2 = vmmov 0   ;;  %s11586_s1 = inlined_call_operand.vmem [shape: bf16[200,128], index: 1, kind: input, shape index: {}]   ;;  %s11587_s0 = inlined_call_operand.vmem [shape: bf16[4,25,16,200], index: 0, kind: input, shape index: {}]   ;;  %s11588_s3 = inlined_call_operand.vmem [shape: bf16[25,128,256], index: 3, kind: input, shape index: {}]   ;;  %s11589_s2 = inlined_call_operand.vmem [shape: f32[1,128], index: 2, kind: input, shape index: {}]   ;;  %s11590_s5 = inlined_call_operand.vmem [shape: bf16[256,128], index: 5, kind: input, shape index: {}]   ;;  %s11591_s7 = inlined_call_operand.vmem [shape: bf16[128,128], index: 7, kind: input, shape index: {}]   ;;  %s11592_s4 = inlined_call_operand.vmem [shape: f32[1,256], index: 4, kind: input, shape index: {}]   ;;  %s11593_s6 = inlined_call_operand.vmem [shape: f32[1,128], index: 6, kind: input, shape index: {}]   ;;  %s11594_s8 = inlined_call_operand.vmem [shape: f32[1,128], index: 8, kind: input, shape index: {}]   ;;  %s11595_s9 = inlined_call_operand.vmem [shape: f32[16,128], index: 9, kind: output, shape index: {}]  }
   0x1   :  { %488 = vmatprep.subr.bf16.mxu0 %v11596_v0  ;;  %1072 = vmatprep.subr.bf16.mxu1 %v11596_v0  ;;  %v8585_v1 = vld [vmem:[%s11586_s1 + $0x38] sm:$0xff]   ;;  %v8592_v2 = vld [vmem:[%s11586_s1 + $0x30] sm:$0xff]   ;;  %v8601_v3 = vld [vmem:[%s11586_s1 + $0x28] sm:$0xff]  }
   0x2   :  { %489 = vmatpush1.bf16.msra.mxu0 %v8585_v1  ;;  %1073 = vmatpush1.bf16.msra.mxu1 %v8585_v1  ;;  %v8610_v4 = vld [vmem:[%s11586_s1 + $0x20] sm:$0xff]   ;;  %v8622_v6 = vld [vmem:[%s11586_s1 + $0x18] sm:$0xff]   ;;  %v8636_v8 = vld [vmem:[%s11586_s1 + $0x10] sm:$0xff]  }
   0x3   :  { %490 = vmatprep.subr.bf16.mxu0 %v11596_v0  ;;  %1074 = vmatprep.subr.bf16.mxu1 %v11596_v0  ;;  %v7604_v5 = vld [vmem:[%s11587_s0 + $0x4] ss:$8 sps:$4 sm:$0xff]   ;;  %v7607_v7 = vld [vmem:[%s11587_s0 + $0x194] ss:$8 sps:$4 sm:$0xff]   ;;  %v7597_v11 = vld [vmem:[%s11586_s1 + $0x60] ss:$0 sps:$4 sm:$0xff]  }
   0x4   :  { %6708 = vmatprep.mubr.msk.bf16.mxu0 %vm408_vm0, %v7604_v5  ;;  %6833 = vmatprep.mubr.msk.bf16.mxu1 %vm408_vm0, %v7607_v7  ;;  %v8645_v9 = vld [vmem:[%s11586_s1 + $0x8] sm:$0xff]   ;;  %v8654_v10 = vld [vmem:[%s11586_s1] sm:$0xff]   ;;  %v8665_v12 = vsel %vm484_vm1, %v7597_v11, 0  ;;  %v8672_v13 = vld [vmem:[%s11586_s1 + $0x58] sm:$0xff]  }
   0x5   :  { %v8681_v14 = vld [vmem:[%s11586_s1 + $0x50] sm:$0xff]   ;;  %v8690_v15 = vld [vmem:[%s11586_s1 + $0x48] sm:$0xff]   ;;  %v8699_v16 = vld [vmem:[%s11586_s1 + $0x40] sm:$0xff]  }
   0x6   :  { %491 = vmatpush1.bf16.msra.mxu0 %v8592_v2  ;;  %1075 = vmatpush1.bf16.msra.mxu1 %v8592_v2  ;;  %v7602_v17 = vld [vmem:[%s11587_s0] ss:$8 sps:$4 sm:$0xff]   ;;  %v7605_v18 = vld [vmem:[%s11587_s0 + $0x190] ss:$8 sps:$4 sm:$0xff]   ;;  %v7608_v19 = vld [vmem:[%s11587_s0 + $0x14] ss:$8 sps:$4 sm:$0xff]  }
   0x7   :  { %492 = vmatprep.subr.bf16.mxu0 %v11596_v0  ;;  %1076 = vmatprep.subr.bf16.mxu1 %v11596_v0  ;;  %v7610_v20 = vld [vmem:[%s11587_s0 + $0x1a4] ss:$8 sps:$4 sm:$0xff]   ;;  %v7612_v21 = vld [vmem:[%s11587_s0 + $0x10] ss:$8 sps:$4 sm:$0xff]   ;;  %v7613_v22 = vld [vmem:[%s11587_s0 + $0x1a0] ss:$8 sps:$4 sm:$0xff]  }
   0x8   :  { %v7614_v23 = vld [vmem:[%s11587_s0 + $0x24] ss:$8 sps:$4 sm:$0xff]   ;;  %v7616_v24 = vld [vmem:[%s11587_s0 + $0x1b4] ss:$8 sps:$4 sm:$0xff]   ;;  %v7618_v25 = vld [vmem:[%s11587_s0 + $0x20] ss:$8 sps:$4 sm:$0xff]  }
   0x9   :  { %v7619_v26 = vld [vmem:[%s11587_s0 + $0x1b0] ss:$8 sps:$4 sm:$0xff]   ;;  %v7620_v27 = vld [vmem:[%s11587_s0 + $0x34] ss:$8 sps:$4 sm:$0xff]   ;;  %v7622_v28 = vld [vmem:[%s11587_s0 + $0x1c4] ss:$8 sps:$4 sm:$0xff]  }
   0xa   :  { %493 = vmatpush1.bf16.msra.mxu0 %v8601_v3  ;;  %1077 = vmatpush1.bf16.msra.mxu1 %v8601_v3  ;;  %v7624_v29 = vld [vmem:[%s11587_s0 + $0x30] ss:$8 sps:$4 sm:$0xff]   ;;  %v7625_v30 = vld [vmem:[%s11587_s0 + $0x1c0] ss:$8 sps:$4 sm:$0xff]   ;;  %v7626_v31 = vld [vmem:[%s11587_s0 + $0x44] ss:$8 sps:$4 sm:$0xff]  }
   0xb   :  { %494 = vmatprep.subr.bf16.mxu0 %v11596_v0  ;;  %1078 = vmatprep.subr.bf16.mxu1 %v11596_v0  ;;  %v7628_v32 = vld [vmem:[%s11587_s0 + $0x1d4] ss:$8 sps:$4 sm:$0xff]   ;;  %v7630_v33 = vld [vmem:[%s11587_s0 + $0x40] ss:$8 sps:$4 sm:$0xff]   ;;  %v7631_v34 = vld [vmem:[%s11587_s0 + $0x1d0] ss:$8 sps:$4 sm:$0xff]  }
   0xc   :  { %v7632_v35 = vld [vmem:[%s11587_s0 + $0x54] ss:$8 sps:$4 sm:$0xff]   ;;  %v7634_v36 = vld [vmem:[%s11587_s0 + $0x1e4] ss:$8 sps:$4 sm:$0xff]   ;;  %v7636_v37 = vld [vmem:[%s11587_s0 + $0x50] ss:$8 sps:$4 sm:$0xff]  }
   0xd   :  { %v7637_v38 = vld [vmem:[%s11587_s0 + $0x1e0] ss:$8 sps:$4 sm:$0xff]   ;;  %v7638_v39 = vld [vmem:[%s11587_s0 + $0x64] ss:$8 sps:$4 sm:$0xff]   ;;  %v7640_v40 = vld [vmem:[%s11587_s0 + $0x1f4] ss:$8 sps:$4 sm:$0xff]  }
   0xe   :  { %495 = vmatpush1.bf16.msra.mxu0 %v8610_v4  ;;  %1079 = vmatpush1.bf16.msra.mxu1 %v8610_v4  ;;  %v7642_v41 = vld [vmem:[%s11587_s0 + $0x60] ss:$8 sps:$4 sm:$0xff]   ;;  %v7643_v42 = vld [vmem:[%s11587_s0 + $0x1f0] ss:$8 sps:$4 sm:$0xff]   ;;  %v7644_v43 = vld [vmem:[%s11587_s0 + $0x74] ss:$8 sps:$4 sm:$0xff]  }
   0xf   :  { %496 = vmatprep.subr.bf16.mxu0 %v11596_v0  ;;  %1080 = vmatprep.subr.bf16.mxu1 %v11596_v0  ;;  %v7646_v44 = vld [vmem:[%s11587_s0 + $0x204] ss:$8 sps:$4 sm:$0xff]   ;;  %v7648_v45 = vld [vmem:[%s11587_s0 + $0x70] ss:$8 sps:$4 sm:$0xff]   ;;  %v7649_v46 = vld [vmem:[%s11587_s0 + $0x200] ss:$8 sps:$4 sm:$0xff]  }
  0x10   :  { %v7650_v47 = vld [vmem:[%s11587_s0 + $0x84] ss:$8 sps:$4 sm:$0xff]   ;;  %v7652_v48 = vld [vmem:[%s11587_s0 + $0x214] ss:$8 sps:$4 sm:$0xff]   ;;  %v7654_v49 = vld [vmem:[%s11587_s0 + $0x80] ss:$8 sps:$4 sm:$0xff]  }
  0x11   :  { %v7655_v50 = vld [vmem:[%s11587_s0 + $0x210] ss:$8 sps:$4 sm:$0xff]   ;;  %v7656_v51 = vld [vmem:[%s11587_s0 + $0x94] ss:$8 sps:$4 sm:$0xff]   ;;  %v7658_v52 = vld [vmem:[%s11587_s0 + $0x224] ss:$8 sps:$4 sm:$0xff]  }
  0x12   :  { %497 = vmatpush1.bf16.msra.mxu0 %v8622_v6  ;;  %1081 = vmatpush1.bf16.msra.mxu1 %v8622_v6  ;;  %v7660_v53 = vld [vmem:[%s11587_s0 + $0x90] ss:$8 sps:$4 sm:$0xff]   ;;  %v7661_v54 = vld [vmem:[%s11587_s0 + $0x220] ss:$8 sps:$4 sm:$0xff]   ;;  %v7662_v55 = vld [vmem:[%s11587_s0 + $0xa4] ss:$8 sps:$4 sm:$0xff]  }
  0x13   :  { %498 = vmatprep.subr.bf16.mxu0 %v11596_v0  ;;  %1082 = vmatprep.subr.bf16.mxu1 %v11596_v0  ;;  %v7664_v56 = vld [vmem:[%s11587_s0 + $0x234] ss:$8 sps:$4 sm:$0xff]   ;;  %v7666_v57 = vld [vmem:[%s11587_s0 + $0xa0] ss:$8 sps:$4 sm:$0xff]   ;;  %v7667_v58 = vld [vmem:[%s11587_s0 + $0x230] ss:$8 sps:$4 sm:$0xff]  }
  0x14   :  { %v7668_v59 = vld [vmem:[%s11587_s0 + $0xb4] ss:$8 sps:$4 sm:$0xff]   ;;  %v7670_v60 = vld [vmem:[%s11587_s0 + $0x244] ss:$8 sps:$4 sm:$0xff]   ;;  %v7672_v62 = vld [vmem:[%s11587_s0 + $0xb0] ss:$8 sps:$4 sm:$0xff]  }
  0x15   :  { %v7762_v61 = vld [vmem:[%s11588_s3 + $0x74] ss:$8 sps:$4 sm:$0xff]   ;;  %v7673_v63 = vld [vmem:[%s11587_s0 + $0x240] ss:$8 sps:$4 sm:$0xff]   ;;  %v7684_v7 = vld [vmem:[%s11587_s0 + $0xd0] ss:$8 sps:$4 sm:$0xff]  }
  0x16   :  { %499 = vmatpush1.bf16.msra.mxu0 %v8636_v8  ;;  %1083 = vmatpush1.bf16.msra.mxu1 %v8636_v8  ;;  %v7680_v5 = vld [vmem:[%s11587_s0 + $0xd4] ss:$8 sps:$4 sm:$0xff]   ;;  %v7690_v11 = vld [vmem:[%s11587_s0 + $0xe0] ss:$8 sps:$4 sm:$0xff]  }
  0x17   :  { %500 = vmatprep.subr.bf16.mxu0 %v11596_v0  ;;  %1084 = vmatprep.subr.bf16.mxu1 %v11596_v0 }
  0x1a   :  { %501 = vmatpush1.bf16.msra.mxu0 %v8645_v9  ;;  %1085 = vmatpush1.bf16.msra.mxu1 %v8645_v9 }
  0x1b   :  { %502 = vmatprep.subr.bf16.mxu0 %v11596_v0  ;;  %1086 = vmatprep.subr.bf16.mxu1 %v11596_v0 }
  0x1e   :  { %503 = vmatpush1.bf16.msra.mxu0 %v8654_v10  ;;  %1087 = vmatpush1.bf16.msra.mxu1 %v8654_v10 }
  0x1f   :  { %510 = vmatprep.subr.bf16.mxu0 %v11596_v0  ;;  %1094 = vmatprep.subr.bf16.mxu1 %v11596_v0 }
  0x22   :  { %511 = vmatpush2.bf16.msra.mxu0 %v8665_v12  ;;  %1095 = vmatpush2.bf16.msra.mxu1 %v8665_v12 }
  0x23   :  { %512 = vmatprep.subr.bf16.mxu0 %v11596_v0  ;;  %1096 = vmatprep.subr.bf16.mxu1 %v11596_v0 }
  0x26   :  { %513 = vmatpush2.bf16.msra.mxu0 %v8672_v13  ;;  %1097 = vmatpush2.bf16.msra.mxu1 %v8672_v13 }
  0x27   :  { %514 = vmatprep.subr.bf16.mxu0 %v11596_v0  ;;  %1098 = vmatprep.subr.bf16.mxu1 %v11596_v0 }
  0x2a   :  { %515 = vmatpush2.bf16.msra.mxu0 %v8681_v14  ;;  %1099 = vmatpush2.bf16.msra.mxu1 %v8681_v14 }
  0x2b   :  { %516 = vmatprep.subr.bf16.mxu0 %v11596_v0  ;;  %1100 = vmatprep.subr.bf16.mxu1 %v11596_v0 }
  0x2e   :  { %517 = vmatpush2.bf16.msra.mxu0 %v8690_v15  ;;  %1101 = vmatpush2.bf16.msra.mxu1 %v8690_v15 }
  0x2f   :  { %518 = vmatprep.subr.bf16.mxu0 %v11596_v0  ;;  %1102 = vmatprep.subr.bf16.mxu1 %v11596_v0 }
  0x32   :  { %519 = vmatpush2.bf16.msra.mxu0 %v8699_v16  ;;  %1103 = vmatpush2.bf16.msra.mxu1 %v8699_v16 }
  0x33   :  { %1706 = vmatprep.subr.bf16.mxu0 %v11596_v0  ;;  %2340 = vmatprep.subr.bf16.mxu1 %v11596_v0 }
  0x35   :  { %521 = vmatmul.mubr.bf16.vlgmr.msra.gmra.mxu0 %v7602_v17  ;;  %1105 = vmatmul.mubr.bf16.vlgmr.msra.gmra.mxu1 %v7605_v18  ;;  %v7697_v17 = vld [vmem:[%s11587_s0 + $0x280] ss:$8 sps:$4 sm:$0xff]   ;;  %v7698_v18 = vld [vmem:[%s11587_s0 + $0x104] ss:$8 sps:$4 sm:$0xff]  }
  0x36   :  { %1707 = vmatpush1.bf16.msra.mxu0 %v8585_v1  ;;  %2341 = vmatpush1.bf16.msra.mxu1 %v8585_v1  ;;  %v7674_v1 = vld [vmem:[%s11587_s0 + $0xc4] ss:$8 sps:$4 sm:$0xff]  }
  0x37   :  { %6709 = vmatprep.mubr.msk.bf16.mxu0 %vm408_vm0, %v7608_v19  ;;  %6834 = vmatprep.mubr.msk.bf16.mxu1 %vm408_vm0, %v7610_v20  ;;  %v7700_v19 = vld [vmem:[%s11587_s0 + $0x294] ss:$8 sps:$4 sm:$0xff]   ;;  %v7702_v20 = vld [vmem:[%s11587_s0 + $0x100] ss:$8 sps:$4 sm:$0xff]  }
  0x38   :  { %1708 = vmatprep.subr.bf16.mxu0 %v11596_v0  ;;  %2342 = vmatprep.subr.bf16.mxu1 %v11596_v0 }
  0x3a   :  { %1709 = vmatpush1.bf16.msra.mxu0 %v8592_v2  ;;  %2343 = vmatpush1.bf16.msra.mxu1 %v8592_v2  ;;  %v7676_v2 = vld [vmem:[%s11587_s0 + $0x254] ss:$8 sps:$4 sm:$0xff]  }
  0x3b   :  { %1710 = vmatprep.subr.bf16.mxu0 %v11596_v0  ;;  %2344 = vmatprep.subr.bf16.mxu1 %v11596_v0 }
  0x3d   :  { %529 = vmatmul.mubr.bf16.gmra.mxu0 %v7612_v21  ;;  %1113 = vmatmul.mubr.bf16.gmra.mxu1 %v7613_v22  ;;  %v7703_v21 = vld [vmem:[%s11587_s0 + $0x290] ss:$8 sps:$4 sm:$0xff]   ;;  %v7704_v22 = vld [vmem:[%s11587_s0 + $0x114] ss:$8 sps:$4 sm:$0xff]  }
  0x3e   :  { %6710 = vmatprep.mubr.msk.bf16.mxu0 %vm408_vm0, %v7614_v23  ;;  %6835 = vmatprep.mubr.msk.bf16.mxu1 %vm408_vm0, %v7616_v24  ;;  %v7706_v23 = vld [vmem:[%s11587_s0 + $0x2a4] ss:$8 sps:$4 sm:$0xff]   ;;  %v7708_v24 = vld [vmem:[%s11587_s0 + $0x110] ss:$8 sps:$4 sm:$0xff]  }
  0x3f   :  { %1711 = vmatpush1.bf16.msra.mxu0 %v8601_v3  ;;  %2345 = vmatpush1.bf16.msra.mxu1 %v8601_v3  ;;  %v7678_v3 = vld [vmem:[%s11587_s0 + $0xc0] ss:$8 sps:$4 sm:$0xff]  }
  0x40   :  { %1712 = vmatprep.subr.bf16.mxu0 %v11596_v0  ;;  %2346 = vmatprep.subr.bf16.mxu1 %v11596_v0 }
  0x43   :  { %1713 = vmatpush1.bf16.msra.mxu0 %v8610_v4  ;;  %2347 = vmatpush1.bf16.msra.mxu1 %v8610_v4  ;;  %v7679_v4 = vld [vmem:[%s11587_s0 + $0x250] ss:$8 sps:$4 sm:$0xff]  }
  0x44   :  { %1714 = vmatprep.subr.bf16.mxu0 %v11596_v0  ;;  %2348 = vmatprep.subr.bf16.mxu1 %v11596_v0 }
  0x45   :  { %537 = vmatmul.mubr.bf16.gmra.mxu0 %v7618_v25  ;;  %1121 = vmatmul.mubr.bf16.gmra.mxu1 %v7619_v26  ;;  %v7709_v25 = vld [vmem:[%s11587_s0 + $0x2a0] ss:$8 sps:$4 sm:$0xff]   ;;  %v7710_v26 = vld [vmem:[%s11587_s0 + $0x124] ss:$8 sps:$4 sm:$0xff]  }
  0x46   :  { %6711 = vmatprep.mubr.msk.bf16.mxu0 %vm408_vm0, %v7620_v27  ;;  %6836 = vmatprep.mubr.msk.bf16.mxu1 %vm408_vm0, %v7622_v28  ;;  %v7712_v27 = vld [vmem:[%s11587_s0 + $0x2b4] ss:$8 sps:$4 sm:$0xff]   ;;  %v7714_v28 = vld [vmem:[%s11587_s0 + $0x120] ss:$8 sps:$4 sm:$0xff]  }
  0x47   :  { %1715 = vmatpush1.bf16.msra.mxu0 %v8622_v6  ;;  %2349 = vmatpush1.bf16.msra.mxu1 %v8622_v6  ;;  %v7682_v6 = vld [vmem:[%s11587_s0 + $0x264] ss:$8 sps:$4 sm:$0xff]  }
  0x48   :  { %1716 = vmatprep.subr.bf16.mxu0 %v11596_v0  ;;  %2350 = vmatprep.subr.bf16.mxu1 %v11596_v0 }
  0x4b   :  { %1717 = vmatpush1.bf16.msra.mxu0 %v8636_v8  ;;  %2351 = vmatpush1.bf16.msra.mxu1 %v8636_v8  ;;  %v7685_v8 = vld [vmem:[%s11587_s0 + $0x260] ss:$8 sps:$4 sm:$0xff]  }
  0x4c   :  { %1718 = vmatprep.subr.bf16.mxu0 %v11596_v0  ;;  %2352 = vmatprep.subr.bf16.mxu1 %v11596_v0 }
  0x4d   :  { %545 = vmatmul.mubr.bf16.gmra.mxu0 %v7624_v29  ;;  %1129 = vmatmul.mubr.bf16.gmra.mxu1 %v7625_v30  ;;  %v7715_v29 = vld [vmem:[%s11587_s0 + $0x2b0] ss:$8 sps:$4 sm:$0xff]   ;;  %v7716_v30 = vld [vmem:[%s11587_s0 + $0x134] ss:$8 sps:$4 sm:$0xff]  }
  0x4e   :  { %6712 = vmatprep.mubr.msk.bf16.mxu0 %vm408_vm0, %v7626_v31  ;;  %6837 = vmatprep.mubr.msk.bf16.mxu1 %vm408_vm0, %v7628_v32  ;;  %v7718_v31 = vld [vmem:[%s11587_s0 + $0x2c4] ss:$8 sps:$4 sm:$0xff]   ;;  %v7720_v32 = vld [vmem:[%s11587_s0 + $0x130] ss:$8 sps:$4 sm:$0xff]  }
  0x4f   :  { %1719 = vmatpush1.bf16.msra.mxu0 %v8645_v9  ;;  %2353 = vmatpush1.bf16.msra.mxu1 %v8645_v9  ;;  %v7686_v9 = vld [vmem:[%s11587_s0 + $0xe4] ss:$8 sps:$4 sm:$0xff]  }
  0x50   :  { %1720 = vmatprep.subr.bf16.mxu0 %v11596_v0  ;;  %2354 = vmatprep.subr.bf16.mxu1 %v11596_v0 }
  0x53   :  { %1721 = vmatpush1.bf16.msra.mxu0 %v8654_v10  ;;  %2355 = vmatpush1.bf16.msra.mxu1 %v8654_v10  ;;  %v7688_v10 = vld [vmem:[%s11587_s0 + $0x274] ss:$8 sps:$4 sm:$0xff]  }
  0x54   :  { %1728 = vmatprep.subr.bf16.mxu0 %v11596_v0  ;;  %2362 = vmatprep.subr.bf16.mxu1 %v11596_v0 }
  0x55   :  { %553 = vmatmul.mubr.bf16.gmra.mxu0 %v7630_v33  ;;  %1137 = vmatmul.mubr.bf16.gmra.mxu1 %v7631_v34  ;;  %v7721_v33 = vld [vmem:[%s11587_s0 + $0x2c0] ss:$8 sps:$4 sm:$0xff]   ;;  %v7722_v34 = vld [vmem:[%s11587_s0 + $0x144] ss:$8 sps:$4 sm:$0xff]  }
  0x56   :  { %6713 = vmatprep.mubr.msk.bf16.mxu0 %vm408_vm0, %v7632_v35  ;;  %6838 = vmatprep.mubr.msk.bf16.mxu1 %vm408_vm0, %v7634_v36  ;;  %v7724_v35 = vld [vmem:[%s11587_s0 + $0x2d4] ss:$8 sps:$4 sm:$0xff]   ;;  %v7726_v36 = vld [vmem:[%s11587_s0 + $0x140] ss:$8 sps:$4 sm:$0xff]  }
  0x57   :  { %1729 = vmatpush2.bf16.msra.mxu0 %v8665_v12  ;;  %2363 = vmatpush2.bf16.msra.mxu1 %v8665_v12  ;;  %v7691_v12 = vld [vmem:[%s11587_s0 + $0x270] ss:$8 sps:$4 sm:$0xff]  }
  0x58   :  { %1730 = vmatprep.subr.bf16.mxu0 %v11596_v0  ;;  %2364 = vmatprep.subr.bf16.mxu1 %v11596_v0 }
  0x5b   :  { %1731 = vmatpush2.bf16.msra.mxu0 %v8672_v13  ;;  %2365 = vmatpush2.bf16.msra.mxu1 %v8672_v13  ;;  %v7692_v13 = vld [vmem:[%s11587_s0 + $0xf4] ss:$8 sps:$4 sm:$0xff]  }
  0x5c   :  { %1732 = vmatprep.subr.bf16.mxu0 %v11596_v0  ;;  %2366 = vmatprep.subr.bf16.mxu1 %v11596_v0 }
  0x5d   :  { %561 = vmatmul.mubr.bf16.gmra.mxu0 %v7636_v37  ;;  %1145 = vmatmul.mubr.bf16.gmra.mxu1 %v7637_v38  ;;  %v7727_v37 = vld [vmem:[%s11587_s0 + $0x2d0] ss:$8 sps:$4 sm:$0xff]   ;;  %v7728_v38 = vld [vmem:[%s11587_s0 + $0x154] ss:$8 sps:$4 sm:$0xff]  }
  0x5e   :  { %6714 = vmatprep.mubr.msk.bf16.mxu0 %vm408_vm0, %v7638_v39  ;;  %6839 = vmatprep.mubr.msk.bf16.mxu1 %vm408_vm0, %v7640_v40  ;;  %v7730_v39 = vld [vmem:[%s11587_s0 + $0x2e4] ss:$8 sps:$4 sm:$0xff]   ;;  %v7732_v40 = vld [vmem:[%s11587_s0 + $0x150] ss:$8 sps:$4 sm:$0xff]  }
  0x5f   :  { %1733 = vmatpush2.bf16.msra.mxu0 %v8681_v14  ;;  %2367 = vmatpush2.bf16.msra.mxu1 %v8681_v14  ;;  %v7694_v14 = vld [vmem:[%s11587_s0 + $0x284] ss:$8 sps:$4 sm:$0xff]  }
  0x60   :  { %1734 = vmatprep.subr.bf16.mxu0 %v11596_v0  ;;  %2368 = vmatprep.subr.bf16.mxu1 %v11596_v0 }
  0x63   :  { %1735 = vmatpush2.bf16.msra.mxu0 %v8690_v15  ;;  %2369 = vmatpush2.bf16.msra.mxu1 %v8690_v15  ;;  %v7790_v15 = vld [vmem:[%s11588_s3 + $0xf4] ss:$8 sps:$4 sm:$0xff]  }
  0x64   :  { %1736 = vmatprep.subr.bf16.mxu0 %v11596_v0  ;;  %2370 = vmatprep.subr.bf16.mxu1 %v11596_v0 }
  0x65   :  { %569 = vmatmul.mubr.bf16.gmra.mxu0 %v7642_v41  ;;  %1153 = vmatmul.mubr.bf16.gmra.mxu1 %v7643_v42  ;;  %v7733_v41 = vld [vmem:[%s11587_s0 + $0x2e0] ss:$8 sps:$4 sm:$0xff]   ;;  %v7734_v42 = vld [vmem:[%s11587_s0 + $0x164] ss:$8 sps:$4 sm:$0xff]  }
  0x66   :  { %6715 = vmatprep.mubr.msk.bf16.mxu0 %vm408_vm0, %v7644_v43  ;;  %6840 = vmatprep.mubr.msk.bf16.mxu1 %vm408_vm0, %v7646_v44  ;;  %v7736_v43 = vld [vmem:[%s11587_s0 + $0x2f4] ss:$8 sps:$4 sm:$0xff]   ;;  %v7738_v44 = vld [vmem:[%s11587_s0 + $0x160] ss:$8 sps:$4 sm:$0xff]  }
  0x67   :  { %1737 = vmatpush2.bf16.msra.mxu0 %v8699_v16  ;;  %2371 = vmatpush2.bf16.msra.mxu1 %v8699_v16  ;;  %v7696_v16 = vld [vmem:[%s11587_s0 + $0xf0] ss:$8 sps:$4 sm:$0xff]  }
  0x68   :  { %3235 = vmatprep.subr.bf16.mxu0 %v7762_v61  ;;  %3358 = vmatprep.subr.bf16.mxu1 %v7790_v15  ;;  %v7752_v61 = vld [vmem:[%s11587_s0 + $0x320] ss:$8 sps:$4 sm:$0xff]  }
  0x6d   :  { %577 = vmatmul.mubr.bf16.gmra.mxu0 %v7648_v45  ;;  %1161 = vmatmul.mubr.bf16.gmra.mxu1 %v7649_v46  ;;  %v7739_v45 = vld [vmem:[%s11587_s0 + $0x2f0] ss:$8 sps:$4 sm:$0xff]   ;;  %v7740_v46 = vld [vmem:[%s11587_s0 + $0x174] ss:$8 sps:$4 sm:$0xff]  }
  0x6e   :  { %6716 = vmatprep.mubr.msk.bf16.mxu0 %vm408_vm0, %v7650_v47  ;;  %6841 = vmatprep.mubr.msk.bf16.mxu1 %vm408_vm0, %v7652_v48  ;;  %v7742_v47 = vld [vmem:[%s11587_s0 + $0x304] ss:$8 sps:$4 sm:$0xff]   ;;  %v7744_v48 = vld [vmem:[%s11587_s0 + $0x170] ss:$8 sps:$4 sm:$0xff]  }
  0x75   :  { %585 = vmatmul.mubr.bf16.gmra.mxu0 %v7654_v49  ;;  %1169 = vmatmul.mubr.bf16.gmra.mxu1 %v7655_v50  ;;  %v7745_v49 = vld [vmem:[%s11587_s0 + $0x300] ss:$8 sps:$4 sm:$0xff]   ;;  %v7746_v50 = vld [vmem:[%s11587_s0 + $0x184] ss:$8 sps:$4 sm:$0xff]  }
  0x76   :  { %6717 = vmatprep.mubr.msk.bf16.mxu0 %vm408_vm0, %v7656_v51  ;;  %6842 = vmatprep.mubr.msk.bf16.mxu1 %vm408_vm0, %v7658_v52  ;;  %v7748_v51 = vld [vmem:[%s11587_s0 + $0x314] ss:$8 sps:$4 sm:$0xff]   ;;  %v7750_v52 = vld [vmem:[%s11587_s0 + $0x180] ss:$8 sps:$4 sm:$0xff]  }
  0x7d   :  { %593 = vmatmul.mubr.bf16.gmra.mxu0 %v7660_v53  ;;  %1177 = vmatmul.mubr.bf16.gmra.mxu1 %v7661_v54  ;;  %v7751_v53 = vld [vmem:[%s11587_s0 + $0x310] ss:$8 sps:$4 sm:$0xff]   ;;  %v7754_v54 = vld [vmem:[%s11587_s0 + $0x324] ss:$8 sps:$4 sm:$0xff]  }
  0x7e   :  { %6718 = vmatprep.mubr.msk.bf16.mxu0 %vm408_vm0, %v7662_v55  ;;  %6843 = vmatprep.mubr.msk.bf16.mxu1 %vm408_vm0, %v7664_v56  ;;  %v7757_v55 = vld [vmem:[%s11587_s0 + $0x4b4] ss:$8 sps:$4 sm:$0xff]  }
  0x85   :  { %601 = vmatmul.mubr.bf16.gmra.mxu0 %v7666_v57  ;;  %1185 = vmatmul.mubr.bf16.gmra.mxu1 %v7667_v58 }
  0x86   :  { %6719 = vmatprep.mubr.msk.bf16.mxu0 %vm408_vm0, %v7668_v59  ;;  %6844 = vmatprep.mubr.msk.bf16.mxu1 %vm408_vm0, %v7670_v60 }
  0x8d   :  { %609 = vmatmul.mubr.bf16.gmra.mxu0 %v7672_v62  ;;  %1193 = vmatmul.mubr.bf16.gmra.mxu1 %v7673_v63  ;;  %v7755_v62 = vld [vmem:[%s11587_s0 + $0x4b0] ss:$8 sps:$4 sm:$0xff]   ;;  %v7758_v63 = vld [vmem:[%s11587_s0 + $0x334] ss:$8 sps:$4 sm:$0xff]  }
  0x8e   :  { %6720 = vmatprep.mubr.msk.bf16.mxu0 %vm408_vm0, %v7674_v1  ;;  %6845 = vmatprep.mubr.msk.bf16.mxu1 %vm408_vm0, %v7676_v2  ;;  %v7760_v1 = vld [vmem:[%s11588_s3 + $0x70] ss:$8 sps:$4 sm:$0xff]  }
  0x95   :  { %617 = vmatmul.mubr.bf16.gmra.mxu0 %v7678_v3  ;;  %1201 = vmatmul.mubr.bf16.gmra.mxu1 %v7679_v4 }
  0x96   :  { %6721 = vmatprep.mubr.msk.bf16.mxu0 %vm408_vm0, %v7680_v5  ;;  %6846 = vmatprep.mubr.msk.bf16.mxu1 %vm408_vm0, %v7682_v6  ;;  %v7764_v5 = vld [vmem:[%s11587_s0 + $0x4c4] ss:$8 sps:$4 sm:$0xff]  }
  0x9d   :  { %625 = vmatmul.mubr.bf16.gmra.mxu0 %v7684_v7  ;;  %1209 = vmatmul.mubr.bf16.gmra.mxu1 %v7685_v8  ;;  %v7784_v8 = vld [vmem:[%s11588_s3 + $0x64] ss:$8 sps:$4 sm:$0xff]  }
  0x9e   :  { %6722 = vmatprep.mubr.msk.bf16.mxu0 %vm408_vm0, %v7686_v9  ;;  %6847 = vmatprep.mubr.msk.bf16.mxu1 %vm408_vm0, %v7688_v10  ;;  %v7782_v9 = vld [vmem:[%s11588_s3 + $0x60] ss:$8 sps:$4 sm:$0xff]   ;;  %v7788_v10 = vld [vmem:[%s11588_s3 + $0xf0] ss:$8 sps:$4 sm:$0xff]  }
  0xa5   :  { %633 = vmatmul.mubr.bf16.gmra.mxu0 %v7690_v11  ;;  %1217 = vmatmul.mubr.bf16.gmra.mxu1 %v7691_v12 }
  0xa6   :  { %6723 = vmatprep.mubr.msk.bf16.mxu0 %vm408_vm0, %v7692_v13  ;;  %6848 = vmatprep.mubr.msk.bf16.mxu1 %vm408_vm0, %v7694_v14  ;;  %v7810_v13 = vld [vmem:[%s11588_s3 + $0x54] ss:$8 sps:$4 sm:$0xff]   ;;  %v7814_v14 = vld [vmem:[%s11588_s3 + $0xe4] ss:$8 sps:$4 sm:$0xff]  }
  0xad   :  { %641 = vmatmul.mubr.bf16.gmra.mxu0 %v7696_v16  ;;  %1225 = vmatmul.mubr.bf16.gmra.mxu1 %v7697_v17  ;;  %v7812_v16 = vld [vmem:[%s11588_s3 + $0xe0] ss:$8 sps:$4 sm:$0xff]  }
  0xae   :  { %6724 = vmatprep.mubr.msk.bf16.mxu0 %vm408_vm0, %v7698_v18  ;;  %6849 = vmatprep.mubr.msk.bf16.mxu1 %vm408_vm0, %v7700_v19  ;;  %v7763_v19 = vld [vmem:[%s11587_s0 + $0x330] ss:$8 sps:$4 sm:$0xff]  }
  0xb5   :  { %649 = vmatmul.mubr.bf16.gmra.mxu0 %v7702_v20  ;;  %1233 = vmatmul.mubr.bf16.gmra.mxu1 %v7703_v21  ;;  %v7766_v20 = vld [vmem:[%s11587_s0 + $0x4c0] ss:$8 sps:$4 sm:$0xff]   ;;  %v7767_v21 = vld [vmem:[%s11587_s0 + $0x344] ss:$8 sps:$4 sm:$0xff]  }
  0xb6   :  { %6725 = vmatprep.mubr.msk.bf16.mxu0 %vm408_vm0, %v7704_v22  ;;  %6850 = vmatprep.mubr.msk.bf16.mxu1 %vm408_vm0, %v7706_v23 }
  0xbd   :  { %657 = vmatmul.mubr.bf16.gmra.mxu0 %v7708_v24  ;;  %1241 = vmatmul.mubr.bf16.gmra.mxu1 %v7709_v25  ;;  %v7770_v25 = vld [vmem:[%s11587_s0 + $0x4d4] ss:$8 sps:$4 sm:$0xff]  }
  0xbe   :  { %6726 = vmatprep.mubr.msk.bf16.mxu0 %vm408_vm0, %v7710_v26  ;;  %6851 = vmatprep.mubr.msk.bf16.mxu1 %vm408_vm0, %v7712_v27  ;;  %v7808_v26 = vld [vmem:[%s11588_s3 + $0x50] ss:$8 sps:$4 sm:$0xff]   ;;  %v7835_v27 = vld [vmem:[%s11588_s3 + $0x44] ss:$8 sps:$4 sm:$0xff]  }
  0xc5   :  { %665 = vmatmul.mubr.bf16.gmra.mxu0 %v7714_v28  ;;  %1249 = vmatmul.mubr.bf16.gmra.mxu1 %v7715_v29 }
  0xc6   :  { %6727 = vmatprep.mubr.msk.bf16.mxu0 %vm408_vm0, %v7716_v30  ;;  %6852 = vmatprep.mubr.msk.bf16.mxu1 %vm408_vm0, %v7718_v31  ;;  %v7840_v30 = vld [vmem:[%s11588_s3 + $0xd4] ss:$8 sps:$4 sm:$0xff]   ;;  %v7838_v31 = vld [vmem:[%s11588_s3 + $0xd0] ss:$8 sps:$4 sm:$0xff]  }
  0xcd   :  { %673 = vmatmul.mubr.bf16.gmra.mxu0 %v7720_v32  ;;  %1257 = vmatmul.mubr.bf16.gmra.mxu1 %v7721_v33 }
  0xce   :  { %6728 = vmatprep.mubr.msk.bf16.mxu0 %vm408_vm0, %v7722_v34  ;;  %6853 = vmatprep.mubr.msk.bf16.mxu1 %vm408_vm0, %v7724_v35  ;;  %v7833_v34 = vld [vmem:[%s11588_s3 + $0x40] ss:$8 sps:$4 sm:$0xff]   ;;  %v7865_v35 = vld [vmem:[%s11588_s3 + $0xc4] ss:$8 sps:$4 sm:$0xff]  }
  0xd5   :  { %681 = vmatmul.mubr.bf16.gmra.mxu0 %v7726_v36  ;;  %1265 = vmatmul.mubr.bf16.gmra.mxu1 %v7727_v37  ;;  %v7859_v37 = vld [vmem:[%s11588_s3 + $0x34] ss:$8 sps:$4 sm:$0xff]  }
  0xd6   :  { %6729 = vmatprep.mubr.msk.bf16.mxu0 %vm408_vm0, %v7728_v38  ;;  %6854 = vmatprep.mubr.msk.bf16.mxu1 %vm408_vm0, %v7730_v39  ;;  %v7863_v38 = vld [vmem:[%s11588_s3 + $0xc0] ss:$8 sps:$4 sm:$0xff]  }
  0xdd   :  { %689 = vmatmul.mubr.bf16.gmra.mxu0 %v7732_v40  ;;  %1273 = vmatmul.mubr.bf16.gmra.mxu1 %v7733_v41  ;;  %v7769_v41 = vld [vmem:[%s11587_s0 + $0x340] ss:$8 sps:$4 sm:$0xff]  }
  0xde   :  { %6730 = vmatprep.mubr.msk.bf16.mxu0 %vm408_vm0, %v7734_v42  ;;  %6855 = vmatprep.mubr.msk.bf16.mxu1 %vm408_vm0, %v7736_v43  ;;  %v7772_v42 = vld [vmem:[%s11587_s0 + $0x4d0] ss:$8 sps:$4 sm:$0xff]   ;;  %v7773_v43 = vld [vmem:[%s11587_s0 + $0x354] ss:$8 sps:$4 sm:$0xff]  }
  0xe5   :  { %697 = vmatmul.mubr.bf16.gmra.mxu0 %v7738_v44  ;;  %1281 = vmatmul.mubr.bf16.gmra.mxu1 %v7739_v45  ;;  %v7776_v44 = vld [vmem:[%s11587_s0 + $0x4e4] ss:$8 sps:$4 sm:$0xff]  }
  0xe6   :  { %6731 = vmatprep.mubr.msk.bf16.mxu0 %vm408_vm0, %v7740_v46  ;;  %6856 = vmatprep.mubr.msk.bf16.mxu1 %vm408_vm0, %v7742_v47  ;;  %v7857_v47 = vld [vmem:[%s11588_s3 + $0x30] ss:$8 sps:$4 sm:$0xff]  }
  0xed   :  { %705 = vmatmul.mubr.bf16.gmra.mxu0 %v7744_v48  ;;  %1289 = vmatmul.mubr.bf16.gmra.mxu1 %v7745_v49  ;;  %v7883_v49 = vld [vmem:[%s11588_s3 + $0x24] ss:$8 sps:$4 sm:$0xff]  }
  0xee   :  { %6732 = vmatprep.mubr.msk.bf16.mxu0 %vm408_vm0, %v7746_v50  ;;  %6857 = vmatprep.mubr.msk.bf16.mxu1 %vm408_vm0, %v7748_v51 }
  0xf5   :  { %v9111_v56 = vpop.f32.mrf.mxu0  ;;  %713 = vmatmul.mubr.bf16.gmra.mxu0 %v7750_v52  ;;  %v9113_v57 = vpop.f32.mrf.mxu1  ;;  %1297 = vmatmul.mubr.bf16.gmra.mxu1 %v7751_v53  ;;  %v7891_v52 = vld [vmem:[%s11588_s3 + $0xb4] ss:$8 sps:$4 sm:$0xff]   ;;  %v7889_v53 = vld [vmem:[%s11588_s3 + $0xb0] ss:$8 sps:$4 sm:$0xff]  }
  0xf6   :  { %6958 = vmatprep.mubr.msk.bf16.mxu0 %vm408_vm0, %v7754_v54  ;;  %7083 = vmatprep.mubr.msk.bf16.mxu1 %vm408_vm0, %v7757_v55 }
  0xf7   :  { %v524_v59 = vpop.f32.mrf.mxu0  ;;  %v1108_v60 = vpop.f32.mrf.mxu1 }
  0xf8   :  { %v7881_v59 = vld [vmem:[%s11588_s3 + $0x20] ss:$8 sps:$4 sm:$0xff]  }
  0xf9   :  { %v9131_v2 = vpop.f32.mrf.mxu0  ;;  %v9133_v3 = vpop.f32.mrf.mxu1 }
  0xfb   :  { %v527_v6 = vpop.f32.mrf.mxu0  ;;  %v1111_v7 = vpop.f32.mrf.mxu1 }
  0xfd   :  { %v9149_v11 = vpop.f32.mrf.mxu0  ;;  %v9151_v12 = vpop.f32.mrf.mxu1  ;;  %1739 = vmatmul.mubr.bf16.vlgmr.msra.gmra.mxu0 %v7752_v61  ;;  %2373 = vmatmul.mubr.bf16.vlgmr.msra.gmra.mxu1 %v7755_v62 }
  0xfe   :  { %6959 = vmatprep.mubr.msk.bf16.mxu0 %vm408_vm0, %v7758_v63  ;;  %3236 = vmatpush1.bf16.msra.mxu0 %v7760_v1  ;;  %v7775_v63 = vld [vmem:[%s11587_s0 + $0x350] ss:$8 sps:$4 sm:$0xff]   ;;  %v7778_v1 = vld [vmem:[%s11587_s0 + $0x4e0] ss:$8 sps:$4 sm:$0xff]  }
  0xff   :  { %v532_v17 = vpop.f32.mrf.mxu0  ;;  %v1116_v18 = vpop.f32.mrf.mxu1  ;;  %7084 = vmatprep.mubr.msk.bf16.mxu1 %vm408_vm0, %v7764_v5  ;;  %3237 = vmatprep.subr.bf16.mxu0 %v7784_v8  ;;  %v7779_v5 = vld [vmem:[%s11587_s0 + $0x364] ss:$8 sps:$4 sm:$0xff]  }
 0x100   :  { %3359 = vmatpush1.bf16.msra.mxu1 %v7788_v10  ;;  %v7952_v17 = vld [vmem:[%s11588_s3 + $0x84] ss:$8 sps:$4 sm:$0xff]  }
 0x101   :  { %v9175_v22 = vpop.f32.mrf.mxu0  ;;  %v9177_v23 = vpop.f32.mrf.mxu1  ;;  %3360 = vmatprep.subr.bf16.mxu1 %v7814_v14 }
 0x102   :  { %3238 = vmatpush1.bf16.msra.mxu0 %v7782_v9  ;;  %v7785_v9 = vld [vmem:[%s11587_s0 + $0x4f4] ss:$8 sps:$4 sm:$0xff]  }
 0x103   :  { %v535_v28 = vpop.f32.mrf.mxu0  ;;  %v1119_v29 = vpop.f32.mrf.mxu1  ;;  %3239 = vmatprep.subr.bf16.mxu0 %v7810_v13 }
 0x104   :  { %3361 = vmatpush1.bf16.msra.mxu1 %v7812_v16  ;;  %v7791_v28 = vld [vmem:[%s11587_s0 + $0x374] ss:$8 sps:$4 sm:$0xff]   ;;  %v7794_v29 = vld [vmem:[%s11587_s0 + $0x504] ss:$8 sps:$4 sm:$0xff]  }
 0x105   :  { %v9196_v32 = vpop.f32.mrf.mxu0  ;;  %v9198_v33 = vpop.f32.mrf.mxu1  ;;  %1747 = vmatmul.mubr.bf16.gmra.mxu0 %v7763_v19  ;;  %2381 = vmatmul.mubr.bf16.gmra.mxu1 %v7766_v20  ;;  %v7781_v20 = vld [vmem:[%s11587_s0 + $0x360] ss:$8 sps:$4 sm:$0xff]  }
 0x106   :  { %6960 = vmatprep.mubr.msk.bf16.mxu0 %vm408_vm0, %v7767_v21  ;;  %7085 = vmatprep.mubr.msk.bf16.mxu1 %vm408_vm0, %v7770_v25  ;;  %v7787_v21 = vld [vmem:[%s11587_s0 + $0x4f0] ss:$8 sps:$4 sm:$0xff]  }
 0x107   :  { %v540_v39 = vpop.f32.mrf.mxu0  ;;  %v1124_v40 = vpop.f32.mrf.mxu1  ;;  %3240 = vmatpush1.bf16.msra.mxu0 %v7808_v26  ;;  %3362 = vmatprep.subr.bf16.mxu1 %v7840_v30  ;;  %v7907_v30 = vld [vmem:[%s11588_s3 + $0x14] ss:$8 sps:$4 sm:$0xff]  }
 0x108   :  { %3241 = vmatprep.subr.bf16.mxu0 %v7835_v27  ;;  %3363 = vmatpush1.bf16.msra.mxu1 %v7838_v31 }
 0x109   :  { %v9228_v45 = vpop.f32.mrf.mxu0  ;;  %v9230_v46 = vpop.f32.mrf.mxu1  ;;  %3364 = vmatprep.subr.bf16.mxu1 %v7865_v35  ;;  %v7905_v35 = vld [vmem:[%s11588_s3 + $0x10] ss:$8 sps:$4 sm:$0xff]  }
 0x10b   :  { %v543_v50 = vpop.f32.mrf.mxu0  ;;  %v1127_v51 = vpop.f32.mrf.mxu1  ;;  %3242 = vmatpush1.bf16.msra.mxu0 %v7833_v34 }
 0x10c   :  { %3243 = vmatprep.subr.bf16.mxu0 %v7859_v37  ;;  %3365 = vmatpush1.bf16.msra.mxu1 %v7863_v38 }
 0x10d   :  { %v9246_v54 = vpop.f32.mrf.mxu0  ;;  %v9248_v55 = vpop.f32.mrf.mxu1  ;;  %1755 = vmatmul.mubr.bf16.gmra.mxu0 %v7769_v41  ;;  %2389 = vmatmul.mubr.bf16.gmra.mxu1 %v7772_v42  ;;  %v7793_v42 = vld [vmem:[%s11587_s0 + $0x370] ss:$8 sps:$4 sm:$0xff]  }
 0x10e   :  { %6961 = vmatprep.mubr.msk.bf16.mxu0 %vm408_vm0, %v7773_v43  ;;  %7086 = vmatprep.mubr.msk.bf16.mxu1 %vm408_vm0, %v7776_v44  ;;  %v7796_v43 = vld [vmem:[%s11587_s0 + $0x500] ss:$8 sps:$4 sm:$0xff]  }
 0x10f   :  { %v548_v61 = vpop.f32.mrf.mxu0  ;;  %v1132_v62 = vpop.f32.mrf.mxu1  ;;  %3244 = vmatpush1.bf16.msra.mxu0 %v7857_v47  ;;  %3366 = vmatprep.subr.bf16.mxu1 %v7891_v52  ;;  %v7914_v44 = vld [vmem:[%s11588_s3 + $0xa0] ss:$8 sps:$4 sm:$0xff]   ;;  %v7916_v47 = vld [vmem:[%s11588_s3 + $0xa4] ss:$8 sps:$4 sm:$0xff]  }
 0x110   :  { %3245 = vmatprep.subr.bf16.mxu0 %v7883_v49  ;;  %3367 = vmatpush1.bf16.msra.mxu1 %v7889_v53  ;;  %v7797_v49 = vld [vmem:[%s11587_s0 + $0x384] ss:$8 sps:$4 sm:$0xff]   ;;  %v7800_v53 = vld [vmem:[%s11587_s0 + $0x514] ss:$8 sps:$4 sm:$0xff]  }
 0x111   :  { %v9266_v6 = vpop.f32.mrf.mxu0  ;;  %v9268_v7 = vpop.f32.mrf.mxu1  ;;  %3368 = vmatprep.subr.bf16.mxu1 %v7916_v47  ;;  %v7811_v47 = vld [vmem:[%s11587_s0 + $0x520] ss:$8 sps:$4 sm:$0xff]  }
 0x113   :  { %v551_v10 = vpop.f32.mrf.mxu0  ;;  %v1135_v13 = vpop.f32.mrf.mxu1  ;;  %3246 = vmatpush1.bf16.msra.mxu0 %v7881_v59 }
 0x114   :  { %3247 = vmatprep.subr.bf16.mxu0 %v7907_v30  ;;  %3369 = vmatpush1.bf16.msra.mxu1 %v7914_v44  ;;  %v7799_v10 = vld [vmem:[%s11587_s0 + $0x380] ss:$8 sps:$4 sm:$0xff]   ;;  %v7802_v13 = vld [vmem:[%s11587_s0 + $0x510] ss:$8 sps:$4 sm:$0xff]  }
 0x115   :  { %v9275_v14 = vpop.f32.mrf.mxu0  ;;  %v9277_v16 = vpop.f32.mrf.mxu1  ;;  %1763 = vmatmul.mubr.bf16.gmra.mxu0 %v7775_v63  ;;  %2397 = vmatmul.mubr.bf16.gmra.mxu1 %v7778_v1  ;;  %v7805_v44 = vld [vmem:[%s11587_s0 + $0x390] ss:$8 sps:$4 sm:$0xff]  }
 0x116   :  { %6962 = vmatprep.mubr.msk.bf16.mxu0 %vm408_vm0, %v7779_v5  ;;  %7087 = vmatprep.mubr.msk.bf16.mxu1 %vm408_vm0, %v7785_v9 }
 0x117   :  { %v556_v18 = vpop.f32.mrf.mxu0  ;;  %v1140_v19 = vpop.f32.mrf.mxu1  ;;  %3248 = vmatpush1.bf16.msra.mxu0 %v7905_v35 }
 0x118   :  { %v7803_v18 = vld [vmem:[%s11587_s0 + $0x394] ss:$8 sps:$4 sm:$0xff]  }
 0x119   :  { %v9289_v25 = vpop.f32.mrf.mxu0  ;;  %v9291_v26 = vpop.f32.mrf.mxu1 }
 0x11b   :  { %v559_v31 = vpop.f32.mrf.mxu0  ;;  %v1143_v34 = vpop.f32.mrf.mxu1 }
 0x11d   :  { %v9307_v37 = vpop.f32.mrf.mxu0  ;;  %v9309_v38 = vpop.f32.mrf.mxu1  ;;  %1771 = vmatmul.mubr.bf16.gmra.mxu0 %v7781_v20  ;;  %2405 = vmatmul.mubr.bf16.gmra.mxu1 %v7787_v21 }
 0x11e   :  { %6963 = vmatprep.mubr.msk.bf16.mxu0 %vm408_vm0, %v7791_v28  ;;  %7088 = vmatprep.mubr.msk.bf16.mxu1 %vm408_vm0, %v7794_v29  ;;  %v7806_v28 = vld [vmem:[%s11587_s0 + $0x524] ss:$8 sps:$4 sm:$0xff]  }
 0x11f   :  { %v564_v40 = vpop.f32.mrf.mxu0  ;;  %v1148_v41 = vpop.f32.mrf.mxu1 }
 0x121   :  { %v9330_v50 = vpop.f32.mrf.mxu0  ;;  %v9332_v51 = vpop.f32.mrf.mxu1 }
 0x123   :  { %v567_v59 = vpop.f32.mrf.mxu0  ;;  %v1151_v61 = vpop.f32.mrf.mxu1 }
 0x124   :  { %v7818_v59 = vld [vmem:[%s11587_s0 + $0x534] ss:$8 sps:$4 sm:$0xff]  }
 0x125   :  { %v9339_v62 = vpop.f32.mrf.mxu0  ;;  %v9341_v63 = vpop.f32.mrf.mxu1  ;;  %1779 = vmatmul.mubr.bf16.gmra.mxu0 %v7793_v42  ;;  %2413 = vmatmul.mubr.bf16.gmra.mxu1 %v7796_v43 }
 0x126   :  { %6964 = vmatprep.mubr.msk.bf16.mxu0 %vm408_vm0, %v7797_v49  ;;  %7089 = vmatprep.mubr.msk.bf16.mxu1 %vm408_vm0, %v7800_v53  ;;  %v7815_v53 = vld [vmem:[%s11587_s0 + $0x3a4] ss:$8 sps:$4 sm:$0xff]  }
 0x127   :  { %v572_v5 = vpop.f32.mrf.mxu0  ;;  %v1156_v9 = vpop.f32.mrf.mxu1 }
 0x128   :  { %v7931_v9 = vld [vmem:[%s11588_s3 + $0x4] ss:$8 sps:$4 sm:$0xff]  }
 0x129   :  { %v9356_v19 = vpop.f32.mrf.mxu0  ;;  %v9358_v20 = vpop.f32.mrf.mxu1  ;;  %3249 = vmatprep.subr.bf16.mxu0 %v7931_v9  ;;  %v7824_v9 = vld [vmem:[%s11587_s0 + $0x544] ss:$8 sps:$4 sm:$0xff]  }
 0x12b   :  { %v575_v29 = vpop.f32.mrf.mxu0  ;;  %v1159_v30 = vpop.f32.mrf.mxu1 }
 0x12d   :  { %v9365_v31 = vpop.f32.mrf.mxu0  ;;  %v9367_v34 = vpop.f32.mrf.mxu1  ;;  %1787 = vmatmul.mubr.bf16.gmra.mxu0 %v7799_v10  ;;  %2421 = vmatmul.mubr.bf16.gmra.mxu1 %v7802_v13  ;;  %v7929_v10 = vld [vmem:[%s11588_s3] ss:$8 sps:$4 sm:$0xff]  }
 0x12e   :  { %6965 = vmatprep.mubr.msk.bf16.mxu0 %vm408_vm0, %v7803_v18  ;;  %7090 = vmatprep.mubr.msk.bf16.mxu1 %vm408_vm0, %v7806_v28 }
 0x12f   :  { %v580_v40 = vpop.f32.mrf.mxu0  ;;  %v1164_v41 = vpop.f32.mrf.mxu1  ;;  %3250 = vmatpush1.bf16.msra.mxu0 %v7929_v10 }
 0x130   :  { %v7938_v40 = vld [vmem:[%s11588_s3 + $0x90] ss:$8 sps:$4 sm:$0xff]   ;;  %v7940_v41 = vld [vmem:[%s11588_s3 + $0x94] ss:$8 sps:$4 sm:$0xff]  }
 0x131   :  { %v9373_v42 = vpop.f32.mrf.mxu0  ;;  %v9375_v43 = vpop.f32.mrf.mxu1  ;;  %3370 = vmatprep.subr.bf16.mxu1 %v7940_v41 }
 0x132   :  { %3371 = vmatpush1.bf16.msra.mxu1 %v7938_v40 }
 0x133   :  { %v583_v61 = vpop.f32.mrf.mxu0  ;;  %v1167_v5 = vpop.f32.mrf.mxu1  ;;  %3372 = vmatprep.subr.bf16.mxu1 %v7952_v17  ;;  %v7845_v17 = vld [vmem:[%s11587_s0 + $0x3e4] ss:$8 sps:$4 sm:$0xff]  }
 0x134   :  { %v7821_v5 = vld [vmem:[%s11587_s0 + $0x3b4] ss:$8 sps:$4 sm:$0xff]  }
 0x135   :  { %v9397_v13 = vpop.f32.mrf.mxu0  ;;  %v9399_v18 = vpop.f32.mrf.mxu1  ;;  %1795 = vmatmul.mubr.bf16.gmra.mxu0 %v7805_v44  ;;  %2429 = vmatmul.mubr.bf16.gmra.mxu1 %v7811_v47 }
 0x136   :  { %6966 = vmatprep.mubr.msk.bf16.mxu0 %vm408_vm0, %v7815_v53  ;;  %7091 = vmatprep.mubr.msk.bf16.mxu1 %vm408_vm0, %v7818_v59  ;;  %v7817_v53 = vld [vmem:[%s11587_s0 + $0x3a0] ss:$8 sps:$4 sm:$0xff]   ;;  %v7820_v59 = vld [vmem:[%s11587_s0 + $0x530] ss:$8 sps:$4 sm:$0xff]  }
 0x137   :  { %v588_v29 = vpop.f32.mrf.mxu0  ;;  %v1172_v30 = vpop.f32.mrf.mxu1 }
 0x139   :  { %v9411_v44 = vpop.f32.mrf.mxu0  ;;  %v9413_v47 = vpop.f32.mrf.mxu1 }
 0x13b   :  { %v591_v10 = vpop.f32.mrf.mxu0  ;;  %v1175_v29 = vpop.f32.mrf.mxu1 }
 0x13c   :  { %v7823_v10 = vld [vmem:[%s11587_s0 + $0x3b0] ss:$8 sps:$4 sm:$0xff]  }
 0x13d   :  { %v9429_v30 = vpop.f32.mrf.mxu0  ;;  %v9431_v28 = vpop.f32.mrf.mxu1  ;;  %1803 = vmatmul.mubr.bf16.gmra.mxu0 %v7817_v53  ;;  %2437 = vmatmul.mubr.bf16.gmra.mxu1 %v7820_v59  ;;  %v7826_v53 = vld [vmem:[%s11587_s0 + $0x540] ss:$8 sps:$4 sm:$0xff]  }
 0x13e   :  { %6967 = vmatprep.mubr.msk.bf16.mxu0 %vm408_vm0, %v7821_v5  ;;  %7092 = vmatprep.mubr.msk.bf16.mxu1 %vm408_vm0, %v7824_v9 }
 0x13f   :  { %v596_v61 = vpop.f32.mrf.mxu0  ;;  %v1180_v49 = vpop.f32.mrf.mxu1 }
 0x140   :  { %v7827_v61 = vld [vmem:[%s11587_s0 + $0x3c4] ss:$8 sps:$4 sm:$0xff]   ;;  %v7830_v49 = vld [vmem:[%s11587_s0 + $0x554] ss:$8 sps:$4 sm:$0xff]  }
 0x141   :  { %v9437_v35 = vpop.f32.mrf.mxu0  ;;  %v9439_v40 = vpop.f32.mrf.mxu1 }
 0x143   :  { %v599_v5 = vpop.f32.mrf.mxu0  ;;  %v1183_v9 = vpop.f32.mrf.mxu1 }
 0x144   :  { %v7829_v5 = vld [vmem:[%s11587_s0 + $0x3c0] ss:$8 sps:$4 sm:$0xff]  }
 0x145   :  { %v9455_v29 = vpop.f32.mrf.mxu0  ;;  %v9457_v41 = vpop.f32.mrf.mxu1  ;;  %1811 = vmatmul.mubr.bf16.gmra.mxu0 %v7823_v10  ;;  %2445 = vmatmul.mubr.bf16.gmra.mxu1 %v7826_v53  ;;  %v7832_v10 = vld [vmem:[%s11587_s0 + $0x550] ss:$8 sps:$4 sm:$0xff]   ;;  %v7949_v53 = vld [vmem:[%s11588_s3 + $0x174] ss:$8 sps:$4 sm:$0xff]  }
 0x146   :  { %6968 = vmatprep.mubr.msk.bf16.mxu0 %vm408_vm0, %v7827_v61  ;;  %7093 = vmatprep.mubr.msk.bf16.mxu1 %vm408_vm0, %v7830_v49  ;;  %v7842_v61 = vld [vmem:[%s11587_s0 + $0x564] ss:$8 sps:$4 sm:$0xff]  }
 0x147   :  { %v604_v59 = vpop.f32.mrf.mxu0  ;;  %v1188_v1 = vpop.f32.mrf.mxu1  ;;  %3481 = vmatprep.subr.bf16.mxu0 %v7949_v53  ;;  %v7950_v53 = vld [vmem:[%s11588_s3 + $0x80] ss:$8 sps:$4 sm:$0xff]  }
 0x148   :  { %v7836_v1 = vld [vmem:[%s11587_s0 + $0x3d4] ss:$8 sps:$4 sm:$0xff]   ;;  %3373 = vmatpush1.bf16.msra.mxu1 %v7950_v53 }
 0x149   :  { %v9463_v52 = vpop.f32.mrf.mxu0  ;;  %v9465_v39 = vpop.f32.mrf.mxu1  ;;  %v7961_v59 = vld [vmem:[%s11588_s3 + $0x1f4] ss:$8 sps:$4 sm:$0xff]  }
 0x14a   :  { %3604 = vmatprep.subr.bf16.mxu1 %v7961_v59  ;;  %v7850_v59 = vld [vmem:[%s11587_s0 + $0x570] ss:$8 sps:$4 sm:$0xff]  }
 0x14b   :  { %v607_v49 = vpop.f32.mrf.mxu0  ;;  %v1191_v9 = vpop.f32.mrf.mxu1 }
 0x14d   :  { %v9484_v21 = vpop.f32.mrf.mxu0  ;;  %v9486_v27 = vpop.f32.mrf.mxu1  ;;  %1819 = vmatmul.mubr.bf16.gmra.mxu0 %v7829_v5  ;;  %2453 = vmatmul.mubr.bf16.gmra.mxu1 %v7832_v10 }
 0x14e   :  { %11655 = vst [vmem:[#allocation2_spill] sm:$0xff] %v9486_v27  ;;  %6969 = vmatprep.mubr.msk.bf16.mxu0 %vm408_vm0, %v7836_v1  ;;  %7094 = vmatprep.mubr.msk.bf16.mxu1 %vm408_vm0, %v7842_v61  ;;  %v7841_v1 = vld [vmem:[%s11587_s0 + $0x3d0] ss:$8 sps:$4 sm:$0xff]   ;;  %v7844_v61 = vld [vmem:[%s11587_s0 + $0x560] ss:$8 sps:$4 sm:$0xff]  }
 0x14f   :  { %v612_v49 = vpop.f32.mrf.mxu0  ;;  %v1196_v9 = vpop.f32.mrf.mxu1 }
 0x150   :  { %v7848_v9 = vld [vmem:[%s11587_s0 + $0x574] ss:$8 sps:$4 sm:$0xff]  }
 0x151   :  { %v9498_v5 = vpop.f32.mrf.mxu0  ;;  %v9500_v10 = vpop.f32.mrf.mxu1 }
 0x152   :  { %11656 = vst [vmem:[#allocation3_spill] sm:$0xff] %v9498_v5  ;;  %11657 = vst [vmem:[#allocation4_spill] sm:$0xff] %v9500_v10 }
 0x153   :  { %v615_v8 = vpop.f32.mrf.mxu0  ;;  %v1199_v60 = vpop.f32.mrf.mxu1 }
 0x154   :  { %v7847_v60 = vld [vmem:[%s11587_s0 + $0x3e0] ss:$8 sps:$4 sm:$0xff]  }
 0x155   :  { %v9519_v48 = vpop.f32.mrf.mxu0  ;;  %v9521_v53 = vpop.f32.mrf.mxu1  ;;  %1827 = vmatmul.mubr.bf16.gmra.mxu0 %v7841_v1  ;;  %2461 = vmatmul.mubr.bf16.gmra.mxu1 %v7844_v61 }
 0x156   :  { %11658 = vst [vmem:[#allocation5_spill] sm:$0xff] %v9519_v48  ;;  %11659 = vst [vmem:[#allocation6_spill] sm:$0xff] %v9521_v53  ;;  %6970 = vmatprep.mubr.msk.bf16.mxu0 %vm408_vm0, %v7845_v17  ;;  %7095 = vmatprep.mubr.msk.bf16.mxu1 %vm408_vm0, %v7848_v9 }
 0x157   :  { %v620_v36 = vpop.f32.mrf.mxu0  ;;  %v1204_v24 = vpop.f32.mrf.mxu1 }
 0x158   :  { %v7851_v36 = vld [vmem:[%s11587_s0 + $0x3f4] ss:$8 sps:$4 sm:$0xff]   ;;  %v7854_v24 = vld [vmem:[%s11587_s0 + $0x584] ss:$8 sps:$4 sm:$0xff]  }
 0x159   :  { %v9527_v15 = vpop.f32.mrf.mxu0  ;;  %v9529_v8 = vpop.f32.mrf.mxu1 }
 0x15a   :  { %11660 = vst [vmem:[#allocation7_spill] sm:$0xff] %v9527_v15  ;;  %11661 = vst [vmem:[#allocation8_spill] sm:$0xff] %v9529_v8 }
 0x15b   :  { %v623_v61 = vpop.f32.mrf.mxu0  ;;  %v1207_v17 = vpop.f32.mrf.mxu1 }
 0x15c   :  { %v7853_v61 = vld [vmem:[%s11587_s0 + $0x3f0] ss:$8 sps:$4 sm:$0xff]  }
 0x15d   :  { %v9545_v9 = vpop.f32.mrf.mxu0  ;;  %v9547_v49 = vpop.f32.mrf.mxu1  ;;  %1835 = vmatmul.mubr.bf16.gmra.mxu0 %v7847_v60  ;;  %2469 = vmatmul.mubr.bf16.gmra.mxu1 %v7850_v59  ;;  %v7856_v60 = vld [vmem:[%s11587_s0 + $0x580] ss:$8 sps:$4 sm:$0xff]  }
 0x15e   :  { %11662 = vst [vmem:[#allocation9_spill] sm:$0xff] %v9545_v9  ;;  %11663 = vst [vmem:[#allocation10_spill] sm:$0xff] %v9547_v49  ;;  %6971 = vmatprep.mubr.msk.bf16.mxu0 %vm408_vm0, %v7851_v36  ;;  %7096 = vmatprep.mubr.msk.bf16.mxu1 %vm408_vm0, %v7854_v24 }
 0x15f   :  { %v628_v1 = vpop.f32.mrf.mxu0  ;;  %v1212_v0 = vpop.f32.mrf.mxu1 }
 0x160   :  { %v7860_v1 = vld [vmem:[%s11587_s0 + $0x404] ss:$8 sps:$4 sm:$0xff]   ;;  %v7866_v0 = vld [vmem:[%s11587_s0 + $0x594] ss:$8 sps:$4 sm:$0xff]  }
 0x161   :  { %v9553_v58 = vpop.f32.mrf.mxu0  ;;  %v9555_v8 = vpop.f32.mrf.mxu1 }
 0x162   :  { %11664 = vst [vmem:[#allocation11_spill] sm:$0xff] %v9553_v58  ;;  %11665 = vst [vmem:[#allocation12_spill] sm:$0xff] %v9555_v8 }
 0x163   :  { %v631_v36 = vpop.f32.mrf.mxu0  ;;  %v1215_v24 = vpop.f32.mrf.mxu1 }
 0x164   :  { %v7862_v36 = vld [vmem:[%s11587_s0 + $0x400] ss:$8 sps:$4 sm:$0xff]  }
 0x165   :  { %v9571_v17 = vpop.f32.mrf.mxu0  ;;  %v9573_v4 = vpop.f32.mrf.mxu1  ;;  %1843 = vmatmul.mubr.bf16.gmra.mxu0 %v7853_v61  ;;  %2477 = vmatmul.mubr.bf16.gmra.mxu1 %v7856_v60  ;;  %v7868_v61 = vld [vmem:[%s11587_s0 + $0x590] ss:$8 sps:$4 sm:$0xff]  }
 0x166   :  { %11666 = vst [vmem:[#allocation13_spill] sm:$0xff] %v9571_v17  ;;  %11667 = vst [vmem:[#allocation14_spill] sm:$0xff] %v9573_v4  ;;  %6972 = vmatprep.mubr.msk.bf16.mxu0 %vm408_vm0, %v7860_v1  ;;  %7097 = vmatprep.mubr.msk.bf16.mxu1 %vm408_vm0, %v7866_v0 }
 0x167   :  { %v636_v59 = vpop.f32.mrf.mxu0  ;;  %v1220_v8 = vpop.f32.mrf.mxu1 }
 0x168   :  { %v7869_v59 = vld [vmem:[%s11587_s0 + $0x414] ss:$8 sps:$4 sm:$0xff]   ;;  %v7872_v8 = vld [vmem:[%s11587_s0 + $0x5a4] ss:$8 sps:$4 sm:$0xff]  }
 0x169   :  { %v9579_v58 = vpop.f32.mrf.mxu0  ;;  %v9581_v9 = vpop.f32.mrf.mxu1 }
 0x16a   :  { %11668 = vst [vmem:[#allocation15_spill] sm:$0xff] %v9579_v58  ;;  %11669 = vst [vmem:[#allocation16_spill] sm:$0xff] %v9581_v9 }
 0x16b   :  { %v639_v1 = vpop.f32.mrf.mxu0  ;;  %v1223_v0 = vpop.f32.mrf.mxu1 }
 0x16c   :  { %v7871_v1 = vld [vmem:[%s11587_s0 + $0x410] ss:$8 sps:$4 sm:$0xff]  }
 0x16d   :  { %v9597_v24 = vpop.f32.mrf.mxu0  ;;  %v9599_v49 = vpop.f32.mrf.mxu1  ;;  %1851 = vmatmul.mubr.bf16.gmra.mxu0 %v7862_v36  ;;  %2485 = vmatmul.mubr.bf16.gmra.mxu1 %v7868_v61  ;;  %v7874_v36 = vld [vmem:[%s11587_s0 + $0x5a0] ss:$8 sps:$4 sm:$0xff]  }
 0x16e   :  { %11670 = vst [vmem:[#allocation17_spill] sm:$0xff] %v9597_v24  ;;  %11671 = vst [vmem:[#allocation18_spill] sm:$0xff] %v9599_v49  ;;  %6973 = vmatprep.mubr.msk.bf16.mxu0 %vm408_vm0, %v7869_v59  ;;  %7098 = vmatprep.mubr.msk.bf16.mxu1 %vm408_vm0, %v7872_v8 }
 0x16f   :  { %v644_v60 = vpop.f32.mrf.mxu0  ;;  %v1228_v9 = vpop.f32.mrf.mxu1 }
 0x170   :  { %v7875_v60 = vld [vmem:[%s11587_s0 + $0x424] ss:$8 sps:$4 sm:$0xff]   ;;  %v7878_v9 = vld [vmem:[%s11587_s0 + $0x5b4] ss:$8 sps:$4 sm:$0xff]  }
 0x171   :  { %v9605_v58 = vpop.f32.mrf.mxu0  ;;  %v9607_v17 = vpop.f32.mrf.mxu1 }
 0x172   :  { %11672 = vst [vmem:[#allocation19_spill] sm:$0xff] %v9605_v58  ;;  %11673 = vst [vmem:[#allocation20_spill] sm:$0xff] %v9607_v17 }
 0x173   :  { %v647_v59 = vpop.f32.mrf.mxu0  ;;  %v1231_v8 = vpop.f32.mrf.mxu1 }
 0x174   :  { %v7877_v59 = vld [vmem:[%s11587_s0 + $0x420] ss:$8 sps:$4 sm:$0xff]  }
 0x175   :  { %v9623_v0 = vpop.f32.mrf.mxu0  ;;  %v9625_v4 = vpop.f32.mrf.mxu1  ;;  %1859 = vmatmul.mubr.bf16.gmra.mxu0 %v7871_v1  ;;  %2493 = vmatmul.mubr.bf16.gmra.mxu1 %v7874_v36  ;;  %v7880_v1 = vld [vmem:[%s11587_s0 + $0x5b0] ss:$8 sps:$4 sm:$0xff]  }
 0x176   :  { %11674 = vst [vmem:[#allocation21_spill] sm:$0xff] %v9623_v0  ;;  %11675 = vst [vmem:[#allocation22_spill] sm:$0xff] %v9625_v4  ;;  %6974 = vmatprep.mubr.msk.bf16.mxu0 %vm408_vm0, %v7875_v60  ;;  %7099 = vmatprep.mubr.msk.bf16.mxu1 %vm408_vm0, %v7878_v9 }
 0x177   :  { %v652_v61 = vpop.f32.mrf.mxu0  ;;  %v1236_v17 = vpop.f32.mrf.mxu1 }
 0x178   :  { %v7884_v61 = vld [vmem:[%s11587_s0 + $0x434] ss:$8 sps:$4 sm:$0xff]   ;;  %v7887_v17 = vld [vmem:[%s11587_s0 + $0x5c4] ss:$8 sps:$4 sm:$0xff]  }
 0x179   :  { %v9631_v58 = vpop.f32.mrf.mxu0  ;;  %v9633_v24 = vpop.f32.mrf.mxu1 }
 0x17a   :  { %11676 = vst [vmem:[#allocation23_spill] sm:$0xff] %v9631_v58  ;;  %11677 = vst [vmem:[#allocation24_spill] sm:$0xff] %v9633_v24 }
 0x17b   :  { %v655_v60 = vpop.f32.mrf.mxu0  ;;  %v1239_v9 = vpop.f32.mrf.mxu1 }
 0x17c   :  { %v7886_v60 = vld [vmem:[%s11587_s0 + $0x430] ss:$8 sps:$4 sm:$0xff]  }
 0x17d   :  { %v9649_v8 = vpop.f32.mrf.mxu0  ;;  %v9651_v49 = vpop.f32.mrf.mxu1  ;;  %1867 = vmatmul.mubr.bf16.gmra.mxu0 %v7877_v59  ;;  %2501 = vmatmul.mubr.bf16.gmra.mxu1 %v7880_v1  ;;  %v7892_v59 = vld [vmem:[%s11587_s0 + $0x5c0] ss:$8 sps:$4 sm:$0xff]  }
 0x17e   :  { %11678 = vst [vmem:[#allocation25_spill] sm:$0xff] %v9649_v8  ;;  %11679 = vst [vmem:[#allocation26_spill] sm:$0xff] %v9651_v49  ;;  %6975 = vmatprep.mubr.msk.bf16.mxu0 %vm408_vm0, %v7884_v61  ;;  %7100 = vmatprep.mubr.msk.bf16.mxu1 %vm408_vm0, %v7887_v17 }
 0x17f   :  { %v660_v36 = vpop.f32.mrf.mxu0  ;;  %v1244_v24 = vpop.f32.mrf.mxu1 }
 0x180   :  { %v7893_v36 = vld [vmem:[%s11587_s0 + $0x444] ss:$8 sps:$4 sm:$0xff]   ;;  %v7896_v24 = vld [vmem:[%s11587_s0 + $0x5d4] ss:$8 sps:$4 sm:$0xff]  }
 0x181   :  { %v9657_v58 = vpop.f32.mrf.mxu0  ;;  %v9659_v0 = vpop.f32.mrf.mxu1 }
 0x182   :  { %11680 = vst [vmem:[#allocation27_spill] sm:$0xff] %v9657_v58  ;;  %11681 = vst [vmem:[#allocation28_spill] sm:$0xff] %v9659_v0 }
 0x183   :  { %v663_v61 = vpop.f32.mrf.mxu0  ;;  %v1247_v17 = vpop.f32.mrf.mxu1 }
 0x184   :  { %v7895_v61 = vld [vmem:[%s11587_s0 + $0x440] ss:$8 sps:$4 sm:$0xff]  }
 0x185   :  { %v9675_v9 = vpop.f32.mrf.mxu0  ;;  %v9677_v4 = vpop.f32.mrf.mxu1  ;;  %1875 = vmatmul.mubr.bf16.gmra.mxu0 %v7886_v60  ;;  %2509 = vmatmul.mubr.bf16.gmra.mxu1 %v7892_v59  ;;  %v7898_v60 = vld [vmem:[%s11587_s0 + $0x5d0] ss:$8 sps:$4 sm:$0xff]  }
 0x186   :  { %11682 = vst [vmem:[#allocation29_spill] sm:$0xff] %v9675_v9  ;;  %11683 = vst [vmem:[#allocation30_spill] sm:$0xff] %v9677_v4  ;;  %6976 = vmatprep.mubr.msk.bf16.mxu0 %vm408_vm0, %v7893_v36  ;;  %7101 = vmatprep.mubr.msk.bf16.mxu1 %vm408_vm0, %v7896_v24 }
 0x187   :  { %v668_v1 = vpop.f32.mrf.mxu0  ;;  %v1252_v0 = vpop.f32.mrf.mxu1 }
 0x188   :  { %v7899_v1 = vld [vmem:[%s11587_s0 + $0x454] ss:$8 sps:$4 sm:$0xff]   ;;  %v7902_v0 = vld [vmem:[%s11587_s0 + $0x5e4] ss:$8 sps:$4 sm:$0xff]  }
 0x189   :  { %v9683_v58 = vpop.f32.mrf.mxu0  ;;  %v9685_v8 = vpop.f32.mrf.mxu1 }
 0x18a   :  { %11684 = vst [vmem:[#allocation31_spill] sm:$0xff] %v9683_v58  ;;  %11685 = vst [vmem:[#allocation32_spill] sm:$0xff] %v9685_v8 }
 0x18b   :  { %v671_v36 = vpop.f32.mrf.mxu0  ;;  %v1255_v24 = vpop.f32.mrf.mxu1 }
 0x18c   :  { %v7901_v36 = vld [vmem:[%s11587_s0 + $0x450] ss:$8 sps:$4 sm:$0xff]  }
 0x18d   :  { %v9701_v17 = vpop.f32.mrf.mxu0  ;;  %v9703_v49 = vpop.f32.mrf.mxu1  ;;  %1883 = vmatmul.mubr.bf16.gmra.mxu0 %v7895_v61  ;;  %2517 = vmatmul.mubr.bf16.gmra.mxu1 %v7898_v60  ;;  %v7904_v61 = vld [vmem:[%s11587_s0 + $0x5e0] ss:$8 sps:$4 sm:$0xff]  }
 0x18e   :  { %11686 = vst [vmem:[#allocation33_spill] sm:$0xff] %v9701_v17  ;;  %11687 = vst [vmem:[#allocation34_spill] sm:$0xff] %v9703_v49  ;;  %6977 = vmatprep.mubr.msk.bf16.mxu0 %vm408_vm0, %v7899_v1  ;;  %7102 = vmatprep.mubr.msk.bf16.mxu1 %vm408_vm0, %v7902_v0 }
 0x18f   :  { %v676_v59 = vpop.f32.mrf.mxu0  ;;  %v1260_v8 = vpop.f32.mrf.mxu1 }
 0x190   :  { %v7908_v59 = vld [vmem:[%s11587_s0 + $0x464] ss:$8 sps:$4 sm:$0xff]   ;;  %v7911_v8 = vld [vmem:[%s11587_s0 + $0x5f4] ss:$8 sps:$4 sm:$0xff]  }
 0x191   :  { %v9709_v58 = vpop.f32.mrf.mxu0  ;;  %v9711_v9 = vpop.f32.mrf.mxu1 }
 0x192   :  { %11688 = vst [vmem:[#allocation35_spill] sm:$0xff] %v9709_v58  ;;  %11689 = vst [vmem:[#allocation36_spill] sm:$0xff] %v9711_v9 }
 0x193   :  { %v679_v1 = vpop.f32.mrf.mxu0  ;;  %v1263_v0 = vpop.f32.mrf.mxu1 }
 0x194   :  { %v7910_v1 = vld [vmem:[%s11587_s0 + $0x460] ss:$8 sps:$4 sm:$0xff]  }
 0x195   :  { %v9727_v24 = vpop.f32.mrf.mxu0  ;;  %v9729_v4 = vpop.f32.mrf.mxu1  ;;  %1891 = vmatmul.mubr.bf16.gmra.mxu0 %v7901_v36  ;;  %2525 = vmatmul.mubr.bf16.gmra.mxu1 %v7904_v61  ;;  %v7913_v36 = vld [vmem:[%s11587_s0 + $0x5f0] ss:$8 sps:$4 sm:$0xff]  }
 0x196   :  { %11690 = vst [vmem:[#allocation37_spill] sm:$0xff] %v9727_v24  ;;  %11691 = vst [vmem:[#allocation38_spill] sm:$0xff] %v9729_v4  ;;  %6978 = vmatprep.mubr.msk.bf16.mxu0 %vm408_vm0, %v7908_v59  ;;  %7103 = vmatprep.mubr.msk.bf16.mxu1 %vm408_vm0, %v7911_v8 }
 0x197   :  { %v684_v60 = vpop.f32.mrf.mxu0  ;;  %v1268_v9 = vpop.f32.mrf.mxu1 }
 0x198   :  { %v7917_v60 = vld [vmem:[%s11587_s0 + $0x474] ss:$8 sps:$4 sm:$0xff]   ;;  %v7920_v9 = vld [vmem:[%s11587_s0 + $0x604] ss:$8 sps:$4 sm:$0xff]  }
 0x199   :  { %v9735_v58 = vpop.f32.mrf.mxu0  ;;  %v9737_v17 = vpop.f32.mrf.mxu1 }
 0x19a   :  { %11692 = vst [vmem:[#allocation39_spill] sm:$0xff] %v9735_v58  ;;  %11693 = vst [vmem:[#allocation40_spill] sm:$0xff] %v9737_v17 }
 0x19b   :  { %v687_v59 = vpop.f32.mrf.mxu0  ;;  %v1271_v8 = vpop.f32.mrf.mxu1 }
 0x19c   :  { %v7919_v59 = vld [vmem:[%s11587_s0 + $0x470] ss:$8 sps:$4 sm:$0xff]  }
 0x19d   :  { %v9753_v0 = vpop.f32.mrf.mxu0  ;;  %v9755_v49 = vpop.f32.mrf.mxu1  ;;  %1899 = vmatmul.mubr.bf16.gmra.mxu0 %v7910_v1  ;;  %2533 = vmatmul.mubr.bf16.gmra.mxu1 %v7913_v36  ;;  %v7922_v1 = vld [vmem:[%s11587_s0 + $0x600] ss:$8 sps:$4 sm:$0xff]  }
 0x19e   :  { %11694 = vst [vmem:[#allocation41_spill] sm:$0xff] %v9753_v0  ;;  %11695 = vst [vmem:[#allocation42_spill] sm:$0xff] %v9755_v49  ;;  %6979 = vmatprep.mubr.msk.bf16.mxu0 %vm408_vm0, %v7917_v60  ;;  %7104 = vmatprep.mubr.msk.bf16.mxu1 %vm408_vm0, %v7920_v9 }
 0x19f   :  { %v692_v61 = vpop.f32.mrf.mxu0  ;;  %v1276_v17 = vpop.f32.mrf.mxu1 }
 0x1a0   :  { %v7923_v61 = vld [vmem:[%s11587_s0 + $0x484] ss:$8 sps:$4 sm:$0xff]   ;;  %v7926_v17 = vld [vmem:[%s11587_s0 + $0x614] ss:$8 sps:$4 sm:$0xff]  }
 0x1a1   :  { %v9761_v58 = vpop.f32.mrf.mxu0  ;;  %v9763_v24 = vpop.f32.mrf.mxu1 }
 0x1a2   :  { %11696 = vst [vmem:[#allocation43_spill] sm:$0xff] %v9761_v58  ;;  %11697 = vst [vmem:[#allocation44_spill] sm:$0xff] %v9763_v24 }
 0x1a3   :  { %v695_v60 = vpop.f32.mrf.mxu0  ;;  %v1279_v9 = vpop.f32.mrf.mxu1 }
 0x1a4   :  { %v7925_v60 = vld [vmem:[%s11587_s0 + $0x480] ss:$8 sps:$4 sm:$0xff]  }
 0x1a5   :  { %v9779_v8 = vpop.f32.mrf.mxu0  ;;  %v9781_v4 = vpop.f32.mrf.mxu1  ;;  %1907 = vmatmul.mubr.bf16.gmra.mxu0 %v7919_v59  ;;  %2541 = vmatmul.mubr.bf16.gmra.mxu1 %v7922_v1  ;;  %v7928_v59 = vld [vmem:[%s11587_s0 + $0x610] ss:$8 sps:$4 sm:$0xff]  }
 0x1a6   :  { %11698 = vst [vmem:[#allocation45_spill] sm:$0xff] %v9779_v8  ;;  %11699 = vst [vmem:[#allocation46_spill] sm:$0xff] %v9781_v4  ;;  %6980 = vmatprep.mubr.msk.bf16.mxu0 %vm408_vm0, %v7923_v61  ;;  %7105 = vmatprep.mubr.msk.bf16.mxu1 %vm408_vm0, %v7926_v17 }
 0x1a7   :  { %v700_v36 = vpop.f32.mrf.mxu0  ;;  %v1284_v24 = vpop.f32.mrf.mxu1 }
 0x1a8   :  { %v7932_v36 = vld [vmem:[%s11587_s0 + $0x494] ss:$8 sps:$4 sm:$0xff]   ;;  %v7935_v24 = vld [vmem:[%s11587_s0 + $0x624] ss:$8 sps:$4 sm:$0xff]  }
 0x1a9   :  { %v9787_v58 = vpop.f32.mrf.mxu0  ;;  %v9789_v0 = vpop.f32.mrf.mxu1 }
 0x1aa   :  { %11700 = vst [vmem:[#allocation47_spill] sm:$0xff] %v9787_v58  ;;  %11701 = vst [vmem:[#allocation48_spill] sm:$0xff] %v9789_v0 }
 0x1ab   :  { %v703_v61 = vpop.f32.mrf.mxu0  ;;  %v1287_v17 = vpop.f32.mrf.mxu1 }
 0x1ac   :  { %v7934_v61 = vld [vmem:[%s11587_s0 + $0x490] ss:$8 sps:$4 sm:$0xff]  }
 0x1ad   :  { %v9805_v9 = vpop.f32.mrf.mxu0  ;;  %v9807_v49 = vpop.f32.mrf.mxu1  ;;  %1915 = vmatmul.mubr.bf16.gmra.mxu0 %v7925_v60  ;;  %2549 = vmatmul.mubr.bf16.gmra.mxu1 %v7928_v59  ;;  %v7937_v60 = vld [vmem:[%s11587_s0 + $0x620] ss:$8 sps:$4 sm:$0xff]  }
 0x1ae   :  { %11702 = vst [vmem:[#allocation49_spill] sm:$0xff] %v9805_v9  ;;  %11703 = vst [vmem:[#allocation50_spill] sm:$0xff] %v9807_v49  ;;  %6981 = vmatprep.mubr.msk.bf16.mxu0 %vm408_vm0, %v7932_v36  ;;  %7106 = vmatprep.mubr.msk.bf16.mxu1 %vm408_vm0, %v7935_v24 }
 0x1af   :  { %v708_v1 = vpop.f32.mrf.mxu0  ;;  %v1292_v0 = vpop.f32.mrf.mxu1 }
 0x1b0   :  { %v7941_v1 = vld [vmem:[%s11587_s0 + $0x4a4] ss:$8 sps:$4 sm:$0xff]   ;;  %v7944_v0 = vld [vmem:[%s11587_s0 + $0x634] ss:$8 sps:$4 sm:$0xff]  }
 0x1b1   :  { %v9813_v58 = vpop.f32.mrf.mxu0  ;;  %v9815_v8 = vpop.f32.mrf.mxu1 }
 0x1b2   :  { %11704 = vst [vmem:[#allocation51_spill] sm:$0xff] %v9813_v58  ;;  %11705 = vst [vmem:[#allocation52_spill] sm:$0xff] %v9815_v8 }
 0x1b3   :  { %v711_v36 = vpop.f32.mrf.mxu0  ;;  %v1295_v24 = vpop.f32.mrf.mxu1 }
 0x1b4   :  { %v7943_v36 = vld [vmem:[%s11587_s0 + $0x4a0] ss:$8 sps:$4 sm:$0xff]  }
 0x1b5   :  { %v9831_v17 = vpop.f32.mrf.mxu0  ;;  %v9833_v4 = vpop.f32.mrf.mxu1  ;;  %1923 = vmatmul.mubr.bf16.gmra.mxu0 %v7934_v61  ;;  %2557 = vmatmul.mubr.bf16.gmra.mxu1 %v7937_v60  ;;  %v7946_v61 = vld [vmem:[%s11587_s0 + $0x630] ss:$8 sps:$4 sm:$0xff]  }
 0x1b6   :  { %11706 = vst [vmem:[#allocation53_spill] sm:$0xff] %v9831_v17  ;;  %11707 = vst [vmem:[#allocation54_spill] sm:$0xff] %v9833_v4  ;;  %6982 = vmatprep.mubr.msk.bf16.mxu0 %vm408_vm0, %v7941_v1  ;;  %7107 = vmatprep.mubr.msk.bf16.mxu1 %vm408_vm0, %v7944_v0  ;;  %v11711_v4 = vmov 0  }
 0x1b7   :  { %v716_v59 = vpop.f32.mrf.mxu0  ;;  %v1300_v8 = vpop.f32.mrf.mxu1 }
 0x1b8   :  { %v11710_v59 = vmax.f32 %v9111_v56, %v9113_v57 }
 0x1b9   :  { %v9839_v58 = vpop.f32.mrf.mxu0  ;;  %v9841_v9 = vpop.f32.mrf.mxu1 }
 0x1ba   :  { %11708 = vst [vmem:[#allocation55_spill] sm:$0xff] %v9839_v58  ;;  %11709 = vst [vmem:[#allocation56_spill] sm:$0xff] %v9841_v9 }
 0x1bb   :  { %v719_v1 = vpop.f32.mrf.mxu0  ;;  %v1303_v24 = vpop.f32.mrf.mxu1 }
 0x1bc   :  { %v9859_v1 = vld [vmem:[%s11589_s2] ss:$0 sm:$0xff] }
 0x1bd   :  { %v1740_v0 = vpop.f32.mrf.mxu0  ;;  %1931 = vmatmul.mubr.bf16.gmra.mxu0 %v7943_v36  ;;  %v2374_v8 = vpop.f32.mrf.mxu1  ;;  %2565 = vmatmul.mubr.bf16.gmra.mxu1 %v7946_v61  ;;  %v11712_v61 = vmax.f32 %v9131_v2, %v9133_v3 }
 0x1be   :  { %v1939_v49 = vmax.f32 %v11710_v59, %v1740_v0  ;;  %3267 = vmatprep.mubr.bf16.mxu0 %v11711_v4  ;;  %3390 = vmatprep.mubr.bf16.mxu1 %v11711_v4 }
 0x1bf   :  { %v1742_v17 = vpop.f32.mrf.mxu0  ;;  %v2376_v15 = vpop.f32.mrf.mxu1 }
 0x1c0   :  { %v2573_v53 = vmax.f32 %v1939_v49, %v2374_v8  ;;  %v11713_v49 = vmax.f32 %v9149_v11, %v9151_v12  ;;  %v7955_v11 = vld [vmem:[%s11588_s3 + $0x164] ss:$8 sps:$4 sm:$0xff]  }
 0x1c1   :  { %v1743_v24 = vpop.f32.mrf.mxu0  ;;  %v2377_v36 = vpop.f32.mrf.mxu1 }
 0x1c2   :  { %v1940_v60 = vmax.f32 %v11712_v61, %v1743_v24  ;;  %v2630_v0 = vadd.f32 %v9859_v1, %v2573_v53  ;;  %v7947_v53 = vld [vmem:[%s11588_s3 + $0x170] ss:$8 sps:$4 sm:$0xff]   ;;  %v11714_v24 = vmax.f32 %v9175_v22, %v9177_v23  ;;  %v11715_v23 = vmax.f32 %v9196_v32, %v9198_v33 }
 0x1c3   :  { %v1745_v56 = vpop.f32.mrf.mxu0  ;;  %v2379_v57 = vpop.f32.mrf.mxu1  ;;  %v7959_v32 = vld [vmem:[%s11588_s3 + $0x1f0] ss:$8 sps:$4 sm:$0xff]  }
 0x1c4   :  { %v2574_v59 = vmax.f32 %v1940_v60, %v2377_v36  ;;  %v2680_v10 = vmax.f32 %v2630_v0, 0.0 }
 0x1c5   :  { %v1748_v9 = vpop.f32.mrf.mxu0  ;;  %v2382_v17 = vpop.f32.mrf.mxu1 }
 0x1c6   :  { %v2631_v15 = vadd.f32 %v9859_v1, %v2574_v59  ;;  %v1941_v8 = vmax.f32 %v11713_v49, %v1748_v9 }
 0x1c7   :  { %v1750_v58 = vpop.f32.mrf.mxu0  ;;  %v2384_v48 = vpop.f32.mrf.mxu1 }
 0x1c8   :  { %v2681_v5 = vmax.f32 %v2631_v15, 0.0  ;;  %v2575_v27 = vmax.f32 %v1941_v8, %v2382_v17 }
 0x1c9   :  { %v1751_v2 = vpop.f32.mrf.mxu0  ;;  %v2385_v3 = vpop.f32.mrf.mxu1 }
 0x1ca   :  { %v2730_v60 = vpack.c.bf16 %v2681_v5, %v2680_v10  ;;  %v1942_v36 = vmax.f32 %v11714_v24, %v1751_v2  ;;  %v2632_v48 = vadd.f32 %v9859_v1, %v2575_v27  ;;  %v7953_v5 = vld [vmem:[%s11588_s3 + $0x160] ss:$8 sps:$4 sm:$0xff]   ;;  %v7958_v27 = vld [vmem:[%s11588_s3 + $0x154] ss:$8 sps:$4 sm:$0xff]   ;;  %v7956_v2 = vld [vmem:[%s11588_s3 + $0x150] ss:$8 sps:$4 sm:$0xff]  }
 0x1cb   :  { %v1753_v58 = vpop.f32.mrf.mxu0  ;;  %v2387_v12 = vpop.f32.mrf.mxu1  ;;  %v7967_v24 = vld [vmem:[%s11588_s3 + $0x1e4] ss:$8 sps:$4 sm:$0xff]  }
 0x1cc   :  { %v2576_v9 = vmax.f32 %v1942_v36, %v2385_v3  ;;  %3268 = vmatmul.mubr.bf16.vlgmr.msra.gmra.mxu0 %v2730_v60  ;;  %v2682_v59 = vmax.f32 %v2632_v48, 0.0  ;;  %v11716_v3 = vmax.f32 %v9228_v45, %v9230_v46  ;;  %v7964_v60 = vld [vmem:[%s11588_s3 + $0x144] ss:$8 sps:$4 sm:$0xff]   ;;  %v7962_v46 = vld [vmem:[%s11588_s3 + $0x140] ss:$8 sps:$4 sm:$0xff]  }
 0x1cd   :  { %3482 = vmatpush1.bf16.msra.mxu0 %v7947_v53  ;;  %v1756_v61 = vpop.f32.mrf.mxu0  ;;  %v2390_v56 = vpop.f32.mrf.mxu1  ;;  %3513 = vmatprep.mubr.bf16.mxu0 %v11711_v4 }
 0x1ce   :  { %v2633_v22 = vadd.f32 %v9859_v1, %v2576_v9  ;;  %v1943_v10 = vmax.f32 %v11715_v23, %v1756_v61  ;;  %3483 = vmatprep.subr.bf16.mxu0 %v7955_v11  ;;  %v7965_v9 = vld [vmem:[%s11588_s3 + $0x1e0] ss:$8 sps:$4 sm:$0xff]   ;;  %v7973_v23 = vld [vmem:[%s11588_s3 + $0x1d4] ss:$8 sps:$4 sm:$0xff]  }
 0x1cf   :  { %v1758_v57 = vpop.f32.mrf.mxu0  ;;  %v2392_v0 = vpop.f32.mrf.mxu1 }
 0x1d0   :  { %v2683_v17 = vmax.f32 %v2633_v22, 0.0  ;;  %v2577_v15 = vmax.f32 %v1943_v10, %v2390_v56  ;;  %v11717_v56 = vmax.f32 %v9246_v54, %v9248_v55  ;;  %v7970_v22 = vld [vmem:[%s11588_s3 + $0x134] ss:$8 sps:$4 sm:$0xff]  }
 0x1d1   :  { %3484 = vmatpush1.bf16.msra.mxu0 %v7953_v5  ;;  %v1759_v49 = vpop.f32.mrf.mxu0  ;;  %v2393_v8 = vpop.f32.mrf.mxu1 }
 0x1d2   :  { %v2731_v33 = vpack.c.bf16 %v2683_v17, %v2682_v59  ;;  %v1944_v53 = vmax.f32 %v11716_v3, %v1759_v49  ;;  %3485 = vmatprep.subr.bf16.mxu0 %v7958_v27  ;;  %v2634_v58 = vadd.f32 %v9859_v1, %v2577_v15  ;;  %v7968_v17 = vld [vmem:[%s11588_s3 + $0x130] ss:$8 sps:$4 sm:$0xff]  }
 0x1d3   :  { %v1761_v36 = vpop.f32.mrf.mxu0  ;;  %v2395_v11 = vpop.f32.mrf.mxu1  ;;  %v7971_v15 = vld [vmem:[%s11588_s3 + $0x1d0] ss:$8 sps:$4 sm:$0xff]  }
 0x1d4   :  { %v2578_v12 = vmax.f32 %v1944_v53, %v2393_v8  ;;  %3391 = vmatmul.mubr.bf16.vlgmr.msra.gmra.mxu1 %v2731_v33  ;;  %v2684_v57 = vmax.f32 %v2634_v58, 0.0  ;;  %v11718_v8 = vmax.f32 %v9266_v6, %v9268_v7  ;;  %v7979_v33 = vld [vmem:[%s11588_s3 + $0x1c4] ss:$8 sps:$4 sm:$0xff]   ;;  %v7974_v7 = vld [vmem:[%s11588_s3 + $0x120] ss:$8 sps:$4 sm:$0xff]  }
 0x1d5   :  { %3486 = vmatpush1.bf16.msra.mxu0 %v7956_v2  ;;  %3605 = vmatpush1.bf16.msra.mxu1 %v7959_v32  ;;  %v1764_v48 = vpop.f32.mrf.mxu0  ;;  %v2398_v45 = vpop.f32.mrf.mxu1  ;;  %v7976_v32 = vld [vmem:[%s11588_s3 + $0x124] ss:$8 sps:$4 sm:$0xff]   ;;  %v7977_v11 = vld [vmem:[%s11588_s3 + $0x1c0] ss:$8 sps:$4 sm:$0xff]  }
 0x1d6   :  { %v2635_v61 = vadd.f32 %v9859_v1, %v2578_v12  ;;  %v1945_v5 = vmax.f32 %v11717_v56, %v1764_v48  ;;  %3487 = vmatprep.subr.bf16.mxu0 %v7964_v60  ;;  %3606 = vmatprep.subr.bf16.mxu1 %v7967_v24  ;;  %v11719_v12 = vmax.f32 %v9275_v14, %v9277_v16  ;;  %v7980_v16 = vld [vmem:[%s11588_s3 + $0x110] ss:$8 sps:$4 sm:$0xff]  }
 0x1d7   :  { %v1766_v10 = vpop.f32.mrf.mxu0  ;;  %v2400_v27 = vpop.f32.mrf.mxu1  ;;  %3636 = vmatprep.mubr.bf16.mxu1 %v11711_v4 }
 0x1d8   :  { %v2685_v0 = vmax.f32 %v2635_v61, 0.0  ;;  %v2579_v59 = vmax.f32 %v1945_v5, %v2398_v45  ;;  %v7982_v45 = vld [vmem:[%s11588_s3 + $0x114] ss:$8 sps:$4 sm:$0xff]   ;;  %v7983_v10 = vld [vmem:[%s11588_s3 + $0x1b0] ss:$8 sps:$4 sm:$0xff]  }
 0x1d9   :  { %3488 = vmatpush1.bf16.msra.mxu0 %v7962_v46  ;;  %3607 = vmatpush1.bf16.msra.mxu1 %v7965_v9  ;;  %v1767_v54 = vpop.f32.mrf.mxu0  ;;  %v2401_v55 = vpop.f32.mrf.mxu1  ;;  %v7985_v46 = vld [vmem:[%s11588_s3 + $0x1b4] ss:$8 sps:$4 sm:$0xff]  }
 0x1da   :  { %v9929_v49 = vpack.c.bf16 %v2685_v0, %v2684_v57  ;;  %v1946_v2 = vmax.f32 %v11718_v8, %v1767_v54  ;;  %3489 = vmatprep.subr.bf16.mxu0 %v7970_v22  ;;  %3608 = vmatprep.subr.bf16.mxu1 %v7973_v23  ;;  %v2636_v60 = vadd.f32 %v9859_v1, %v2579_v59  ;;  %v7988_v59 = vld [vmem:[%s11588_s3 + $0x104] ss:$8 sps:$4 sm:$0xff]  }
 0x1db   :  { %v1769_v3 = vpop.f32.mrf.mxu0  ;;  %v2403_v53 = vpop.f32.mrf.mxu1  ;;  %v11720_v57 = vmax.f32 %v9289_v25, %v9291_v26  ;;  %v7991_v54 = vld [vmem:[%s11588_s3 + $0x1a4] ss:$8 sps:$4 sm:$0xff]   ;;  %v7986_v26 = vld [vmem:[%s11588_s3 + $0x100] ss:$8 sps:$4 sm:$0xff]  }
 0x1dc   :  { %v2580_v24 = vmax.f32 %v1946_v2, %v2401_v55  ;;  %v2686_v56 = vmax.f32 %v2636_v60, 0.0  ;;  %v11721_v3 = vmax.f32 %v9307_v37, %v9309_v38  ;;  %v7994_v60 = vld [vmem:[%s11588_s3 + $0x194] ss:$8 sps:$4 sm:$0xff]   ;;  %v7992_v38 = vld [vmem:[%s11588_s3 + $0x190] ss:$8 sps:$4 sm:$0xff]  }
 0x1dd   :  { %3490 = vmatpush1.bf16.msra.mxu0 %v7968_v17  ;;  %3609 = vmatpush1.bf16.msra.mxu1 %v7971_v15  ;;  %v1772_v36 = vpop.f32.mrf.mxu0  ;;  %v2406_v6 = vpop.f32.mrf.mxu1 }
 0x1de   :  { %v2637_v58 = vadd.f32 %v9859_v1, %v2580_v24  ;;  %v1947_v48 = vmax.f32 %v11719_v12, %v1772_v36  ;;  %3491 = vmatprep.subr.bf16.mxu0 %v7976_v32  ;;  %3610 = vmatprep.subr.bf16.mxu1 %v7979_v33  ;;  %v7989_v32 = vld [vmem:[%s11588_s3 + $0x1a0] ss:$8 sps:$4 sm:$0xff]   ;;  %v7997_v24 = vld [vmem:[%s11588_s3 + $0x274] ss:$8 sps:$4 sm:$0xff]  }
 0x1df   :  { %v1774_v9 = vpop.f32.mrf.mxu0  ;;  %v2408_v61 = vpop.f32.mrf.mxu1 }
 0x1e0   :  { %v2687_v5 = vmax.f32 %v2637_v58, 0.0  ;;  %v2581_v22 = vmax.f32 %v1947_v48, %v2406_v6  ;;  %v7995_v48 = vld [vmem:[%s11588_s3 + $0x270] ss:$8 sps:$4 sm:$0xff]   ;;  %v8000_v61 = vld [vmem:[%s11588_s3 + $0x184] ss:$8 sps:$4 sm:$0xff]  }
 0x1e1   :  { %3492 = vmatpush1.bf16.msra.mxu0 %v7974_v7  ;;  %3611 = vmatpush1.bf16.msra.mxu1 %v7977_v11  ;;  %v1775_v23 = vpop.f32.mrf.mxu0  ;;  %v2409_v14 = vpop.f32.mrf.mxu1 }
 0x1e2   :  { %v9963_v27 = vpack.c.bf16 %v2687_v5, %v2686_v56  ;;  %v1948_v0 = vmax.f32 %v11720_v57, %v1775_v23  ;;  %3493 = vmatprep.subr.bf16.mxu0 %v7982_v45  ;;  %3612 = vmatprep.subr.bf16.mxu1 %v7985_v46  ;;  %v2638_v15 = vadd.f32 %v9859_v1, %v2581_v22  ;;  %v8003_v56 = vld [vmem:[%s11588_s3 + $0x264] ss:$8 sps:$4 sm:$0xff]  }
 0x1e3   :  { %v1777_v55 = vpop.f32.mrf.mxu0  ;;  %v2411_v17 = vpop.f32.mrf.mxu1  ;;  %v11722_v46 = vmax.f32 %v9330_v50, %v9332_v51 }
 0x1e4   :  { %v2582_v8 = vmax.f32 %v1948_v0, %v2409_v14  ;;  %v2688_v7 = vmax.f32 %v2638_v15, 0.0  ;;  %v11723_v0 = vmax.f32 %v9339_v62, %v9341_v63 }
 0x1e5   :  { %3494 = vmatpush1.bf16.msra.mxu0 %v7980_v16  ;;  %3613 = vmatpush1.bf16.msra.mxu1 %v7983_v10  ;;  %v1780_v2 = vpop.f32.mrf.mxu0  ;;  %v2414_v25 = vpop.f32.mrf.mxu1  ;;  %v7998_v16 = vld [vmem:[%s11588_s3 + $0x180] ss:$8 sps:$4 sm:$0xff]  }
 0x1e6   :  { %v2639_v33 = vadd.f32 %v9859_v1, %v2582_v8  ;;  %v1949_v53 = vmax.f32 %v11721_v3, %v1780_v2  ;;  %3495 = vmatprep.subr.bf16.mxu0 %v7988_v59  ;;  %3614 = vmatprep.subr.bf16.mxu1 %v7991_v54  ;;  %v8001_v10 = vld [vmem:[%s11588_s3 + $0x260] ss:$8 sps:$4 sm:$0xff]   ;;  %v8009_v54 = vld [vmem:[%s11588_s3 + $0x2f4] ss:$8 sps:$4 sm:$0xff]  }
 0x1e7   :  { %v1782_v36 = vpop.f32.mrf.mxu0  ;;  %v2416_v6 = vpop.f32.mrf.mxu1 }
 0x1e8   :  { %v2689_v11 = vmax.f32 %v2639_v33, 0.0  ;;  %v2583_v58 = vmax.f32 %v1949_v53, %v2414_v25  ;;  %v8004_v25 = vld [vmem:[%s11588_s3 + $0x250] ss:$8 sps:$4 sm:$0xff]   ;;  %v11724_v33 = vmax.f32 %v9356_v19, %v9358_v20  ;;  %v8012_v53 = vld [vmem:[%s11588_s3 + $0x244] ss:$8 sps:$4 sm:$0xff]  }
 0x1e9   :  { %3496 = vmatpush1.bf16.msra.mxu0 %v7986_v26  ;;  %3615 = vmatpush1.bf16.msra.mxu1 %v7989_v32  ;;  %v1783_v12 = vpop.f32.mrf.mxu0  ;;  %v2417_v37 = vpop.f32.mrf.mxu1  ;;  %v8007_v26 = vld [vmem:[%s11588_s3 + $0x2f0] ss:$8 sps:$4 sm:$0xff]  }
 0x1ea   :  { %v9997_v45 = vpack.c.bf16 %v2689_v11, %v2688_v7  ;;  %v1950_v9 = vmax.f32 %v11722_v46, %v1783_v12  ;;  %3616 = vmatprep.subr.bf16.mxu1 %v7994_v60  ;;  %3727 = vmatprep.subr.bf16.mxu0 %v7997_v24  ;;  %v2640_v23 = vadd.f32 %v9859_v1, %v2583_v58  ;;  %v8015_v60 = vld [vmem:[%s11588_s3 + $0x2e4] ss:$8 sps:$4 sm:$0xff]   ;;  %v8010_v11 = vld [vmem:[%s11588_s3 + $0x240] ss:$8 sps:$4 sm:$0xff]  }
 0x1eb   :  { %v1785_v5 = vpop.f32.mrf.mxu0  ;;  %v2419_v22 = vpop.f32.mrf.mxu1  ;;  %v8013_v58 = vld [vmem:[%s11588_s3 + $0x2e0] ss:$8 sps:$4 sm:$0xff]  }
 0x1ec   :  { %v2584_v14 = vmax.f32 %v1950_v9, %v2417_v37  ;;  %3514 = vmatmul.mubr.bf16.vlgmr.msra.gmra.mxu0 %v9929_v49  ;;  %v8006_v49 = vld [vmem:[%s11588_s3 + $0x254] ss:$8 sps:$4 sm:$0xff]   ;;  %v2690_v15 = vmax.f32 %v2640_v23, 0.0  ;;  %v11725_v37 = vmax.f32 %v9365_v31, %v9367_v34  ;;  %v8016_v22 = vld [vmem:[%s11588_s3 + $0x230] ss:$8 sps:$4 sm:$0xff]  }
 0x1ed   :  { %3617 = vmatpush1.bf16.msra.mxu1 %v7992_v38  ;;  %3728 = vmatpush1.bf16.msra.mxu0 %v7995_v48  ;;  %v1788_v50 = vpop.f32.mrf.mxu0  ;;  %v2422_v51 = vpop.f32.mrf.mxu1  ;;  %v8021_v48 = vld [vmem:[%s11588_s3 + $0x2d4] ss:$8 sps:$4 sm:$0xff]   ;;  %v8019_v23 = vld [vmem:[%s11588_s3 + $0x2d0] ss:$8 sps:$4 sm:$0xff]  }
 0x1ee   :  { %v2641_v57 = vadd.f32 %v9859_v1, %v2584_v14  ;;  %v1951_v59 = vmax.f32 %v11723_v0, %v1788_v50  ;;  %3618 = vmatprep.subr.bf16.mxu1 %v8000_v61  ;;  %3729 = vmatprep.subr.bf16.mxu0 %v8003_v56  ;;  %v11726_v50 = vmax.f32 %v9373_v42, %v9375_v43  ;;  %v8022_v43 = vld [vmem:[%s11588_s3 + $0x220] ss:$8 sps:$4 sm:$0xff]  }
 0x1ef   :  { %v1790_v55 = vpop.f32.mrf.mxu0  ;;  %v2424_v17 = vpop.f32.mrf.mxu1  ;;  %3759 = vmatprep.mubr.bf16.mxu0 %v11711_v4 }
 0x1f0   :  { %v2691_v8 = vmax.f32 %v2641_v57, 0.0  ;;  %v2585_v2 = vmax.f32 %v1951_v59, %v2422_v51  ;;  %v8025_v55 = vld [vmem:[%s11588_s3 + $0x2c0] ss:$8 sps:$4 sm:$0xff]  }
 0x1f1   :  { %3619 = vmatpush1.bf16.msra.mxu1 %v7998_v16  ;;  %3730 = vmatpush1.bf16.msra.mxu0 %v8001_v10  ;;  %v1791_v62 = vpop.f32.mrf.mxu0  ;;  %v2425_v63 = vpop.f32.mrf.mxu1  ;;  %v8024_v16 = vld [vmem:[%s11588_s3 + $0x224] ss:$8 sps:$4 sm:$0xff]  }
 0x1f2   :  { %v10033_v32 = vpack.c.bf16 %v2691_v8, %v2690_v15  ;;  %v1952_v3 = vmax.f32 %v11724_v33, %v1791_v62  ;;  %3731 = vmatprep.subr.bf16.mxu0 %v8006_v49  ;;  %3850 = vmatprep.subr.bf16.mxu1 %v8009_v54  ;;  %v2642_v6 = vadd.f32 %v9859_v1, %v2585_v2  ;;  %v8027_v10 = vld [vmem:[%s11588_s3 + $0x2c4] ss:$8 sps:$4 sm:$0xff]   ;;  %v8030_v2 = vld [vmem:[%s11588_s3 + $0x214] ss:$8 sps:$4 sm:$0xff]  }
 0x1f3   :  { %v1793_v24 = vpop.f32.mrf.mxu0  ;;  %v2427_v36 = vpop.f32.mrf.mxu1  ;;  %v11727_v15 = vmax.f32 %v9397_v13, %v9399_v18  ;;  %v8033_v62 = vld [vmem:[%s11588_s3 + $0x2b4] ss:$8 sps:$4 sm:$0xff]   ;;  %v8028_v18 = vld [vmem:[%s11588_s3 + $0x210] ss:$8 sps:$4 sm:$0xff]  }
 0x1f4   :  { %v2586_v7 = vmax.f32 %v1952_v3, %v2425_v63  ;;  %3637 = vmatmul.mubr.bf16.vlgmr.msra.gmra.mxu1 %v9963_v27  ;;  %v8018_v27 = vld [vmem:[%s11588_s3 + $0x234] ss:$8 sps:$4 sm:$0xff]   ;;  %v2692_v61 = vmax.f32 %v2642_v6, 0.0  ;;  %v11728_v36 = vmax.f32 %v9411_v44, %v9413_v47  ;;  %v8034_v47 = vld [vmem:[%s11588_s3 + $0x200] ss:$8 sps:$4 sm:$0xff]  }
 0x1f5   :  { %3732 = vmatpush1.bf16.msra.mxu0 %v8004_v25  ;;  %3851 = vmatpush1.bf16.msra.mxu1 %v8007_v26  ;;  %v1796_v19 = vpop.f32.mrf.mxu0  ;;  %v2430_v20 = vpop.f32.mrf.mxu1 }
 0x1f6   :  { %v2643_v12 = vadd.f32 %v9859_v1, %v2586_v7  ;;  %v1953_v38 = vmax.f32 %v11725_v37, %v1796_v19  ;;  %3733 = vmatprep.subr.bf16.mxu0 %v8012_v53  ;;  %3852 = vmatprep.subr.bf16.mxu1 %v8015_v60  ;;  %v8031_v60 = vld [vmem:[%s11588_s3 + $0x2b0] ss:$8 sps:$4 sm:$0xff]   ;;  %v8036_v7 = vld [vmem:[%s11588_s3 + $0x204] ss:$8 sps:$4 sm:$0xff]  }
 0x1f7   :  { %v1798_v46 = vpop.f32.mrf.mxu0  ;;  %v2432_v9 = vpop.f32.mrf.mxu1  ;;  %3882 = vmatprep.mubr.bf16.mxu1 %v11711_v4  ;;  %v8039_v19 = vld [vmem:[%s11588_s3 + $0x2a4] ss:$8 sps:$4 sm:$0xff]  }
 0x1f8   :  { %v2693_v56 = vmax.f32 %v2643_v12, 0.0  ;;  %v2587_v5 = vmax.f32 %v1953_v38, %v2430_v20  ;;  %v8037_v38 = vld [vmem:[%s11588_s3 + $0x2a0] ss:$8 sps:$4 sm:$0xff]   ;;  %v8042_v9 = vld [vmem:[%s11588_s3 + $0x294] ss:$8 sps:$4 sm:$0xff]  }
 0x1f9   :  { %3734 = vmatpush1.bf16.msra.mxu0 %v8010_v11  ;;  %3853 = vmatpush1.bf16.msra.mxu1 %v8013_v58  ;;  %v1799_v31 = vpop.f32.mrf.mxu0  ;;  %v2433_v34 = vpop.f32.mrf.mxu1 }
 0x1fa   :  { %v10069_v14 = vpack.c.bf16 %v2693_v56, %v2692_v61  ;;  %v1954_v51 = vmax.f32 %v11726_v50, %v1799_v31  ;;  %3735 = vmatprep.subr.bf16.mxu0 %v8018_v27  ;;  %3854 = vmatprep.subr.bf16.mxu1 %v8021_v48  ;;  %v2644_v59 = vadd.f32 %v9859_v1, %v2587_v5  ;;  %v8045_v61 = vld [vmem:[%s11588_s3 + $0x374] ss:$8 sps:$4 sm:$0xff]   ;;  %v8043_v50 = vld [vmem:[%s11588_s3 + $0x370] ss:$8 sps:$4 sm:$0xff]  }
 0x1fb   :  { %v1801_v57 = vpop.f32.mrf.mxu0  ;;  %v2435_v0 = vpop.f32.mrf.mxu1  ;;  %v11729_v48 = vmax.f32 %v9429_v30, %v9431_v28  ;;  %v8040_v30 = vld [vmem:[%s11588_s3 + $0x290] ss:$8 sps:$4 sm:$0xff]  }
 0x1fc   :  { %v2588_v49 = vmax.f32 %v1954_v51, %v2433_v34  ;;  %v2694_v26 = vmax.f32 %v2644_v59, 0.0  ;;  %v8048_v57 = vld [vmem:[%s11588_s3 + $0x284] ss:$8 sps:$4 sm:$0xff]  }
 0x1fd   :  { %3736 = vmatpush1.bf16.msra.mxu0 %v8016_v22  ;;  %3855 = vmatpush1.bf16.msra.mxu1 %v8019_v23  ;;  %v1804_v54 = vpop.f32.mrf.mxu0  ;;  %v2438_v42 = vpop.f32.mrf.mxu1  ;;  %v8051_v0 = vld [vmem:[%s11588_s3 + $0x364] ss:$8 sps:$4 sm:$0xff]  }
 0x1fe   :  { %v2645_v17 = vadd.f32 %v9859_v1, %v2588_v49  ;;  %v1955_v8 = vmax.f32 %v11727_v15, %v1804_v54  ;;  %3737 = vmatprep.subr.bf16.mxu0 %v8024_v16  ;;  %3856 = vmatprep.subr.bf16.mxu1 %v8027_v10  ;;  %v11730_v16 = vmax.f32 %v9437_v35, %v9439_v40 }
 0x1ff   :  { %v1806_v63 = vpop.f32.mrf.mxu0  ;;  %v2440_v25 = vpop.f32.mrf.mxu1  ;;  %v11731_v15 = vmax.f32 %v9455_v29, %v9457_v41 }
 0x200   :  { %v2695_v33 = vmax.f32 %v2645_v17, 0.0  ;;  %v2589_v3 = vmax.f32 %v1955_v8, %v2438_v42 }
 0x201   :  { %3738 = vmatpush1.bf16.msra.mxu0 %v8022_v43  ;;  %3857 = vmatpush1.bf16.msra.mxu1 %v8025_v55  ;;  %v1807_v53 = vpop.f32.mrf.mxu0  ;;  %v2441_v13 = vpop.f32.mrf.mxu1  ;;  %v8046_v43 = vld [vmem:[%s11588_s3 + $0x280] ss:$8 sps:$4 sm:$0xff]  }
 0x202   :  { %v10103_v24 = vpack.c.bf16 %v2695_v33, %v2694_v26  ;;  %v1956_v6 = vmax.f32 %v11728_v36, %v1807_v53  ;;  %3739 = vmatprep.subr.bf16.mxu0 %v8030_v2  ;;  %3858 = vmatprep.subr.bf16.mxu1 %v8033_v62  ;;  %v2646_v58 = vadd.f32 %v9859_v1, %v2589_v3  ;;  %v8049_v55 = vld [vmem:[%s11588_s3 + $0x360] ss:$8 sps:$4 sm:$0xff]   ;;  %v8057_v2 = vld [vmem:[%s11588_s3 + $0x3f4] ss:$8 sps:$4 sm:$0xff]   ;;  %v8052_v3 = vld [vmem:[%s11588_s3 + $0x350] ss:$8 sps:$4 sm:$0xff]  }
 0x203   :  { %v1809_v20 = vpop.f32.mrf.mxu0  ;;  %v2443_v11 = vpop.f32.mrf.mxu1  ;;  %v8055_v53 = vld [vmem:[%s11588_s3 + $0x3f0] ss:$8 sps:$4 sm:$0xff]   ;;  %v8060_v36 = vld [vmem:[%s11588_s3 + $0x344] ss:$8 sps:$4 sm:$0xff]  }
 0x204   :  { %v2590_v12 = vmax.f32 %v1956_v6, %v2441_v13  ;;  %v2696_v31 = vmax.f32 %v2646_v58, 0.0  ;;  %v8063_v6 = vld [vmem:[%s11588_s3 + $0x3e4] ss:$8 sps:$4 sm:$0xff]   ;;  %v8058_v58 = vld [vmem:[%s11588_s3 + $0x340] ss:$8 sps:$4 sm:$0xff]  }
 0x205   :  { %3740 = vmatpush1.bf16.msra.mxu0 %v8028_v18  ;;  %3859 = vmatpush1.bf16.msra.mxu1 %v8031_v60  ;;  %v1812_v37 = vpop.f32.mrf.mxu0  ;;  %v2446_v44 = vpop.f32.mrf.mxu1  ;;  %v11732_v18 = vmax.f32 %v9463_v52, %v9465_v39 }
 0x206   :  { %v2647_v27 = vadd.f32 %v9859_v1, %v2590_v12  ;;  %v1957_v46 = vmax.f32 %v11729_v48, %v1812_v37  ;;  %3741 = vmatprep.subr.bf16.mxu0 %v8036_v7  ;;  %3860 = vmatprep.subr.bf16.mxu1 %v8039_v19  ;;  %v8061_v12 = vld [vmem:[%s11588_s3 + $0x3e0] ss:$8 sps:$4 sm:$0xff]  }
 0x207   :  { %v1814_v56 = vpop.f32.mrf.mxu0  ;;  %v2448_v5 = vpop.f32.mrf.mxu1 }
 0x208   :  { %v2697_v34 = vmax.f32 %v2647_v27, 0.0  ;;  %v2591_v22 = vmax.f32 %v1957_v46, %v2446_v44  ;;  %v11733_v44 = vld [vmem:[#allocation2_spill] sm:$0xff]  ;;  %v8069_v27 = vld [vmem:[%s11588_s3 + $0x3d4] ss:$8 sps:$4 sm:$0xff]  }
 0x209   :  { %3742 = vmatpush1.bf16.msra.mxu0 %v8034_v47  ;;  %3861 = vmatpush1.bf16.msra.mxu1 %v8037_v38  ;;  %v1815_v23 = vpop.f32.mrf.mxu0  ;;  %v2449_v28 = vpop.f32.mrf.mxu1  ;;  %v11734_v47 = vmax.f32 %v9484_v21, %v11733_v44  ;;  %v8082_v44 = vld [vmem:[%s11588_s3 + $0x300] ss:$8 sps:$4 sm:$0xff]  }
 0x20a   :  { %v10137_v51 = vpack.c.bf16 %v2697_v34, %v2696_v31  ;;  %v1958_v10 = vmax.f32 %v11730_v16, %v1815_v23  ;;  %3862 = vmatprep.subr.bf16.mxu1 %v8042_v9  ;;  %3973 = vmatprep.subr.bf16.mxu0 %v8045_v61  ;;  %v2648_v54 = vadd.f32 %v9859_v1, %v2591_v22  ;;  %v8064_v31 = vld [vmem:[%s11588_s3 + $0x330] ss:$8 sps:$4 sm:$0xff]   ;;  %v11735_v23 = vld [vmem:[#allocation3_spill] sm:$0xff] }
 0x20b   :  { %v1817_v59 = vpop.f32.mrf.mxu0  ;;  %v2451_v49 = vpop.f32.mrf.mxu1  ;;  %v8067_v34 = vld [vmem:[%s11588_s3 + $0x3d0] ss:$8 sps:$4 sm:$0xff]   ;;  %v8072_v16 = vld [vmem:[%s11588_s3 + $0x324] ss:$8 sps:$4 sm:$0xff]  }
 0x20c   :  { %v2592_v42 = vmax.f32 %v1958_v10, %v2449_v28  ;;  %3760 = vmatmul.mubr.bf16.vlgmr.msra.gmra.mxu0 %v9997_v45  ;;  %v8054_v45 = vld [vmem:[%s11588_s3 + $0x354] ss:$8 sps:$4 sm:$0xff]   ;;  %v2698_v25 = vmax.f32 %v2648_v54, 0.0  ;;  %v8075_v10 = vld [vmem:[%s11588_s3 + $0x3c4] ss:$8 sps:$4 sm:$0xff]  }
 0x20d   :  { %3863 = vmatpush1.bf16.msra.mxu1 %v8040_v30  ;;  %3974 = vmatpush1.bf16.msra.mxu0 %v8043_v50  ;;  %v1820_v35 = vpop.f32.mrf.mxu0  ;;  %v2454_v40 = vpop.f32.mrf.mxu1  ;;  %v11736_v28 = vld [vmem:[#allocation4_spill] sm:$0xff] }
 0x20e   :  { %v2649_v17 = vadd.f32 %v9859_v1, %v2592_v42  ;;  %v1959_v8 = vmax.f32 %v11731_v15, %v1820_v35  ;;  %3864 = vmatprep.subr.bf16.mxu1 %v8048_v57  ;;  %3975 = vmatprep.subr.bf16.mxu0 %v8051_v0  ;;  %v11737_v30 = vmax.f32 %v11735_v23, %v11736_v28  ;;  %v8070_v35 = vld [vmem:[%s11588_s3 + $0x320] ss:$8 sps:$4 sm:$0xff]  }
 0x20f   :  { %v1822_v62 = vpop.f32.mrf.mxu0  ;;  %v2456_v63 = vpop.f32.mrf.mxu1  ;;  %4005 = vmatprep.mubr.bf16.mxu0 %v11711_v4 }
 0x210   :  { %v2699_v26 = vmax.f32 %v2649_v17, 0.0  ;;  %v2593_v33 = vmax.f32 %v1959_v8, %v2454_v40  ;;  %v8073_v40 = vld [vmem:[%s11588_s3 + $0x3c0] ss:$8 sps:$4 sm:$0xff]  }
 0x211   :  { %3865 = vmatpush1.bf16.msra.mxu1 %v8046_v43  ;;  %3976 = vmatpush1.bf16.msra.mxu0 %v8049_v55  ;;  %v1823_v41 = vpop.f32.mrf.mxu0  ;;  %v2457_v29 = vpop.f32.mrf.mxu1  ;;  %v11738_v55 = vld [vmem:[#allocation5_spill] sm:$0xff]  ;;  %v11739_v17 = vld [vmem:[#allocation6_spill] sm:$0xff] }
 0x212   :  { %v10173_v13 = vpack.c.bf16 %v2699_v26, %v2698_v25  ;;  %v1960_v60 = vmax.f32 %v11732_v18, %v1823_v41  ;;  %3977 = vmatprep.subr.bf16.mxu0 %v8054_v45  ;;  %4096 = vmatprep.subr.bf16.mxu1 %v8057_v2  ;;  %v2650_v20 = vadd.f32 %v9859_v1, %v2593_v33  ;;  %v8078_v45 = vld [vmem:[%s11588_s3 + $0x314] ss:$8 sps:$4 sm:$0xff]  }
 0x213   :  { %v1825_v7 = vpop.f32.mrf.mxu0  ;;  %v2459_v19 = vpop.f32.mrf.mxu1  ;;  %v11740_v15 = vmax.f32 %v11738_v55, %v11739_v17  ;;  %v8081_v2 = vld [vmem:[%s11588_s3 + $0x3b4] ss:$8 sps:$4 sm:$0xff]  }
 0x214   :  { %v2594_v11 = vmax.f32 %v1960_v60, %v2457_v29  ;;  %3883 = vmatmul.mubr.bf16.vlgmr.msra.gmra.mxu1 %v10033_v32  ;;  %v8066_v32 = vld [vmem:[%s11588_s3 + $0x334] ss:$8 sps:$4 sm:$0xff]   ;;  %v2700_v9 = vmax.f32 %v2650_v20, 0.0  ;;  %v11741_v60 = vld [vmem:[#allocation7_spill] sm:$0xff] }
 0x215   :  { %3978 = vmatpush1.bf16.msra.mxu0 %v8052_v3  ;;  %4097 = vmatpush1.bf16.msra.mxu1 %v8055_v53  ;;  %v1828_v39 = vpop.f32.mrf.mxu0  ;;  %v2462_v52 = vpop.f32.mrf.mxu1  ;;  %v8076_v3 = vld [vmem:[%s11588_s3 + $0x310] ss:$8 sps:$4 sm:$0xff]   ;;  %v8084_v19 = vld [vmem:[%s11588_s3 + $0x304] ss:$8 sps:$4 sm:$0xff]  }
 0x216   :  { %v2651_v37 = vadd.f32 %v9859_v1, %v2594_v11  ;;  %v1961_v38 = vmax.f32 %v11734_v47, %v1828_v39  ;;  %3979 = vmatprep.subr.bf16.mxu0 %v8060_v36  ;;  %4098 = vmatprep.subr.bf16.mxu1 %v8063_v6  ;;  %v8079_v53 = vld [vmem:[%s11588_s3 + $0x3b0] ss:$8 sps:$4 sm:$0xff]   ;;  %v8087_v20 = vld [vmem:[%s11588_s3 + $0x3a4] ss:$8 sps:$4 sm:$0xff]   ;;  %v8085_v47 = vld [vmem:[%s11588_s3 + $0x3a0] ss:$8 sps:$4 sm:$0xff]  }
 0x217   :  { %v1830_v48 = vpop.f32.mrf.mxu0  ;;  %v2464_v46 = vpop.f32.mrf.mxu1  ;;  %4128 = vmatprep.mubr.bf16.mxu1 %v11711_v4  ;;  %v11742_v36 = vld [vmem:[#allocation8_spill] sm:$0xff] }
 0x218   :  { %v2701_v61 = vmax.f32 %v2651_v37, 0.0  ;;  %v2595_v56 = vmax.f32 %v1961_v38, %v2462_v52  ;;  %v11743_v6 = vmax.f32 %v11741_v60, %v11742_v36 }
 0x219   :  { %3980 = vmatpush1.bf16.msra.mxu0 %v8058_v58  ;;  %4099 = vmatpush1.bf16.msra.mxu1 %v8061_v12  ;;  %v1831_v21 = vpop.f32.mrf.mxu0  ;;  %v2465_v5 = vpop.f32.mrf.mxu1 }
 0x21a   :  { %v10209_v22 = vpack.c.bf16 %v2701_v61, %v2700_v9  ;;  %v1962_v50 = vmax.f32 %v11737_v30, %v1831_v21  ;;  %3981 = vmatprep.subr.bf16.mxu0 %v8066_v32  ;;  %4100 = vmatprep.subr.bf16.mxu1 %v8069_v27  ;;  %v2652_v59 = vadd.f32 %v9859_v1, %v2595_v56  ;;  %v11744_v32 = vld [vmem:[#allocation9_spill] sm:$0xff]  ;;  %v11745_v27 = vld [vmem:[#allocation10_spill] sm:$0xff] }
 0x21b   :  { %v1833_v57 = vpop.f32.mrf.mxu0  ;;  %v2467_v0 = vpop.f32.mrf.mxu1  ;;  %v11746_v48 = vmax.f32 %v11744_v32, %v11745_v27  ;;  %v8090_v9 = vld [vmem:[%s11588_s3 + $0x394] ss:$8 sps:$4 sm:$0xff]   ;;  %v8088_v30 = vld [vmem:[%s11588_s3 + $0x390] ss:$8 sps:$4 sm:$0xff]  }
 0x21c   :  { %v2596_v49 = vmax.f32 %v1962_v50, %v2465_v5  ;;  %v2702_v25 = vmax.f32 %v2652_v59, 0.0  ;;  %v8093_v61 = vld [vmem:[%s11588_s3 + $0x474] ss:$8 sps:$4 sm:$0xff]   ;;  %v8091_v50 = vld [vmem:[%s11588_s3 + $0x470] ss:$8 sps:$4 sm:$0xff]  }
 0x21d   :  { %3982 = vmatpush1.bf16.msra.mxu0 %v8064_v31  ;;  %4101 = vmatpush1.bf16.msra.mxu1 %v8067_v34  ;;  %v1836_v54 = vpop.f32.mrf.mxu0  ;;  %v2470_v42 = vpop.f32.mrf.mxu1  ;;  %v11748_v57 = vld [vmem:[#allocation12_spill] sm:$0xff] }
 0x21e   :  { %v2653_v43 = vadd.f32 %v9859_v1, %v2596_v49  ;;  %v1963_v8 = vmax.f32 %v11740_v15, %v1836_v54  ;;  %3983 = vmatprep.subr.bf16.mxu0 %v8072_v16  ;;  %4102 = vmatprep.subr.bf16.mxu1 %v8075_v10  ;;  %v11747_v10 = vld [vmem:[#allocation11_spill] sm:$0xff] }
 0x21f   :  { %v1838_v62 = vpop.f32.mrf.mxu0  ;;  %v2472_v63 = vpop.f32.mrf.mxu1  ;;  %v11749_v0 = vmax.f32 %v11747_v10, %v11748_v57  ;;  %v8096_v49 = vld [vmem:[%s11588_s3 + $0x384] ss:$8 sps:$4 sm:$0xff]   ;;  %v8094_v15 = vld [vmem:[%s11588_s3 + $0x380] ss:$8 sps:$4 sm:$0xff]  }
 0x220   :  { %v2703_v26 = vmax.f32 %v2653_v43, 0.0  ;;  %v2597_v33 = vmax.f32 %v1963_v8, %v2470_v42  ;;  %v8099_v54 = vld [vmem:[%s11588_s3 + $0x464] ss:$8 sps:$4 sm:$0xff]   ;;  %v8097_v8 = vld [vmem:[%s11588_s3 + $0x460] ss:$8 sps:$4 sm:$0xff]  }
 0x221   :  { %3984 = vmatpush1.bf16.msra.mxu0 %v8070_v35  ;;  %4103 = vmatpush1.bf16.msra.mxu1 %v8073_v40  ;;  %v1839_v41 = vpop.f32.mrf.mxu0  ;;  %v2473_v29 = vpop.f32.mrf.mxu1  ;;  %v11751_v62 = vld [vmem:[#allocation14_spill] sm:$0xff] }
 0x222   :  { %v10243_v18 = vpack.c.bf16 %v2703_v26, %v2702_v25  ;;  %v1964_v7 = vmax.f32 %v11743_v6, %v1839_v41  ;;  %3985 = vmatprep.subr.bf16.mxu0 %v8078_v45  ;;  %4104 = vmatprep.subr.bf16.mxu1 %v8081_v2  ;;  %v2654_v52 = vadd.f32 %v9859_v1, %v2597_v33  ;;  %v11750_v2 = vld [vmem:[#allocation13_spill] sm:$0xff] }
 0x223   :  { %v1841_v11 = vpop.f32.mrf.mxu0  ;;  %v2475_v39 = vpop.f32.mrf.mxu1  ;;  %v11752_v63 = vmax.f32 %v11750_v2, %v11751_v62  ;;  %v8105_v26 = vld [vmem:[%s11588_s3 + $0x4f4] ss:$8 sps:$4 sm:$0xff]   ;;  %v8100_v6 = vld [vmem:[%s11588_s3 + $0x450] ss:$8 sps:$4 sm:$0xff]  }
 0x224   :  { %v2598_v58 = vmax.f32 %v1964_v7, %v2473_v29  ;;  %v2704_v5 = vmax.f32 %v2654_v52, 0.0  ;;  %v8103_v7 = vld [vmem:[%s11588_s3 + $0x4f0] ss:$8 sps:$4 sm:$0xff]  }
 0x225   :  { %3986 = vmatpush1.bf16.msra.mxu0 %v8076_v3  ;;  %4105 = vmatpush1.bf16.msra.mxu1 %v8079_v53  ;;  %v1844_v12 = vpop.f32.mrf.mxu0  ;;  %v2478_v37 = vpop.f32.mrf.mxu1  ;;  %v11754_v11 = vld [vmem:[#allocation16_spill] sm:$0xff] }
 0x226   :  { %v2655_v38 = vadd.f32 %v9859_v1, %v2598_v58  ;;  %v1965_v46 = vmax.f32 %v11746_v48, %v1844_v12  ;;  %3987 = vmatprep.subr.bf16.mxu0 %v8084_v19  ;;  %4106 = vmatprep.subr.bf16.mxu1 %v8087_v20  ;;  %v11753_v20 = vld [vmem:[#allocation15_spill] sm:$0xff] }
 0x227   :  { %v1846_v56 = vpop.f32.mrf.mxu0  ;;  %v2480_v21 = vpop.f32.mrf.mxu1  ;;  %v11755_v39 = vmax.f32 %v11753_v20, %v11754_v11  ;;  %v8108_v58 = vld [vmem:[%s11588_s3 + $0x444] ss:$8 sps:$4 sm:$0xff]   ;;  %v8106_v48 = vld [vmem:[%s11588_s3 + $0x440] ss:$8 sps:$4 sm:$0xff]  }
 0x228   :  { %v2705_v31 = vmax.f32 %v2655_v38, 0.0  ;;  %v2599_v34 = vmax.f32 %v1965_v46, %v2478_v37  ;;  %v8111_v12 = vld [vmem:[%s11588_s3 + $0x4e4] ss:$8 sps:$4 sm:$0xff]   ;;  %v8109_v46 = vld [vmem:[%s11588_s3 + $0x4e0] ss:$8 sps:$4 sm:$0xff]  }
 0x229   :  { %3988 = vmatpush1.bf16.msra.mxu0 %v8082_v44  ;;  %4107 = vmatpush1.bf16.msra.mxu1 %v8085_v47  ;;  %v1847_v23 = vpop.f32.mrf.mxu0  ;;  %v2481_v28 = vpop.f32.mrf.mxu1  ;;  %v11757_v56 = vld [vmem:[#allocation18_spill] sm:$0xff] }
 0x22a   :  { %v10277_v16 = vpack.c.bf16 %v2705_v31, %v2704_v5  ;;  %v1966_v59 = vmax.f32 %v11749_v0, %v1847_v23  ;;  %4108 = vmatprep.subr.bf16.mxu1 %v8090_v9  ;;  %4219 = vmatprep.subr.bf16.mxu0 %v8093_v61  ;;  %v2656_v40 = vadd.f32 %v9859_v1, %v2599_v34  ;;  %v11756_v61 = vld [vmem:[#allocation17_spill] sm:$0xff] }
 0x22b   :  { %v1849_v42 = vpop.f32.mrf.mxu0  ;;  %v2483_v35 = vpop.f32.mrf.mxu1  ;;  %v11758_v21 = vmax.f32 %v11756_v61, %v11757_v56  ;;  %v8117_v31 = vld [vmem:[%s11588_s3 + $0x4d4] ss:$8 sps:$4 sm:$0xff]   ;;  %v8112_v0 = vld [vmem:[%s11588_s3 + $0x430] ss:$8 sps:$4 sm:$0xff]  }
 0x22c   :  { %v2600_v43 = vmax.f32 %v1966_v59, %v2481_v28  ;;  %4006 = vmatmul.mubr.bf16.vlgmr.msra.gmra.mxu0 %v10069_v14  ;;  %v8102_v14 = vld [vmem:[%s11588_s3 + $0x454] ss:$8 sps:$4 sm:$0xff]   ;;  %v2706_v29 = vmax.f32 %v2656_v40, 0.0  ;;  %v8115_v59 = vld [vmem:[%s11588_s3 + $0x4d0] ss:$8 sps:$4 sm:$0xff]  }
 0x22d   :  { %4109 = vmatpush1.bf16.msra.mxu1 %v8088_v30  ;;  %4220 = vmatpush1.bf16.msra.mxu0 %v8091_v50  ;;  %v1852_v55 = vpop.f32.mrf.mxu0  ;;  %v2486_v17 = vpop.f32.mrf.mxu1  ;;  %v11760_v42 = vld [vmem:[#allocation20_spill] sm:$0xff] }
 0x22e   :  { %v2657_v45 = vadd.f32 %v9859_v1, %v2600_v43  ;;  %v1967_v25 = vmax.f32 %v11752_v63, %v1852_v55  ;;  %4110 = vmatprep.subr.bf16.mxu1 %v8096_v49  ;;  %4221 = vmatprep.subr.bf16.mxu0 %v8099_v54  ;;  %v11759_v54 = vld [vmem:[#allocation19_spill] sm:$0xff] }
 0x22f   :  { %v1854_v33 = vpop.f32.mrf.mxu0  ;;  %v2488_v41 = vpop.f32.mrf.mxu1  ;;  %4251 = vmatprep.mubr.bf16.mxu0 %v11711_v4  ;;  %v11761_v35 = vmax.f32 %v11759_v54, %v11760_v42  ;;  %v8120_v43 = vld [vmem:[%s11588_s3 + $0x424] ss:$8 sps:$4 sm:$0xff]   ;;  %v8118_v63 = vld [vmem:[%s11588_s3 + $0x420] ss:$8 sps:$4 sm:$0xff]  }
 0x230   :  { %v2707_v3 = vmax.f32 %v2657_v45, 0.0  ;;  %v2601_v53 = vmax.f32 %v1967_v25, %v2486_v17  ;;  %v8123_v55 = vld [vmem:[%s11588_s3 + $0x4c4] ss:$8 sps:$4 sm:$0xff]   ;;  %v8121_v25 = vld [vmem:[%s11588_s3 + $0x4c0] ss:$8 sps:$4 sm:$0xff]  }
 0x231   :  { %4111 = vmatpush1.bf16.msra.mxu1 %v8094_v15  ;;  %4222 = vmatpush1.bf16.msra.mxu0 %v8097_v8  ;;  %v1855_v60 = vpop.f32.mrf.mxu0  ;;  %v2489_v36 = vpop.f32.mrf.mxu1  ;;  %v11763_v33 = vld [vmem:[#allocation22_spill] sm:$0xff] }
 0x232   :  { %v10313_v19 = vpack.c.bf16 %v2707_v3, %v2706_v29  ;;  %v1968_v52 = vmax.f32 %v11755_v39, %v1855_v60  ;;  %4223 = vmatprep.subr.bf16.mxu0 %v8102_v14  ;;  %4342 = vmatprep.subr.bf16.mxu1 %v8105_v26  ;;  %v2658_v47 = vadd.f32 %v9859_v1, %v2601_v53  ;;  %v11762_v26 = vld [vmem:[#allocation21_spill] sm:$0xff] }
 0x233   :  { %v1857_v37 = vpop.f32.mrf.mxu0  ;;  %v2491_v44 = vpop.f32.mrf.mxu1  ;;  %v11764_v41 = vmax.f32 %v11762_v26, %v11763_v33  ;;  %v8126_v3 = vld [vmem:[%s11588_s3 + $0x414] ss:$8 sps:$4 sm:$0xff]   ;;  %v8124_v39 = vld [vmem:[%s11588_s3 + $0x410] ss:$8 sps:$4 sm:$0xff]  }
 0x234   :  { %v2602_v38 = vmax.f32 %v1968_v52, %v2489_v36  ;;  %4129 = vmatmul.mubr.bf16.vlgmr.msra.gmra.mxu1 %v10103_v24  ;;  %v8114_v24 = vld [vmem:[%s11588_s3 + $0x434] ss:$8 sps:$4 sm:$0xff]   ;;  %v2708_v28 = vmax.f32 %v2658_v47, 0.0  ;;  %v8127_v52 = vld [vmem:[%s11588_s3 + $0x4b0] ss:$8 sps:$4 sm:$0xff]  }
 0x235   :  { %4224 = vmatpush1.bf16.msra.mxu0 %v8100_v6  ;;  %4343 = vmatpush1.bf16.msra.mxu1 %v8103_v7  ;;  %v1860_v32 = vpop.f32.mrf.mxu0  ;;  %v2494_v27 = vpop.f32.mrf.mxu1  ;;  %v8129_v53 = vld [vmem:[%s11588_s3 + $0x4b4] ss:$8 sps:$4 sm:$0xff]  }
 0x236   :  { %v2659_v9 = vadd.f32 %v9859_v1, %v2602_v38  ;;  %v1969_v5 = vmax.f32 %v11758_v21, %v1860_v32  ;;  %4225 = vmatprep.subr.bf16.mxu0 %v8108_v58  ;;  %4344 = vmatprep.subr.bf16.mxu1 %v8111_v12  ;;  %v11765_v12 = vld [vmem:[#allocation23_spill] sm:$0xff]  ;;  %v11766_v37 = vld [vmem:[#allocation24_spill] sm:$0xff] }
 0x237   :  { %v1862_v34 = vpop.f32.mrf.mxu0  ;;  %v2496_v23 = vpop.f32.mrf.mxu1  ;;  %4374 = vmatprep.mubr.bf16.mxu1 %v11711_v4  ;;  %v11767_v44 = vmax.f32 %v11765_v12, %v11766_v37  ;;  %v8132_v38 = vld [vmem:[%s11588_s3 + $0x404] ss:$8 sps:$4 sm:$0xff]  }
 0x238   :  { %v2709_v30 = vmax.f32 %v2659_v9, 0.0  ;;  %v2603_v50 = vmax.f32 %v1969_v5, %v2494_v27  ;;  %v8135_v32 = vld [vmem:[%s11588_s3 + $0x4a4] ss:$8 sps:$4 sm:$0xff]   ;;  %v8130_v5 = vld [vmem:[%s11588_s3 + $0x400] ss:$8 sps:$4 sm:$0xff]   ;;  %v11768_v34 = vld [vmem:[#allocation25_spill] sm:$0xff] }
 0x239   :  { %4226 = vmatpush1.bf16.msra.mxu0 %v8106_v48  ;;  %4345 = vmatpush1.bf16.msra.mxu1 %v8109_v46  ;;  %v1863_v10 = vpop.f32.mrf.mxu0  ;;  %v2497_v57 = vpop.f32.mrf.mxu1  ;;  %v10397_v46 = vld [vmem:[%s11589_s2] ss:$0 sm:$0xff] }
 0x23a   :  { %v10349_v49 = vpack.c.bf16 %v2709_v30, %v2708_v28  ;;  %v1970_v40 = vmax.f32 %v11761_v35, %v1863_v10  ;;  %4227 = vmatprep.subr.bf16.mxu0 %v8114_v24  ;;  %4346 = vmatprep.subr.bf16.mxu1 %v8117_v31  ;;  %v2660_v8 = vadd.f32 %v9859_v1, %v2603_v50  ;;  %v8133_v24 = vld [vmem:[%s11588_s3 + $0x4a0] ss:$8 sps:$4 sm:$0xff]   ;;  %v8138_v50 = vld [vmem:[%s11588_s3 + $0x494] ss:$8 sps:$4 sm:$0xff]  }
 0x23b   :  { %v1865_v17 = vpop.f32.mrf.mxu0  ;;  %v2499_v15 = vpop.f32.mrf.mxu1  ;;  %v11769_v23 = vld [vmem:[#allocation26_spill] sm:$0xff]  ;;  %v8141_v10 = vld [vmem:[%s11588_s3 + $0x574] ss:$8 sps:$4 sm:$0xff]  }
 0x23c   :  { %v2604_v45 = vmax.f32 %v1970_v40, %v2497_v57  ;;  %v2710_v6 = vmax.f32 %v2660_v8, 0.0  ;;  %v11770_v28 = vmax.f32 %v11768_v34, %v11769_v23  ;;  %v11771_v15 = vld [vmem:[#allocation27_spill] sm:$0xff]  ;;  %v11772_v8 = vld [vmem:[#allocation28_spill] sm:$0xff] }
 0x23d   :  { %4228 = vmatpush1.bf16.msra.mxu0 %v8112_v0  ;;  %4347 = vmatpush1.bf16.msra.mxu1 %v8115_v59  ;;  %v1868_v2 = vpop.f32.mrf.mxu0  ;;  %v2502_v62 = vpop.f32.mrf.mxu1 }
 0x23e   :  { %v2661_v14 = vadd.f32 %v9859_v1, %v2604_v45  ;;  %v1971_v29 = vmax.f32 %v11764_v41, %v1868_v2  ;;  %4229 = vmatprep.subr.bf16.mxu0 %v8120_v43  ;;  %4348 = vmatprep.subr.bf16.mxu1 %v8123_v55  ;;  %v8136_v43 = vld [vmem:[%s11588_s3 + $0x490] ss:$8 sps:$4 sm:$0xff]   ;;  %v11773_v45 = vmax.f32 %v11771_v15, %v11772_v8 }
 0x23f   :  { %v1870_v60 = vpop.f32.mrf.mxu0  ;;  %v2504_v36 = vpop.f32.mrf.mxu1  ;;  %v8139_v55 = vld [vmem:[%s11588_s3 + $0x570] ss:$8 sps:$4 sm:$0xff]  }
 0x240   :  { %v2711_v7 = vmax.f32 %v2661_v14, 0.0  ;;  %v2605_v20 = vmax.f32 %v1971_v29, %v2502_v62  ;;  %v8144_v62 = vld [vmem:[%s11588_s3 + $0x484] ss:$8 sps:$4 sm:$0xff]   ;;  %v11774_v36 = vld [vmem:[#allocation29_spill] sm:$0xff] }
 0x241   :  { %4230 = vmatpush1.bf16.msra.mxu0 %v8118_v63  ;;  %4349 = vmatpush1.bf16.msra.mxu1 %v8121_v25  ;;  %v1871_v1 = vpop.f32.mrf.mxu0  ;;  %v2505_v11 = vpop.f32.mrf.mxu1  ;;  %v8147_v63 = vld [vmem:[%s11588_s3 + $0x564] ss:$8 sps:$4 sm:$0xff]  }
 0x242   :  { %v10383_v58 = vpack.c.bf16 %v2711_v7, %v2710_v6  ;;  %v1972_v47 = vmax.f32 %v11767_v44, %v1871_v1  ;;  %4231 = vmatprep.subr.bf16.mxu0 %v8126_v3  ;;  %4350 = vmatprep.subr.bf16.mxu1 %v8129_v53  ;;  %v2662_v9 = vadd.f32 %v10397_v46, %v2605_v20  ;;  %v8142_v3 = vld [vmem:[%s11588_s3 + $0x480] ss:$8 sps:$4 sm:$0xff]   ;;  %v8153_v1 = vld [vmem:[%s11588_s3 + $0x5f4] ss:$8 sps:$4 sm:$0xff]  }
 0x243   :  { %v1873_v27 = vpop.f32.mrf.mxu0  ;;  %v2507_v48 = vpop.f32.mrf.mxu1  ;;  %v8145_v53 = vld [vmem:[%s11588_s3 + $0x560] ss:$8 sps:$4 sm:$0xff]  }
 0x244   :  { %v2606_v61 = vmax.f32 %v1972_v47, %v2505_v11  ;;  %v2712_v59 = vmax.f32 %v2662_v9, 0.0  ;;  %v11775_v6 = vld [vmem:[#allocation30_spill] sm:$0xff]  ;;  %v11777_v48 = vld [vmem:[#allocation31_spill] sm:$0xff]  ;;  %v11778_v9 = vld [vmem:[#allocation32_spill] sm:$0xff] }
 0x245   :  { %4232 = vmatpush1.bf16.msra.mxu0 %v8124_v39  ;;  %4351 = vmatpush1.bf16.msra.mxu1 %v8127_v52  ;;  %v1876_v56 = vpop.f32.mrf.mxu0  ;;  %v2510_v21 = vpop.f32.mrf.mxu1  ;;  %v11776_v7 = vmax.f32 %v11774_v36, %v11775_v6 }
 0x246   :  { %v2663_v31 = vadd.f32 %v10397_v46, %v2606_v61  ;;  %v1973_v30 = vmax.f32 %v11770_v28, %v1876_v56  ;;  %4233 = vmatprep.subr.bf16.mxu0 %v8132_v38  ;;  %4352 = vmatprep.subr.bf16.mxu1 %v8135_v32  ;;  %v8148_v38 = vld [vmem:[%s11588_s3 + $0x550] ss:$8 sps:$4 sm:$0xff]   ;;  %v11779_v61 = vmax.f32 %v11777_v48, %v11778_v9 }
 0x247   :  { %v1878_v57 = vpop.f32.mrf.mxu0  ;;  %v2512_v0 = vpop.f32.mrf.mxu1  ;;  %v8151_v32 = vld [vmem:[%s11588_s3 + $0x5f0] ss:$8 sps:$4 sm:$0xff]  }
 0x248   :  { %v2713_v54 = vmax.f32 %v2663_v31, 0.0  ;;  %v2607_v42 = vmax.f32 %v1973_v30, %v2510_v21  ;;  %v8156_v21 = vld [vmem:[%s11588_s3 + $0x544] ss:$8 sps:$4 sm:$0xff]   ;;  %v11780_v0 = vld [vmem:[#allocation33_spill] sm:$0xff] }
 0x249   :  { %4234 = vmatpush1.bf16.msra.mxu0 %v8130_v5  ;;  %4353 = vmatpush1.bf16.msra.mxu1 %v8133_v24  ;;  %v1879_v35 = vpop.f32.mrf.mxu0  ;;  %v2513_v40 = vpop.f32.mrf.mxu1  ;;  %v8159_v5 = vld [vmem:[%s11588_s3 + $0x5e4] ss:$8 sps:$4 sm:$0xff]  }
 0x24a   :  { %v10422_v17 = vpack.c.bf16 %v2713_v54, %v2712_v59  ;;  %v1974_v2 = vmax.f32 %v11773_v45, %v1879_v35  ;;  %4354 = vmatprep.subr.bf16.mxu1 %v8138_v50  ;;  %4465 = vmatprep.subr.bf16.mxu0 %v8141_v10  ;;  %v2664_v26 = vadd.f32 %v10397_v46, %v2607_v42  ;;  %v8154_v50 = vld [vmem:[%s11588_s3 + $0x540] ss:$8 sps:$4 sm:$0xff]   ;;  %v8165_v35 = vld [vmem:[%s11588_s3 + $0x5d4] ss:$8 sps:$4 sm:$0xff]  }
 0x24b   :  { %v1881_v25 = vpop.f32.mrf.mxu0  ;;  %v2515_v14 = vpop.f32.mrf.mxu1  ;;  %v8157_v10 = vld [vmem:[%s11588_s3 + $0x5e0] ss:$8 sps:$4 sm:$0xff]  }
 0x24c   :  { %v2608_v33 = vmax.f32 %v1974_v2, %v2513_v40  ;;  %4252 = vmatmul.mubr.bf16.vlgmr.msra.gmra.mxu0 %v10137_v51  ;;  %v8150_v51 = vld [vmem:[%s11588_s3 + $0x554] ss:$8 sps:$4 sm:$0xff]   ;;  %v2714_v52 = vmax.f32 %v2664_v26, 0.0  ;;  %v11781_v59 = vld [vmem:[#allocation34_spill] sm:$0xff]  ;;  %v11783_v14 = vld [vmem:[#allocation35_spill] sm:$0xff] }
 0x24d   :  { %4355 = vmatpush1.bf16.msra.mxu1 %v8136_v43  ;;  %4466 = vmatpush1.bf16.msra.mxu0 %v8139_v55  ;;  %v1884_v41 = vpop.f32.mrf.mxu0  ;;  %v2518_v29 = vpop.f32.mrf.mxu1  ;;  %v11782_v54 = vmax.f32 %v11780_v0, %v11781_v59  ;;  %v11784_v26 = vld [vmem:[#allocation36_spill] sm:$0xff] }
 0x24e   :  { %v2665_v60 = vadd.f32 %v10397_v46, %v2608_v33  ;;  %v1975_v20 = vmax.f32 %v11776_v7, %v1884_v41  ;;  %4356 = vmatprep.subr.bf16.mxu1 %v8144_v62  ;;  %4467 = vmatprep.subr.bf16.mxu0 %v8147_v63  ;;  %v8160_v62 = vld [vmem:[%s11588_s3 + $0x530] ss:$8 sps:$4 sm:$0xff]   ;;  %v11785_v33 = vmax.f32 %v11783_v14, %v11784_v26 }
 0x24f   :  { %v1886_v11 = vpop.f32.mrf.mxu0  ;;  %v2520_v39 = vpop.f32.mrf.mxu1  ;;  %4497 = vmatprep.mubr.bf16.mxu0 %v11711_v4  ;;  %v8163_v63 = vld [vmem:[%s11588_s3 + $0x5d0] ss:$8 sps:$4 sm:$0xff]  }
 0x250   :  { %v2715_v12 = vmax.f32 %v2665_v60, 0.0  ;;  %v2609_v37 = vmax.f32 %v1975_v20, %v2518_v29  ;;  %v8168_v29 = vld [vmem:[%s11588_s3 + $0x524] ss:$8 sps:$4 sm:$0xff]   ;;  %v11786_v39 = vld [vmem:[#allocation37_spill] sm:$0xff] }
 0x251   :  { %4357 = vmatpush1.bf16.msra.mxu1 %v8142_v3  ;;  %4468 = vmatpush1.bf16.msra.mxu0 %v8145_v53  ;;  %v1887_v44 = vpop.f32.mrf.mxu0  ;;  %v2521_v47 = vpop.f32.mrf.mxu1  ;;  %v8171_v3 = vld [vmem:[%s11588_s3 + $0x5c4] ss:$8 sps:$4 sm:$0xff]  }
 0x252   :  { %v10458_v27 = vpack.c.bf16 %v2715_v12, %v2714_v52  ;;  %v1976_v56 = vmax.f32 %v11779_v61, %v1887_v44  ;;  %4469 = vmatprep.subr.bf16.mxu0 %v8150_v51  ;;  %4588 = vmatprep.subr.bf16.mxu1 %v8153_v1  ;;  %v2666_v34 = vadd.f32 %v10397_v46, %v2609_v37  ;;  %v8166_v51 = vld [vmem:[%s11588_s3 + $0x520] ss:$8 sps:$4 sm:$0xff]   ;;  %v8174_v44 = vld [vmem:[%s11588_s3 + $0x514] ss:$8 sps:$4 sm:$0xff]  }
 0x253   :  { %v1889_v24 = vpop.f32.mrf.mxu0  ;;  %v2523_v31 = vpop.f32.mrf.mxu1  ;;  %v8169_v1 = vld [vmem:[%s11588_s3 + $0x5c0] ss:$8 sps:$4 sm:$0xff]  }
 0x254   :  { %v2610_v23 = vmax.f32 %v1976_v56, %v2521_v47  ;;  %4375 = vmatmul.mubr.bf16.vlgmr.msra.gmra.mxu1 %v10173_v13  ;;  %v8162_v13 = vld [vmem:[%s11588_s3 + $0x534] ss:$8 sps:$4 sm:$0xff]   ;;  %v2716_v55 = vmax.f32 %v2666_v34, 0.0  ;;  %v11787_v52 = vld [vmem:[#allocation38_spill] sm:$0xff]  ;;  %v8175_v24 = vld [vmem:[%s11588_s3 + $0x5b0] ss:$8 sps:$4 sm:$0xff]  }
 0x255   :  { %4470 = vmatpush1.bf16.msra.mxu0 %v8148_v38  ;;  %4589 = vmatpush1.bf16.msra.mxu1 %v8151_v32  ;;  %v1892_v28 = vpop.f32.mrf.mxu0  ;;  %v2526_v30 = vpop.f32.mrf.mxu1  ;;  %v11788_v12 = vmax.f32 %v11786_v39, %v11787_v52  ;;  %v8177_v47 = vld [vmem:[%s11588_s3 + $0x5b4] ss:$8 sps:$4 sm:$0xff]   ;;  %v11789_v34 = vld [vmem:[#allocation39_spill] sm:$0xff] }
 0x256   :  { %v2667_v57 = vadd.f32 %v10397_v46, %v2610_v23  ;;  %v1977_v42 = vmax.f32 %v11782_v54, %v1892_v28  ;;  %4471 = vmatprep.subr.bf16.mxu0 %v8156_v21  ;;  %4590 = vmatprep.subr.bf16.mxu1 %v8159_v5  ;;  %v8172_v5 = vld [vmem:[%s11588_s3 + $0x510] ss:$8 sps:$4 sm:$0xff]  }
 0x257   :  { %v1894_v40 = vpop.f32.mrf.mxu0  ;;  %v2528_v43 = vpop.f32.mrf.mxu1  ;;  %4620 = vmatprep.mubr.bf16.mxu1 %v11711_v4  ;;  %v11790_v23 = vld [vmem:[#allocation40_spill] sm:$0xff] }
 0x258   :  { %v2717_v15 = vmax.f32 %v2667_v57, 0.0  ;;  %v2611_v8 = vmax.f32 %v1977_v42, %v2526_v30  ;;  %v11791_v28 = vmax.f32 %v11789_v34, %v11790_v23  ;;  %v8181_v40 = vld [vmem:[%s11588_s3 + $0x5a0] ss:$8 sps:$4 sm:$0xff]  }
 0x259   :  { %4472 = vmatpush1.bf16.msra.mxu0 %v8154_v50  ;;  %4591 = vmatpush1.bf16.msra.mxu1 %v8157_v10  ;;  %v1895_v45 = vpop.f32.mrf.mxu0  ;;  %v2529_v2 = vpop.f32.mrf.mxu1  ;;  %v8180_v50 = vld [vmem:[%s11588_s3 + $0x504] ss:$8 sps:$4 sm:$0xff]  }
 0x25a   :  { %v10494_v25 = vpack.c.bf16 %v2717_v15, %v2716_v55  ;;  %v1978_v41 = vmax.f32 %v11785_v33, %v1895_v45  ;;  %4473 = vmatprep.subr.bf16.mxu0 %v8162_v13  ;;  %4592 = vmatprep.subr.bf16.mxu1 %v8165_v35  ;;  %v2668_v36 = vadd.f32 %v10397_v46, %v2611_v8  ;;  %v8183_v10 = vld [vmem:[%s11588_s3 + $0x5a4] ss:$8 sps:$4 sm:$0xff]   ;;  %v8178_v35 = vld [vmem:[%s11588_s3 + $0x500] ss:$8 sps:$4 sm:$0xff]   ;;  %v11792_v55 = vld [vmem:[#allocation41_spill] sm:$0xff] }
 0x25b   :  { %v1897_v53 = vpop.f32.mrf.mxu0  ;;  %v2531_v60 = vpop.f32.mrf.mxu1  ;;  %v11793_v15 = vld [vmem:[#allocation42_spill] sm:$0xff] }
 0x25c   :  { %v2612_v6 = vmax.f32 %v1978_v41, %v2529_v2  ;;  %v2718_v48 = vmax.f32 %v2668_v36, 0.0  ;;  %v11794_v8 = vmax.f32 %v11792_v55, %v11793_v15  ;;  %v8186_v2 = vld [vmem:[%s11588_s3 + $0x594] ss:$8 sps:$4 sm:$0xff]   ;;  %v8184_v53 = vld [vmem:[%s11588_s3 + $0x590] ss:$8 sps:$4 sm:$0xff]  }
 0x25d   :  { %4474 = vmatpush1.bf16.msra.mxu0 %v8160_v62  ;;  %4593 = vmatpush1.bf16.msra.mxu1 %v8163_v63  ;;  %v1900_v7 = vpop.f32.mrf.mxu0  ;;  %v2534_v20 = vpop.f32.mrf.mxu1  ;;  %v8189_v62 = vld [vmem:[%s11588_s3 + $0x674] ss:$8 sps:$4 sm:$0xff]   ;;  %v8187_v60 = vld [vmem:[%s11588_s3 + $0x670] ss:$8 sps:$4 sm:$0xff]  }
 0x25e   :  { %v2669_v11 = vadd.f32 %v10397_v46, %v2612_v6  ;;  %v1979_v37 = vmax.f32 %v11788_v12, %v1900_v7  ;;  %4475 = vmatprep.subr.bf16.mxu0 %v8168_v29  ;;  %4594 = vmatprep.subr.bf16.mxu1 %v8171_v3  ;;  %v11795_v6 = vld [vmem:[#allocation43_spill] sm:$0xff]  ;;  %v11796_v7 = vld [vmem:[#allocation44_spill] sm:$0xff] }
 0x25f   :  { %v1902_v38 = vpop.f32.mrf.mxu0  ;;  %v2536_v32 = vpop.f32.mrf.mxu1 }
 0x260   :  { %v2719_v9 = vmax.f32 %v2669_v11, 0.0  ;;  %v2613_v61 = vmax.f32 %v1979_v37, %v2534_v20  ;;  %v11797_v20 = vmax.f32 %v11795_v6, %v11796_v7  ;;  %v8195_v11 = vld [vmem:[%s11588_s3 + $0x664] ss:$8 sps:$4 sm:$0xff]   ;;  %v8190_v38 = vld [vmem:[%s11588_s3 + $0x580] ss:$8 sps:$4 sm:$0xff]  }
 0x261   :  { %4476 = vmatpush1.bf16.msra.mxu0 %v8166_v51  ;;  %4595 = vmatpush1.bf16.msra.mxu1 %v8169_v1  ;;  %v1903_v56 = vpop.f32.mrf.mxu0  ;;  %v2537_v21 = vpop.f32.mrf.mxu1  ;;  %v8192_v1 = vld [vmem:[%s11588_s3 + $0x584] ss:$8 sps:$4 sm:$0xff]   ;;  %v8193_v32 = vld [vmem:[%s11588_s3 + $0x660] ss:$8 sps:$4 sm:$0xff]  }
 0x262   :  { %v10528_v31 = vpack.c.bf16 %v2719_v9, %v2718_v48  ;;  %v1980_v30 = vmax.f32 %v11791_v28, %v1903_v56  ;;  %4477 = vmatprep.subr.bf16.mxu0 %v8174_v44  ;;  %4596 = vmatprep.subr.bf16.mxu1 %v8177_v47  ;;  %v2670_v59 = vadd.f32 %v10397_v46, %v2613_v61  ;;  %v11798_v9 = vld [vmem:[#allocation45_spill] sm:$0xff]  ;;  %v11799_v61 = vld [vmem:[#allocation46_spill] sm:$0xff] }
 0x263   :  { %v1905_v57 = vpop.f32.mrf.mxu0  ;;  %v2539_v0 = vpop.f32.mrf.mxu1  ;;  %v11800_v56 = vmax.f32 %v11798_v9, %v11799_v61 }
 0x264   :  { %v2614_v54 = vmax.f32 %v1980_v30, %v2537_v21  ;;  %v2720_v26 = vmax.f32 %v2670_v59, 0.0  ;;  %v8196_v57 = vld [vmem:[%s11588_s3 + $0x650] ss:$8 sps:$4 sm:$0xff]  }
 0x265   :  { %4478 = vmatpush1.bf16.msra.mxu0 %v8172_v5  ;;  %4597 = vmatpush1.bf16.msra.mxu1 %v8175_v24  ;;  %v1908_v42 = vpop.f32.mrf.mxu0  ;;  %v2542_v13 = vpop.f32.mrf.mxu1  ;;  %v8201_v5 = vld [vmem:[%s11588_s3 + $0x6f4] ss:$8 sps:$4 sm:$0xff]   ;;  %v8199_v0 = vld [vmem:[%s11588_s3 + $0x6f0] ss:$8 sps:$4 sm:$0xff]  }
 0x266   :  { %v2671_v43 = vadd.f32 %v10397_v46, %v2614_v54  ;;  %v1981_v45 = vmax.f32 %v11794_v8, %v1908_v42  ;;  %4479 = vmatprep.subr.bf16.mxu0 %v8180_v50  ;;  %4598 = vmatprep.subr.bf16.mxu1 %v8183_v10  ;;  %v11801_v54 = vld [vmem:[#allocation47_spill] sm:$0xff]  ;;  %v11802_v42 = vld [vmem:[#allocation48_spill] sm:$0xff] }
 0x267   :  { %v1910_v63 = vpop.f32.mrf.mxu0  ;;  %v2544_v14 = vpop.f32.mrf.mxu1 }
 0x268   :  { %v2721_v33 = vmax.f32 %v2671_v43, 0.0  ;;  %v2615_v41 = vmax.f32 %v1981_v45, %v2542_v13  ;;  %v11803_v13 = vmax.f32 %v11801_v54, %v11802_v42  ;;  %v8207_v43 = vld [vmem:[%s11588_s3 + $0x6e4] ss:$8 sps:$4 sm:$0xff]   ;;  %v8202_v63 = vld [vmem:[%s11588_s3 + $0x640] ss:$8 sps:$4 sm:$0xff]  }
 0x269   :  { %4480 = vmatpush1.bf16.msra.mxu0 %v8178_v35  ;;  %4599 = vmatpush1.bf16.msra.mxu1 %v8181_v40  ;;  %v1911_v29 = vpop.f32.mrf.mxu0  ;;  %v2545_v3 = vpop.f32.mrf.mxu1  ;;  %v8204_v40 = vld [vmem:[%s11588_s3 + $0x644] ss:$8 sps:$4 sm:$0xff]   ;;  %v8205_v14 = vld [vmem:[%s11588_s3 + $0x6e0] ss:$8 sps:$4 sm:$0xff]  }
 0x26a   :  { %v10562_v36 = vpack.c.bf16 %v2721_v33, %v2720_v26  ;;  %v1982_v51 = vmax.f32 %v11797_v20, %v1911_v29  ;;  %4600 = vmatprep.subr.bf16.mxu1 %v8186_v2  ;;  %4711 = vmatprep.subr.bf16.mxu0 %v8189_v62  ;;  %v2672_v12 = vadd.f32 %v10397_v46, %v2615_v41  ;;  %v11804_v33 = vld [vmem:[#allocation49_spill] sm:$0xff]  ;;  %v11805_v41 = vld [vmem:[#allocation50_spill] sm:$0xff] }
 0x26b   :  { %v1913_v39 = vpop.f32.mrf.mxu0  ;;  %v2547_v52 = vpop.f32.mrf.mxu1  ;;  %v11806_v29 = vmax.f32 %v11804_v33, %v11805_v41  ;;  %v8231_v33 = vld [vmem:[%s11588_s3 + $0x6a4] ss:$8 sps:$4 sm:$0xff]  }
 0x26c   :  { %v2616_v37 = vmax.f32 %v1982_v51, %v2545_v3  ;;  %4498 = vmatmul.mubr.bf16.vlgmr.msra.gmra.mxu0 %v10209_v22  ;;  %v8198_v22 = vld [vmem:[%s11588_s3 + $0x654] ss:$8 sps:$4 sm:$0xff]   ;;  %v2722_v23 = vmax.f32 %v2672_v12, 0.0  ;;  %v8208_v39 = vld [vmem:[%s11588_s3 + $0x630] ss:$8 sps:$4 sm:$0xff]  }
 0x26d   :  { %4601 = vmatpush1.bf16.msra.mxu1 %v8184_v53  ;;  %4712 = vmatpush1.bf16.msra.mxu0 %v8187_v60  ;;  %v1916_v44 = vpop.f32.mrf.mxu0  ;;  %v2550_v47 = vpop.f32.mrf.mxu1  ;;  %v8213_v53 = vld [vmem:[%s11588_s3 + $0x6d4] ss:$8 sps:$4 sm:$0xff]   ;;  %v8211_v52 = vld [vmem:[%s11588_s3 + $0x6d0] ss:$8 sps:$4 sm:$0xff]  }
 0x26e   :  { %v2673_v48 = vadd.f32 %v10397_v46, %v2616_v37  ;;  %v1983_v21 = vmax.f32 %v11800_v56, %v1916_v44  ;;  %4602 = vmatprep.subr.bf16.mxu1 %v8192_v1  ;;  %4713 = vmatprep.subr.bf16.mxu0 %v8195_v11  ;;  %v11807_v37 = vld [vmem:[#allocation51_spill] sm:$0xff]  ;;  %v11808_v44 = vld [vmem:[#allocation52_spill] sm:$0xff] }
 0x26f   :  { %v1918_v24 = vpop.f32.mrf.mxu0  ;;  %v2552_v34 = vpop.f32.mrf.mxu1  ;;  %4743 = vmatprep.mubr.bf16.mxu0 %v11711_v4 }
 0x270   :  { %v2723_v28 = vmax.f32 %v2673_v48, 0.0  ;;  %v2617_v30 = vmax.f32 %v1983_v21, %v2550_v47  ;;  %v11809_v47 = vmax.f32 %v11807_v37, %v11808_v44  ;;  %v8219_v48 = vld [vmem:[%s11588_s3 + $0x6c4] ss:$8 sps:$4 sm:$0xff]   ;;  %v8214_v24 = vld [vmem:[%s11588_s3 + $0x620] ss:$8 sps:$4 sm:$0xff]  }
 0x271   :  { %4603 = vmatpush1.bf16.msra.mxu1 %v8190_v38  ;;  %4714 = vmatpush1.bf16.msra.mxu0 %v8193_v32  ;;  %v1919_v50 = vpop.f32.mrf.mxu0  ;;  %v2553_v10 = vpop.f32.mrf.mxu1  ;;  %v8216_v32 = vld [vmem:[%s11588_s3 + $0x624] ss:$8 sps:$4 sm:$0xff]   ;;  %v8217_v34 = vld [vmem:[%s11588_s3 + $0x6c0] ss:$8 sps:$4 sm:$0xff]  }
 0x272   :  { %v10598_v59 = vpack.c.bf16 %v2723_v28, %v2722_v23  ;;  %v1984_v35 = vmax.f32 %v11803_v13, %v1919_v50  ;;  %4715 = vmatprep.subr.bf16.mxu0 %v8198_v22  ;;  %4834 = vmatprep.subr.bf16.mxu1 %v8201_v5  ;;  %v2674_v8 = vadd.f32 %v10397_v46, %v2617_v30  ;;  %v11810_v28 = vld [vmem:[#allocation53_spill] sm:$0xff]  ;;  %v11811_v30 = vld [vmem:[#allocation54_spill] sm:$0xff] }
 0x273   :  { %v1921_v55 = vpop.f32.mrf.mxu0  ;;  %v2555_v15 = vpop.f32.mrf.mxu1  ;;  %v11812_v50 = vmax.f32 %v11810_v28, %v11811_v30  ;;  %v8243_v37 = vld [vmem:[%s11588_s3 + $0x764] ss:$8 sps:$4 sm:$0xff]   ;;  %v8238_v44 = vld [vmem:[%s11588_s3 + $0x680] ss:$8 sps:$4 sm:$0xff]  }
 0x274   :  { %v2618_v45 = vmax.f32 %v1984_v35, %v2553_v10  ;;  %4621 = vmatmul.mubr.bf16.vlgmr.msra.gmra.mxu1 %v10243_v18  ;;  %v8210_v18 = vld [vmem:[%s11588_s3 + $0x634] ss:$8 sps:$4 sm:$0xff]   ;;  %v2724_v7 = vmax.f32 %v2674_v8, 0.0  ;;  %v8220_v15 = vld [vmem:[%s11588_s3 + $0x610] ss:$8 sps:$4 sm:$0xff]  }
 0x275   :  { %4716 = vmatpush1.bf16.msra.mxu0 %v8196_v57  ;;  %4835 = vmatpush1.bf16.msra.mxu1 %v8199_v0  ;;  %v1924_v2 = vpop.f32.mrf.mxu0  ;;  %v2558_v62 = vpop.f32.mrf.mxu1  ;;  %v8222_v57 = vld [vmem:[%s11588_s3 + $0x614] ss:$8 sps:$4 sm:$0xff]   ;;  %v8223_v8 = vld [vmem:[%s11588_s3 + $0x6b0] ss:$8 sps:$4 sm:$0xff]   ;;  %v8262_v28 = vld [vmem:[%s11588_s3 + $0x720] ss:$8 sps:$4 sm:$0xff]  }
 0x276   :  { %v2675_v26 = vadd.f32 %v10397_v46, %v2618_v45  ;;  %v1985_v3 = vmax.f32 %v11806_v29, %v1924_v2  ;;  %4717 = vmatprep.subr.bf16.mxu0 %v8204_v40  ;;  %4836 = vmatprep.subr.bf16.mxu1 %v8207_v43  ;;  %v8225_v0 = vld [vmem:[%s11588_s3 + $0x6b4] ss:$8 sps:$4 sm:$0xff]   ;;  %v11813_v2 = vld [vmem:[#allocation55_spill] sm:$0xff] }
 0x277   :  { %v1926_v60 = vpop.f32.mrf.mxu0  ;;  %v2560_v6 = vpop.f32.mrf.mxu1  ;;  %4866 = vmatprep.mubr.bf16.mxu1 %v11711_v4  ;;  %v8265_v30 = vld [vmem:[%s11588_s3 + $0x7c0] ss:$8 sps:$4 sm:$0xff]  }
 0x278   :  { %v2725_v20 = vmax.f32 %v2675_v26, 0.0  ;;  %v2619_v51 = vmax.f32 %v1985_v3, %v2558_v62  ;;  %v11814_v62 = vld [vmem:[#allocation56_spill] sm:$0xff]  ;;  %v8228_v26 = vld [vmem:[%s11588_s3 + $0x604] ss:$8 sps:$4 sm:$0xff]   ;;  %v8229_v60 = vld [vmem:[%s11588_s3 + $0x6a0] ss:$8 sps:$4 sm:$0xff]  }
 0x279   :  { %4718 = vmatpush1.bf16.msra.mxu0 %v8202_v63  ;;  %4837 = vmatpush1.bf16.msra.mxu1 %v8205_v14  ;;  %v1927_v1 = vpop.f32.mrf.mxu0  ;;  %v2561_v11 = vpop.f32.mrf.mxu1  ;;  %v11815_v63 = vmax.f32 %v11813_v2, %v11814_v62  ;;  %v8291_v2 = vld [vmem:[%s11588_s3 + $0x864] ss:$8 sps:$4 sm:$0xff]   ;;  %v8286_v62 = vld [vmem:[%s11588_s3 + $0x780] ss:$8 sps:$4 sm:$0xff]  }
 0x27a   :  { %v10634_v12 = vpack.c.bf16 %v2725_v20, %v2724_v7  ;;  %v1986_v38 = vmax.f32 %v11809_v47, %v1927_v1  ;;  %4719 = vmatprep.subr.bf16.mxu0 %v8210_v18  ;;  %4838 = vmatprep.subr.bf16.mxu1 %v8213_v53  ;;  %v2676_v56 = vadd.f32 %v10397_v46, %v2619_v51  ;;  %v8226_v53 = vld [vmem:[%s11588_s3 + $0x600] ss:$8 sps:$4 sm:$0xff]   ;;  %v8234_v7 = vld [vmem:[%s11588_s3 + $0x694] ss:$8 sps:$4 sm:$0xff]  }
 0x27b   :  { %v1929_v9 = vpop.f32.mrf.mxu0  ;;  %v2563_v61 = vpop.f32.mrf.mxu1  ;;  %v8237_v20 = vld [vmem:[%s11588_s3 + $0x774] ss:$8 sps:$4 sm:$0xff]   ;;  %v8241_v47 = vld [vmem:[%s11588_s3 + $0x760] ss:$8 sps:$4 sm:$0xff]  }
 0x27c   :  { %v2620_v21 = vmax.f32 %v1986_v38, %v2561_v11  ;;  %v2726_v13 = vmax.f32 %v2676_v56, 0.0  ;;  %v8232_v11 = vld [vmem:[%s11588_s3 + $0x690] ss:$8 sps:$4 sm:$0xff]   ;;  %v8246_v38 = vld [vmem:[%s11588_s3 + $0x754] ss:$8 sps:$4 sm:$0xff]  }
 0x27d   :  { %4720 = vmatpush1.bf16.msra.mxu0 %v8208_v39  ;;  %4839 = vmatpush1.bf16.msra.mxu1 %v8211_v52  ;;  %v1932_v22 = vpop.f32.mrf.mxu0  ;;  %v2566_v5 = vpop.f32.mrf.mxu1  ;;  %v8240_v52 = vld [vmem:[%s11588_s3 + $0x684] ss:$8 sps:$4 sm:$0xff]   ;;  %v8250_v56 = vld [vmem:[%s11588_s3 + $0x740] ss:$8 sps:$4 sm:$0xff]  }
 0x27e   :  { %v2677_v23 = vadd.f32 %v10397_v46, %v2620_v21  ;;  %v1987_v10 = vmax.f32 %v11812_v50, %v1932_v22  ;;  %4721 = vmatprep.subr.bf16.mxu0 %v8216_v32  ;;  %4840 = vmatprep.subr.bf16.mxu1 %v8219_v48  ;;  %v8244_v32 = vld [vmem:[%s11588_s3 + $0x750] ss:$8 sps:$4 sm:$0xff]   ;;  %v8252_v9 = vld [vmem:[%s11588_s3 + $0x744] ss:$8 sps:$4 sm:$0xff]   ;;  %v8253_v21 = vld [vmem:[%s11588_s3 + $0x7e0] ss:$8 sps:$4 sm:$0xff]  }
 0x27f   :  { %v1934_v54 = vpop.f32.mrf.mxu0  ;;  %v2568_v42 = vpop.f32.mrf.mxu1  ;;  %v8247_v48 = vld [vmem:[%s11588_s3 + $0x7f0] ss:$8 sps:$4 sm:$0xff]   ;;  %v8255_v61 = vld [vmem:[%s11588_s3 + $0x7e4] ss:$8 sps:$4 sm:$0xff]   ;;  %v8258_v22 = vld [vmem:[%s11588_s3 + $0x734] ss:$8 sps:$4 sm:$0xff]  }
 0x280   :  { %v2727_v35 = vmax.f32 %v2677_v23, 0.0  ;;  %v2621_v40 = vmax.f32 %v1987_v10, %v2566_v5  ;;  %v8256_v5 = vld [vmem:[%s11588_s3 + $0x730] ss:$8 sps:$4 sm:$0xff]   ;;  %v8267_v23 = vld [vmem:[%s11588_s3 + $0x7c4] ss:$8 sps:$4 sm:$0xff]  }
 0x281   :  { %4722 = vmatpush1.bf16.msra.mxu0 %v8214_v24  ;;  %4841 = vmatpush1.bf16.msra.mxu1 %v8217_v34  ;;  %v1935_v43 = vpop.f32.mrf.mxu0  ;;  %v2569_v55 = vpop.f32.mrf.mxu1  ;;  %v8259_v24 = vld [vmem:[%s11588_s3 + $0x7d0] ss:$8 sps:$4 sm:$0xff]   ;;  %v8264_v34 = vld [vmem:[%s11588_s3 + $0x724] ss:$8 sps:$4 sm:$0xff]   ;;  %v8270_v50 = vld [vmem:[%s11588_s3 + $0x714] ss:$8 sps:$4 sm:$0xff]  }
 0x282   :  { %v10668_v45 = vpack.c.bf16 %v2727_v35, %v2726_v13  ;;  %v1988_v14 = vmax.f32 %v11815_v63, %v1935_v43  ;;  %4723 = vmatprep.subr.bf16.mxu0 %v8222_v57  ;;  %4842 = vmatprep.subr.bf16.mxu1 %v8225_v0  ;;  %v2678_v3 = vadd.f32 %v10397_v46, %v2621_v40  ;;  %v8273_v10 = vld [vmem:[%s11588_s3 + $0x7b4] ss:$8 sps:$4 sm:$0xff]   ;;  %v8268_v57 = vld [vmem:[%s11588_s3 + $0x710] ss:$8 sps:$4 sm:$0xff]   ;;  %v8276_v54 = vld [vmem:[%s11588_s3 + $0x704] ss:$8 sps:$4 sm:$0xff]  }
 0x283   :  { %v1937_v41 = vpop.f32.mrf.mxu0  ;;  %v2571_v29 = vpop.f32.mrf.mxu1  ;;  %v8271_v0 = vld [vmem:[%s11588_s3 + $0x7b0] ss:$8 sps:$4 sm:$0xff]   ;;  %v8279_v42 = vld [vmem:[%s11588_s3 + $0x7a4] ss:$8 sps:$4 sm:$0xff]   ;;  %v8274_v13 = vld [vmem:[%s11588_s3 + $0x700] ss:$8 sps:$4 sm:$0xff]  }
 0x284   :  { %v2622_v18 = vmax.f32 %v1988_v14, %v2569_v55  ;;  %v2728_v51 = vmax.f32 %v2678_v3, 0.0  ;;  %v8277_v35 = vld [vmem:[%s11588_s3 + $0x7a0] ss:$8 sps:$4 sm:$0xff]   ;;  %v8282_v40 = vld [vmem:[%s11588_s3 + $0x794] ss:$8 sps:$4 sm:$0xff]  }
 0x285   :  { %4724 = vmatpush1.bf16.msra.mxu0 %v8220_v15  ;;  %4843 = vmatpush1.bf16.msra.mxu1 %v8223_v8  ;;  %v8285_v43 = vld [vmem:[%s11588_s3 + $0x874] ss:$8 sps:$4 sm:$0xff]   ;;  %v8280_v55 = vld [vmem:[%s11588_s3 + $0x790] ss:$8 sps:$4 sm:$0xff]   ;;  %v8288_v8 = vld [vmem:[%s11588_s3 + $0x784] ss:$8 sps:$4 sm:$0xff]  }
 0x286   :  { %v2679_v6 = vadd.f32 %v10397_v46, %v2622_v18  ;;  %4725 = vmatprep.subr.bf16.mxu0 %v8228_v26  ;;  %4844 = vmatprep.subr.bf16.mxu1 %v8231_v33  ;;  %v8235_v46 = vld [vmem:[%s11588_s3 + $0x770] ss:$8 sps:$4 sm:$0xff]   ;;  %v8289_v63 = vld [vmem:[%s11588_s3 + $0x860] ss:$8 sps:$4 sm:$0xff]   ;;  %v8294_v14 = vld [vmem:[%s11588_s3 + $0x854] ss:$8 sps:$4 sm:$0xff]  }
 0x287   :  { %v8283_v15 = vld [vmem:[%s11588_s3 + $0x870] ss:$8 sps:$4 sm:$0xff]   ;;  %v8300_v41 = vld [vmem:[%s11588_s3 + $0x844] ss:$8 sps:$4 sm:$0xff]   ;;  %v8298_v3 = vld [vmem:[%s11588_s3 + $0x840] ss:$8 sps:$4 sm:$0xff]  }
 0x288   :  { %v2729_v1 = vmax.f32 %v2679_v6, 0.0  ;;  %v8292_v26 = vld [vmem:[%s11588_s3 + $0x850] ss:$8 sps:$4 sm:$0xff]   ;;  %v8303_v29 = vld [vmem:[%s11588_s3 + $0x8e4] ss:$8 sps:$4 sm:$0xff]  }
 0x289   :  { %4726 = vmatpush1.bf16.msra.mxu0 %v8226_v53  ;;  %4845 = vmatpush1.bf16.msra.mxu1 %v8229_v60  ;;  %v8295_v33 = vld [vmem:[%s11588_s3 + $0x8f0] ss:$8 sps:$4 sm:$0xff]   ;;  %v8301_v18 = vld [vmem:[%s11588_s3 + $0x8e0] ss:$8 sps:$4 sm:$0xff]   ;;  %v8306_v53 = vld [vmem:[%s11588_s3 + $0x834] ss:$8 sps:$4 sm:$0xff]  }
 0x28a   :  { %v10699_v39 = vpack.c.bf16 %v2729_v1, %v2728_v51  ;;  %4846 = vmatprep.subr.bf16.mxu1 %v8234_v7  ;;  %4957 = vmatprep.subr.bf16.mxu0 %v8237_v20  ;;  %v8304_v60 = vld [vmem:[%s11588_s3 + $0x830] ss:$8 sps:$4 sm:$0xff]   ;;  %v8312_v7 = vld [vmem:[%s11588_s3 + $0x824] ss:$8 sps:$4 sm:$0xff]   ;;  %v8310_v51 = vld [vmem:[%s11588_s3 + $0x820] ss:$8 sps:$4 sm:$0xff]  }
 0x28b   :  { %v8307_v6 = vld [vmem:[%s11588_s3 + $0x8d0] ss:$8 sps:$4 sm:$0xff]   ;;  %v8315_v20 = vld [vmem:[%s11588_s3 + $0x8c4] ss:$8 sps:$4 sm:$0xff]   ;;  %v8313_v1 = vld [vmem:[%s11588_s3 + $0x8c0] ss:$8 sps:$4 sm:$0xff]  }
 0x28c   :  { %4744 = vmatmul.mubr.bf16.vlgmr.msra.gmra.mxu0 %v10277_v16  ;;  %v8249_v16 = vld [vmem:[%s11588_s3 + $0x7f4] ss:$8 sps:$4 sm:$0xff]  }
 0x28d   :  { %4847 = vmatpush1.bf16.msra.mxu1 %v8232_v11  ;;  %4958 = vmatpush1.bf16.msra.mxu0 %v8235_v46  ;;  %v8318_v11 = vld [vmem:[%s11588_s3 + $0x814] ss:$8 sps:$4 sm:$0xff]  }
 0x28e   :  { %4848 = vmatprep.subr.bf16.mxu1 %v8240_v52  ;;  %4959 = vmatprep.subr.bf16.mxu0 %v8243_v37  ;;  %v8321_v46 = vld [vmem:[%s11588_s3 + $0x8b4] ss:$8 sps:$4 sm:$0xff]   ;;  %v8316_v52 = vld [vmem:[%s11588_s3 + $0x810] ss:$8 sps:$4 sm:$0xff]  }
 0x28f   :  { %4989 = vmatprep.mubr.bf16.mxu0 %v11711_v4  ;;  %v8319_v37 = vld [vmem:[%s11588_s3 + $0x8b0] ss:$8 sps:$4 sm:$0xff]  }
 0x291   :  { %4849 = vmatpush1.bf16.msra.mxu1 %v8238_v44  ;;  %4960 = vmatpush1.bf16.msra.mxu0 %v8241_v47  ;;  %v8324_v44 = vld [vmem:[%s11588_s3 + $0x804] ss:$8 sps:$4 sm:$0xff]  }
 0x292   :  { %4961 = vmatprep.subr.bf16.mxu0 %v8246_v38  ;;  %5080 = vmatprep.subr.bf16.mxu1 %v8249_v16  ;;  %v8327_v47 = vld [vmem:[%s11588_s3 + $0x8a4] ss:$8 sps:$4 sm:$0xff]   ;;  %v8322_v38 = vld [vmem:[%s11588_s3 + $0x800] ss:$8 sps:$4 sm:$0xff]  }
 0x293   :  { %v8325_v16 = vld [vmem:[%s11588_s3 + $0x8a0] ss:$8 sps:$4 sm:$0xff]  }
 0x294   :  { %4867 = vmatmul.mubr.bf16.vlgmr.msra.gmra.mxu1 %v10313_v19  ;;  %v8261_v19 = vld [vmem:[%s11588_s3 + $0x7d4] ss:$8 sps:$4 sm:$0xff]  }
 0x295   :  { %4962 = vmatpush1.bf16.msra.mxu0 %v8244_v32  ;;  %5081 = vmatpush1.bf16.msra.mxu1 %v8247_v48  ;;  %v8330_v32 = vld [vmem:[%s11588_s3 + $0x894] ss:$8 sps:$4 sm:$0xff]  }
 0x296   :  { %4963 = vmatprep.subr.bf16.mxu0 %v8252_v9  ;;  %5082 = vmatprep.subr.bf16.mxu1 %v8255_v61  ;;  %v8333_v48 = vld [vmem:[%s11588_s3 + $0x974] ss:$8 sps:$4 sm:$0xff]   ;;  %v8328_v9 = vld [vmem:[%s11588_s3 + $0x890] ss:$8 sps:$4 sm:$0xff]  }
 0x297   :  { %5112 = vmatprep.mubr.bf16.mxu1 %v11711_v4  ;;  %v8331_v61 = vld [vmem:[%s11588_s3 + $0x970] ss:$8 sps:$4 sm:$0xff]  }
 0x299   :  { %4964 = vmatpush1.bf16.msra.mxu0 %v8250_v56  ;;  %5083 = vmatpush1.bf16.msra.mxu1 %v8253_v21  ;;  %v8336_v56 = vld [vmem:[%s11588_s3 + $0x884] ss:$8 sps:$4 sm:$0xff]  }
 0x29a   :  { %4965 = vmatprep.subr.bf16.mxu0 %v8258_v22  ;;  %5084 = vmatprep.subr.bf16.mxu1 %v8261_v19  ;;  %v8339_v21 = vld [vmem:[%s11588_s3 + $0x964] ss:$8 sps:$4 sm:$0xff]   ;;  %v8334_v22 = vld [vmem:[%s11588_s3 + $0x880] ss:$8 sps:$4 sm:$0xff]  }
 0x29b   :  { %v8337_v19 = vld [vmem:[%s11588_s3 + $0x960] ss:$8 sps:$4 sm:$0xff]  }
 0x29d   :  { %4966 = vmatpush1.bf16.msra.mxu0 %v8256_v5  ;;  %5085 = vmatpush1.bf16.msra.mxu1 %v8259_v24  ;;  %v8342_v5 = vld [vmem:[%s11588_s3 + $0x954] ss:$8 sps:$4 sm:$0xff]   ;;  %v8340_v24 = vld [vmem:[%s11588_s3 + $0x950] ss:$8 sps:$4 sm:$0xff]  }
 0x29e   :  { %4967 = vmatprep.subr.bf16.mxu0 %v8264_v34  ;;  %5086 = vmatprep.subr.bf16.mxu1 %v8267_v23  ;;  %v8343_v34 = vld [vmem:[%s11588_s3 + $0x9f0] ss:$8 sps:$4 sm:$0xff]   ;;  %v8348_v23 = vld [vmem:[%s11588_s3 + $0x944] ss:$8 sps:$4 sm:$0xff]  }
 0x2a1   :  { %4968 = vmatpush1.bf16.msra.mxu0 %v8262_v28  ;;  %5087 = vmatpush1.bf16.msra.mxu1 %v8265_v30  ;;  %v8351_v28 = vld [vmem:[%s11588_s3 + $0x9e4] ss:$8 sps:$4 sm:$0xff]   ;;  %v8346_v30 = vld [vmem:[%s11588_s3 + $0x940] ss:$8 sps:$4 sm:$0xff]  }
 0x2a2   :  { %4969 = vmatprep.subr.bf16.mxu0 %v8270_v50  ;;  %5088 = vmatprep.subr.bf16.mxu1 %v8273_v10  ;;  %v8349_v50 = vld [vmem:[%s11588_s3 + $0x9e0] ss:$8 sps:$4 sm:$0xff]   ;;  %v8354_v10 = vld [vmem:[%s11588_s3 + $0x934] ss:$8 sps:$4 sm:$0xff]  }
 0x2a5   :  { %4970 = vmatpush1.bf16.msra.mxu0 %v8268_v57  ;;  %5089 = vmatpush1.bf16.msra.mxu1 %v8271_v0  ;;  %v8352_v57 = vld [vmem:[%s11588_s3 + $0x930] ss:$8 sps:$4 sm:$0xff]  }
 0x2a6   :  { %4971 = vmatprep.subr.bf16.mxu0 %v8276_v54  ;;  %5090 = vmatprep.subr.bf16.mxu1 %v8279_v42  ;;  %v8355_v0 = vld [vmem:[%s11588_s3 + $0x9d0] ss:$8 sps:$4 sm:$0xff]   ;;  %v8360_v54 = vld [vmem:[%s11588_s3 + $0x924] ss:$8 sps:$4 sm:$0xff]  }
 0x2a7   :  { %v8363_v42 = vld [vmem:[%s11588_s3 + $0x9c4] ss:$8 sps:$4 sm:$0xff]  }
 0x2a9   :  { %4972 = vmatpush1.bf16.msra.mxu0 %v8274_v13  ;;  %5091 = vmatpush1.bf16.msra.mxu1 %v8277_v35  ;;  %v8358_v13 = vld [vmem:[%s11588_s3 + $0x920] ss:$8 sps:$4 sm:$0xff]  }
 0x2aa   :  { %5092 = vmatprep.subr.bf16.mxu1 %v8282_v40  ;;  %5203 = vmatprep.subr.bf16.mxu0 %v8285_v43  ;;  %v8361_v35 = vld [vmem:[%s11588_s3 + $0x9c0] ss:$8 sps:$4 sm:$0xff]   ;;  %v8366_v40 = vld [vmem:[%s11588_s3 + $0x914] ss:$8 sps:$4 sm:$0xff]  }
 0x2ab   :  { %v8369_v43 = vld [vmem:[%s11588_s3 + $0x9b4] ss:$8 sps:$4 sm:$0xff]  }
 0x2ac   :  { %4990 = vmatmul.mubr.bf16.vlgmr.msra.gmra.mxu0 %v10349_v49  ;;  %v8297_v49 = vld [vmem:[%s11588_s3 + $0x8f4] ss:$8 sps:$4 sm:$0xff]  }
 0x2ad   :  { %5093 = vmatpush1.bf16.msra.mxu1 %v8280_v55  ;;  %5204 = vmatpush1.bf16.msra.mxu0 %v8283_v15  ;;  %v8364_v55 = vld [vmem:[%s11588_s3 + $0x910] ss:$8 sps:$4 sm:$0xff]  }
 0x2ae   :  { %5094 = vmatprep.subr.bf16.mxu1 %v8288_v8  ;;  %5205 = vmatprep.subr.bf16.mxu0 %v8291_v2  ;;  %v8367_v15 = vld [vmem:[%s11588_s3 + $0x9b0] ss:$8 sps:$4 sm:$0xff]   ;;  %v8372_v8 = vld [vmem:[%s11588_s3 + $0x904] ss:$8 sps:$4 sm:$0xff]  }
 0x2af   :  { %5235 = vmatprep.mubr.bf16.mxu0 %v11711_v4  ;;  %v8375_v2 = vld [vmem:[%s11588_s3 + $0x9a4] ss:$8 sps:$4 sm:$0xff]  }
 0x2b1   :  { %5095 = vmatpush1.bf16.msra.mxu1 %v8286_v62  ;;  %5206 = vmatpush1.bf16.msra.mxu0 %v8289_v63  ;;  %v8370_v62 = vld [vmem:[%s11588_s3 + $0x900] ss:$8 sps:$4 sm:$0xff]  }
 0x2b2   :  { %5207 = vmatprep.subr.bf16.mxu0 %v8294_v14  ;;  %5326 = vmatprep.subr.bf16.mxu1 %v8297_v49  ;;  %v8373_v63 = vld [vmem:[%s11588_s3 + $0x9a0] ss:$8 sps:$4 sm:$0xff]   ;;  %v8378_v14 = vld [vmem:[%s11588_s3 + $0x994] ss:$8 sps:$4 sm:$0xff]  }
 0x2b3   :  { %v8381_v49 = vld [vmem:[%s11588_s3 + $0xa74] ss:$8 sps:$4 sm:$0xff]  }
 0x2b4   :  { %5113 = vmatmul.mubr.bf16.vlgmr.msra.gmra.mxu1 %v10383_v58  ;;  %v8309_v58 = vld [vmem:[%s11588_s3 + $0x8d4] ss:$8 sps:$4 sm:$0xff]  }
 0x2b5   :  { %5208 = vmatpush1.bf16.msra.mxu0 %v8292_v26  ;;  %5327 = vmatpush1.bf16.msra.mxu1 %v8295_v33  ;;  %v8376_v26 = vld [vmem:[%s11588_s3 + $0x990] ss:$8 sps:$4 sm:$0xff]  }
 0x2b6   :  { %5209 = vmatprep.subr.bf16.mxu0 %v8300_v41  ;;  %5328 = vmatprep.subr.bf16.mxu1 %v8303_v29  ;;  %v8379_v33 = vld [vmem:[%s11588_s3 + $0xa70] ss:$8 sps:$4 sm:$0xff]   ;;  %v8384_v41 = vld [vmem:[%s11588_s3 + $0x984] ss:$8 sps:$4 sm:$0xff]  }
 0x2b7   :  { %5358 = vmatprep.mubr.bf16.mxu1 %v11711_v4  ;;  %v8387_v29 = vld [vmem:[%s11588_s3 + $0xa64] ss:$8 sps:$4 sm:$0xff]  }
 0x2b9   :  { %5210 = vmatpush1.bf16.msra.mxu0 %v8298_v3  ;;  %5329 = vmatpush1.bf16.msra.mxu1 %v8301_v18  ;;  %v8382_v3 = vld [vmem:[%s11588_s3 + $0x980] ss:$8 sps:$4 sm:$0xff]  }
 0x2ba   :  { %5211 = vmatprep.subr.bf16.mxu0 %v8306_v53  ;;  %5330 = vmatprep.subr.bf16.mxu1 %v8309_v58  ;;  %v8385_v18 = vld [vmem:[%s11588_s3 + $0xa60] ss:$8 sps:$4 sm:$0xff]   ;;  %v8390_v53 = vld [vmem:[%s11588_s3 + $0xa54] ss:$8 sps:$4 sm:$0xff]   ;;  %v8388_v58 = vld [vmem:[%s11588_s3 + $0xa50] ss:$8 sps:$4 sm:$0xff]  }
 0x2bd   :  { %5212 = vmatpush1.bf16.msra.mxu0 %v8304_v60  ;;  %5331 = vmatpush1.bf16.msra.mxu1 %v8307_v6  ;;  %v8391_v60 = vld [vmem:[%s11588_s3 + $0xaf0] ss:$8 sps:$4 sm:$0xff]   ;;  %v8396_v6 = vld [vmem:[%s11588_s3 + $0xa44] ss:$8 sps:$4 sm:$0xff]  }
 0x2be   :  { %5213 = vmatprep.subr.bf16.mxu0 %v8312_v7  ;;  %5332 = vmatprep.subr.bf16.mxu1 %v8315_v20  ;;  %v8399_v7 = vld [vmem:[%s11588_s3 + $0xae4] ss:$8 sps:$4 sm:$0xff]   ;;  %v8394_v20 = vld [vmem:[%s11588_s3 + $0xa40] ss:$8 sps:$4 sm:$0xff]  }
 0x2c1   :  { %5214 = vmatpush1.bf16.msra.mxu0 %v8310_v51  ;;  %5333 = vmatpush1.bf16.msra.mxu1 %v8313_v1  ;;  %v8397_v51 = vld [vmem:[%s11588_s3 + $0xae0] ss:$8 sps:$4 sm:$0xff]   ;;  %v8402_v1 = vld [vmem:[%s11588_s3 + $0xa34] ss:$8 sps:$4 sm:$0xff]  }
 0x2c2   :  { %5215 = vmatprep.subr.bf16.mxu0 %v8318_v11  ;;  %5334 = vmatprep.subr.bf16.mxu1 %v8321_v46  ;;  %v8400_v11 = vld [vmem:[%s11588_s3 + $0xa30] ss:$8 sps:$4 sm:$0xff]  }
 0x2c3   :  { %v8403_v46 = vld [vmem:[%s11588_s3 + $0xad0] ss:$8 sps:$4 sm:$0xff]  }
 0x2c5   :  { %5216 = vmatpush1.bf16.msra.mxu0 %v8316_v52  ;;  %5335 = vmatpush1.bf16.msra.mxu1 %v8319_v37  ;;  %v8408_v52 = vld [vmem:[%s11588_s3 + $0xa24] ss:$8 sps:$4 sm:$0xff]  }
 0x2c6   :  { %5217 = vmatprep.subr.bf16.mxu0 %v8324_v44  ;;  %5336 = vmatprep.subr.bf16.mxu1 %v8327_v47  ;;  %v8411_v37 = vld [vmem:[%s11588_s3 + $0xac4] ss:$8 sps:$4 sm:$0xff]   ;;  %v8406_v44 = vld [vmem:[%s11588_s3 + $0xa20] ss:$8 sps:$4 sm:$0xff]  }
 0x2c7   :  { %v8409_v47 = vld [vmem:[%s11588_s3 + $0xac0] ss:$8 sps:$4 sm:$0xff]  }
 0x2c9   :  { %5218 = vmatpush1.bf16.msra.mxu0 %v8322_v38  ;;  %5337 = vmatpush1.bf16.msra.mxu1 %v8325_v16  ;;  %v8414_v38 = vld [vmem:[%s11588_s3 + $0xa14] ss:$8 sps:$4 sm:$0xff]  }
 0x2ca   :  { %5338 = vmatprep.subr.bf16.mxu1 %v8330_v32  ;;  %5449 = vmatprep.subr.bf16.mxu0 %v8333_v48  ;;  %v8417_v16 = vld [vmem:[%s11588_s3 + $0xab4] ss:$8 sps:$4 sm:$0xff]   ;;  %v8412_v32 = vld [vmem:[%s11588_s3 + $0xa10] ss:$8 sps:$4 sm:$0xff]  }
 0x2cb   :  { %v8415_v48 = vld [vmem:[%s11588_s3 + $0xab0] ss:$8 sps:$4 sm:$0xff]  }
 0x2cc   :  { %5236 = vmatmul.mubr.bf16.vlgmr.msra.gmra.mxu0 %v10422_v17  ;;  %v8345_v17 = vld [vmem:[%s11588_s3 + $0x9f4] ss:$8 sps:$4 sm:$0xff]  }
 0x2cd   :  { %5339 = vmatpush1.bf16.msra.mxu1 %v8328_v9  ;;  %5450 = vmatpush1.bf16.msra.mxu0 %v8331_v61  ;;  %v8420_v9 = vld [vmem:[%s11588_s3 + $0xa04] ss:$8 sps:$4 sm:$0xff]  }
 0x2ce   :  { %5340 = vmatprep.subr.bf16.mxu1 %v8336_v56  ;;  %5451 = vmatprep.subr.bf16.mxu0 %v8339_v21  ;;  %v8423_v61 = vld [vmem:[%s11588_s3 + $0xaa4] ss:$8 sps:$4 sm:$0xff]   ;;  %v8418_v56 = vld [vmem:[%s11588_s3 + $0xa00] ss:$8 sps:$4 sm:$0xff]  }
 0x2cf   :  { %5481 = vmatprep.mubr.bf16.mxu0 %v11711_v4  ;;  %v8421_v21 = vld [vmem:[%s11588_s3 + $0xaa0] ss:$8 sps:$4 sm:$0xff]  }
 0x2d1   :  { %5341 = vmatpush1.bf16.msra.mxu1 %v8334_v22  ;;  %5452 = vmatpush1.bf16.msra.mxu0 %v8337_v19  ;;  %v8426_v22 = vld [vmem:[%s11588_s3 + $0xa94] ss:$8 sps:$4 sm:$0xff]  }
 0x2d2   :  { %5453 = vmatprep.subr.bf16.mxu0 %v8342_v5  ;;  %5572 = vmatprep.subr.bf16.mxu1 %v8345_v17  ;;  %v8429_v19 = vld [vmem:[%s11588_s3 + $0xb74] ss:$8 sps:$4 sm:$0xff]   ;;  %v8424_v5 = vld [vmem:[%s11588_s3 + $0xa90] ss:$8 sps:$4 sm:$0xff]  }
 0x2d3   :  { %v8427_v17 = vld [vmem:[%s11588_s3 + $0xb70] ss:$8 sps:$4 sm:$0xff]  }
 0x2d4   :  { %5359 = vmatmul.mubr.bf16.vlgmr.msra.gmra.mxu1 %v10458_v27  ;;  %v8357_v27 = vld [vmem:[%s11588_s3 + $0x9d4] ss:$8 sps:$4 sm:$0xff]  }
 0x2d5   :  { %5454 = vmatpush1.bf16.msra.mxu0 %v8340_v24  ;;  %5573 = vmatpush1.bf16.msra.mxu1 %v8343_v34  ;;  %v8432_v24 = vld [vmem:[%s11588_s3 + $0xa84] ss:$8 sps:$4 sm:$0xff]  }
 0x2d6   :  { %5455 = vmatprep.subr.bf16.mxu0 %v8348_v23  ;;  %5574 = vmatprep.subr.bf16.mxu1 %v8351_v28  ;;  %v8435_v34 = vld [vmem:[%s11588_s3 + $0xb64] ss:$8 sps:$4 sm:$0xff]   ;;  %v8430_v23 = vld [vmem:[%s11588_s3 + $0xa80] ss:$8 sps:$4 sm:$0xff]  }
 0x2d7   :  { %5604 = vmatprep.mubr.bf16.mxu1 %v11711_v4  ;;  %v8433_v28 = vld [vmem:[%s11588_s3 + $0xb60] ss:$8 sps:$4 sm:$0xff]  }
 0x2d9   :  { %5456 = vmatpush1.bf16.msra.mxu0 %v8346_v30  ;;  %5575 = vmatpush1.bf16.msra.mxu1 %v8349_v50  ;;  %v8438_v30 = vld [vmem:[%s11588_s3 + $0xb54] ss:$8 sps:$4 sm:$0xff]   ;;  %v8436_v50 = vld [vmem:[%s11588_s3 + $0xb50] ss:$8 sps:$4 sm:$0xff]  }
 0x2da   :  { %5457 = vmatprep.subr.bf16.mxu0 %v8354_v10  ;;  %5576 = vmatprep.subr.bf16.mxu1 %v8357_v27  ;;  %v8439_v10 = vld [vmem:[%s11588_s3 + $0xbf0] ss:$8 sps:$4 sm:$0xff]   ;;  %v8444_v27 = vld [vmem:[%s11588_s3 + $0xb44] ss:$8 sps:$4 sm:$0xff]  }
 0x2dd   :  { %5458 = vmatpush1.bf16.msra.mxu0 %v8352_v57  ;;  %5577 = vmatpush1.bf16.msra.mxu1 %v8355_v0  ;;  %v8447_v57 = vld [vmem:[%s11588_s3 + $0xbe4] ss:$8 sps:$4 sm:$0xff]   ;;  %v8442_v0 = vld [vmem:[%s11588_s3 + $0xb40] ss:$8 sps:$4 sm:$0xff]  }
 0x2de   :  { %5459 = vmatprep.subr.bf16.mxu0 %v8360_v54  ;;  %5578 = vmatprep.subr.bf16.mxu1 %v8363_v42  ;;  %v8445_v54 = vld [vmem:[%s11588_s3 + $0xbe0] ss:$8 sps:$4 sm:$0xff]   ;;  %v8450_v42 = vld [vmem:[%s11588_s3 + $0xb34] ss:$8 sps:$4 sm:$0xff]  }
 0x2e1   :  { %5460 = vmatpush1.bf16.msra.mxu0 %v8358_v13  ;;  %5579 = vmatpush1.bf16.msra.mxu1 %v8361_v35  ;;  %v8448_v13 = vld [vmem:[%s11588_s3 + $0xb30] ss:$8 sps:$4 sm:$0xff]  }
 0x2e2   :  { %5461 = vmatprep.subr.bf16.mxu0 %v8366_v40  ;;  %5580 = vmatprep.subr.bf16.mxu1 %v8369_v43  ;;  %v8451_v35 = vld [vmem:[%s11588_s3 + $0xbd0] ss:$8 sps:$4 sm:$0xff]   ;;  %v8456_v40 = vld [vmem:[%s11588_s3 + $0xb24] ss:$8 sps:$4 sm:$0xff]  }
 0x2e3   :  { %v8459_v43 = vld [vmem:[%s11588_s3 + $0xbc4] ss:$8 sps:$4 sm:$0xff]  }
 0x2e5   :  { %5462 = vmatpush1.bf16.msra.mxu0 %v8364_v55  ;;  %5581 = vmatpush1.bf16.msra.mxu1 %v8367_v15  ;;  %v8454_v55 = vld [vmem:[%s11588_s3 + $0xb20] ss:$8 sps:$4 sm:$0xff]  }
 0x2e6   :  { %5463 = vmatprep.subr.bf16.mxu0 %v8372_v8  ;;  %5582 = vmatprep.subr.bf16.mxu1 %v8375_v2  ;;  %v8457_v15 = vld [vmem:[%s11588_s3 + $0xbc0] ss:$8 sps:$4 sm:$0xff]   ;;  %v8462_v8 = vld [vmem:[%s11588_s3 + $0xb14] ss:$8 sps:$4 sm:$0xff]  }
 0x2e7   :  { %v8465_v2 = vld [vmem:[%s11588_s3 + $0xbb4] ss:$8 sps:$4 sm:$0xff]  }
 0x2e9   :  { %5464 = vmatpush1.bf16.msra.mxu0 %v8370_v62  ;;  %5583 = vmatpush1.bf16.msra.mxu1 %v8373_v63  ;;  %v8460_v62 = vld [vmem:[%s11588_s3 + $0xb10] ss:$8 sps:$4 sm:$0xff]  }
 0x2ea   :  { %5584 = vmatprep.subr.bf16.mxu1 %v8378_v14  ;;  %5695 = vmatprep.subr.bf16.mxu0 %v8381_v49  ;;  %v8463_v63 = vld [vmem:[%s11588_s3 + $0xbb0] ss:$8 sps:$4 sm:$0xff]   ;;  %v8468_v14 = vld [vmem:[%s11588_s3 + $0xb04] ss:$8 sps:$4 sm:$0xff]  }
 0x2eb   :  { %v8471_v49 = vld [vmem:[%s11588_s3 + $0xba4] ss:$8 sps:$4 sm:$0xff]  }
 0x2ec   :  { %5482 = vmatmul.mubr.bf16.vlgmr.msra.gmra.mxu0 %v10494_v25  ;;  %v8393_v25 = vld [vmem:[%s11588_s3 + $0xaf4] ss:$8 sps:$4 sm:$0xff]  }
 0x2ed   :  { %5585 = vmatpush1.bf16.msra.mxu1 %v8376_v26  ;;  %5696 = vmatpush1.bf16.msra.mxu0 %v8379_v33  ;;  %v8466_v26 = vld [vmem:[%s11588_s3 + $0xb00] ss:$8 sps:$4 sm:$0xff]  }
 0x2ee   :  { %5586 = vmatprep.subr.bf16.mxu1 %v8384_v41  ;;  %5697 = vmatprep.subr.bf16.mxu0 %v8387_v29  ;;  %v8469_v33 = vld [vmem:[%s11588_s3 + $0xba0] ss:$8 sps:$4 sm:$0xff]   ;;  %v8474_v41 = vld [vmem:[%s11588_s3 + $0xb94] ss:$8 sps:$4 sm:$0xff]  }
 0x2ef   :  { %5727 = vmatprep.mubr.bf16.mxu0 %v11711_v4  ;;  %v8477_v29 = vld [vmem:[%s11588_s3 + $0xc74] ss:$8 sps:$4 sm:$0xff]  }
 0x2f1   :  { %5587 = vmatpush1.bf16.msra.mxu1 %v8382_v3  ;;  %5698 = vmatpush1.bf16.msra.mxu0 %v8385_v18  ;;  %v8472_v3 = vld [vmem:[%s11588_s3 + $0xb90] ss:$8 sps:$4 sm:$0xff]  }
 0x2f2   :  { %5699 = vmatprep.subr.bf16.mxu0 %v8390_v53  ;;  %5818 = vmatprep.subr.bf16.mxu1 %v8393_v25  ;;  %v8475_v18 = vld [vmem:[%s11588_s3 + $0xc70] ss:$8 sps:$4 sm:$0xff]   ;;  %v8480_v53 = vld [vmem:[%s11588_s3 + $0xb84] ss:$8 sps:$4 sm:$0xff]  }
 0x2f3   :  { %v8483_v25 = vld [vmem:[%s11588_s3 + $0xc64] ss:$8 sps:$4 sm:$0xff]  }
 0x2f4   :  { %5605 = vmatmul.mubr.bf16.vlgmr.msra.gmra.mxu1 %v10528_v31  ;;  %v8405_v31 = vld [vmem:[%s11588_s3 + $0xad4] ss:$8 sps:$4 sm:$0xff]  }
 0x2f5   :  { %5700 = vmatpush1.bf16.msra.mxu0 %v8388_v58  ;;  %5819 = vmatpush1.bf16.msra.mxu1 %v8391_v60  ;;  %v8478_v58 = vld [vmem:[%s11588_s3 + $0xb80] ss:$8 sps:$4 sm:$0xff]  }
 0x2f6   :  { %5701 = vmatprep.subr.bf16.mxu0 %v8396_v6  ;;  %5820 = vmatprep.subr.bf16.mxu1 %v8399_v7  ;;  %v8481_v60 = vld [vmem:[%s11588_s3 + $0xc60] ss:$8 sps:$4 sm:$0xff]   ;;  %v8486_v6 = vld [vmem:[%s11588_s3 + $0xc54] ss:$8 sps:$4 sm:$0xff]   ;;  %v8489_v7 = vld [vmem:[%s11588_s3 + $0xc44] ss:$8 sps:$4 sm:$0xff]  }
 0x2f7   :  { %5850 = vmatprep.mubr.bf16.mxu1 %v11711_v4 }
 0x2f9   :  { %5702 = vmatpush1.bf16.msra.mxu0 %v8394_v20  ;;  %5821 = vmatpush1.bf16.msra.mxu1 %v8397_v51  ;;  %v8487_v20 = vld [vmem:[%s11588_s3 + $0xc40] ss:$8 sps:$4 sm:$0xff]   ;;  %v8490_v51 = vld [vmem:[%s11588_s3 + $0xc30] ss:$8 sps:$4 sm:$0xff]  }
 0x2fa   :  { %5703 = vmatprep.subr.bf16.mxu0 %v8402_v1  ;;  %5822 = vmatprep.subr.bf16.mxu1 %v8405_v31  ;;  %v8493_v1 = vld [vmem:[%s11588_s3 + $0xc20] ss:$8 sps:$4 sm:$0xff]   ;;  %v8498_v31 = vld [vmem:[%s11588_s3 + $0xc14] ss:$8 sps:$4 sm:$0xff]  }
 0x2fd   :  { %5704 = vmatpush1.bf16.msra.mxu0 %v8400_v11  ;;  %5823 = vmatpush1.bf16.msra.mxu1 %v8403_v46  ;;  %v8496_v11 = vld [vmem:[%s11588_s3 + $0xc10] ss:$8 sps:$4 sm:$0xff]   ;;  %v8501_v46 = vld [vmem:[%s11588_s3 + $0xc04] ss:$8 sps:$4 sm:$0xff]  }
 0x2fe   :  { %5705 = vmatprep.subr.bf16.mxu0 %v8408_v52  ;;  %5824 = vmatprep.subr.bf16.mxu1 %v8411_v37  ;;  %v8499_v52 = vld [vmem:[%s11588_s3 + $0xc00] ss:$8 sps:$4 sm:$0xff]   ;;  %v11253_v37 = vpop.f32.mrf.mxu0 }
 0x301   :  { %5706 = vmatpush1.bf16.msra.mxu0 %v8406_v44  ;;  %5825 = vmatpush1.bf16.msra.mxu1 %v8409_v47  ;;  %v11255_v44 = vpop.f32.mrf.mxu0  ;;  %v11257_v47 = vpop.f32.mrf.mxu1 }
 0x302   :  { %5707 = vmatprep.subr.bf16.mxu0 %v8414_v38  ;;  %5826 = vmatprep.subr.bf16.mxu1 %v8417_v16 }
 0x303   :  { %v11259_v38 = vpop.f32.mrf.mxu0  ;;  %v11261_v16 = vpop.f32.mrf.mxu1 }
 0x305   :  { %5708 = vmatpush1.bf16.msra.mxu0 %v8412_v32  ;;  %5827 = vmatpush1.bf16.msra.mxu1 %v8415_v48  ;;  %v11263_v32 = vpop.f32.mrf.mxu0  ;;  %v11265_v48 = vpop.f32.mrf.mxu1 }
 0x306   :  { %5709 = vmatprep.subr.bf16.mxu0 %v8420_v9  ;;  %5828 = vmatprep.subr.bf16.mxu1 %v8423_v61 }
 0x307   :  { %v11267_v9 = vpop.f32.mrf.mxu0  ;;  %v11269_v61 = vpop.f32.mrf.mxu1 }
 0x309   :  { %5710 = vmatpush1.bf16.msra.mxu0 %v8418_v56  ;;  %5829 = vmatpush1.bf16.msra.mxu1 %v8421_v21  ;;  %v11271_v56 = vpop.f32.mrf.mxu0 }
 0x30a   :  { %5830 = vmatprep.subr.bf16.mxu1 %v8426_v22  ;;  %5941 = vmatprep.subr.bf16.mxu0 %v8429_v19  ;;  %v8502_v19 = vld [vmem:[%s11590_s5 + $0x78] sm:$0xff]  }
 0x30b   :  { %v11275_v21 = vpop.f32.mrf.mxu0 }
 0x30c   :  { %5728 = vmatmul.mubr.bf16.vlgmr.msra.gmra.mxu0 %v10562_v36  ;;  %v8441_v36 = vld [vmem:[%s11588_s3 + $0xbf4] ss:$8 sps:$4 sm:$0xff]  }
 0x30d   :  { %5831 = vmatpush1.bf16.msra.mxu1 %v8424_v5  ;;  %5942 = vmatpush1.bf16.msra.mxu0 %v8427_v17  ;;  %v8503_v5 = vld [vmem:[%s11590_s5 + $0x38] sm:$0xff]   ;;  %v8504_v17 = vld [vmem:[%s11590_s5 + $0x70] sm:$0xff]  }
 0x30e   :  { %5832 = vmatprep.subr.bf16.mxu1 %v8432_v24  ;;  %5943 = vmatprep.subr.bf16.mxu0 %v8435_v34  ;;  %v8505_v24 = vld [vmem:[%s11590_s5 + $0x30] sm:$0xff]   ;;  %v11291_v34 = vpop.f32.mrf.mxu0 }
 0x30f   :  { %5973 = vmatprep.mubr.bf16.mxu0 %v11711_v4 }
 0x311   :  { %5833 = vmatpush1.bf16.msra.mxu1 %v8430_v23  ;;  %5944 = vmatpush1.bf16.msra.mxu0 %v8433_v28  ;;  %v8506_v28 = vld [vmem:[%s11590_s5 + $0x68] sm:$0xff]  }
 0x312   :  { %5945 = vmatprep.subr.bf16.mxu0 %v8438_v30  ;;  %6064 = vmatprep.subr.bf16.mxu1 %v8441_v36  ;;  %v11298_v30 = vpop.f32.mrf.mxu0  ;;  %v8507_v36 = vld [vmem:[%s11590_s5 + $0x28] sm:$0xff]  }
 0x314   :  { %5851 = vmatmul.mubr.bf16.vlgmr.msra.gmra.mxu1 %v10598_v59  ;;  %v8453_v59 = vld [vmem:[%s11588_s3 + $0xbd4] ss:$8 sps:$4 sm:$0xff]  }
 0x315   :  { %5946 = vmatpush1.bf16.msra.mxu0 %v8436_v50  ;;  %6065 = vmatpush1.bf16.msra.mxu1 %v8439_v10  ;;  %v8508_v50 = vld [vmem:[%s11590_s5 + $0x60] sm:$0xff]  }
 0x316   :  { %5947 = vmatprep.subr.bf16.mxu0 %v8444_v27  ;;  %6066 = vmatprep.subr.bf16.mxu1 %v8447_v57  ;;  %v8509_v27 = vld [vmem:[%s11590_s5 + $0x20] sm:$0xff]   ;;  %v11311_v57 = vpop.f32.mrf.mxu0 }
 0x317   :  { %6096 = vmatprep.mubr.bf16.mxu1 %v11711_v4 }
 0x319   :  { %5948 = vmatpush1.bf16.msra.mxu0 %v8442_v0  ;;  %6067 = vmatpush1.bf16.msra.mxu1 %v8445_v54  ;;  %v11315_v54 = vpop.f32.mrf.mxu0 }
 0x31a   :  { %5949 = vmatprep.subr.bf16.mxu0 %v8450_v42  ;;  %6068 = vmatprep.subr.bf16.mxu1 %v8453_v59  ;;  %v8510_v59 = vld [vmem:[%s11590_s5 + $0x58] sm:$0xff]  }
 0x31d   :  { %5950 = vmatpush1.bf16.msra.mxu0 %v8448_v13  ;;  %6069 = vmatpush1.bf16.msra.mxu1 %v8451_v35  ;;  %v8511_v13 = vld [vmem:[%s11590_s5 + $0x18] sm:$0xff]   ;;  %v11325_v35 = vpop.f32.mrf.mxu0 }
 0x31e   :  { %5951 = vmatprep.subr.bf16.mxu0 %v8456_v40  ;;  %6070 = vmatprep.subr.bf16.mxu1 %v8459_v43 }
 0x31f   :  { %v11329_v43 = vpop.f32.mrf.mxu0 }
 0x321   :  { %5952 = vmatpush1.bf16.msra.mxu0 %v8454_v55  ;;  %6071 = vmatpush1.bf16.msra.mxu1 %v8457_v15  ;;  %v8512_v55 = vld [vmem:[%s11590_s5 + $0x50] sm:$0xff]  }
 0x322   :  { %5953 = vmatprep.subr.bf16.mxu0 %v8462_v8  ;;  %6072 = vmatprep.subr.bf16.mxu1 %v8465_v2  ;;  %v8513_v15 = vld [vmem:[%s11590_s5 + $0x10] sm:$0xff]   ;;  %v11339_v2 = vpop.f32.mrf.mxu0 }
 0x325   :  { %5954 = vmatpush1.bf16.msra.mxu0 %v8460_v62  ;;  %6073 = vmatpush1.bf16.msra.mxu1 %v8463_v63  ;;  %v8514_v63 = vld [vmem:[%s11590_s5 + $0x48] sm:$0xff]  }
 0x326   :  { %5955 = vmatprep.subr.bf16.mxu0 %v8468_v14  ;;  %6074 = vmatprep.subr.bf16.mxu1 %v8471_v49  ;;  %v8515_v14 = vld [vmem:[%s11590_s5 + $0x8] sm:$0xff]   ;;  %v11349_v49 = vpop.f32.mrf.mxu0 }
 0x329   :  { %5956 = vmatpush1.bf16.msra.mxu0 %v8466_v26  ;;  %6075 = vmatpush1.bf16.msra.mxu1 %v8469_v33  ;;  %v8516_v33 = vld [vmem:[%s11590_s5 + $0x40] sm:$0xff]  }
 0x32a   :  { %6076 = vmatprep.subr.bf16.mxu1 %v8474_v41  ;;  %6187 = vmatprep.subr.bf16.mxu0 %v8477_v29  ;;  %v8517_v41 = vld [vmem:[%s11590_s5] sm:$0xff]   ;;  %v11359_v29 = vpop.f32.mrf.mxu0 }
 0x32c   :  { %5974 = vmatmul.mubr.bf16.vlgmr.msra.gmra.mxu0 %v10634_v12  ;;  %v8484_v12 = vld [vmem:[%s11588_s3 + $0xc50] ss:$8 sps:$4 sm:$0xff]  }
 0x32d   :  { %6077 = vmatpush1.bf16.msra.mxu1 %v8472_v3  ;;  %6188 = vmatpush1.bf16.msra.mxu0 %v8475_v18  ;;  %v11363_v18 = vpop.f32.mrf.mxu0 }
 0x32e   :  { %6078 = vmatprep.subr.bf16.mxu1 %v8480_v53  ;;  %6189 = vmatprep.subr.bf16.mxu0 %v8483_v25  ;;  %v11653_v53 = vmov 0.0   ;;  %v8518_v25 = vld [vmem:[%s11591_s7 + $0x38] sm:$0xff]  }
 0x32f   :  { %6219 = vmatprep.mubr.bf16.mxu0 %v11711_v4  ;;  %v8492_v4 = vld [vmem:[%s11588_s3 + $0xc34] ss:$8 sps:$4 sm:$0xff]  }
 0x331   :  { %6079 = vmatpush1.bf16.msra.mxu1 %v8478_v58  ;;  %6190 = vmatpush1.bf16.msra.mxu0 %v8481_v60  ;;  %v8519_v60 = vld [vmem:[%s11591_s7 + $0x30] sm:$0xff]  }
 0x332   :  { %6191 = vmatprep.subr.bf16.mxu0 %v8486_v6  ;;  %7535 = vmatprep.subr.bf16.mxu1 %v8502_v19  ;;  %v11374_v6 = vpop.f32.mrf.mxu0 }
 0x334   :  { %6097 = vmatmul.mubr.bf16.vlgmr.msra.gmra.mxu1 %v10668_v45  ;;  %v8495_v45 = vld [vmem:[%s11588_s3 + $0xc24] ss:$8 sps:$4 sm:$0xff]  }
 0x335   :  { %6192 = vmatpush1.bf16.msra.mxu0 %v8484_v12  ;;  %7536 = vmatpush3.bf16.msra.mxu1 %v8503_v5 }
 0x336   :  { %6193 = vmatprep.subr.bf16.mxu0 %v8489_v7  ;;  %7537 = vmatprep.subr.bf16.mxu1 %v8504_v17  ;;  %v8520_v7 = vld [vmem:[%s11591_s7 + $0x28] sm:$0xff]  }
 0x339   :  { %6194 = vmatpush1.bf16.msra.mxu0 %v8487_v20  ;;  %7538 = vmatpush3.bf16.msra.mxu1 %v8505_v24  ;;  %v11382_v20 = vpop.f32.mrf.mxu0 }
 0x33a   :  { %6195 = vmatprep.subr.bf16.mxu0 %v8492_v4  ;;  %7539 = vmatprep.subr.bf16.mxu1 %v8506_v28 }
 0x33d   :  { %6196 = vmatpush1.bf16.msra.mxu0 %v8490_v51  ;;  %7540 = vmatpush3.bf16.msra.mxu1 %v8507_v36  ;;  %v8521_v51 = vld [vmem:[%s11591_s7 + $0x20] sm:$0xff]  }
 0x33e   :  { %6197 = vmatprep.subr.bf16.mxu0 %v8495_v45  ;;  %7541 = vmatprep.subr.bf16.mxu1 %v8508_v50  ;;  %v11390_v45 = vpop.f32.mrf.mxu0 }
 0x341   :  { %6198 = vmatpush1.bf16.msra.mxu0 %v8493_v1  ;;  %7542 = vmatpush3.bf16.msra.mxu1 %v8509_v27 }
 0x342   :  { %6199 = vmatprep.subr.bf16.mxu0 %v8498_v31  ;;  %7543 = vmatprep.subr.bf16.mxu1 %v8510_v59  ;;  %v11395_v31 = vpop.f32.mrf.mxu0 }
 0x345   :  { %6200 = vmatpush1.bf16.msra.mxu0 %v8496_v11  ;;  %7544 = vmatpush3.bf16.msra.mxu1 %v8511_v13 }
 0x346   :  { %6201 = vmatprep.subr.bf16.mxu0 %v8501_v46  ;;  %7545 = vmatprep.subr.bf16.mxu1 %v8512_v55  ;;  %v11400_v46 = vpop.f32.mrf.mxu0 }
 0x348   :  { %v11404_v19 = vpop.f32.mrf.mxu0 }
 0x349   :  { %6202 = vmatpush1.bf16.msra.mxu0 %v8499_v52  ;;  %7546 = vmatpush3.bf16.msra.mxu1 %v8513_v15 }
 0x34a   :  { %7547 = vmatprep.subr.bf16.mxu1 %v8514_v63  ;;  %7566 = vmatprep.subr.bf16.mxu0 %v11653_v53  ;;  %v11408_v17 = vpop.f32.mrf.mxu0 }
 0x34c   :  { %6220 = vmatmul.mubr.bf16.vlgmr.msra.gmra.mxu0 %v10699_v39  ;;  %v11273_v39 = vpop.f32.mrf.mxu1  ;;  %v11412_v28 = vpop.f32.mrf.mxu0 }
 0x34d   :  { %7548 = vmatpush3.bf16.msra.mxu1 %v8515_v14  ;;  %7567 = vmatpush3.bf16.msra.mxu0 %v8518_v25 }
 0x34e   :  { %v11277_v22 = vpop.f32.mrf.mxu1  ;;  %7549 = vmatprep.subr.bf16.mxu1 %v8516_v33  ;;  %7568 = vmatprep.subr.bf16.mxu0 %v11653_v53  ;;  %v11416_v50 = vpop.f32.mrf.mxu0 }
 0x350   :  { %v11293_v23 = vpop.f32.mrf.mxu1  ;;  %v11420_v59 = vpop.f32.mrf.mxu0 }
 0x351   :  { %7550 = vmatpush3.bf16.msra.mxu1 %v8517_v41  ;;  %7569 = vmatpush3.bf16.msra.mxu0 %v8519_v60 }
 0x352   :  { %v11306_v10 = vpop.f32.mrf.mxu1  ;;  %7570 = vmatprep.subr.bf16.mxu0 %v11653_v53  ;;  %v11424_v55 = vpop.f32.mrf.mxu0 }
 0x353   :  { %11816 = vst [vmem:[#allocation2_spill] sm:$0xff] %v11424_v55 }
 0x354   :  { %v11313_v0 = vpop.f32.mrf.mxu1 }
 0x355   :  { %7571 = vmatpush3.bf16.msra.mxu0 %v8520_v7 }
 0x356   :  { %v11317_v42 = vpop.f32.mrf.mxu1  ;;  %7572 = vmatprep.subr.bf16.mxu0 %v11653_v53 }
 0x358   :  { %v11327_v40 = vpop.f32.mrf.mxu1 }
 0x359   :  { %7573 = vmatpush3.bf16.msra.mxu0 %v8521_v51 }
 0x35a   :  { %v11337_v8 = vpop.f32.mrf.mxu1  ;;  %7574 = vmatprep.subr.bf16.mxu0 %v11653_v53 }
 0x35c   :  { %v11341_v62 = vpop.f32.mrf.mxu1 }
 0x35e   :  { %v11351_v26 = vpop.f32.mrf.mxu1 }
 0x360   :  { %v11361_v3 = vpop.f32.mrf.mxu1 }
 0x362   :  { %v11369_v58 = vpop.f32.mrf.mxu1 }
 0x364   :  { %v11376_v12 = vpop.f32.mrf.mxu1 }
 0x366   :  { %v11384_v4 = vpop.f32.mrf.mxu1 }
 0x368   :  { %v11392_v1 = vpop.f32.mrf.mxu1 }
 0x36a   :  { %v11397_v11 = vpop.f32.mrf.mxu1 }
 0x36c   :  { %v11402_v52 = vpop.f32.mrf.mxu1  ;;  %v11428_v63 = vpop.f32.mrf.mxu0 }
 0x36d   :  { %11818 = vst [vmem:[#allocation4_spill] sm:$0xff] %v11428_v63 }
 0x36e   :  { %v11406_v5 = vpop.f32.mrf.mxu1  ;;  %v11432_v33 = vpop.f32.mrf.mxu0 }
 0x36f   :  { %11820 = vst [vmem:[#allocation6_spill] sm:$0xff] %v11432_v33 }
 0x370   :  { %v11410_v24 = vpop.f32.mrf.mxu1  ;;  %v11436_v25 = vpop.f32.mrf.mxu0 }
 0x371   :  { %11822 = vst [vmem:[#allocation8_spill] sm:$0xff] %v11436_v25 }
 0x372   :  { %v11414_v36 = vpop.f32.mrf.mxu1  ;;  %v11440_v7 = vpop.f32.mrf.mxu0 }
 0x373   :  { %11823 = vst [vmem:[#allocation9_spill] sm:$0xff] %v11440_v7  ;;  %v6254_v7 = vadd.f32 %v11261_v16, %v11255_v44 }
 0x374   :  { %v11418_v27 = vpop.f32.mrf.mxu1 }
 0x376   :  { %v11422_v13 = vpop.f32.mrf.mxu1 }
 0x378   :  { %v11426_v15 = vpop.f32.mrf.mxu1 }
 0x379   :  { %11817 = vst [vmem:[#allocation3_spill] sm:$0xff] %v11426_v15 }
 0x37a   :  { %v11430_v14 = vpop.f32.mrf.mxu1 }
 0x37b   :  { %11819 = vst [vmem:[#allocation5_spill] sm:$0xff] %v11430_v14 }
 0x37c   :  { %v11434_v41 = vpop.f32.mrf.mxu1 }
 0x37d   :  { %11821 = vst [vmem:[#allocation7_spill] sm:$0xff] %v11434_v41 }
 0x37e   :  { %v11438_v60 = vpop.f32.mrf.mxu1 }
 0x380   :  { %v11442_v51 = vpop.f32.mrf.mxu1 }
 0x381   :  { %11824 = vst [vmem:[#allocation10_spill] sm:$0xff] %v11442_v51 }
 0x382   :  { %v11446_v55 = vpop.f32.mrf.mxu1 }
 0x383   :  { %11826 = vst [vmem:[#allocation12_spill] sm:$0xff] %v11446_v55  ;;  %v6278_v55 = vadd.f32 %v11265_v48, %v11259_v38 }
 0x38c   :  { %v11444_v53 = vpop.f32.mrf.mxu0 }
 0x38d   :  { %11825 = vst [vmem:[#allocation11_spill] sm:$0xff] %v11444_v53  ;;  %v6230_v53 = vadd.f32 %v11257_v47, %v11253_v37 }
 0x38e   :  { %v11448_v15 = vpop.f32.mrf.mxu0 }
 0x390   :  { %v11452_v14 = vpop.f32.mrf.mxu0 }
 0x391   :  { %11828 = vst [vmem:[#allocation14_spill] sm:$0xff] %v11452_v14  ;;  %v6231_v14 = vadd.f32 %v6230_v53, %v11267_v9 }
 0x392   :  { %v11456_v41 = vpop.f32.mrf.mxu0 }
 0x393   :  { %11830 = vst [vmem:[#allocation16_spill] sm:$0xff] %v11456_v41  ;;  %v6279_v41 = vadd.f32 %v6278_v55, %v11275_v21  ;;  %v6232_v37 = vadd.f32 %v6231_v14, %v11273_v39 }
 0x394   :  { %v11450_v63 = vpop.f32.mrf.mxu1 }
 0x395   :  { %11827 = vst [vmem:[#allocation13_spill] sm:$0xff] %v11450_v63  ;;  %v6255_v63 = vadd.f32 %v6254_v7, %v11271_v56  ;;  %v6280_v48 = vadd.f32 %v6279_v41, %v11293_v23  ;;  %v6233_v56 = vadd.f32 %v6232_v37, %v11298_v30 }
 0x396   :  { %v11454_v33 = vpop.f32.mrf.mxu1 }
 0x397   :  { %11829 = vst [vmem:[#allocation15_spill] sm:$0xff] %v11454_v33  ;;  %v6256_v44 = vadd.f32 %v6255_v63, %v11277_v22  ;;  %v6234_v39 = vadd.f32 %v6233_v56, %v11313_v0  ;;  %v11834_v56 = vld [vmem:[#allocation6_spill] sm:$0xff] }
 0x398   :  { %v11458_v25 = vpop.f32.mrf.mxu1 }
 0x399   :  { %11831 = vst [vmem:[#allocation17_spill] sm:$0xff] %v11458_v25  ;;  %v6302_v25 = vadd.f32 %v11269_v61, %v11263_v32  ;;  %v6257_v9 = vadd.f32 %v6256_v44, %v11311_v57  ;;  %v6281_v61 = vadd.f32 %v6280_v48, %v11315_v54  ;;  %v6235_v30 = vadd.f32 %v6234_v39, %v11329_v43  ;;  %v11832_v48 = vld [vmem:[#allocation2_spill] sm:$0xff] }
 0x39a   :  { %v11470_v33 = vpop.f32.mrf.mxu1 }
 0x39b   :  { %v6303_v38 = vadd.f32 %v6302_v25, %v11291_v34  ;;  %v6258_v21 = vadd.f32 %v6257_v9, %v11317_v42  ;;  %v6282_v23 = vadd.f32 %v6281_v61, %v11327_v40  ;;  %v6236_v0 = vadd.f32 %v6235_v30, %v11341_v62  ;;  %v11833_v9 = vld [vmem:[#allocation3_spill] sm:$0xff] }
 0x39d   :  { %v6304_v32 = vadd.f32 %v6303_v38, %v11306_v10  ;;  %v6259_v57 = vadd.f32 %v6258_v21, %v11339_v2  ;;  %v6283_v54 = vadd.f32 %v6282_v23, %v11349_v49  ;;  %v6237_v43 = vadd.f32 %v6236_v0, %v11363_v18  ;;  %v11836_v21 = vld [vmem:[#allocation5_spill] sm:$0xff]  ;;  %v11838_v23 = vld [vmem:[#allocation7_spill] sm:$0xff] }
 0x39e   :  { %v11841_v0 = vld [vmem:[#allocation11_spill] sm:$0xff] }
 0x39f   :  { %v6305_v34 = vadd.f32 %v6304_v32, %v11325_v35  ;;  %v6260_v42 = vadd.f32 %v6259_v57, %v11351_v26  ;;  %v6284_v40 = vadd.f32 %v6283_v54, %v11361_v3  ;;  %v6238_v62 = vadd.f32 %v6237_v43, %v11376_v12  ;;  %v11835_v32 = vld [vmem:[#allocation4_spill] sm:$0xff] }
 0x3a1   :  { %v6306_v10 = vadd.f32 %v6305_v34, %v11337_v8  ;;  %v6261_v2 = vadd.f32 %v6260_v42, %v11374_v6  ;;  %v6285_v49 = vadd.f32 %v6284_v40, %v11382_v20  ;;  %v6239_v6 = vadd.f32 %v6238_v62, %v11395_v31  ;;  %v11837_v34 = vld [vmem:[#allocation8_spill] sm:$0xff] }
 0x3a3   :  { %v6307_v35 = vadd.f32 %v6306_v10, %v11359_v29  ;;  %v6262_v26 = vadd.f32 %v6261_v2, %v11384_v4  ;;  %v6286_v29 = vadd.f32 %v6285_v49, %v11392_v1  ;;  %v6240_v4 = vadd.f32 %v6239_v6, %v11402_v52  ;;  %v11840_v10 = vld [vmem:[#allocation10_spill] sm:$0xff]  ;;  %v11842_v2 = vld [vmem:[#allocation12_spill] sm:$0xff] }
 0x3a4   :  { %v11846_v6 = vld [vmem:[#allocation16_spill] sm:$0xff] }
 0x3a5   :  { %v6308_v8 = vadd.f32 %v6307_v35, %v11369_v58  ;;  %v6263_v3 = vadd.f32 %v6262_v26, %v11400_v46  ;;  %v6287_v58 = vadd.f32 %v6286_v29, %v11404_v19  ;;  %v6241_v46 = vadd.f32 %v6240_v4, %v11412_v28  ;;  %v11844_v26 = vld [vmem:[#allocation15_spill] sm:$0xff] }
 0x3a7   :  { %v6309_v25 = vadd.f32 %v6308_v8, %v11390_v45  ;;  %v6264_v20 = vadd.f32 %v6263_v3, %v11406_v5  ;;  %v6288_v45 = vadd.f32 %v6287_v58, %v11410_v24  ;;  %v6242_v5 = vadd.f32 %v6241_v46, %v11418_v27  ;;  %v11839_v27 = vld [vmem:[#allocation9_spill] sm:$0xff]  ;;  %v11843_v8 = vld [vmem:[#allocation14_spill] sm:$0xff] }
 0x3a8   :  { %v11847_v58 = vld [vmem:[#allocation17_spill] sm:$0xff] }
 0x3a9   :  { %v6310_v44 = vadd.f32 %v6309_v25, %v11397_v11  ;;  %v6265_v1 = vadd.f32 %v6264_v20, %v11416_v50  ;;  %v6289_v11 = vadd.f32 %v6288_v45, %v11420_v59  ;;  %v6243_v50 = vadd.f32 %v6242_v5, %v11835_v32  ;;  %v11845_v25 = vld [vmem:[#allocation13_spill] sm:$0xff] }
 0x3ab   :  { %v6311_v12 = vadd.f32 %v6310_v44, %v11408_v17  ;;  %v6266_v19 = vadd.f32 %v6265_v1, %v11422_v13  ;;  %v6290_v17 = vadd.f32 %v6289_v11, %v11833_v9  ;;  %v6244_v13 = vadd.f32 %v6243_v50, %v11838_v23 }
 0x3ac   :  { %v11464_v51 = vpop.f32.mrf.mxu0 }
 0x3ad   :  { %v6312_v38 = vadd.f32 %v6311_v12, %v11414_v36  ;;  %v6267_v24 = vadd.f32 %v6266_v19, %v11834_v56  ;;  %v6291_v36 = vadd.f32 %v6290_v17, %v11837_v34  ;;  %v6245_v35 = vadd.f32 %v6244_v13, %v11841_v0 }
 0x3ae   :  { %v11477_v47 = vpop.f32.mrf.mxu0  ;;  %v6328_v12 = vlaneseq }
 0x3af   :  { %v6313_v52 = vadd.f32 %v6312_v38, %v11832_v48  ;;  %v6268_v59 = vadd.f32 %v6267_v24, %v11438_v60  ;;  %v6292_v54 = vadd.f32 %v6291_v36, %v11840_v10  ;;  %v6246_v60 = vadd.f32 %v6245_v35, %v11845_v25 }
 0x3b0   :  { %v11489_v22 = vpop.f32.mrf.mxu0  ;;  %v11848_v25 = vmov 0.0  }
 0x3b1   :  { %v6314_v39 = vadd.f32 %v6313_v52, %v11836_v21  ;;  %v6269_v42 = vadd.f32 %v6268_v59, %v11448_v15  ;;  %v6293_v49 = vadd.f32 %v6292_v54, %v11843_v8  ;;  %v6247_v15 = vadd.f32 %v6246_v60, %v11464_v51  ;;  %v8523_v60 = vld [vmem:[%s11591_s7 + $0x10] sm:$0xff]   ;;  %7582 = vmatprep.mubr.msk.bf16.mxu0 %vm8529_vm2, %v11848_v25 }
 0x3b2   :  { %v11501_v55 = vpop.f32.mrf.mxu0 }
 0x3b3   :  { %v6315_v30 = vadd.f32 %v6314_v39, %v11839_v27  ;;  %v6270_v62 = vadd.f32 %v6269_v42, %v11844_v26  ;;  %v6294_v20 = vadd.f32 %v6293_v49, %v11847_v58 }
 0x3b4   :  { %v11479_v16 = vpop.f32.mrf.mxu1 }
 0x3b5   :  { %v6316_v43 = vadd.f32 %v6315_v30, %v11842_v2  ;;  %v6271_v4 = vadd.f32 %v6270_v62, %v11477_v47  ;;  %v6295_v1 = vadd.f32 %v6294_v20, %v11489_v22  ;;  %v6248_v38 = vadd.f32 %v6247_v15, %v11479_v16  ;;  %v8522_v62 = vld [vmem:[%s11591_s7 + $0x18] sm:$0xff]   ;;  %v7509_v20 = vld [vmem:[%s11593_s6] ss:$0 sm:$0xff] }
 0x3b6   :  { %v11491_v53 = vpop.f32.mrf.mxu1  ;;  %v6329_v47 = vshrl.u32 %v6328_v12, 7  ;;  %7575 = vmatpush3.bf16.msra.mxu0 %v8522_v62 }
 0x3b7   :  { %v6317_v44 = vadd.f32 %v6316_v43, %v11846_v6  ;;  %v6272_v46 = vadd.f32 %v6271_v4, %v11491_v53  ;;  %7576 = vmatprep.subr.bf16.mxu0 %v11848_v25 }
 0x3b8   :  { %v11503_v63 = vpop.f32.mrf.mxu1  ;;  %v6334_v21 = vsub.s32 1, %v6329_v47  ;;  %v6330_v34 = vsub.s32 0, %v6329_v47 }
 0x3b9   :  { %v6318_v45 = vadd.f32 %v6317_v44, %v11470_v33  ;;  %v6296_v48 = vadd.f32 %v6295_v1, %v11503_v63  ;;  %v6326_v63 = vld [vmem:[%s11592_s4] sm:$0x3] }
 0x3ba   :  { %v5612_v41 = vpop.f32.mrf.mxu1  ;;  %v6331_v23 = vrot.slane %v6326_v63, %v6330_v34  ;;  %7577 = vmatpush3.bf16.msra.mxu0 %v8523_v60 }
 0x3bb   :  { %v6319_v5 = vadd.f32 %v6318_v45, %v11501_v55  ;;  %7578 = vmatprep.subr.bf16.mxu0 %v11848_v25 }
 0x3bd   :  { %v6320_v17 = vadd.f32 %v6319_v5, %v5612_v41 }
 0x3cc   :  { %v5729_v14 = vpop.f32.mrf.mxu0 }
 0x3cd   :  { %v6249_v9 = vadd.f32 %v6248_v38, %v5729_v14 }
 0x3ce   :  { %v5731_v7 = vpop.f32.mrf.mxu0 }
 0x3cf   :  { %v6273_v52 = vadd.f32 %v6272_v46, %v5731_v7 }
 0x3d0   :  { %v5733_v37 = vpop.f32.mrf.mxu0 }
 0x3d1   :  { %v6297_v51 = vadd.f32 %v6296_v48, %v5733_v37 }
 0x3d2   :  { %v5735_v61 = vpop.f32.mrf.mxu0 }
 0x3d3   :  { %v6321_v22 = vadd.f32 %v6320_v17, %v5735_v61  ;;  %v6335_v61 = vrot.slane %v6326_v63, %v6334_v21 }
 0x3d4   :  { %v5852_v18 = vpop.f32.mrf.mxu1 }
 0x3d5   :  { %v6250_v24 = vadd.f32 %v6249_v9, %v5852_v18 }
 0x3d6   :  { %v5854_v31 = vpop.f32.mrf.mxu1 }
 0x3d7   :  { %v6274_v56 = vadd.f32 %v6273_v52, %v5854_v31 }
 0x3d8   :  { %v5856_v28 = vpop.f32.mrf.mxu1 }
 0x3d9   :  { %v6298_v50 = vadd.f32 %v6297_v51, %v5856_v28 }
 0x3da   :  { %v5858_v40 = vpop.f32.mrf.mxu1 }
 0x3db   :  { %v6322_v36 = vadd.f32 %v6321_v22, %v5858_v40 }
 0x3ec   :  { %v5975_v57 = vpop.f32.mrf.mxu0 }
 0x3ed   :  { %v6251_v16 = vadd.f32 %v6250_v24, %v5975_v57 }
 0x3ee   :  { %v5977_v29 = vpop.f32.mrf.mxu0 }
 0x3ef   :  { %v6275_v53 = vadd.f32 %v6274_v56, %v5977_v29  ;;  %v8524_v29 = vld [vmem:[%s11591_s7 + $0x8] sm:$0xff]  }
 0x3f0   :  { %v5979_v11 = vpop.f32.mrf.mxu0  ;;  %7579 = vmatpush3.bf16.msra.mxu0 %v8524_v29 }
 0x3f1   :  { %v6299_v55 = vadd.f32 %v6298_v50, %v5979_v11  ;;  %7580 = vmatprep.subr.bf16.mxu0 %v11848_v25 }
 0x3f2   :  { %v5981_v33 = vpop.f32.mrf.mxu0 }
 0x3f3   :  { %v6323_v18 = vadd.f32 %v6322_v36, %v5981_v33 }
 0x3f4   :  { %v6098_v3 = vpop.f32.mrf.mxu1 }
 0x3f5   :  { %v6252_v14 = vadd.f32 %v6251_v16, %v6098_v3  ;;  %v8525_v3 = vld [vmem:[%s11591_s7] sm:$0xff]  }
 0x3f6   :  { %v6100_v19 = vpop.f32.mrf.mxu1  ;;  %7581 = vmatpush3.bf16.msra.mxu0 %v8525_v3 }
 0x3f7   :  { %v6276_v59 = vadd.f32 %v6275_v53, %v6100_v19  ;;  %v7526_v19 = vld [vmem:[%s11594_s8] ss:$0 sm:$0xff] }
 0x3f8   :  { %v6102_v32 = vpop.f32.mrf.mxu1 }
 0x3f9   :  { %v6300_v37 = vadd.f32 %v6299_v55, %v6102_v32 }
 0x3fa   :  { %v6104_v41 = vpop.f32.mrf.mxu1 }
 0x3fb   :  { %v6324_v57 = vadd.f32 %v6323_v18, %v6104_v41 }
 0x40c   :  { %v6221_v39 = vpop.f32.mrf.mxu0 }
 0x40d   :  { %v6253_v28 = vadd.f32 %v6252_v14, %v6221_v39 }
 0x40e   :  { %v6223_v7 = vpop.f32.mrf.mxu0 }
 0x40f   :  { %v6277_v31 = vadd.f32 %v6276_v59, %v6223_v7  ;;  %v6338_v0 = vadd.f32 %v6331_v23, %v6253_v28 }
 0x410   :  { %v6225_v13 = vpop.f32.mrf.mxu0 }
 0x411   :  { %v6301_v27 = vadd.f32 %v6300_v37, %v6225_v13  ;;  %v6339_v10 = vadd.f32 %v6335_v61, %v6277_v31  ;;  %v6342_v8 = vmax.f32 %v6338_v0, 0.0 }
 0x412   :  { %v6227_v30 = vpop.f32.mrf.mxu0 }
 0x413   :  { %v6340_v54 = vadd.f32 %v6331_v23, %v6301_v27  ;;  %v6325_v42 = vadd.f32 %v6324_v57, %v6227_v30  ;;  %v6343_v2 = vmax.f32 %v6339_v10, 0.0 }
 0x415   :  { %v6341_v35 = vadd.f32 %v6335_v61, %v6325_v42  ;;  %v6344_v40 = vmax.f32 %v6340_v54, 0.0 }
 0x417   :  { %v6345_v43 = vmax.f32 %v6341_v35, 0.0  ;;  %v6346_v26 = vpack.c.bf16 %v6344_v40, %v6342_v8 }
 0x419   :  { %v6347_v49 = vpack.c.bf16 %v6345_v43, %v6343_v2 }
 0x41b   :  { %6515 = vmatprep.mubr.bf16.mxu1 %v6347_v49 }
 0x41c   :  { %6516 = vmatmul.mubr.bf16.vlgmr.msra.gmra.mxu1 %v6346_v26 }
 0x4dc   :  { %v7551_v6 = vpop.f32.mrf.mxu1 }
 0x4de   :  { %v7552_v44 = vpop.f32.mrf.mxu1 }
 0x4df   :  { %v7553_v58 = vadd.f32 %v7552_v44, %v7551_v6 }
 0x4e0   :  { %v7554_v4 = vpop.f32.mrf.mxu1 }
 0x4e1   :  { %v6518_v12 = vadd.f32 %v7553_v58, %v7509_v20 }
 0x4e2   :  { %v7555_v15 = vpop.f32.mrf.mxu1 }
 0x4e3   :  { %v7556_v45 = vadd.f32 %v7555_v15, %v7554_v4  ;;  %v6524_v46 = vmax.f32 %v6518_v12, 0.0 }
 0x4e5   :  { %v6521_v1 = vadd.f32 %v7556_v45, %v7509_v20 }
 0x4e7   :  { %v6525_v38 = vmax.f32 %v6521_v1, 0.0 }
 0x4e9   :  { %v6526_v11 = vpack.c.bf16 %v6525_v38, %v6524_v46 }
 0x4eb   :  { %7583 = vmatmul.mubr.bf16.vlgmr.msra.gmra.mxu0 %v6526_v11 }
 0x5ab   :  { %v6632_v5 = vpop.f32.mrf.mxu0 }
 0x5ac   :  { %v6633_v48 = vadd.f32 %v7526_v19, %v6632_v5 }
 0x5ad   :  { %v7584_v52 = vpop.f32.mrf.mxu0 }
 0x5ae   :  { %6639 = vst [vmem:[%s11595_s9] sm:$0xff] %v6633_v48 }
 0x5af   :  { %v6635_v9 = vpop.f32.mrf.mxu0 }
 0x5b0   :  { %v6636_v47 = vadd.f32 %v7526_v19, %v6635_v9 }
 0x5b1   :  { %v7585_v17 = vpop.f32.mrf.mxu0 }
 0x5b2   :  { %6640 = vst [vmem:[%s11595_s9 + $0x8] sm:$0xff] %v6636_v47 }

</bundles_post_ra>
